<compile_context>
chip_gen: v7x
topology: tpu7x:2x2x1
jax: 0.10.0
libtpu: 0.0.40
codegen_flags: <defaults>
</compile_context>

<pallas_src>
import functools
import math

import jax
import jax.numpy as jnp
from jax.experimental import pallas as pl
from jax.experimental.pallas import tpu as pltpu


# ----------------------------------------------------------------------------
# helpers
# ----------------------------------------------------------------------------

def _round_up(x, m):
    return (x + m - 1) // m * m


def _choose_tile(dim, unit, max_units):
    """tile = unit * t (t <= max_units) dividing round_up(dim, unit)."""
    padded = _round_up(dim, unit)
    m = padded // unit
    for t in range(max_units, 0, -1):
        if m % t == 0:
            return unit * t, padded
    return unit, padded


def _largest_divisor(n, cap):
    for t in range(min(cap, n), 0, -1):
        if n % t == 0:
            return t
    return 1


def _row_tile(m, cap_units=32):
    """Row tile that is a multiple of 8 (or the full dim) and divides m."""
    if m < 8 or m % 8 != 0:
        return m
    t, _ = _choose_tile(m, 8, cap_units)
    return t


def _silu(y):
    # reciprocal on the EUP path; exact enough for inference.
    return y * pl.reciprocal(1.0 + jnp.exp(-y), approx=True)


def _apply_act(y, kind):
    if kind == "silu":
        return _silu(y)
    if kind == "sigmoid":
        return 1.0 / (1.0 + jnp.exp(-y))          # exact (final / gate outputs)
    return y


_VMEM_LIMIT = 32 * 1024 * 1024


# ----------------------------------------------------------------------------
# fused matmul + folded-BN affine + activation (+ optional residual)
# bf16 MXU operands, f32 scratch accumulation, bf16 output
# ----------------------------------------------------------------------------

def _mm_kernel(*refs, act, has_res):
    if has_res:
        a_ref, b_ref, s_ref, c_ref, r_ref, o_ref, acc_ref = refs
    else:
        a_ref, b_ref, s_ref, c_ref, o_ref, acc_ref = refs
        r_ref = None
    k = pl.program_id(1)

    @pl.when(k == 0)
    def _():
        acc_ref[...] = jnp.zeros_like(acc_ref)

    acc_ref[...] += jnp.dot(a_ref[...], b_ref[...],
                            preferred_element_type=jnp.float32)

    @pl.when(k == pl.num_programs(1) - 1)
    def _():
        y = acc_ref[...] * s_ref[...] + c_ref[...]
        y = _apply_act(y, act)
        if r_ref is not None:
            y = y + r_ref[...].astype(jnp.float32)
        o_ref[...] = y.astype(o_ref.dtype)


def matmul_scale_bias_act(a, b, scale, bias, act="none", residual=None,
                          out_dtype=jnp.bfloat16):
    """out[m, n] = act(sum_k a[m,k] b[k,n] * scale[n] + bias[n]) (+ residual)."""
    M, K = a.shape
    K2, N = b.shape
    assert K == K2
    a = a.astype(jnp.bfloat16)
    b = b.astype(jnp.bfloat16)
    s = scale.astype(jnp.float32).reshape(1, N)
    c = bias.astype(jnp.float32).reshape(1, N)

    # K: keep the whole reduction resident when it fits, otherwise 512/256.
    if K <= 1024 or K % 128 != 0:
        TK = K
    elif K % 512 == 0:
        TK = 512
    elif K % 256 == 0:
        TK = 256
    else:
        TK = 128
    TN = N                           # full-N: weight matrix stays VMEM-resident
    if M % 8 != 0:
        TM = M                       # tiny-M tail layers only
    else:
        per_unit = (TK * 4 + TN * 12) * 8          # bytes per 8 rows (2 bufs + acc)
        cap_units = max(1, min(64, (6 * 1024 * 1024) // per_unit))
        TM, _ = _choose_tile(M, 8, cap_units)

    grid = (M // TM, K // TK)
    has_res = residual is not None
    in_specs = [
        pl.BlockSpec((TM, TK), lambda i, k: (i, k)),
        pl.BlockSpec((TK, TN), lambda i, k: (k, 0)),
        pl.BlockSpec((1, TN), lambda i, k: (0, 0)),
        pl.BlockSpec((1, TN), lambda i, k: (0, 0)),
    ]
    args = [a, b, s, c]
    if has_res:
        in_specs.append(pl.BlockSpec((TM, TN), lambda i, k: (i, 0)))
        args.append(residual.astype(jnp.bfloat16))

    return pl.pallas_call(
        functools.partial(_mm_kernel, act=act, has_res=has_res),
        out_shape=jax.ShapeDtypeStruct((M, N), out_dtype),
        grid_spec=pltpu.PrefetchScalarGridSpec(
            num_scalar_prefetch=0,
            grid=grid,
            in_specs=in_specs,
            out_specs=pl.BlockSpec((TM, TN), lambda i, k: (i, 0)),
            scratch_shapes=[pltpu.VMEM((TM, TN), jnp.float32)]),
        compiler_params=pltpu.CompilerParams(
            dimension_semantics=("parallel", "arbitrary"),
            vmem_limit_bytes=_VMEM_LIMIT),
    )(*args)


# ----------------------------------------------------------------------------
# 3x3 conv + folded BN + act (+ optional residual), tap-streamed (no im2col)
# ----------------------------------------------------------------------------

def _conv3x3_kernel(*refs, act, wo, has_res):
    if has_res:
        x0, x1, x2, w_ref, s_ref, c_ref, r_ref, o_ref = refs
    else:
        x0, x1, x2, w_ref, s_ref, c_ref, o_ref = refs
        r_ref = None
    trh, _, cin = x0.shape
    cout = o_ref.shape[-1]
    acc = jnp.zeros((trh * wo, cout), jnp.float32)
    for dh, xr in enumerate((x0, x1, x2)):
        x = xr[...]                                    # (trh, Wp, cin) bf16
        for j in range(3):
            tap = x[:, j:j + wo, :].reshape(trh * wo, cin)
            acc = acc + jnp.dot(tap, w_ref[dh, j],
                                preferred_element_type=jnp.float32)
    y = _apply_act(acc * s_ref[...] + c_ref[...], act)
    if r_ref is not None:
        y = y + r_ref[...].reshape(trh * wo, cout).astype(jnp.float32)
    o_ref[...] = y.reshape(trh, wo, cout).astype(o_ref.dtype)


def conv3x3_bn_act(x, p, stride=1, act="silu", residual=None):
    """Conv2d(Cin, Cout, 3, stride, padding=1, bias=False) + BN + act, NHWC."""
    w = p["w"]                                         # (Cout, Cin, 3, 3)
    Cout, Cin = w.shape[0], w.shape[1]
    N, H, W, _ = x.shape
    Ho = (H - 1) // stride + 1
    Wo = (W - 1) // stride + 1
    Wp = W + 2
    xp = jnp.pad(x.astype(jnp.bfloat16), ((0, 0), (1, 1), (1, 1), (0, 0)))
    shifts = []
    for dh in range(3):                                # 3 vertical tap views
        sl = jax.lax.slice(
            xp, (0, dh, 0, 0),
            (N, dh + (Ho - 1) * stride + 1, Wp, Cin),
            (1, stride, 1, 1))
        shifts.append(sl.reshape(N * Ho, Wp, Cin))
    wk = jnp.transpose(w, (2, 3, 1, 0)).astype(jnp.bfloat16)   # (3,3,Cin,Cout)
    s = p["scale"].astype(jnp.float32).reshape(1, Cout)
    c = p["bias"].astype(jnp.float32).reshape(1, Cout)

    M = N * Ho
    per_row = Wp * Cin * 12 + Wo * Cout * 12
    trh = _largest_divisor(M, max(1, min(64, (6 * 1024 * 1024) // per_row)))

    has_res = residual is not None
    in_specs = ([pl.BlockSpec((trh, Wp, Cin), lambda r: (r, 0, 0))] * 3 +
                [pl.BlockSpec((3, 3, Cin, Cout), lambda r: (0, 0, 0, 0)),
                 pl.BlockSpec((1, Cout), lambda r: (0, 0)),
                 pl.BlockSpec((1, Cout), lambda r: (0, 0))])
    args = shifts + [wk, s, c]
    if has_res:
        in_specs.append(pl.BlockSpec((trh, Wo, Cout), lambda r: (r, 0, 0)))
        args.append(residual.reshape(N * Ho, Wo, Cout).astype(jnp.bfloat16))

    out = pl.pallas_call(
        functools.partial(_conv3x3_kernel, act=act, wo=Wo, has_res=has_res),
        out_shape=jax.ShapeDtypeStruct((M, Wo, Cout), jnp.bfloat16),
        grid_spec=pltpu.PrefetchScalarGridSpec(
            num_scalar_prefetch=0,
            grid=(M // trh,),
            in_specs=in_specs,
            out_specs=pl.BlockSpec((trh, Wo, Cout), lambda r: (r, 0, 0))),
        compiler_params=pltpu.CompilerParams(
            dimension_semantics=("parallel",),
            vmem_limit_bytes=_VMEM_LIMIT),
    )(*args)
    return out.reshape(N, Ho, Wo, Cout)


# ----------------------------------------------------------------------------
# depthwise 3x3 conv + folded BN + SiLU (VPU, tap-streamed)
# ----------------------------------------------------------------------------

def _dw_kernel(x0, x1, x2, w_ref, s_ref, c_ref, o_ref, *, wo):
    acc = jnp.zeros(o_ref.shape, jnp.float32)
    for dh, xr in enumerate((x0, x1, x2)):
        x = xr[...].astype(jnp.float32)                # (trh, Wp, C)
        for j in range(3):
            w = w_ref[3 * dh + j:3 * dh + j + 1, :].reshape(1, 1, -1)
            acc = acc + x[:, j:j + wo, :] * w
    y = acc * s_ref[...] + c_ref[...]
    o_ref[...] = _silu(y).astype(o_ref.dtype)


def depthwise_conv_bn_silu(x, p, stride):
    """Conv2d(C, C, 3, stride, padding=1, groups=C) + BN + SiLU, NHWC bf16."""
    N, H, W, C = x.shape
    Ho = (H - 1) // stride + 1
    Wo = (W - 1) // stride + 1
    Wp = W + 2
    xp = jnp.pad(x.astype(jnp.bfloat16), ((0, 0), (1, 1), (1, 1), (0, 0)))
    shifts = []
    for dh in range(3):
        sl = jax.lax.slice(
            xp, (0, dh, 0, 0),
            (N, dh + (Ho - 1) * stride + 1, Wp, C),
            (1, stride, 1, 1))
        shifts.append(sl.reshape(N * Ho, Wp, C))
    wk = p["w"].reshape(C, 9).T.astype(jnp.float32)            # (9, C)
    s = p["scale"].astype(jnp.float32).reshape(1, 1, C)
    c = p["bias"].astype(jnp.float32).reshape(1, 1, C)

    M = N * Ho
    per_row = Wp * C * 12 + Wo * C * 12
    trh = _largest_divisor(M, max(1, min(64, (6 * 1024 * 1024) // per_row)))

    out = pl.pallas_call(
        functools.partial(_dw_kernel, wo=Wo),
        out_shape=jax.ShapeDtypeStruct((M, Wo, C), jnp.bfloat16),
        grid_spec=pltpu.PrefetchScalarGridSpec(
            num_scalar_prefetch=0,
            grid=(M // trh,),
            in_specs=[pl.BlockSpec((trh, Wp, C), lambda r: (r, 0, 0))] * 3 +
                     [pl.BlockSpec((9, C), lambda r: (0, 0)),
                      pl.BlockSpec((1, 1, C), lambda r: (0, 0, 0)),
                      pl.BlockSpec((1, 1, C), lambda r: (0, 0, 0))],
            out_specs=pl.BlockSpec((trh, Wo, C), lambda r: (r, 0, 0))),
        compiler_params=pltpu.CompilerParams(
            dimension_semantics=("parallel",),
            vmem_limit_bytes=_VMEM_LIMIT),
    )(*shifts, wk, s, c)
    return out.reshape(N, Ho, Wo, C)


# ----------------------------------------------------------------------------
# pooling / SE kernels
# ----------------------------------------------------------------------------

def _gap_kernel(x_ref, o_ref, *, inv_count):
    @pl.when(pl.program_id(1) == 0)
    def _():
        o_ref[...] = jnp.zeros_like(o_ref)

    o_ref[...] += jnp.sum(x_ref[...].astype(jnp.float32), axis=1,
                          keepdims=True) * inv_count


def global_avg_pool(x):
    """AdaptiveAvgPool2d(1): (N, H, W, C) bf16 -> (N, C) f32."""
    N, H, W, C = x.shape
    M = H * W
    TR = _row_tile(M, 64)
    x2 = x.astype(jnp.bfloat16).reshape(N, M, C)
    out = pl.pallas_call(
        functools.partial(_gap_kernel, inv_count=1.0 / M),
        out_shape=jax.ShapeDtypeStruct((N, 1, C), jnp.float32),
        grid_spec=pltpu.PrefetchScalarGridSpec(
            num_scalar_prefetch=0,
            grid=(N, M // TR),
            in_specs=[pl.BlockSpec((1, TR, C), lambda n, r: (n, r, 0))],
            out_specs=pl.BlockSpec((1, 1, C), lambda n, r: (n, 0, 0))),
        compiler_params=pltpu.CompilerParams(
            dimension_semantics=("parallel", "arbitrary")),
    )(x2)
    return out.reshape(N, C)


def _scale_kernel(x_ref, s_ref, o_ref):
    o_ref[...] = (x_ref[...].astype(jnp.float32) *
                  s_ref[...].astype(jnp.float32)).astype(o_ref.dtype)


def channel_scale(x, s):
    """x[n, h, w, c] * s[n, c] (SE gating), bf16 in/out."""
    N, H, W, C = x.shape
    M = H * W
    TR = _row_tile(M, 64)
    x2 = x.reshape(N, M, C)
    s3 = s.reshape(N, 1, C)
    out = pl.pallas_call(
        _scale_kernel,
        out_shape=jax.ShapeDtypeStruct((N, M, C), jnp.bfloat16),
        grid_spec=pltpu.PrefetchScalarGridSpec(
            num_scalar_prefetch=0,
            grid=(N, M // TR),
            in_specs=[pl.BlockSpec((1, TR, C), lambda n, r: (n, r, 0)),
                      pl.BlockSpec((1, 1, C), lambda n, r: (n, 0, 0))],
            out_specs=pl.BlockSpec((1, TR, C), lambda n, r: (n, r, 0))),
        compiler_params=pltpu.CompilerParams(
            dimension_semantics=("parallel", "parallel")),
    )(x2, s3)
    return out.reshape(N, H, W, C)


def _se_kernel(p_ref, w1_ref, b1_ref, w2_ref, b2_ref, o_ref):
    h = jnp.dot(p_ref[...], w1_ref[...],
                preferred_element_type=jnp.float32) + b1_ref[...]
    h = _silu(h)
    g = jnp.dot(h, w2_ref[...],
                preferred_element_type=jnp.float32) + b2_ref[...]
    o_ref[...] = (1.0 / (1.0 + jnp.exp(-g))).astype(o_ref.dtype)


def squeeze_excite(x, p):
    pooled = global_avg_pool(x)                                # (N, Cexp) f32
    N, Cexp = pooled.shape
    Csq = p["b1"].shape[0]
    gate = pl.pallas_call(                                     # FC1+FC2 fused
        _se_kernel,
        out_shape=jax.ShapeDtypeStruct((N, Cexp), jnp.bfloat16),
    )(pooled, p["w1"], p["b1"].reshape(1, Csq),
      p["w2"], p["b2"].reshape(1, Cexp))
    # TODO(synk): fold the per-sample gate into the project matmul's A block
    # and the pooling into the depthwise epilogue to remove this extra pass.
    return channel_scale(x, gate)


# ----------------------------------------------------------------------------
# conv dispatch
# ----------------------------------------------------------------------------

def conv1x1_bn_act(x, p, act="silu", residual=None):
    w = p["w"]                                         # (Cout, Cin, 1, 1)
    Cout, Cin = w.shape[0], w.shape[1]
    N, H, W, C = x.shape
    a = x.reshape(N * H * W, C)
    res = None if residual is None else residual.reshape(N * H * W, Cout)
    y = matmul_scale_bias_act(a, w.reshape(Cout, Cin).T, p["scale"], p["bias"],
                              act=act, residual=res)
    return y.reshape(N, H, W, Cout)


# ----------------------------------------------------------------------------
# parameter construction (deterministic; shapes follow efficientnet_v2_s)
# ----------------------------------------------------------------------------

class ParamGen:
    def __init__(self, key):
        self.key = key
        self.i = 0

    def normal(self, shape, std):
        self.i += 1
        return std * jax.random.normal(
            jax.random.fold_in(self.key, self.i), shape, jnp.float32)


def _bn_affine(pg, cout, eps=1e-3):
    gamma = 1.0 + 0.1 * pg.normal((cout,), 1.0)
    beta = 0.1 * pg.normal((cout,), 1.0)
    # eval-mode BN with running_mean=0, running_var=1 folded to scale/bias
    scale = gamma / jnp.sqrt(1.0 + eps)
    bias = beta
    return scale, bias


def make_conv_bn(pg, cin, cout, k):
    w = pg.normal((cout, cin, k, k), math.sqrt(2.0 / (cin * k * k)))
    scale, bias = _bn_affine(pg, cout)
    return dict(w=w, scale=scale, bias=bias)


def make_dw_bn(pg, c):
    w = pg.normal((c, 1, 3, 3), math.sqrt(2.0 / 9.0))
    scale, bias = _bn_affine(pg, c)
    return dict(w=w, scale=scale, bias=bias)


def make_se(pg, cexp, csq):
    return dict(
        w1=pg.normal((cexp, csq), math.sqrt(2.0 / cexp)),      # (K, N) layout
        b1=0.01 * pg.normal((csq,), 1.0),
        w2=pg.normal((csq, cexp), math.sqrt(1.0 / csq)),
        b2=0.01 * pg.normal((cexp,), 1.0),
    )


# (block_type, expand_ratio, kernel, stride, in_ch, out_ch, num_layers)
EFFNET_V2_S_CONFIG = [
    ("fused", 1, 3, 1, 24, 24, 2),
    ("fused", 4, 3, 2, 24, 48, 4),
    ("fused", 4, 3, 2, 48, 64, 4),
    ("mb",    4, 3, 2, 64, 128, 6),
    ("mb",    6, 3, 1, 128, 160, 9),
    ("mb",    6, 3, 2, 160, 256, 15),
]
LAST_CHANNEL = 1280


def build_params(key, num_classes):
    pg = ParamGen(key)
    params = {"stem": make_conv_bn(pg, 3, 24, 3)}              # conv 3x3 s2
    stages = []
    for (btype, er, k, s, cin, cout, n) in EFFNET_V2_S_CONFIG:
        blocks = []
        for li in range(n):
            bcin = cin if li == 0 else cout
            bstride = s if li == 0 else 1
            cexp = bcin * er
            if btype == "fused":
                p = dict(type="fused", stride=bstride, cin=bcin, cout=cout)
                if cexp != bcin:
                    p["expand"] = make_conv_bn(pg, bcin, cexp, 3)   # 3x3, stride
                    p["project"] = make_conv_bn(pg, cexp, cout, 1)  # 1x1
                else:
                    p["single"] = make_conv_bn(pg, bcin, cout, 3)
            else:
                csq = max(1, bcin // 4)
                p = dict(type="mb", stride=bstride, cin=bcin, cout=cout,
                         expand=make_conv_bn(pg, bcin, cexp, 1),
                         dw=make_dw_bn(pg, cexp),
                         se=make_se(pg, cexp, csq),
                         project=make_conv_bn(pg, cexp, cout, 1))
            blocks.append(p)
        stages.append(blocks)
    params["stages"] = stages
    params["head"] = make_conv_bn(pg, 256, LAST_CHANNEL, 1)
    params["classifier"] = dict(
        w=pg.normal((LAST_CHANNEL, num_classes), math.sqrt(1.0 / LAST_CHANNEL)),
        b=0.01 * pg.normal((num_classes,), 1.0))
    return params


# ----------------------------------------------------------------------------
# forward pass
# ----------------------------------------------------------------------------

def fused_mbconv_fwd(x, p):
    use_res = p["stride"] == 1 and p["cin"] == p["cout"]
    res = x if use_res else None                    # StochasticDepth = identity
    if "single" in p:
        return conv3x3_bn_act(x, p["single"], stride=p["stride"], act="silu",
                              residual=res)
    h = conv3x3_bn_act(x, p["expand"], stride=p["stride"], act="silu")
    return conv1x1_bn_act(h, p["project"], act="none", residual=res)


def mbconv_fwd(x, p):
    use_res = p["stride"] == 1 and p["cin"] == p["cout"]
    res = x if use_res else None
    h = conv1x1_bn_act(x, p["expand"], act="silu")                 # 1x1
    h = depthwise_conv_bn_silu(h, p["dw"], stride=p["stride"])     # dw 3x3
    h = squeeze_excite(h, p["se"])
    return conv1x1_bn_act(h, p["project"], act="none", residual=res)


def efficientnet_forward(params, x_nchw):
    """Returns sigmoid class scores (N, num_classes), matching the module."""
    x = jnp.transpose(x_nchw, (0, 2, 3, 1)).astype(jnp.float32)    # NHWC
    x = conv3x3_bn_act(x, params["stem"], stride=2, act="silu")
    for stage in params["stages"]:
        for blk in stage:
            if blk["type"] == "fused":
                x = fused_mbconv_fwd(x, blk)
            else:
                x = mbconv_fwd(x, blk)
    x = conv1x1_bn_act(x, params["head"], act="silu")
    pooled = global_avg_pool(x)                                    # (N, 1280)
    cls = params["classifier"]
    ones = jnp.ones((cls["w"].shape[1],), jnp.float32)
    return matmul_scale_bias_act(pooled, cls["w"], ones, cls["b"],
                                 act="sigmoid", out_dtype=jnp.float32)


# ----------------------------------------------------------------------------
# main
# ----------------------------------------------------------------------------

if __name__ == "__main__":
    num_classes = 5
    key = jax.random.PRNGKey(0)
    params = build_params(jax.random.fold_in(key, 1), num_classes)
    # small RGB input: batch=2, 3 channels, 32x32 spatial (overall stride 32)
    x = jax.random.normal(jax.random.fold_in(key, 2), (2, 3, 32, 32),
                          jnp.float32)

    out = jax.block_until_ready(efficientnet_forward(params, x))
    assert out.shape == (2, num_classes), out.shape
    assert bool(jnp.all(jnp.isfinite(out)))
    assert bool(jnp.all((out >= 0.0) & (out <= 1.0)))      # sigmoid outputs
    print("KERNEL_OK")
</pallas_src>

<mosaic_0001>
module attributes {stable_mosaic.version = 11 : i64} {
  func.func @_conv3x3_kernel(%arg0: i32, %arg1: memref<32x34x3xbf16, #tpu.memory_space<vmem>>, %arg2: memref<32x34x3xbf16, #tpu.memory_space<vmem>>, %arg3: memref<32x34x3xbf16, #tpu.memory_space<vmem>>, %arg4: memref<3x3x3x24xbf16, #tpu.memory_space<vmem>>, %arg5: memref<1x24xf32, #tpu.memory_space<vmem>>, %arg6: memref<1x24xf32, #tpu.memory_space<vmem>>, %arg7: memref<32x16x24xbf16, #tpu.memory_space<vmem>>) attributes {dimension_semantics = [#tpu.dimension_semantics<parallel>], iteration_bounds = array<i64: 1>, scalar_prefetch = 0 : i64, scratch_operands = 0 : i64, tpu.core_type = #tpu.core_type<tc>, window_params = [{transform_indices = @transform_0, window_bounds = array<i64: 32, 34, 3>}, {transform_indices = @transform_1, window_bounds = array<i64: 32, 34, 3>}, {transform_indices = @transform_2, window_bounds = array<i64: 32, 34, 3>}, {pipeline_mode = #tpu.pipeline_mode<synchronous>, transform_indices = @transform_3, window_bounds = array<i64: 3, 3, 3, 24>}, {pipeline_mode = #tpu.pipeline_mode<synchronous>, transform_indices = @transform_4, window_bounds = array<i64: 1, 24>}, {pipeline_mode = #tpu.pipeline_mode<synchronous>, transform_indices = @transform_5, window_bounds = array<i64: 1, 24>}, {transform_indices = @transform_6, window_bounds = array<i64: 32, 16, 24>}]} {
    %cst = arith.constant 0.000000e+00 : f32
    %0 = vector.broadcast %cst : f32 to vector<512x24xf32>
    %c0 = arith.constant 0 : index
    %c0_0 = arith.constant 0 : index
    %c0_1 = arith.constant 0 : index
    %1 = vector.load %arg1[%c0, %c0_0, %c0_1] : memref<32x34x3xbf16, #tpu.memory_space<vmem>>, vector<32x34x3xbf16>
    %2 = vector.extract_strided_slice %1 {offsets = [0, 0, 0], sizes = [32, 16, 3], strides = [1, 1, 1]} : vector<32x34x3xbf16> to vector<32x16x3xbf16>
    %3 = vector.shape_cast %2 : vector<32x16x3xbf16> to vector<512x3xbf16>
    %c0_2 = arith.constant 0 : index
    %c0_3 = arith.constant 0 : index
    %c0_4 = arith.constant 0 : index
    %c0_5 = arith.constant 0 : index
    %4 = vector.load %arg4[%c0_2, %c0_3, %c0_4, %c0_5] : memref<3x3x3x24xbf16, #tpu.memory_space<vmem>>, vector<1x1x3x24xbf16>
    %5 = vector.shape_cast %4 : vector<1x1x3x24xbf16> to vector<3x24xbf16>
    %cst_6 = arith.constant dense<0.000000e+00> : vector<512x24xf32>
    %6 = tpu.matmul %3, %5, %cst_6 {dimension_numbers = #tpu.dot_dimension_numbers<[1], [0], [0], [1], [0, 0, 1, 1], [], []>} : vector<512x3xbf16>, vector<3x24xbf16>, vector<512x24xf32> -> vector<512x24xf32>
    %7 = arith.addf %0, %6 : vector<512x24xf32>
    %8 = vector.extract_strided_slice %1 {offsets = [0, 1, 0], sizes = [32, 16, 3], strides = [1, 1, 1]} : vector<32x34x3xbf16> to vector<32x16x3xbf16>
    %9 = vector.shape_cast %8 : vector<32x16x3xbf16> to vector<512x3xbf16>
    %c0_7 = arith.constant 0 : index
    %c1 = arith.constant 1 : index
    %c0_8 = arith.constant 0 : index
    %c0_9 = arith.constant 0 : index
    %10 = vector.load %arg4[%c0_7, %c1, %c0_8, %c0_9] : memref<3x3x3x24xbf16, #tpu.memory_space<vmem>>, vector<1x1x3x24xbf16>
    %11 = vector.shape_cast %10 : vector<1x1x3x24xbf16> to vector<3x24xbf16>
    %cst_10 = arith.constant dense<0.000000e+00> : vector<512x24xf32>
    %12 = tpu.matmul %9, %11, %cst_10 {dimension_numbers = #tpu.dot_dimension_numbers<[1], [0], [0], [1], [0, 0, 1, 1], [], []>} : vector<512x3xbf16>, vector<3x24xbf16>, vector<512x24xf32> -> vector<512x24xf32>
    %13 = arith.addf %7, %12 : vector<512x24xf32>
    %14 = vector.extract_strided_slice %1 {offsets = [0, 2, 0], sizes = [32, 16, 3], strides = [1, 1, 1]} : vector<32x34x3xbf16> to vector<32x16x3xbf16>
    %15 = vector.shape_cast %14 : vector<32x16x3xbf16> to vector<512x3xbf16>
    %c0_11 = arith.constant 0 : index
    %c2 = arith.constant 2 : index
    %c0_12 = arith.constant 0 : index
    %c0_13 = arith.constant 0 : index
    %16 = vector.load %arg4[%c0_11, %c2, %c0_12, %c0_13] : memref<3x3x3x24xbf16, #tpu.memory_space<vmem>>, vector<1x1x3x24xbf16>
    %17 = vector.shape_cast %16 : vector<1x1x3x24xbf16> to vector<3x24xbf16>
    %cst_14 = arith.constant dense<0.000000e+00> : vector<512x24xf32>
    %18 = tpu.matmul %15, %17, %cst_14 {dimension_numbers = #tpu.dot_dimension_numbers<[1], [0], [0], [1], [0, 0, 1, 1], [], []>} : vector<512x3xbf16>, vector<3x24xbf16>, vector<512x24xf32> -> vector<512x24xf32>
    %19 = arith.addf %13, %18 : vector<512x24xf32>
    %c0_15 = arith.constant 0 : index
    %c0_16 = arith.constant 0 : index
    %c0_17 = arith.constant 0 : index
    %20 = vector.load %arg2[%c0_15, %c0_16, %c0_17] : memref<32x34x3xbf16, #tpu.memory_space<vmem>>, vector<32x34x3xbf16>
    %21 = vector.extract_strided_slice %20 {offsets = [0, 0, 0], sizes = [32, 16, 3], strides = [1, 1, 1]} : vector<32x34x3xbf16> to vector<32x16x3xbf16>
    %22 = vector.shape_cast %21 : vector<32x16x3xbf16> to vector<512x3xbf16>
    %c1_18 = arith.constant 1 : index
    %c0_19 = arith.constant 0 : index
    %c0_20 = arith.constant 0 : index
    %c0_21 = arith.constant 0 : index
    %23 = vector.load %arg4[%c1_18, %c0_19, %c0_20, %c0_21] : memref<3x3x3x24xbf16, #tpu.memory_space<vmem>>, vector<1x1x3x24xbf16>
    %24 = vector.shape_cast %23 : vector<1x1x3x24xbf16> to vector<3x24xbf16>
    %cst_22 = arith.constant dense<0.000000e+00> : vector<512x24xf32>
    %25 = tpu.matmul %22, %24, %cst_22 {dimension_numbers = #tpu.dot_dimension_numbers<[1], [0], [0], [1], [0, 0, 1, 1], [], []>} : vector<512x3xbf16>, vector<3x24xbf16>, vector<512x24xf32> -> vector<512x24xf32>
    %26 = arith.addf %19, %25 : vector<512x24xf32>
    %27 = vector.extract_strided_slice %20 {offsets = [0, 1, 0], sizes = [32, 16, 3], strides = [1, 1, 1]} : vector<32x34x3xbf16> to vector<32x16x3xbf16>
    %28 = vector.shape_cast %27 : vector<32x16x3xbf16> to vector<512x3xbf16>
    %c1_23 = arith.constant 1 : index
    %c1_24 = arith.constant 1 : index
    %c0_25 = arith.constant 0 : index
    %c0_26 = arith.constant 0 : index
    %29 = vector.load %arg4[%c1_23, %c1_24, %c0_25, %c0_26] : memref<3x3x3x24xbf16, #tpu.memory_space<vmem>>, vector<1x1x3x24xbf16>
    %30 = vector.shape_cast %29 : vector<1x1x3x24xbf16> to vector<3x24xbf16>
    %cst_27 = arith.constant dense<0.000000e+00> : vector<512x24xf32>
    %31 = tpu.matmul %28, %30, %cst_27 {dimension_numbers = #tpu.dot_dimension_numbers<[1], [0], [0], [1], [0, 0, 1, 1], [], []>} : vector<512x3xbf16>, vector<3x24xbf16>, vector<512x24xf32> -> vector<512x24xf32>
    %32 = arith.addf %26, %31 : vector<512x24xf32>
    %33 = vector.extract_strided_slice %20 {offsets = [0, 2, 0], sizes = [32, 16, 3], strides = [1, 1, 1]} : vector<32x34x3xbf16> to vector<32x16x3xbf16>
    %34 = vector.shape_cast %33 : vector<32x16x3xbf16> to vector<512x3xbf16>
    %c1_28 = arith.constant 1 : index
    %c2_29 = arith.constant 2 : index
    %c0_30 = arith.constant 0 : index
    %c0_31 = arith.constant 0 : index
    %35 = vector.load %arg4[%c1_28, %c2_29, %c0_30, %c0_31] : memref<3x3x3x24xbf16, #tpu.memory_space<vmem>>, vector<1x1x3x24xbf16>
    %36 = vector.shape_cast %35 : vector<1x1x3x24xbf16> to vector<3x24xbf16>
    %cst_32 = arith.constant dense<0.000000e+00> : vector<512x24xf32>
    %37 = tpu.matmul %34, %36, %cst_32 {dimension_numbers = #tpu.dot_dimension_numbers<[1], [0], [0], [1], [0, 0, 1, 1], [], []>} : vector<512x3xbf16>, vector<3x24xbf16>, vector<512x24xf32> -> vector<512x24xf32>
    %38 = arith.addf %32, %37 : vector<512x24xf32>
    %c0_33 = arith.constant 0 : index
    %c0_34 = arith.constant 0 : index
    %c0_35 = arith.constant 0 : index
    %39 = vector.load %arg3[%c0_33, %c0_34, %c0_35] : memref<32x34x3xbf16, #tpu.memory_space<vmem>>, vector<32x34x3xbf16>
    %40 = vector.extract_strided_slice %39 {offsets = [0, 0, 0], sizes = [32, 16, 3], strides = [1, 1, 1]} : vector<32x34x3xbf16> to vector<32x16x3xbf16>
    %41 = vector.shape_cast %40 : vector<32x16x3xbf16> to vector<512x3xbf16>
    %c2_36 = arith.constant 2 : index
    %c0_37 = arith.constant 0 : index
    %c0_38 = arith.constant 0 : index
    %c0_39 = arith.constant 0 : index
    %42 = vector.load %arg4[%c2_36, %c0_37, %c0_38, %c0_39] : memref<3x3x3x24xbf16, #tpu.memory_space<vmem>>, vector<1x1x3x24xbf16>
    %43 = vector.shape_cast %42 : vector<1x1x3x24xbf16> to vector<3x24xbf16>
    %cst_40 = arith.constant dense<0.000000e+00> : vector<512x24xf32>
    %44 = tpu.matmul %41, %43, %cst_40 {dimension_numbers = #tpu.dot_dimension_numbers<[1], [0], [0], [1], [0, 0, 1, 1], [], []>} : vector<512x3xbf16>, vector<3x24xbf16>, vector<512x24xf32> -> vector<512x24xf32>
    %45 = arith.addf %38, %44 : vector<512x24xf32>
    %46 = vector.extract_strided_slice %39 {offsets = [0, 1, 0], sizes = [32, 16, 3], strides = [1, 1, 1]} : vector<32x34x3xbf16> to vector<32x16x3xbf16>
    %47 = vector.shape_cast %46 : vector<32x16x3xbf16> to vector<512x3xbf16>
    %c2_41 = arith.constant 2 : index
    %c1_42 = arith.constant 1 : index
    %c0_43 = arith.constant 0 : index
    %c0_44 = arith.constant 0 : index
    %48 = vector.load %arg4[%c2_41, %c1_42, %c0_43, %c0_44] : memref<3x3x3x24xbf16, #tpu.memory_space<vmem>>, vector<1x1x3x24xbf16>
    %49 = vector.shape_cast %48 : vector<1x1x3x24xbf16> to vector<3x24xbf16>
    %cst_45 = arith.constant dense<0.000000e+00> : vector<512x24xf32>
    %50 = tpu.matmul %47, %49, %cst_45 {dimension_numbers = #tpu.dot_dimension_numbers<[1], [0], [0], [1], [0, 0, 1, 1], [], []>} : vector<512x3xbf16>, vector<3x24xbf16>, vector<512x24xf32> -> vector<512x24xf32>
    %51 = arith.addf %45, %50 : vector<512x24xf32>
    %52 = vector.extract_strided_slice %39 {offsets = [0, 2, 0], sizes = [32, 16, 3], strides = [1, 1, 1]} : vector<32x34x3xbf16> to vector<32x16x3xbf16>
    %53 = vector.shape_cast %52 : vector<32x16x3xbf16> to vector<512x3xbf16>
    %c2_46 = arith.constant 2 : index
    %c2_47 = arith.constant 2 : index
    %c0_48 = arith.constant 0 : index
    %c0_49 = arith.constant 0 : index
    %54 = vector.load %arg4[%c2_46, %c2_47, %c0_48, %c0_49] : memref<3x3x3x24xbf16, #tpu.memory_space<vmem>>, vector<1x1x3x24xbf16>
    %55 = vector.shape_cast %54 : vector<1x1x3x24xbf16> to vector<3x24xbf16>
    %cst_50 = arith.constant dense<0.000000e+00> : vector<512x24xf32>
    %56 = tpu.matmul %53, %55, %cst_50 {dimension_numbers = #tpu.dot_dimension_numbers<[1], [0], [0], [1], [0, 0, 1, 1], [], []>} : vector<512x3xbf16>, vector<3x24xbf16>, vector<512x24xf32> -> vector<512x24xf32>
    %57 = arith.addf %51, %56 : vector<512x24xf32>
    %c0_51 = arith.constant 0 : index
    %c0_52 = arith.constant 0 : index
    %58 = vector.load %arg5[%c0_51, %c0_52] : memref<1x24xf32, #tpu.memory_space<vmem>>, vector<1x24xf32>
    %59 = vector.broadcast %58 : vector<1x24xf32> to vector<512x24xf32>
    %60 = arith.mulf %57, %59 : vector<512x24xf32>
    %c0_53 = arith.constant 0 : index
    %c0_54 = arith.constant 0 : index
    %61 = vector.load %arg6[%c0_53, %c0_54] : memref<1x24xf32, #tpu.memory_space<vmem>>, vector<1x24xf32>
    %62 = vector.broadcast %61 : vector<1x24xf32> to vector<512x24xf32>
    %63 = arith.addf %60, %62 : vector<512x24xf32>
    %cst_55 = arith.constant 0.000000e+00 : f32
    %64 = vector.broadcast %cst_55 : f32 to vector<512x24xf32>
    %65 = arith.subf %64, %63 : vector<512x24xf32>
    %66 = math.exp %65 : vector<512x24xf32>
    %cst_56 = arith.constant 1.000000e+00 : f32
    %67 = vector.broadcast %cst_56 : f32 to vector<512x24xf32>
    %68 = arith.addf %67, %66 : vector<512x24xf32>
    %69 = tpu.reciprocal %68 {approx = true} : vector<512x24xf32> -> vector<512x24xf32>
    %70 = arith.mulf %63, %69 : vector<512x24xf32>
    %71 = vector.shape_cast %70 : vector<512x24xf32> to vector<32x16x24xf32>
    %72 = arith.truncf %71 : vector<32x16x24xf32> to vector<32x16x24xbf16>
    %c0_57 = arith.constant 0 : index
    %c0_58 = arith.constant 0 : index
    %c0_59 = arith.constant 0 : index
    %73 = vector.load %arg7[%c0_57, %c0_58, %c0_59] : memref<32x16x24xbf16, #tpu.memory_space<vmem>>, vector<32x16x24xbf16>
    tpu.vector_store %arg7[%c0_57, %c0_58, %c0_59], %72 {strides = array<i32>} : memref<32x16x24xbf16, #tpu.memory_space<vmem>>, vector<32x16x24xbf16>,
    return
  }
  func.func @transform_0(%arg0: i32) -> (i32, i32, i32) {
    %c0_i32 = arith.constant 0 : i32
    %c0_i32_0 = arith.constant 0 : i32
    %c0_i32_1 = arith.constant 0 : i32
    return %arg0, %c0_i32, %c0_i32_0 : i32, i32, i32
  }
  func.func @transform_1(%arg0: i32) -> (i32, i32, i32) {
    %c0_i32 = arith.constant 0 : i32
    %c0_i32_0 = arith.constant 0 : i32
    %c0_i32_1 = arith.constant 0 : i32
    return %arg0, %c0_i32, %c0_i32_0 : i32, i32, i32
  }
  func.func @transform_2(%arg0: i32) -> (i32, i32, i32) {
    %c0_i32 = arith.constant 0 : i32
    %c0_i32_0 = arith.constant 0 : i32
    %c0_i32_1 = arith.constant 0 : i32
    return %arg0, %c0_i32, %c0_i32_0 : i32, i32, i32
  }
  func.func @transform_3(%arg0: i32) -> (i32, i32, i32, i32) {
    %c0_i32 = arith.constant 0 : i32
    %c0_i32_0 = arith.constant 0 : i32
    %c0_i32_1 = arith.constant 0 : i32
    %c0_i32_2 = arith.constant 0 : i32
    %c0_i32_3 = arith.constant 0 : i32
    return %c0_i32, %c0_i32_0, %c0_i32_1, %c0_i32_2 : i32, i32, i32, i32
  }
  func.func @transform_4(%arg0: i32) -> (i32, i32) {
    %c0_i32 = arith.constant 0 : i32
    %c0_i32_0 = arith.constant 0 : i32
    %c0_i32_1 = arith.constant 0 : i32
    return %c0_i32, %c0_i32_0 : i32, i32
  }
  func.func @transform_5(%arg0: i32) -> (i32, i32) {
    %c0_i32 = arith.constant 0 : i32
    %c0_i32_0 = arith.constant 0 : i32
    %c0_i32_1 = arith.constant 0 : i32
    return %c0_i32, %c0_i32_0 : i32, i32
  }
  func.func @transform_6(%arg0: i32) -> (i32, i32, i32) {
    %c0_i32 = arith.constant 0 : i32
    %c0_i32_0 = arith.constant 0 : i32
    %c0_i32_1 = arith.constant 0 : i32
    return %arg0, %c0_i32, %c0_i32_0 : i32, i32, i32
  }
}

</mosaic_0001>

<bundles_post_ra>
// kernel: tpu_custom_call.1
= control target key start
LH: loop header
LB: loop body
LE: loop exit
PB: predicated region body
PF: predicated region fallthrough
CT: control target
= control target key end

     0   :  { %vm1087_vm0 = vcmask 1040384   ;;  %vm1088_vm1 = vcmask 1041408   ;;  %vm121_vm2 = vsmask.f32 3328  ;;  %v12154_v1 = vmov 65535   ;;  %s17987_s3 = inlined_call_operand.vmem [shape: bf16[3,3,3,24], index: 3, kind: input, shape index: {}]   ;;  %s17988_s0 = inlined_call_operand.vmem [shape: bf16[32,34,3], index: 0, kind: input, shape index: {}]   ;;  %s17989_s1 = inlined_call_operand.vmem [shape: bf16[32,34,3], index: 1, kind: input, shape index: {}]   ;;  %s17990_s2 = inlined_call_operand.vmem [shape: bf16[32,34,3], index: 2, kind: input, shape index: {}]   ;;  %s17991_s4 = inlined_call_operand.vmem [shape: f32[1,24], index: 4, kind: input, shape index: {}]   ;;  %s17992_s5 = inlined_call_operand.vmem [shape: f32[1,24], index: 5, kind: input, shape index: {}]   ;;  %s17993_s6 = inlined_call_operand.vmem [shape: bf16[32,16,24], index: 6, kind: output, shape index: {}]  }
   0x1   :  { %v9259_v0 = vld [vmem:[%s17987_s3 + $0x2] sm:$0x3]  ;;  %v1089_v2 = vsel %vm1087_vm0, 4294967295, %v12154_v1  ;;  %v9550_v3 = vld [vmem:[%s17987_s3 + $0x8] sm:$0x3]  ;;  %vm990_vm4 = vcmask 23552  }
   0x2   :  { %v12196_v4 = vsel %vm1088_vm1, %v1089_v2, 0  ;;  %v24_v5 = vld [vmem:[%s17988_s0] sm:$0xf]  ;;  %v25_v6 = vld [vmem:[%s17988_s0 + $0x4] sm:$0xf]  ;;  %v18125_v34 = vmov 0 }
   0x3   :  { %v1092_v7 = vand.u32 %v9259_v0, %v12196_v4  ;;  %v12206_v8 = vand.u32 %v9550_v3, %v12196_v4  ;;  %v26_v9 = vld [vmem:[%s17988_s0 + $0x8] sm:$0xf]  ;;  %vm122_vm3 = vsmask.f32 7440  ;;  %v125_v10 = vshrl.u32 %v24_v5, 16 }
   0x4   :  { %v128_v11 = vshll.u32 %v24_v5, 16  ;;  %v134_v12 = vshll.u32 %v25_v6, 16  ;;  %v138_v13 = vshrl.u32 %v25_v6, 16  ;;  %v144_v14 = vshll.u32 %v26_v9, 16  ;;  %v120_v15 = vld [vmem:[%s17987_s3] sm:$0x3]  ;;  %vm12240_vm5 = vmor %vm121_vm2, %vm122_vm3 }
   0x5   :  { %18124 = vst [vmem:[#allocation2_spill] sm:$0xff] %v12206_v8  ;;  %10366 = vmatprep.subr.bf16.mxu1 %v1092_v7  ;;  %10630 = vmatprep.subr.bf16.mxu0 %v12206_v8  ;;  %v127_v16 = vrot.slane %v125_v10, 4  ;;  %v12216_v17 = vand.u32 %v12196_v4, %v120_v15  ;;  %v2740_v18 = vld [vmem:[%s17989_s1] sm:$0xf]  ;;  %v2741_v19 = vld [vmem:[%s17989_s1 + $0x4] sm:$0xf] }
   0x6   :  { %10367 = vmatpush3.bf16.msra.mxu1 %v1092_v7  ;;  %10631 = vmatpush3.bf16.msra.mxu0 %v12206_v8  ;;  %v130_v20 = vrot.slane %v128_v11, 5  ;;  %v136_v21 = vrot.slane %v134_v12, 5  ;;  %v140_v22 = vrot.slane %v138_v13, 4  ;;  %v12228_v23 = vld [vmem:[%s17989_s1 + $0x8] sm:$0xf]  ;;  %v3451_v24 = vshrl.u32 %v2740_v18, 16 }
   0x7   :  { %10432 = vmatprep.subr.bf16.mxu1 %v12216_v17  ;;  %v3454_v25 = vshll.u32 %v2740_v18, 16  ;;  %v3460_v26 = vshll.u32 %v2741_v19, 16  ;;  %v3464_v27 = vshrl.u32 %v2741_v19, 16  ;;  %v9647_v28 = vld [vmem:[%s17987_s3 + $0xa] sm:$0x3]  ;;  %v146_v31 = vrot.slane %v144_v14, 5 }
   0x8   :  { %v131_v29 = vor.u32 %v130_v20, %v127_v16  ;;  %v141_v30 = vor.u32 %v140_v22, %v136_v21  ;;  %v3470_v32 = vshll.u32 %v12228_v23, 16  ;;  %v27_v33 = vld [vmem:[%s17988_s0 + $0x14] sm:$0xf]  ;;  %v18126_v34 = vsel %vm12240_vm5, 4294967295, %v18125_v34  ;;  %v28_v39 = vld [vmem:[%s17988_s0 + $0x18] sm:$0xf] }
   0x9   :  { %18127 = vst [vmem:[#allocation3_spill] sm:$0xff] %v18126_v34  ;;  %v3453_v35 = vrot.slane %v3451_v24, 4  ;;  %v3456_v36 = vrot.slane %v3454_v25, 5  ;;  %v3462_v37 = vrot.slane %v3460_v26, 5  ;;  %v3466_v38 = vrot.slane %v3464_v27, 4 }
   0xa   :  { %v132_v40 = vrot.slane %v131_v29, 4  ;;  %v142_v41 = vrot.slane %v141_v30, 4  ;;  %v3472_v42 = vrot.slane %v3470_v32, 5  ;;  %v12248_v43 = vand.u32 %v9647_v28, %v12196_v4  ;;  %v29_v46 = vld [vmem:[%s17988_s0 + $0x1c] sm:$0xf] }
   0xb   :  { %v3457_v44 = vor.u32 %v3456_v36, %v3453_v35  ;;  %v3467_v45 = vor.u32 %v3466_v38, %v3462_v37  ;;  %v149_v47 = vshrl.u32 %v27_v33, 16  ;;  %v152_v48 = vshll.u32 %v27_v33, 16  ;;  %v2743_v57 = vld [vmem:[%s17989_s1 + $0x14] sm:$0xf]  ;;  %v12264_v62 = vld [vmem:[%s17989_s1 + $0x18] sm:$0xf] }
   0xc   :  { %v137_v49 = vsel %vm12240_vm5, %v132_v40, %v136_v21  ;;  %v147_v50 = vsel %vm12240_vm5, %v142_v41, %v146_v31  ;;  %10696 = vmatprep.subr.bf16.mxu0 %v12248_v43  ;;  %v158_v51 = vshll.u32 %v28_v39, 16  ;;  %v162_v52 = vshrl.u32 %v28_v39, 16  ;;  %v12275_v2 = vld [vmem:[%s17989_s1 + $0x1c] sm:$0xf]  ;;  %v30_v13 = vld [vmem:[%s17988_s0 + $0x28] sm:$0xf] }
   0xd   :  { %v9260_v53 = vcombine.low %v137_v49, %v147_v50  ;;  %v3458_v54 = vrot.slane %v3457_v44, 4  ;;  %v3468_v55 = vrot.slane %v3467_v45, 4  ;;  %v151_v56 = vrot.slane %v149_v47, 4  ;;  %v31_v19 = vld [vmem:[%s17988_s0 + $0x2c] sm:$0xf] }
   0xe   :  { %v154_v58 = vrot.slane %v152_v48, 5  ;;  %v160_v59 = vrot.slane %v158_v51, 5  ;;  %v164_v60 = vrot.slane %v162_v52, 4  ;;  %v168_v61 = vshll.u32 %v29_v46, 16  ;;  %v32_v25 = vld [vmem:[%s17988_s0 + $0x30] sm:$0xf] }
   0xf   :  { %10368 = vmatprep.mubr.msk.bf16.mxu1 %vm990_vm4, %v9260_v53  ;;  %v3463_v63 = vsel %vm12240_vm5, %v3458_v54, %v3462_v37  ;;  %v3473_v0 = vsel %vm12240_vm5, %v3468_v55, %v3472_v42  ;;  %v4805_v1 = vrot.slane %v12228_v23, 5  ;;  %v3475_v9 = vshrl.u32 %v2743_v57, 16  ;;  %v2746_v30 = vld [vmem:[%s17989_s1 + $0x28] sm:$0xf]  ;;  %v2747_v40 = vld [vmem:[%s17989_s1 + $0x2c] sm:$0xf] }
  0x10   :  { %v9551_v3 = vcombine.low %v3463_v63, %v3473_v0  ;;  %v155_v5 = vor.u32 %v154_v58, %v151_v56  ;;  %v165_v6 = vor.u32 %v164_v60, %v160_v59  ;;  %v170_v7 = vrot.slane %v168_v61, 5  ;;  %v2748_v45 = vld [vmem:[%s17989_s1 + $0x30] sm:$0xf]  ;;  %v33_v51 = vld [vmem:[%s17988_s0 + $0x3c] sm:$0xf] }
  0x11   :  { %v3478_v10 = vshll.u32 %v2743_v57, 16  ;;  %v3484_v11 = vshll.u32 %v12264_v62, 16  ;;  %v3488_v12 = vshrl.u32 %v12264_v62, 16  ;;  %v3494_v16 = vshll.u32 %v12275_v2, 16  ;;  %v34_v63 = vld [vmem:[%s17988_s0 + $0x40] sm:$0xf] }
  0x12   :  { %10632 = vmatprep.mubr.msk.bf16.mxu0 %vm990_vm4, %v9551_v3  ;;  %v156_v14 = vrot.slane %v155_v5, 4  ;;  %v166_v15 = vrot.slane %v165_v6, 4  ;;  %v4809_v18 = vrot.slane %v12264_v62, 5  ;;  %v3477_v20 = vrot.slane %v3475_v9, 4  ;;  %v9485_v34 = vld [vmem:[%s17987_s3 + $0x6] sm:$0x3] }
  0x13   :  { %v3480_v21 = vrot.slane %v3478_v10, 5  ;;  %v3486_v22 = vrot.slane %v3484_v11, 5  ;;  %v3490_v24 = vrot.slane %v3488_v12, 4  ;;  %v3496_v28 = vrot.slane %v3494_v16, 5 }
  0x14   :  { %v161_v26 = vsel %vm12240_vm5, %v156_v14, %v160_v59  ;;  %v171_v27 = vsel %vm12240_vm5, %v166_v15, %v170_v7  ;;  %v4812_v29 = vrot.slane %v12275_v2, 5  ;;  %v173_v35 = vshrl.u32 %v30_v13, 16  ;;  %v35_v7 = vld [vmem:[%s17988_s0 + $0x44] sm:$0xf]  ;;  %v2749_v14 = vld [vmem:[%s17989_s1 + $0x3c] sm:$0xf] }
  0x15   :  { %v9261_v31 = vcombine.low %v161_v26, %v171_v27  ;;  %v3481_v32 = vor.u32 %v3480_v21, %v3477_v20  ;;  %v3491_v33 = vor.u32 %v3490_v24, %v3486_v22  ;;  %v176_v36 = vshll.u32 %v30_v13, 16 }
  0x16   :  { %v182_v37 = vshll.u32 %v31_v19, 16  ;;  %v186_v38 = vshrl.u32 %v31_v19, 16  ;;  %v192_v39 = vshll.u32 %v32_v25, 16  ;;  %v175_v44 = vrot.slane %v173_v35, 4  ;;  %v2750_v25 = vld [vmem:[%s17989_s1 + $0x40] sm:$0xf] }
  0x17   :  { %10369 = vmatmul.mubr.msk.bf16.vlgmr.msra.gmra.mrb[0].mxu1 %vm990_vm4, %v9261_v31  ;;  %v3482_v41 = vrot.slane %v3481_v32, 4  ;;  %v3492_v42 = vrot.slane %v3491_v33, 4  ;;  %v3499_v46 = vshrl.u32 %v2746_v30, 16  ;;  %v178_v47 = vrot.slane %v176_v36, 5  ;;  %v2751_v35 = vld [vmem:[%s17989_s1 + $0x44] sm:$0xf] }
  0x18   :  { %10433 = vmatpush3.bf16.msra.mxu1 %v12216_v17  ;;  %v184_v48 = vrot.slane %v182_v37, 5  ;;  %v188_v49 = vrot.slane %v186_v38, 4  ;;  %v194_v50 = vrot.slane %v192_v39, 5  ;;  %v3502_v55 = vshll.u32 %v2746_v30, 16 }
  0x19   :  { %v3487_v52 = vsel %vm12240_vm5, %v3482_v41, %v3486_v22  ;;  %v3497_v53 = vsel %vm12240_vm5, %v3492_v42, %v3496_v28  ;;  %v3501_v54 = vrot.slane %v3499_v46, 4  ;;  %v179_v57 = vor.u32 %v178_v47, %v175_v44  ;;  %v36_v41 = vld [vmem:[%s17988_s0 + $0x50] sm:$0xf]  ;;  %v37_v47 = vld [vmem:[%s17988_s0 + $0x54] sm:$0xf] }
  0x1a   :  { %v9552_v56 = vcombine.low %v3487_v52, %v3497_v53  ;;  %v189_v58 = vor.u32 %v188_v49, %v184_v48  ;;  %v3508_v17 = vshll.u32 %v2747_v40, 16  ;;  %v3504_v59 = vrot.slane %v3502_v55, 5  ;;  %v38_v55 = vld [vmem:[%s17988_s0 + $0x58] sm:$0xf] }
  0x1b   :  { %v3512_v60 = vshrl.u32 %v2747_v40, 16  ;;  %v3518_v61 = vshll.u32 %v2748_v45, 16  ;;  %v197_v0 = vshrl.u32 %v33_v51, 16  ;;  %v180_v3 = vrot.slane %v179_v57, 4 }
  0x1c   :  { %10633 = vmatmul.mubr.msk.bf16.vlgmr.msra.gmra.mrb[0].mxu0 %vm990_vm4, %v9552_v56  ;;  %v190_v5 = vrot.slane %v189_v58, 4  ;;  %v3510_v6 = vrot.slane %v3508_v17, 5  ;;  %v200_v9 = vshll.u32 %v33_v51, 16  ;;  %v3505_v10 = vor.u32 %v3504_v59, %v3501_v54 }
  0x1d   :  { %10697 = vmatpush3.bf16.msra.mxu0 %v12248_v43  ;;  %v3514_v11 = vrot.slane %v3512_v60, 4  ;;  %v3520_v12 = vrot.slane %v3518_v61, 5  ;;  %v199_v13 = vrot.slane %v197_v0, 4  ;;  %v185_v15 = vsel %vm12240_vm5, %v180_v3, %v184_v48  ;;  %v2752_v60 = vld [vmem:[%s17989_s1 + $0x50] sm:$0xf] }
  0x1e   :  { %v195_v16 = vsel %vm12240_vm5, %v190_v5, %v194_v50  ;;  %v202_v19 = vrot.slane %v200_v9, 5  ;;  %v206_v20 = vshll.u32 %v34_v63, 16  ;;  %v3506_v22 = vrot.slane %v3505_v10, 4  ;;  %v2753_v5 = vld [vmem:[%s17989_s1 + $0x54] sm:$0xf] }
  0x1f   :  { %v9262_v21 = vcombine.low %v185_v15, %v195_v16  ;;  %v3515_v24 = vor.u32 %v3514_v11, %v3510_v6  ;;  %v210_v43 = vshrl.u32 %v34_v63, 16  ;;  %v216_v28 = vshll.u32 %v35_v7, 16 }
  0x20   :  { %v203_v26 = vor.u32 %v202_v19, %v199_v13  ;;  %v208_v27 = vrot.slane %v206_v20, 5  ;;  %v3523_v30 = vshrl.u32 %v2749_v14, 16  ;;  %v3511_v31 = vsel %vm12240_vm5, %v3506_v22, %v3510_v6  ;;  %v2754_v19 = vld [vmem:[%s17989_s1 + $0x58] sm:$0xf]  ;;  %v39_v22 = vld [vmem:[%s17988_s0 + $0x64] sm:$0xf] }
  0x21   :  { %10372 = vmatprep.mubr.msk.bf16.mxu1 %vm990_vm4, %v9262_v21  ;;  %v3516_v32 = vrot.slane %v3515_v24, 4  ;;  %v212_v33 = vrot.slane %v210_v43, 4  ;;  %v3526_v36 = vshll.u32 %v2749_v14, 16  ;;  %v218_v38 = vrot.slane %v216_v28, 5 }
  0x22   :  { %v204_v37 = vrot.slane %v203_v26, 4  ;;  %v3525_v39 = vrot.slane %v3523_v30, 4  ;;  %v3532_v40 = vshll.u32 %v2750_v25, 16  ;;  %v3536_v46 = vshrl.u32 %v2750_v25, 16 }
  0x23   :  { %v3521_v42 = vsel %vm12240_vm5, %v3516_v32, %v3520_v12  ;;  %v213_v44 = vor.u32 %v212_v33, %v208_v27  ;;  %v3528_v45 = vrot.slane %v3526_v36, 5  ;;  %v3542_v51 = vshll.u32 %v2751_v35, 16  ;;  %v40_v36 = vld [vmem:[%s17988_s0 + $0x68] sm:$0xf] }
  0x24   :  { %v9553_v48 = vcombine.low %v3511_v31, %v3521_v42  ;;  %v209_v49 = vsel %vm12240_vm5, %v204_v37, %v208_v27  ;;  %v3534_v50 = vrot.slane %v3532_v40, 5  ;;  %v3538_v54 = vrot.slane %v3536_v46, 4 }
  0x25   :  { %v214_v52 = vrot.slane %v213_v44, 4  ;;  %v3529_v53 = vor.u32 %v3528_v45, %v3525_v39  ;;  %v221_v56 = vshrl.u32 %v36_v41, 16  ;;  %v3544_v57 = vrot.slane %v3542_v51, 5  ;;  %v2755_v44 = vld [vmem:[%s17989_s1 + $0x64] sm:$0xf] }
  0x26   :  { %10636 = vmatprep.mubr.msk.bf16.mxu0 %vm990_vm4, %v9553_v48  ;;  %v224_v58 = vshll.u32 %v36_v41, 16  ;;  %v230_v17 = vshll.u32 %v37_v47, 16  ;;  %v234_v59 = vshrl.u32 %v37_v47, 16  ;;  %v3539_v0 = vor.u32 %v3538_v54, %v3534_v50  ;;  %v41_v41 = vld [vmem:[%s17988_s0 + $0x6c] sm:$0xf] }
  0x27   :  { %v219_v61 = vsel %vm12240_vm5, %v214_v52, %v218_v38  ;;  %v3530_v63 = vrot.slane %v3529_v53, 4  ;;  %v223_v3 = vrot.slane %v221_v56, 4  ;;  %v240_v13 = vshll.u32 %v38_v55, 16  ;;  %v2756_v55 = vld [vmem:[%s17989_s1 + $0x68] sm:$0xf] }
  0x28   :  { %v9263_v6 = vcombine.low %v209_v49, %v219_v61  ;;  %v226_v7 = vrot.slane %v224_v58, 5  ;;  %v232_v9 = vrot.slane %v230_v17, 5  ;;  %v236_v10 = vrot.slane %v234_v59, 4  ;;  %v2757_v61 = vld [vmem:[%s17989_s1 + $0x6c] sm:$0xf] }
  0x29   :  { %v3535_v11 = vsel %vm12240_vm5, %v3530_v63, %v3534_v50  ;;  %v3540_v12 = vrot.slane %v3539_v0, 4  ;;  %v3547_v14 = vshrl.u32 %v2752_v60, 16  ;;  %v3550_v20 = vshll.u32 %v2752_v60, 16  ;;  %v42_v63 = vld [vmem:[%s17988_s0 + $0x78] sm:$0xf] }
  0x2a   :  { %10373 = vmatmul.mubr.msk.bf16.gmra.mrb[4].mxu1 %vm990_vm4, %v9263_v6  ;;  %v227_v15 = vor.u32 %v226_v7, %v223_v3  ;;  %v237_v16 = vor.u32 %v236_v10, %v232_v9  ;;  %v3556_v21 = vshll.u32 %v2753_v5, 16  ;;  %v242_v43 = vrot.slane %v240_v13, 5 }
  0x2b   :  { %v3545_v24 = vsel %vm12240_vm5, %v3540_v12, %v3544_v57  ;;  %v3549_v25 = vrot.slane %v3547_v14, 4  ;;  %v3560_v26 = vshrl.u32 %v2753_v5, 16  ;;  %v3552_v31 = vrot.slane %v3550_v20, 5 }
  0x2c   :  { %v9554_v27 = vcombine.low %v3535_v11, %v3545_v24  ;;  %v228_v28 = vrot.slane %v227_v15, 4  ;;  %v238_v30 = vrot.slane %v237_v16, 4  ;;  %v3558_v32 = vrot.slane %v3556_v21, 5  ;;  %v43_v15 = vld [vmem:[%s17988_s0 + $0x7c] sm:$0xf] }
  0x2d   :  { %v3562_v33 = vrot.slane %v3560_v26, 4  ;;  %v3566_v35 = vshll.u32 %v2754_v19, 16  ;;  %v245_v37 = vshrl.u32 %v39_v22, 16  ;;  %v3553_v40 = vor.u32 %v3552_v31, %v3549_v25 }
  0x2e   :  { %10637 = vmatmul.mubr.msk.bf16.gmra.mrb[4].mxu0 %vm990_vm4, %v9554_v27  ;;  %v233_v38 = vsel %vm12240_vm5, %v228_v28, %v232_v9  ;;  %v243_v39 = vsel %vm12240_vm5, %v238_v30, %v242_v43  ;;  %v248_v42 = vshll.u32 %v39_v22, 16  ;;  %v254_v51 = vshll.u32 %v40_v36, 16  ;;  %v44_v22 = vld [vmem:[%s17988_s0 + $0x80] sm:$0xf]  ;;  %v2758_v28 = vld [vmem:[%s17989_s1 + $0x78] sm:$0xf] }
  0x2f   :  { %v9264_v45 = vcombine.low %v233_v38, %v243_v39  ;;  %v3563_v46 = vor.u32 %v3562_v33, %v3558_v32  ;;  %v3568_v47 = vrot.slane %v3566_v35, 5  ;;  %v247_v48 = vrot.slane %v245_v37, 4  ;;  %v2759_v35 = vld [vmem:[%s17989_s1 + $0x7c] sm:$0xf] }
  0x30   :  { %v3554_v49 = vrot.slane %v3553_v40, 4  ;;  %v250_v50 = vrot.slane %v248_v42, 5  ;;  %v258_v52 = vshrl.u32 %v40_v36, 16  ;;  %v264_v54 = vshll.u32 %v41_v41, 16 }
  0x31   :  { %10376 = vmatprep.mubr.msk.bf16.mxu1 %vm990_vm4, %v9264_v45  ;;  %v3564_v53 = vrot.slane %v3563_v46, 4  ;;  %v3571_v56 = vshrl.u32 %v2755_v44, 16  ;;  %v3574_v57 = vshll.u32 %v2755_v44, 16  ;;  %v256_v59 = vrot.slane %v254_v51, 5  ;;  %v2760_v44 = vld [vmem:[%s17989_s1 + $0x80] sm:$0xf] }
  0x32   :  { %v3559_v58 = vsel %vm12240_vm5, %v3554_v49, %v3558_v32  ;;  %v251_v17 = vor.u32 %v250_v50, %v247_v48  ;;  %v260_v60 = vrot.slane %v258_v52, 4  ;;  %v266_v3 = vrot.slane %v264_v54, 5  ;;  %v45_v54 = vld [vmem:[%s17988_s0 + $0x8c] sm:$0xf] }
  0x33   :  { %v3569_v0 = vsel %vm12240_vm5, %v3564_v53, %v3568_v47  ;;  %v3573_v5 = vrot.slane %v3571_v56, 4  ;;  %v3576_v6 = vrot.slane %v3574_v57, 5  ;;  %v3580_v11 = vshll.u32 %v2756_v55, 16 }
  0x34   :  { %v9555_v7 = vcombine.low %v3559_v58, %v3569_v0  ;;  %v252_v9 = vrot.slane %v251_v17, 4  ;;  %v261_v10 = vor.u32 %v260_v60, %v256_v59  ;;  %v3584_v13 = vshrl.u32 %v2756_v55, 16  ;;  %v46_v17 = vld [vmem:[%s17988_s0 + $0x90] sm:$0xf] }
  0x35   :  { %v3577_v12 = vor.u32 %v3576_v6, %v3573_v5  ;;  %v3590_v14 = vshll.u32 %v2757_v61, 16  ;;  %v269_v16 = vshrl.u32 %v42_v63, 16  ;;  %v3582_v21 = vrot.slane %v3580_v11, 5  ;;  %v47_v5 = vld [vmem:[%s17988_s0 + $0x94] sm:$0xf] }
  0x36   :  { %10640 = vmatprep.mubr.msk.bf16.mxu0 %vm990_vm4, %v9555_v7  ;;  %v257_v19 = vsel %vm12240_vm5, %v252_v9, %v256_v59  ;;  %v262_v20 = vrot.slane %v261_v10, 4  ;;  %v272_v24 = vshll.u32 %v42_v63, 16  ;;  %v3586_v25 = vrot.slane %v3584_v13, 4  ;;  %v2761_v13 = vld [vmem:[%s17989_s1 + $0x8c] sm:$0xf] }
  0x37   :  { %v3578_v43 = vrot.slane %v3577_v12, 4  ;;  %v3592_v26 = vrot.slane %v3590_v14, 5  ;;  %v271_v27 = vrot.slane %v269_v16, 4  ;;  %v278_v32 = vshll.u32 %v43_v15, 16 }
  0x38   :  { %v267_v30 = vsel %vm12240_vm5, %v262_v20, %v266_v3  ;;  %v274_v31 = vrot.slane %v272_v24, 5  ;;  %v282_v33 = vshrl.u32 %v43_v15, 16  ;;  %v3587_v38 = vor.u32 %v3586_v25, %v3582_v21  ;;  %v2762_v20 = vld [vmem:[%s17989_s1 + $0x90] sm:$0xf] }
  0x39   :  { %v9265_v36 = vcombine.low %v257_v19, %v267_v30  ;;  %v3583_v37 = vsel %vm12240_vm5, %v3578_v43, %v3582_v21  ;;  %v288_v39 = vshll.u32 %v44_v22, 16  ;;  %v280_v41 = vrot.slane %v278_v32, 5 }
  0x3a   :  { %v275_v40 = vor.u32 %v274_v31, %v271_v27  ;;  %v284_v42 = vrot.slane %v282_v33, 4  ;;  %v3595_v45 = vshrl.u32 %v2758_v28, 16  ;;  %v3588_v46 = vrot.slane %v3587_v38, 4  ;;  %v2763_v27 = vld [vmem:[%s17989_s1 + $0x94] sm:$0xf] }
  0x3b   :  { %10377 = vmatmul.mubr.msk.bf16.gmra.mrb[8].mxu1 %vm990_vm4, %v9265_v36  ;;  %v290_v47 = vrot.slane %v288_v39, 5  ;;  %v3598_v48 = vshll.u32 %v2758_v28, 16  ;;  %v3604_v49 = vshll.u32 %v2759_v35, 16  ;;  %v3608_v53 = vshrl.u32 %v2759_v35, 16  ;;  %v48_v36 = vld [vmem:[%s17988_s0 + $0xa0] sm:$0xf] }
  0x3c   :  { %v276_v50 = vrot.slane %v275_v40, 4  ;;  %v285_v51 = vor.u32 %v284_v42, %v280_v41  ;;  %v3597_v52 = vrot.slane %v3595_v45, 4  ;;  %v3593_v55 = vsel %vm12240_vm5, %v3588_v46, %v3592_v26 }
  0x3d   :  { %v3600_v56 = vrot.slane %v3598_v48, 5  ;;  %v3606_v57 = vrot.slane %v3604_v49, 5  ;;  %v3614_v58 = vshll.u32 %v2760_v44, 16  ;;  %v9556_v59 = vcombine.low %v3583_v37, %v3593_v55  ;;  %v50_v49 = vld [vmem:[%s17988_s0 + $0xa8] sm:$0xf] }
  0x3e   :  { %v281_v60 = vsel %vm12240_vm5, %v276_v50, %v280_v41  ;;  %v286_v61 = vrot.slane %v285_v51, 4  ;;  %v3610_v63 = vrot.slane %v3608_v53, 4  ;;  %v293_v6 = vshrl.u32 %v45_v54, 16  ;;  %v49_v41 = vld [vmem:[%s17988_s0 + $0xa4] sm:$0xf] }
  0x3f   :  { %v3601_v0 = vor.u32 %v3600_v56, %v3597_v52  ;;  %v3616_v3 = vrot.slane %v3614_v58, 5  ;;  %v296_v7 = vshll.u32 %v45_v54, 16  ;;  %10641 = vmatmul.mubr.msk.bf16.gmra.mrb[8].mxu0 %vm990_vm4, %v9556_v59  ;;  %v302_v11 = vshll.u32 %v46_v17, 16  ;;  %v2764_v56 = vld [vmem:[%s17989_s1 + $0xa0] sm:$0xf] }
  0x40   :  { %v291_v9 = vsel %vm12240_vm5, %v286_v61, %v290_v47  ;;  %v3611_v10 = vor.u32 %v3610_v63, %v3606_v57  ;;  %v306_v12 = vshrl.u32 %v46_v17, 16  ;;  %v295_v16 = vrot.slane %v293_v6, 4 }
  0x41   :  { %v9266_v14 = vcombine.low %v281_v60, %v291_v9  ;;  %v3602_v15 = vrot.slane %v3601_v0, 4  ;;  %v298_v19 = vrot.slane %v296_v7, 5  ;;  %v304_v22 = vrot.slane %v302_v11, 5  ;;  %v2765_v60 = vld [vmem:[%s17989_s1 + $0xa4] sm:$0xf] }
  0x42   :  { %v3612_v21 = vrot.slane %v3611_v10, 4  ;;  %v308_v24 = vrot.slane %v306_v12, 4  ;;  %v312_v43 = vshll.u32 %v47_v5, 16  ;;  %v3619_v28 = vshrl.u32 %v2761_v13, 16  ;;  %v2766_v7 = vld [vmem:[%s17989_s1 + $0xa8] sm:$0xf] }
  0x43   :  { %10380 = vmatprep.mubr.msk.bf16.mxu1 %vm990_vm4, %v9266_v14  ;;  %v3607_v25 = vsel %vm12240_vm5, %v3602_v15, %v3606_v57  ;;  %v299_v26 = vor.u32 %v298_v19, %v295_v16  ;;  %v3622_v30 = vshll.u32 %v2761_v13, 16  ;;  %v3628_v35 = vshll.u32 %v2762_v20, 16 }
  0x44   :  { %v3617_v31 = vsel %vm12240_vm5, %v3612_v21, %v3616_v3  ;;  %v309_v32 = vor.u32 %v308_v24, %v304_v22  ;;  %v314_v33 = vrot.slane %v312_v43, 5  ;;  %v3621_v39 = vrot.slane %v3619_v28, 4  ;;  %v51_v21 = vld [vmem:[%s17988_s0 + $0xb4] sm:$0xf] }
  0x45   :  { %v9557_v37 = vcombine.low %v3607_v25, %v3617_v31  ;;  %v300_v38 = vrot.slane %v299_v26, 4  ;;  %v3624_v40 = vrot.slane %v3622_v30, 5  ;;  %v3630_v44 = vrot.slane %v3628_v35, 5  ;;  %v52_v26 = vld [vmem:[%s17988_s0 + $0xb8] sm:$0xf] }
  0x46   :  { %v310_v42 = vrot.slane %v309_v32, 4  ;;  %v3632_v45 = vshrl.u32 %v2762_v20, 16  ;;  %v3638_v46 = vshll.u32 %v2763_v27, 16  ;;  %v317_v50 = vshrl.u32 %v48_v36, 16  ;;  %v53_v32 = vld [vmem:[%s17988_s0 + $0xbc] sm:$0xf] }
  0x47   :  { %10644 = vmatprep.mubr.msk.bf16.mxu0 %vm990_vm4, %v9557_v37  ;;  %v305_v47 = vsel %vm12240_vm5, %v300_v38, %v304_v22  ;;  %v3625_v48 = vor.u32 %v3624_v40, %v3621_v39  ;;  %v320_v51 = vshll.u32 %v48_v36, 16  ;;  %v326_v55 = vshll.u32 %v49_v41, 16 }
  0x48   :  { %v315_v52 = vsel %vm12240_vm5, %v310_v42, %v314_v33  ;;  %v3634_v53 = vrot.slane %v3632_v45, 4  ;;  %v3640_v54 = vrot.slane %v3638_v46, 5  ;;  %v319_v17 = vrot.slane %v317_v50, 4  ;;  %v2767_v42 = vld [vmem:[%s17989_s1 + $0xb4] sm:$0xf] }
  0x49   :  { %v9267_v57 = vcombine.low %v305_v47, %v315_v52  ;;  %v3626_v58 = vrot.slane %v3625_v48, 4  ;;  %v322_v59 = vrot.slane %v320_v51, 5  ;;  %v328_v63 = vrot.slane %v326_v55, 5  ;;  %v2768_v48 = vld [vmem:[%s17989_s1 + $0xb8] sm:$0xf] }
  0x4a   :  { %v3635_v61 = vor.u32 %v3634_v53, %v3630_v44  ;;  %v330_v0 = vshrl.u32 %v49_v41, 16  ;;  %v336_v3 = vshll.u32 %v50_v49, 16  ;;  %v3643_v9 = vshrl.u32 %v2764_v56, 16 }
  0x4b   :  { %10381 = vmatmul.mubr.msk.bf16.gmra.mrb[12].mxu1 %vm990_vm4, %v9267_v57  ;;  %v3631_v5 = vsel %vm12240_vm5, %v3626_v58, %v3630_v44  ;;  %v323_v6 = vor.u32 %v322_v59, %v319_v17  ;;  %v3646_v10 = vshll.u32 %v2764_v56, 16  ;;  %v3652_v14 = vshll.u32 %v2765_v60, 16  ;;  %v2769_v56 = vld [vmem:[%s17989_s1 + $0xbc] sm:$0xf] }
  0x4c   :  { %v3636_v11 = vrot.slane %v3635_v61, 4  ;;  %v332_v12 = vrot.slane %v330_v0, 4  ;;  %v338_v13 = vrot.slane %v336_v3, 5  ;;  %v3645_v16 = vrot.slane %v3643_v9, 4  ;;  %v54_v61 = vld [vmem:[%s17988_s0 + $0xc8] sm:$0xf] }
  0x4d   :  { %v324_v15 = vrot.slane %v323_v6, 4  ;;  %v3648_v19 = vrot.slane %v3646_v10, 5  ;;  %v3656_v20 = vshrl.u32 %v2765_v60, 16  ;;  %v3654_v43 = vrot.slane %v3652_v14, 5  ;;  %v55_v6 = vld [vmem:[%s17988_s0 + $0xcc] sm:$0xf] }
  0x4e   :  { %v3641_v22 = vsel %vm12240_vm5, %v3636_v11, %v3640_v54  ;;  %v333_v24 = vor.u32 %v332_v12, %v328_v63  ;;  %v3662_v25 = vshll.u32 %v2766_v7, 16  ;;  %v341_v36 = vshrl.u32 %v51_v21, 16 }
  0x4f   :  { %v9558_v27 = vcombine.low %v3631_v5, %v3641_v22  ;;  %v329_v28 = vsel %vm12240_vm5, %v324_v15, %v328_v63  ;;  %v3649_v30 = vor.u32 %v3648_v19, %v3645_v16  ;;  %v3658_v31 = vrot.slane %v3656_v20, 4 }
  0x50   :  { %v334_v33 = vrot.slane %v333_v24, 4  ;;  %v3664_v35 = vrot.slane %v3662_v25, 5  ;;  %v344_v37 = vshll.u32 %v51_v21, 16  ;;  %v350_v40 = vshll.u32 %v52_v26, 16  ;;  %v56_v21 = vld [vmem:[%s17988_s0 + $0xd0] sm:$0xf] }
  0x51   :  { %10645 = vmatmul.mubr.msk.bf16.gmra.mrb[12].mxu0 %vm990_vm4, %v9558_v27  ;;  %v3650_v38 = vrot.slane %v3649_v30, 4  ;;  %v3659_v39 = vor.u32 %v3658_v31, %v3654_v43  ;;  %v354_v41 = vshrl.u32 %v52_v26, 16  ;;  %v343_v45 = vrot.slane %v341_v36, 4  ;;  %v2770_v24 = vld [vmem:[%s17989_s1 + $0xc8] sm:$0xf] }
  0x52   :  { %v339_v44 = vsel %vm12240_vm5, %v334_v33, %v338_v13  ;;  %v346_v46 = vrot.slane %v344_v37, 5  ;;  %v360_v47 = vshll.u32 %v53_v32, 16  ;;  %v352_v52 = vrot.slane %v350_v40, 5 }
  0x53   :  { %v9268_v49 = vcombine.low %v329_v28, %v339_v44  ;;  %v3655_v50 = vsel %vm12240_vm5, %v3650_v38, %v3654_v43  ;;  %v3660_v51 = vrot.slane %v3659_v39, 4  ;;  %v356_v54 = vrot.slane %v354_v41, 4  ;;  %v2771_v28 = vld [vmem:[%s17989_s1 + $0xcc] sm:$0xf]  ;;  %v2772_v41 = vld [vmem:[%s17989_s1 + $0xd0] sm:$0xf] }
  0x54   :  { %v347_v53 = vor.u32 %v346_v46, %v343_v45  ;;  %v362_v55 = vrot.slane %v360_v47, 5  ;;  %v3667_v57 = vshrl.u32 %v2767_v42, 16  ;;  %v3670_v17 = vshll.u32 %v2767_v42, 16  ;;  %v57_v45 = vld [vmem:[%s17988_s0 + $0xdc] sm:$0xf] }
  0x55   :  { %10384 = vmatprep.mubr.msk.bf16.mxu1 %vm990_vm4, %v9268_v49  ;;  %v3665_v58 = vsel %vm12240_vm5, %v3660_v51, %v3664_v35  ;;  %v3676_v59 = vshll.u32 %v2768_v48, 16  ;;  %v3680_v60 = vshrl.u32 %v2768_v48, 16  ;;  %v357_v3 = vor.u32 %v356_v54, %v352_v52 }
  0x56   :  { %v9559_v63 = vcombine.low %v3655_v50, %v3665_v58  ;;  %v348_v0 = vrot.slane %v347_v53, 4  ;;  %v3669_v5 = vrot.slane %v3667_v57, 4  ;;  %v3672_v7 = vrot.slane %v3670_v17, 5  ;;  %v58_v50 = vld [vmem:[%s17988_s0 + $0xe0] sm:$0xf] }
  0x57   :  { %v3678_v9 = vrot.slane %v3676_v59, 5  ;;  %v3682_v10 = vrot.slane %v3680_v60, 4  ;;  %v3686_v11 = vshll.u32 %v2769_v56, 16  ;;  %v358_v13 = vrot.slane %v357_v3, 4  ;;  %v59_v58 = vld [vmem:[%s17988_s0 + $0xe4] sm:$0xf] }
  0x58   :  { %10648 = vmatprep.mubr.msk.bf16.mxu0 %vm990_vm4, %v9559_v63  ;;  %v353_v12 = vsel %vm12240_vm5, %v348_v0, %v352_v52  ;;  %v365_v14 = vshrl.u32 %v54_v61, 16  ;;  %v368_v15 = vshll.u32 %v54_v61, 16  ;;  %v3673_v16 = vor.u32 %v3672_v7, %v3669_v5  ;;  %v2773_v0 = vld [vmem:[%s17989_s1 + $0xdc] sm:$0xf] }
  0x59   :  { %v3683_v19 = vor.u32 %v3682_v10, %v3678_v9  ;;  %v3688_v20 = vrot.slane %v3686_v11, 5  ;;  %v374_v22 = vshll.u32 %v55_v6, 16  ;;  %v363_v43 = vsel %vm12240_vm5, %v358_v13, %v362_v55  ;;  %v2774_v13 = vld [vmem:[%s17989_s1 + $0xe0] sm:$0xf] }
  0x5a   :  { %v367_v25 = vrot.slane %v365_v14, 4  ;;  %v370_v26 = vrot.slane %v368_v15, 5  ;;  %v378_v27 = vshrl.u32 %v55_v6, 16  ;;  %v9269_v30 = vcombine.low %v353_v12, %v363_v43 }
  0x5b   :  { %v3674_v31 = vrot.slane %v3673_v16, 4  ;;  %v3684_v32 = vrot.slane %v3683_v19, 4  ;;  %v376_v33 = vrot.slane %v374_v22, 5  ;;  %v384_v37 = vshll.u32 %v56_v21, 16 }
  0x5c   :  { %v371_v35 = vor.u32 %v370_v26, %v367_v25  ;;  %v380_v36 = vrot.slane %v378_v27, 4  ;;  %v3691_v38 = vshrl.u32 %v2770_v24, 16  ;;  %10385 = vmatmul.mubr.msk.bf16.gmra.mrb[16].mxu1 %vm990_vm4, %v9269_v30  ;;  %v3694_v42 = vshll.u32 %v2770_v24, 16  ;;  %v2775_v24 = vld [vmem:[%s17989_s1 + $0xe4] sm:$0xf] }
  0x5d   :  { %v3679_v39 = vsel %vm12240_vm5, %v3674_v31, %v3678_v9  ;;  %v3689_v40 = vsel %vm12240_vm5, %v3684_v32, %v3688_v20  ;;  %v3700_v44 = vshll.u32 %v2771_v28, 16  ;;  %v386_v49 = vrot.slane %v384_v37, 5  ;;  %v60_v30 = vld [vmem:[%s17988_s0 + $0xf0] sm:$0xf] }
  0x5e   :  { %v9560_v46 = vcombine.low %v3679_v39, %v3689_v40  ;;  %v372_v47 = vrot.slane %v371_v35, 4  ;;  %v381_v48 = vor.u32 %v380_v36, %v376_v33  ;;  %v3693_v51 = vrot.slane %v3691_v38, 4  ;;  %v61_v36 = vld [vmem:[%s17988_s0 + $0xf4] sm:$0xf] }
  0x5f   :  { %v3696_v52 = vrot.slane %v3694_v42, 5  ;;  %v3702_v53 = vrot.slane %v3700_v44, 5  ;;  %v3704_v54 = vshrl.u32 %v2771_v28, 16  ;;  %v3710_v57 = vshll.u32 %v2772_v41, 16 }
  0x60   :  { %10649 = vmatmul.mubr.msk.bf16.gmra.mrb[16].mxu0 %vm990_vm4, %v9560_v46  ;;  %v377_v55 = vsel %vm12240_vm5, %v372_v47, %v376_v33  ;;  %v382_v56 = vrot.slane %v381_v48, 4  ;;  %v389_v17 = vshrl.u32 %v57_v45, 16  ;;  %v392_v61 = vshll.u32 %v57_v45, 16  ;;  %v62_v45 = vld [vmem:[%s17988_s0 + $0xf8] sm:$0xf] }
  0x61   :  { %v3697_v59 = vor.u32 %v3696_v52, %v3693_v51  ;;  %v3706_v60 = vrot.slane %v3704_v54, 4  ;;  %v398_v63 = vshll.u32 %v58_v50, 16  ;;  %v3712_v5 = vrot.slane %v3710_v57, 5  ;;  %v2776_v51 = vld [vmem:[%s17989_s1 + $0xf0] sm:$0xf] }
  0x62   :  { %v387_v3 = vsel %vm12240_vm5, %v382_v56, %v386_v49  ;;  %v391_v6 = vrot.slane %v389_v17, 4  ;;  %v402_v7 = vshrl.u32 %v58_v50, 16  ;;  %v394_v12 = vrot.slane %v392_v61, 5  ;;  %v2777_v56 = vld [vmem:[%s17989_s1 + $0xf4] sm:$0xf] }
  0x63   :  { %v9270_v9 = vcombine.low %v377_v55, %v387_v3  ;;  %v3698_v10 = vrot.slane %v3697_v59, 4  ;;  %v3707_v11 = vor.u32 %v3706_v60, %v3702_v53  ;;  %v400_v14 = vrot.slane %v398_v63, 5  ;;  %v2778_v63 = vld [vmem:[%s17989_s1 + $0xf8] sm:$0xf] }
  0x64   :  { %v404_v15 = vrot.slane %v402_v7, 4  ;;  %v408_v16 = vshll.u32 %v59_v58, 16  ;;  %v3715_v19 = vshrl.u32 %v2773_v0, 16  ;;  %v395_v22 = vor.u32 %v394_v12, %v391_v6 }
  0x65   :  { %10388 = vmatprep.mubr.msk.bf16.mxu1 %vm990_vm4, %v9270_v9  ;;  %v3703_v20 = vsel %vm12240_vm5, %v3698_v10, %v3702_v53  ;;  %v3708_v21 = vrot.slane %v3707_v11, 4  ;;  %v3718_v43 = vshll.u32 %v2773_v0, 16  ;;  %v3724_v28 = vshll.u32 %v2774_v13, 16  ;;  %v63_v10 = vld [vmem:[%s17988_s0 + $0x104] sm:$0xf] }
  0x66   :  { %v405_v25 = vor.u32 %v404_v15, %v400_v14  ;;  %v410_v26 = vrot.slane %v408_v16, 5  ;;  %v3717_v27 = vrot.slane %v3715_v19, 4  ;;  %v396_v32 = vrot.slane %v395_v22, 4  ;;  %v64_v15 = vld [vmem:[%s17988_s0 + $0x108] sm:$0xf] }
  0x67   :  { %v3713_v31 = vsel %vm12240_vm5, %v3708_v21, %v3712_v5  ;;  %v3720_v33 = vrot.slane %v3718_v43, 5  ;;  %v3728_v35 = vshrl.u32 %v2774_v13, 16  ;;  %v3726_v39 = vrot.slane %v3724_v28, 5  ;;  %v65_v28 = vld [vmem:[%s17988_s0 + $0x10c] sm:$0xf] }
  0x68   :  { %v9561_v37 = vcombine.low %v3703_v20, %v3713_v31  ;;  %v406_v38 = vrot.slane %v405_v25, 4  ;;  %v3734_v40 = vshll.u32 %v2775_v24, 16  ;;  %v401_v41 = vsel %vm12240_vm5, %v396_v32, %v400_v14 }
  0x69   :  { %v3721_v42 = vor.u32 %v3720_v33, %v3717_v27  ;;  %v3730_v44 = vrot.slane %v3728_v35, 4  ;;  %v413_v46 = vshrl.u32 %v60_v30, 16  ;;  %v416_v49 = vshll.u32 %v60_v30, 16 }
  0x6a   :  { %10652 = vmatprep.mubr.msk.bf16.mxu0 %vm990_vm4, %v9561_v37  ;;  %v411_v47 = vsel %vm12240_vm5, %v406_v38, %v410_v26  ;;  %v3736_v48 = vrot.slane %v3734_v40, 5  ;;  %v422_v50 = vshll.u32 %v61_v36, 16  ;;  %v426_v17 = vshrl.u32 %v61_v36, 16  ;;  %v2779_v37 = vld [vmem:[%s17989_s1 + $0x104] sm:$0xf] }
  0x6b   :  { %v9271_v52 = vcombine.low %v401_v41, %v411_v47  ;;  %v3722_v53 = vrot.slane %v3721_v42, 4  ;;  %v3731_v54 = vor.u32 %v3730_v44, %v3726_v39  ;;  %v415_v55 = vrot.slane %v413_v46, 4  ;;  %v2780_v42 = vld [vmem:[%s17989_s1 + $0x108] sm:$0xf] }
  0x6c   :  { %v418_v57 = vrot.slane %v416_v49, 5  ;;  %v424_v58 = vrot.slane %v422_v50, 5  ;;  %v432_v59 = vshll.u32 %v62_v45, 16  ;;  %v3739_v0 = vshrl.u32 %v2776_v51, 16  ;;  %v2781_v50 = vld [vmem:[%s17989_s1 + $0x10c] sm:$0xf] }
  0x6d   :  { %10389 = vmatmul.mubr.msk.bf16.gmra.mrb[20].mxu1 %vm990_vm4, %v9271_v52  ;;  %v3727_v60 = vsel %vm12240_vm5, %v3722_v53, %v3726_v39  ;;  %v3732_v61 = vrot.slane %v3731_v54, 4  ;;  %v3742_v3 = vshll.u32 %v2776_v51, 16  ;;  %v428_v6 = vrot.slane %v426_v17, 4 }
  0x6e   :  { %v419_v5 = vor.u32 %v418_v57, %v415_v55  ;;  %v434_v7 = vrot.slane %v432_v59, 5  ;;  %v3748_v9 = vshll.u32 %v2777_v56, 16  ;;  %v3741_v12 = vrot.slane %v3739_v0, 4  ;;  %v66_v57 = vld [vmem:[%s17988_s0 + $0x118] sm:$0xf] }
  0x6f   :  { %v3737_v11 = vsel %vm12240_vm5, %v3732_v61, %v3736_v48  ;;  %v3744_v13 = vrot.slane %v3742_v3, 5  ;;  %v3752_v14 = vshrl.u32 %v2777_v56, 16  ;;  %v429_v20 = vor.u32 %v428_v6, %v424_v58  ;;  %v67_v61 = vld [vmem:[%s17988_s0 + $0x11c] sm:$0xf] }
  0x70   :  { %v9562_v16 = vcombine.low %v3727_v60, %v3737_v11  ;;  %v420_v19 = vrot.slane %v419_v5, 4  ;;  %v3750_v21 = vrot.slane %v3748_v9, 5  ;;  %v3758_v43 = vshll.u32 %v2778_v63, 16 }
  0x71   :  { %v3745_v22 = vor.u32 %v3744_v13, %v3741_v12  ;;  %v3754_v24 = vrot.slane %v3752_v14, 4  ;;  %v437_v25 = vshrl.u32 %v63_v10, 16  ;;  %v430_v27 = vrot.slane %v429_v20, 4  ;;  %v68_v14 = vld [vmem:[%s17988_s0 + $0x120] sm:$0xf] }
  0x72   :  { %10653 = vmatmul.mubr.msk.bf16.gmra.mrb[20].mxu0 %vm990_vm4, %v9562_v16  ;;  %v425_v26 = vsel %vm12240_vm5, %v420_v19, %v424_v58  ;;  %v440_v30 = vshll.u32 %v63_v10, 16  ;;  %v446_v31 = vshll.u32 %v64_v15, 16  ;;  %v3760_v35 = vrot.slane %v3758_v43, 5  ;;  %v12635_v16 = vld [vmem:[%s17989_s1 + $0x118] sm:$0xf] }
  0x73   :  { %v3746_v32 = vrot.slane %v3745_v22, 4  ;;  %v3755_v33 = vor.u32 %v3754_v24, %v3750_v21  ;;  %v439_v36 = vrot.slane %v437_v25, 4  ;;  %v435_v38 = vsel %vm12240_vm5, %v430_v27, %v434_v7  ;;  %v12642_v24 = vld [vmem:[%s17989_s1 + $0x11c] sm:$0xf] }
  0x74   :  { %v442_v39 = vrot.slane %v440_v30, 5  ;;  %v448_v40 = vrot.slane %v446_v31, 5  ;;  %v450_v41 = vshrl.u32 %v64_v15, 16  ;;  %v9272_v44 = vcombine.low %v425_v26, %v435_v38 }
  0x75   :  { %v3751_v45 = vsel %vm12240_vm5, %v3746_v32, %v3750_v21  ;;  %v3756_v46 = vrot.slane %v3755_v33, 4  ;;  %v456_v47 = vshll.u32 %v65_v28, 16  ;;  %v3763_v51 = vshrl.u32 %v2779_v37, 16 }
  0x76   :  { %v443_v48 = vor.u32 %v442_v39, %v439_v36  ;;  %v452_v49 = vrot.slane %v450_v41, 4  ;;  %v3766_v52 = vshll.u32 %v2779_v37, 16  ;;  %10392 = vmatprep.mubr.msk.bf16.mxu1 %vm990_vm4, %v9272_v44  ;;  %v3772_v55 = vshll.u32 %v2780_v42, 16  ;;  %v12653_v36 = vld [vmem:[%s17989_s1 + $0x120] sm:$0xf] }
  0x77   :  { %v3761_v53 = vsel %vm12240_vm5, %v3756_v46, %v3760_v35  ;;  %v458_v54 = vrot.slane %v456_v47, 5  ;;  %v3776_v56 = vshrl.u32 %v2780_v42, 16  ;;  %v3765_v60 = vrot.slane %v3763_v51, 4  ;;  %v69_v39 = vld [vmem:[%s17988_s0 + $0x12c] sm:$0xf] }
  0x78   :  { %v9563_v58 = vcombine.low %v3751_v45, %v3761_v53  ;;  %v444_v17 = vrot.slane %v443_v48, 4  ;;  %v453_v59 = vor.u32 %v452_v49, %v448_v40  ;;  %v3768_v63 = vrot.slane %v3766_v52, 5  ;;  %v70_v45 = vld [vmem:[%s17988_s0 + $0x130] sm:$0xf]  ;;  %v71_v53 = vld [vmem:[%s17988_s0 + $0x134] sm:$0xf] }
  0x79   :  { %v3774_v0 = vrot.slane %v3772_v55, 5  ;;  %v3778_v3 = vrot.slane %v3776_v56, 4  ;;  %v3782_v5 = vshll.u32 %v2781_v50, 16  ;;  %v461_v9 = vshrl.u32 %v66_v57, 16 }
  0x7a   :  { %10656 = vmatprep.mubr.msk.bf16.mxu0 %vm990_vm4, %v9563_v58  ;;  %v449_v6 = vsel %vm12240_vm5, %v444_v17, %v448_v40  ;;  %v454_v7 = vrot.slane %v453_v59, 4  ;;  %v464_v10 = vshll.u32 %v66_v57, 16  ;;  %v3769_v11 = vor.u32 %v3768_v63, %v3765_v60  ;;  %v12674_v17 = vld [vmem:[%s17989_s1 + $0x12c] sm:$0xf] }
  0x7b   :  { %v3779_v12 = vor.u32 %v3778_v3, %v3774_v0  ;;  %v3784_v13 = vrot.slane %v3782_v5, 5  ;;  %v470_v15 = vshll.u32 %v67_v61, 16  ;;  %v463_v20 = vrot.slane %v461_v9, 4 }
  0x7c   :  { %v459_v19 = vsel %vm12240_vm5, %v454_v7, %v458_v54  ;;  %v466_v21 = vrot.slane %v464_v10, 5  ;;  %v474_v22 = vshrl.u32 %v67_v61, 16  ;;  %v3770_v25 = vrot.slane %v3769_v11, 4  ;;  %v12681_v7 = vld [vmem:[%s17989_s1 + $0x130] sm:$0xf] }
  0x7d   :  { %v9273_v43 = vcombine.low %v449_v6, %v459_v19  ;;  %v3780_v26 = vrot.slane %v3779_v12, 4  ;;  %v472_v27 = vrot.slane %v470_v15, 5  ;;  %v480_v31 = vshll.u32 %v68_v14, 16  ;;  %v12690_v19 = vld [vmem:[%s17989_s1 + $0x134] sm:$0xf] }
  0x7e   :  { %v467_v28 = vor.u32 %v466_v21, %v463_v20  ;;  %v476_v30 = vrot.slane %v474_v22, 4  ;;  %v3787_v32 = vshrl.u32 %v12635_v16, 16  ;;  %v3775_v33 = vsel %vm12240_vm5, %v3770_v25, %v3774_v0 }
  0x7f   :  { %10393 = vmatmul.mubr.msk.bf16.gmra.mrb[24].mxu1 %vm990_vm4, %v9273_v43  ;;  %v3785_v35 = vsel %vm12240_vm5, %v3780_v26, %v3784_v13  ;;  %v3790_v37 = vshll.u32 %v12635_v16, 16  ;;  %v3796_v38 = vshll.u32 %v12642_v24, 16  ;;  %v482_v44 = vrot.slane %v480_v31, 5  ;;  %v72_v26 = vld [vmem:[%s17988_s0 + $0x140] sm:$0xf] }
  0x80   :  { %v9564_v40 = vcombine.low %v3775_v33, %v3785_v35  ;;  %v468_v41 = vrot.slane %v467_v28, 4  ;;  %v477_v42 = vor.u32 %v476_v30, %v472_v27  ;;  %v3789_v46 = vrot.slane %v3787_v32, 4  ;;  %v73_v32 = vld [vmem:[%s17988_s0 + $0x144] sm:$0xf] }
  0x81   :  { %v3792_v47 = vrot.slane %v3790_v37, 5  ;;  %v3798_v48 = vrot.slane %v3796_v38, 5  ;;  %v3800_v49 = vshrl.u32 %v12642_v24, 16  ;;  %v3806_v52 = vshll.u32 %v12653_v36, 16 }
  0x82   :  { %10657 = vmatmul.mubr.msk.bf16.gmra.mrb[24].mxu0 %vm990_vm4, %v9564_v40  ;;  %v473_v50 = vsel %vm12240_vm5, %v468_v41, %v472_v27  ;;  %v478_v51 = vrot.slane %v477_v42, 4  ;;  %v485_v54 = vshrl.u32 %v69_v39, 16  ;;  %v488_v57 = vshll.u32 %v69_v39, 16  ;;  %v74_v42 = vld [vmem:[%s17988_s0 + $0x148] sm:$0xf] }
  0x83   :  { %v3793_v55 = vor.u32 %v3792_v47, %v3789_v46  ;;  %v3802_v56 = vrot.slane %v3800_v49, 4  ;;  %v494_v58 = vshll.u32 %v70_v45, 16  ;;  %v3808_v60 = vrot.slane %v3806_v52, 5 }
  0x84   :  { %v483_v59 = vsel %vm12240_vm5, %v478_v51, %v482_v44  ;;  %v487_v61 = vrot.slane %v485_v54, 4  ;;  %v498_v63 = vshrl.u32 %v70_v45, 16  ;;  %v490_v6 = vrot.slane %v488_v57, 5 }
  0x85   :  { %v9274_v0 = vcombine.low %v473_v50, %v483_v59  ;;  %v3794_v3 = vrot.slane %v3793_v55, 4  ;;  %v3803_v5 = vor.u32 %v3802_v56, %v3798_v48  ;;  %v496_v9 = vrot.slane %v494_v58, 5  ;;  %v75_v58 = vld [vmem:[%s17988_s0 + $0x154] sm:$0xf] }
  0x86   :  { %v500_v10 = vrot.slane %v498_v63, 4  ;;  %v504_v11 = vshll.u32 %v71_v53, 16  ;;  %v3811_v12 = vshrl.u32 %v12674_v17, 16  ;;  %v491_v15 = vor.u32 %v490_v6, %v487_v61  ;;  %v9712_v53 = vld [vmem:[%s17987_s3 + $0xc] sm:$0x3] }
  0x87   :  { %10396 = vmatprep.mubr.msk.bf16.mxu1 %vm990_vm4, %v9274_v0  ;;  %v3799_v13 = vsel %vm12240_vm5, %v3794_v3, %v3798_v48  ;;  %v3804_v14 = vrot.slane %v3803_v5, 4  ;;  %v3814_v20 = vshll.u32 %v12674_v17, 16  ;;  %v3820_v25 = vshll.u32 %v12681_v7, 16  ;;  %v11827_v5 = vld [vmem:[%s17989_s1] sm:$0xf] }
  0x88   :  { %v501_v21 = vor.u32 %v500_v10, %v496_v9  ;;  %v506_v22 = vrot.slane %v504_v11, 5  ;;  %v3813_v43 = vrot.slane %v3811_v12, 4  ;;  %v492_v28 = vrot.slane %v491_v15, 4  ;;  %v11828_v11 = vld [vmem:[%s17989_s1 + $0x4] sm:$0xf] }
  0x89   :  { %v3809_v27 = vsel %vm12240_vm5, %v3804_v14, %v3808_v60  ;;  %v3816_v30 = vrot.slane %v3814_v20, 5  ;;  %v3824_v31 = vshrl.u32 %v12681_v7, 16  ;;  %v3822_v37 = vrot.slane %v3820_v25, 5 }
  0x8a   :  { %v9565_v33 = vcombine.low %v3799_v13, %v3809_v27  ;;  %v502_v35 = vrot.slane %v501_v21, 4  ;;  %v3830_v38 = vshll.u32 %v12690_v19, 16  ;;  %v497_v39 = vsel %vm12240_vm5, %v492_v28, %v496_v9  ;;  %v76_v9 = vld [vmem:[%s17988_s0 + $0x158] sm:$0xf] }
  0x8b   :  { %v3817_v40 = vor.u32 %v3816_v30, %v3813_v43  ;;  %v3826_v41 = vrot.slane %v3824_v31, 4  ;;  %v509_v44 = vshrl.u32 %v72_v26, 16  ;;  %v512_v47 = vshll.u32 %v72_v26, 16 }
  0x8c   :  { %10660 = vmatprep.mubr.msk.bf16.mxu0 %vm990_vm4, %v9565_v33  ;;  %v507_v45 = vsel %vm12240_vm5, %v502_v35, %v506_v22  ;;  %v3832_v46 = vrot.slane %v3830_v38, 5  ;;  %v518_v48 = vshll.u32 %v73_v32, 16  ;;  %v522_v56 = vshrl.u32 %v73_v32, 16  ;;  %v77_v22 = vld [vmem:[%s17988_s0 + $0x15c] sm:$0xf] }
  0x8d   :  { %v9275_v49 = vcombine.low %v497_v39, %v507_v45  ;;  %v3818_v50 = vrot.slane %v3817_v40, 4  ;;  %v3827_v51 = vor.u32 %v3826_v41, %v3822_v37  ;;  %v511_v52 = vrot.slane %v509_v44, 4  ;;  %v11829_v39 = vld [vmem:[%s17989_s1 + $0x14] sm:$0xf]  ;;  %v78_v41 = vld [vmem:[%s17988_s0 + $0x168] sm:$0xf] }
  0x8e   :  { %v514_v54 = vrot.slane %v512_v47, 5  ;;  %v520_v55 = vrot.slane %v518_v48, 5  ;;  %v528_v57 = vshll.u32 %v74_v42, 16  ;;  %vm1963_vm6 = vcmask 1042432  }
  0x8f   :  { %10397 = vmatmul.mubr.msk.bf16.gmra.mrb[28].mxu1 %vm990_vm4, %v9275_v49  ;;  %v3823_v59 = vsel %vm12240_vm5, %v3818_v50, %v3822_v37  ;;  %v3828_v60 = vrot.slane %v3827_v51, 4  ;;  %vm1964_vm7 = vcmask 1046532   ;;  %v524_v63 = vrot.slane %v522_v56, 4 }
  0x90   :  { %v515_v61 = vor.u32 %v514_v54, %v511_v52  ;;  %v530_v0 = vrot.slane %v528_v57, 5  ;;  %vm12721_vm8 = vmor %vm1963_vm6, %vm1964_vm7  ;;  %v9615_v6 = vrot.slane %v11827_v5, 9  ;;  %v4802_v12 = vrot.slane %v11828_v11, 5  ;;  %v11831_v11 = vld [vmem:[%s17989_s1 + $0x2c] sm:$0xf] }
  0x91   :  { %v3833_v10 = vsel %vm12240_vm5, %v3828_v60, %v3832_v46  ;;  %v5929_v13 = vand.u32 %v9712_v53, %v12196_v4  ;;  %v533_v14 = vshrl.u32 %v75_v58, 16  ;;  %v525_v21 = vor.u32 %v524_v63, %v520_v55  ;;  %v80_v46 = vld [vmem:[%s17988_s0 + $0x170] sm:$0xf] }
  0x92   :  { %v9566_v15 = vcombine.low %v3823_v59, %v3833_v10  ;;  %v516_v20 = vrot.slane %v515_v61, 4  ;;  %v536_v43 = vshll.u32 %v75_v58, 16  ;;  %v4803_v25 = vsel %vm12721_vm8, %v9615_v6, %v4802_v12  ;;  %v81_v61 = vld [vmem:[%s17988_s0 + $0x17c] sm:$0xf] }
  0x93   :  { %v4804_v26 = vrot.slane %v4802_v12, 4  ;;  %10762 = vmatprep.subr.bf16.mxu0 %v5929_v13  ;;  %v535_v27 = vrot.slane %v533_v14, 4  ;;  %v542_v28 = vshll.u32 %v76_v9, 16  ;;  %v526_v31 = vrot.slane %v525_v21, 4  ;;  %v11832_v14 = vld [vmem:[%s17989_s1 + $0x30] sm:$0xf] }
  0x94   :  { %10661 = vmatmul.mubr.msk.bf16.gmra.mrb[28].mxu0 %vm990_vm4, %v9566_v15  ;;  %v521_v30 = vsel %vm12240_vm5, %v516_v20, %v520_v55  ;;  %v538_v32 = vrot.slane %v536_v43, 5  ;;  %v546_v33 = vshrl.u32 %v76_v9, 16  ;;  %v552_v38 = vshll.u32 %v77_v22, 16  ;;  %v11830_v9 = vld [vmem:[%s17989_s1 + $0x28] sm:$0xf] }
  0x95   :  { %v4806_v35 = vsel %vm12721_vm8, %v4804_v26, %v4805_v1  ;;  %v544_v37 = vrot.slane %v542_v28, 5  ;;  %v9616_v40 = vrot.slane %v11829_v39, 9  ;;  %v531_v42 = vsel %vm12240_vm5, %v526_v31, %v530_v0  ;;  %v79_v1 = vld [vmem:[%s17988_s0 + $0x16c] sm:$0xf]  ;;  %v83_v43 = vld [vmem:[%s17988_s0 + $0x184] sm:$0xf] }
  0x96   :  { %v9648_v44 = vcombine.low %v4803_v25, %v4806_v35  ;;  %v539_v45 = vor.u32 %v538_v32, %v535_v27  ;;  %v548_v23 = vrot.slane %v546_v33, 4  ;;  %v9276_v47 = vcombine.low %v521_v30, %v531_v42 }
  0x97   :  { %v554_v48 = vrot.slane %v552_v38, 5  ;;  %v4810_v49 = vsel %vm12721_vm8, %v9616_v40, %v4809_v18  ;;  %v4811_v50 = vrot.slane %v4809_v18, 4  ;;  %v557_v53 = vshrl.u32 %v78_v41, 16  ;;  %v84_v40 = vld [vmem:[%s17988_s0 + $0x190] sm:$0xf] }
  0x98   :  { %10698 = vmatprep.mubr.msk.bf16.mxu0 %vm990_vm4, %v9648_v44  ;;  %v540_v51 = vrot.slane %v539_v45, 4  ;;  %v549_v52 = vor.u32 %v548_v23, %v544_v37  ;;  %v560_v54 = vshll.u32 %v78_v41, 16  ;;  %10400 = vmatprep.mubr.msk.bf16.mxu1 %vm990_vm4, %v9276_v47  ;;  %v566_v56 = vshll.u32 %v79_v1, 16  ;;  %v85_v23 = vld [vmem:[%s17988_s0 + $0x194] sm:$0xf] }
  0x99   :  { %v4813_v55 = vsel %vm12721_vm8, %v4811_v50, %v4812_v29  ;;  %v570_v57 = vshrl.u32 %v79_v1, 16  ;;  %v576_v58 = vshll.u32 %v80_v46, 16  ;;  %v559_v60 = vrot.slane %v557_v53, 4  ;;  %v82_v29 = vld [vmem:[%s17988_s0 + $0x180] sm:$0xf] }
  0x9a   :  { %v545_v62 = vsel %vm12240_vm5, %v540_v51, %v544_v37  ;;  %v550_v18 = vrot.slane %v549_v52, 4  ;;  %v9649_v59 = vcombine.low %v4810_v49, %v4813_v55  ;;  %v562_v63 = vrot.slane %v560_v54, 5  ;;  %v11834_v51 = vld [vmem:[%s17989_s1 + $0x40] sm:$0xf]  ;;  %v11835_v53 = vld [vmem:[%s17989_s1 + $0x44] sm:$0xf] }
  0x9b   :  { %v568_v0 = vrot.slane %v566_v56, 5  ;;  %v572_v5 = vrot.slane %v570_v57, 4  ;;  %v578_v2 = vrot.slane %v576_v58, 5  ;;  %v9617_v10 = vrot.slane %v11830_v9, 9  ;;  %v86_v57 = vld [vmem:[%s17988_s0 + $0x198] sm:$0xf] }
  0x9c   :  { %v555_v6 = vsel %vm12240_vm5, %v550_v18, %v554_v48  ;;  %10699 = vmatmul.mubr.msk.bf16.vlgmr.msra.gmra.mrb[0].mxu0 %vm990_vm4, %v9649_v59  ;;  %v4816_v12 = vrot.slane %v11831_v11, 5  ;;  %v4819_v15 = vrot.slane %v11832_v14, 5  ;;  %v563_v21 = vor.u32 %v562_v63, %v559_v60  ;;  %v11833_v48 = vld [vmem:[%s17989_s1 + $0x3c] sm:$0xf] }
  0x9d   :  { %v9277_v20 = vcombine.low %v545_v62, %v555_v6  ;;  %10763 = vmatpush3.bf16.msra.mxu0 %v5929_v13  ;;  %v573_v22 = vor.u32 %v572_v5, %v568_v0  ;;  %v581_v25 = vshrl.u32 %v81_v61, 16  ;;  %v584_v28 = vshll.u32 %v81_v61, 16  ;;  %v87_v6 = vld [vmem:[%s17988_s0 + $0x1a4] sm:$0xf] }
  0x9e   :  { %v4817_v26 = vsel %vm12721_vm8, %v9617_v10, %v4816_v12  ;;  %v4818_v27 = vrot.slane %v4816_v12, 4  ;;  %v590_v30 = vshll.u32 %v82_v29, 16  ;;  %v564_v31 = vrot.slane %v563_v21, 4  ;;  %v11836_v12 = vld [vmem:[%s17989_s1 + $0x50] sm:$0xf] }
  0x9f   :  { %10401 = vmatmul.mubr.msk.bf16.gmra.mrb[32].mxu1 %vm990_vm4, %v9277_v20  ;;  %v574_v32 = vrot.slane %v573_v22, 4  ;;  %v583_v33 = vrot.slane %v581_v25, 4  ;;  %v594_v35 = vshrl.u32 %v82_v29, 16  ;;  %v586_v37 = vrot.slane %v584_v28, 5  ;;  %v11838_v28 = vld [vmem:[%s17989_s1 + $0x58] sm:$0xf] }
  0xa0   :  { %v4820_v13 = vsel %vm12721_vm8, %v4818_v27, %v4819_v15  ;;  %v592_v38 = vrot.slane %v590_v30, 5  ;;  %v600_v39 = vshll.u32 %v83_v43, 16  ;;  %v569_v41 = vsel %vm12240_vm5, %v564_v31, %v568_v0  ;;  %v88_v15 = vld [vmem:[%s17988_s0 + $0x1a8] sm:$0xf] }
  0xa1   :  { %v579_v42 = vsel %vm12240_vm5, %v574_v32, %v578_v2  ;;  %v9650_v44 = vcombine.low %v4817_v26, %v4820_v13  ;;  %v596_v45 = vrot.slane %v594_v35, 4  ;;  %v587_v46 = vor.u32 %v586_v37, %v583_v33  ;;  %v11837_v26 = vld [vmem:[%s17989_s1 + $0x54] sm:$0xf]  ;;  %v89_v35 = vld [vmem:[%s17988_s0 + $0x1ac] sm:$0xf] }
  0xa2   :  { %v9278_v1 = vcombine.low %v569_v41, %v579_v42  ;;  %v602_v47 = vrot.slane %v600_v39, 5  ;;  %v9618_v49 = vrot.slane %v11833_v48, 9  ;;  %v4823_v52 = vrot.slane %v11834_v51, 5 }
  0xa3   :  { %10702 = vmatprep.mubr.msk.bf16.mxu0 %vm990_vm4, %v9650_v44  ;;  %v597_v50 = vor.u32 %v596_v45, %v592_v38  ;;  %v4826_v54 = vrot.slane %v11835_v53, 5  ;;  %v605_v55 = vshrl.u32 %v84_v40, 16  ;;  %v588_v56 = vrot.slane %v587_v46, 4 }
  0xa4   :  { %10404 = vmatprep.mubr.msk.bf16.mxu1 %vm990_vm4, %v9278_v1  ;;  %v608_v58 = vshll.u32 %v84_v40, 16  ;;  %v614_v62 = vshll.u32 %v85_v23, 16  ;;  %v618_v18 = vshrl.u32 %v85_v23, 16  ;;  %v4824_v60 = vsel %vm12721_vm8, %v9618_v49, %v4823_v52  ;;  %v90_v1 = vld [vmem:[%s17988_s0 + $0x1b8] sm:$0xf] }
  0xa5   :  { %v598_v59 = vrot.slane %v597_v50, 4  ;;  %v4825_v61 = vrot.slane %v4823_v52, 4  ;;  %v607_v63 = vrot.slane %v605_v55, 4  ;;  %v593_v0 = vsel %vm12240_vm5, %v588_v56, %v592_v38  ;;  %v11839_v52 = vld [vmem:[%s17989_s1 + $0x64] sm:$0xf] }
  0xa6   :  { %v610_v5 = vrot.slane %v608_v58, 5  ;;  %v616_v2 = vrot.slane %v614_v62, 5  ;;  %v620_v29 = vrot.slane %v618_v18, 4  ;;  %v624_v11 = vshll.u32 %v86_v57, 16  ;;  %v91_v56 = vld [vmem:[%s17988_s0 + $0x1bc] sm:$0xf] }
  0xa7   :  { %v603_v9 = vsel %vm12240_vm5, %v598_v59, %v602_v47  ;;  %v4827_v10 = vsel %vm12721_vm8, %v4825_v61, %v4826_v54  ;;  %v9619_v14 = vrot.slane %v11836_v12, 9  ;;  %v4830_v27 = vrot.slane %v11837_v26, 5  ;;  %v11840_v54 = vld [vmem:[%s17989_s1 + $0x68] sm:$0xf]  ;;  %v11841_v62 = vld [vmem:[%s17989_s1 + $0x6c] sm:$0xf] }
  0xa8   :  { %v9279_v20 = vcombine.low %v593_v0, %v603_v9  ;;  %v9651_v21 = vcombine.low %v4824_v60, %v4827_v10  ;;  %v611_v22 = vor.u32 %v610_v5, %v607_v63  ;;  %v621_v43 = vor.u32 %v620_v29, %v616_v2  ;;  %v92_v59 = vld [vmem:[%s17988_s0 + $0x1c0] sm:$0xf] }
  0xa9   :  { %v626_v25 = vrot.slane %v624_v11, 5  ;;  %v4833_v30 = vrot.slane %v11838_v28, 5  ;;  %v629_v31 = vshrl.u32 %v87_v6, 16  ;;  %v632_v13 = vshll.u32 %v87_v6, 16 }
  0xaa   :  { %10405 = vmatmul.mubr.msk.bf16.gmra.mrb[36].mxu1 %vm990_vm4, %v9279_v20  ;;  %10703 = vmatmul.mubr.msk.bf16.gmra.mrb[4].mxu0 %vm990_vm4, %v9651_v21  ;;  %v612_v32 = vrot.slane %v611_v22, 4  ;;  %v622_v33 = vrot.slane %v621_v43, 4  ;;  %v638_v37 = vshll.u32 %v88_v15, 16  ;;  %v4831_v38 = vsel %vm12721_vm8, %v9619_v14, %v4830_v27 }
  0xab   :  { %v4832_v39 = vrot.slane %v4830_v27, 4  ;;  %v631_v40 = vrot.slane %v629_v31, 4  ;;  %v642_v41 = vshrl.u32 %v88_v15, 16  ;;  %v634_v45 = vrot.slane %v632_v13, 5  ;;  %v93_v15 = vld [vmem:[%s17988_s0 + $0x1cc] sm:$0xf] }
  0xac   :  { %v617_v42 = vsel %vm12240_vm5, %v612_v32, %v616_v2  ;;  %v627_v44 = vsel %vm12240_vm5, %v622_v33, %v626_v25  ;;  %v640_v23 = vrot.slane %v638_v37, 5  ;;  %v648_v49 = vshll.u32 %v89_v35, 16  ;;  %v94_v25 = vld [vmem:[%s17988_s0 + $0x1d0] sm:$0xf]  ;;  %v11843_v33 = vld [vmem:[%s17989_s1 + $0x7c] sm:$0xf] }
  0xad   :  { %v9280_v46 = vcombine.low %v617_v42, %v627_v44  ;;  %v4834_v47 = vsel %vm12721_vm8, %v4832_v39, %v4833_v30  ;;  %v644_v48 = vrot.slane %v642_v41, 4  ;;  %v635_v51 = vor.u32 %v634_v45, %v631_v40  ;;  %v11842_v30 = vld [vmem:[%s17989_s1 + $0x78] sm:$0xf]  ;;  %v11844_v13 = vld [vmem:[%s17989_s1 + $0x80] sm:$0xf] }
  0xae   :  { %v9652_v50 = vcombine.low %v4831_v38, %v4834_v47  ;;  %v9620_v53 = vrot.slane %v11839_v52, 9  ;;  %v4837_v55 = vrot.slane %v11840_v54, 5  ;;  %v650_v58 = vrot.slane %v648_v49, 5  ;;  %v95_v40 = vld [vmem:[%s17988_s0 + $0x1d4] sm:$0xf] }
  0xaf   :  { %10408 = vmatprep.mubr.msk.bf16.mxu1 %vm990_vm4, %v9280_v46  ;;  %v645_v57 = vor.u32 %v644_v48, %v640_v23  ;;  %v4840_v18 = vrot.slane %v11841_v62, 5  ;;  %v653_v60 = vshrl.u32 %v90_v1, 16  ;;  %v636_v61 = vrot.slane %v635_v51, 4  ;;  %v96_v51 = vld [vmem:[%s17988_s0 + $0x1e0] sm:$0xf] }
  0xb0   :  { %10706 = vmatprep.mubr.msk.bf16.mxu0 %vm990_vm4, %v9652_v50  ;;  %v4838_v63 = vsel %vm12721_vm8, %v9620_v53, %v4837_v55  ;;  %v4839_v0 = vrot.slane %v4837_v55, 4  ;;  %v656_v5 = vshll.u32 %v90_v1, 16  ;;  %v662_v6 = vshll.u32 %v91_v56, 16  ;;  %v11845_v55 = vld [vmem:[%s17989_s1 + $0x8c] sm:$0xf] }
  0xb1   :  { %v646_v2 = vrot.slane %v645_v57, 4  ;;  %v655_v29 = vrot.slane %v653_v60, 4  ;;  %v666_v9 = vshrl.u32 %v91_v56, 16  ;;  %v641_v10 = vsel %vm12240_vm5, %v636_v61, %v640_v23  ;;  %v97_v57 = vld [vmem:[%s17988_s0 + $0x1e4] sm:$0xf] }
  0xb2   :  { %v4841_v11 = vsel %vm12721_vm8, %v4839_v0, %v4840_v18  ;;  %v658_v12 = vrot.slane %v656_v5, 5  ;;  %v672_v14 = vshll.u32 %v92_v59, 16  ;;  %v664_v22 = vrot.slane %v662_v6, 5  ;;  %v11846_v61 = vld [vmem:[%s17989_s1 + $0x90] sm:$0xf] }
  0xb3   :  { %v651_v20 = vsel %vm12240_vm5, %v646_v2, %v650_v58  ;;  %v9653_v21 = vcombine.low %v4838_v63, %v4841_v11  ;;  %v668_v43 = vrot.slane %v666_v9, 4  ;;  %v9621_v31 = vrot.slane %v11842_v30, 9  ;;  %v11847_v0 = vld [vmem:[%s17989_s1 + $0x94] sm:$0xf]  ;;  %v98_v9 = vld [vmem:[%s17988_s0 + $0x1e8] sm:$0xf] }
  0xb4   :  { %v9281_v26 = vcombine.low %v641_v10, %v651_v20  ;;  %v659_v27 = vor.u32 %v658_v12, %v655_v29  ;;  %v674_v28 = vrot.slane %v672_v14, 5  ;;  %v4844_v35 = vrot.slane %v11843_v33, 5 }
  0xb5   :  { %10707 = vmatmul.mubr.msk.bf16.gmra.mrb[8].mxu0 %vm990_vm4, %v9653_v21  ;;  %v669_v32 = vor.u32 %v668_v43, %v664_v22  ;;  %v4847_v37 = vrot.slane %v11844_v13, 5  ;;  %v677_v38 = vshrl.u32 %v93_v15, 16  ;;  %v680_v41 = vshll.u32 %v93_v15, 16 }
  0xb6   :  { %10409 = vmatmul.mubr.msk.bf16.gmra.mrb[40].mxu1 %vm990_vm4, %v9281_v26  ;;  %v660_v39 = vrot.slane %v659_v27, 4  ;;  %v686_v42 = vshll.u32 %v94_v25, 16  ;;  %v690_v44 = vshrl.u32 %v94_v25, 16  ;;  %v4845_v23 = vsel %vm12721_vm8, %v9621_v31, %v4844_v35  ;;  %v12948_v26 = vld [vmem:[%s17988_s0 + $0x1f4] sm:$0xf] }
  0xb7   :  { %v670_v45 = vrot.slane %v669_v32, 4  ;;  %v4846_v1 = vrot.slane %v4844_v35, 4  ;;  %v679_v46 = vrot.slane %v677_v38, 4  ;;  %v682_v48 = vrot.slane %v680_v41, 5  ;;  %v11848_v35 = vld [vmem:[%s17989_s1 + $0xa0] sm:$0xf] }
  0xb8   :  { %v665_v47 = vsel %vm12240_vm5, %v660_v39, %v664_v22  ;;  %v688_v49 = vrot.slane %v686_v42, 5  ;;  %v692_v50 = vrot.slane %v690_v44, 4  ;;  %v696_v54 = vshll.u32 %v95_v40, 16  ;;  %v12961_v39 = vld [vmem:[%s17988_s0 + $0x1f8] sm:$0xf] }
  0xb9   :  { %v675_v52 = vsel %vm12240_vm5, %v670_v45, %v674_v28  ;;  %v4848_v53 = vsel %vm12721_vm8, %v4846_v1, %v4847_v37  ;;  %v9622_v56 = vrot.slane %v11845_v55, 9  ;;  %v683_v18 = vor.u32 %v682_v48, %v679_v46  ;;  %v11849_v37 = vld [vmem:[%s17989_s1 + $0xa4] sm:$0xf]  ;;  %v11850_v42 = vld [vmem:[%s17989_s1 + $0xa8] sm:$0xf] }
  0xba   :  { %v9282_v58 = vcombine.low %v665_v47, %v675_v52  ;;  %v9654_v62 = vcombine.low %v4845_v23, %v4848_v53  ;;  %v693_v59 = vor.u32 %v692_v50, %v688_v49  ;;  %v698_v60 = vrot.slane %v696_v54, 5  ;;  %v101_v45 = vld [vmem:[%s17988_s0 + $0x1fc] sm:$0xf] }
  0xbb   :  { %v4851_v63 = vrot.slane %v11846_v61, 5  ;;  %v4854_v5 = vrot.slane %v11847_v0, 5  ;;  %v701_v2 = vshrl.u32 %v96_v51, 16  ;;  %v684_v29 = vrot.slane %v683_v18, 4 }
  0xbc   :  { %10412 = vmatprep.mubr.msk.bf16.mxu1 %vm990_vm4, %v9282_v58  ;;  %10710 = vmatprep.mubr.msk.bf16.mxu0 %vm990_vm4, %v9654_v62  ;;  %v694_v6 = vrot.slane %v693_v59, 4  ;;  %v704_v10 = vshll.u32 %v96_v51, 16  ;;  %v710_v11 = vshll.u32 %v97_v57, 16  ;;  %v714_v20 = vshrl.u32 %v97_v57, 16  ;;  %v12984_v57 = vld [vmem:[%s17988_s0 + $0x208] sm:$0xf] }
  0xbd   :  { %v4852_v12 = vsel %vm12721_vm8, %v9622_v56, %v4851_v63  ;;  %v4853_v14 = vrot.slane %v4851_v63, 4  ;;  %v703_v15 = vrot.slane %v701_v2, 4  ;;  %v689_v21 = vsel %vm12240_vm5, %v684_v29, %v688_v49 }
  0xbe   :  { %v699_v22 = vsel %vm12240_vm5, %v694_v6, %v698_v60  ;;  %v706_v43 = vrot.slane %v704_v10, 5  ;;  %v712_v25 = vrot.slane %v710_v11, 5  ;;  %v716_v30 = vrot.slane %v714_v20, 4  ;;  %v12991_v60 = vld [vmem:[%s17988_s0 + $0x20c] sm:$0xf] }
  0xbf   :  { %v9283_v27 = vcombine.low %v689_v21, %v699_v22  ;;  %v4855_v28 = vsel %vm12721_vm8, %v4853_v14, %v4854_v5  ;;  %v720_v31 = vshll.u32 %v98_v9, 16  ;;  %v9623_v13 = vrot.slane %v11848_v35, 9  ;;  %v11851_v5 = vld [vmem:[%s17989_s1 + $0xb4] sm:$0xf]  ;;  %v11852_v6 = vld [vmem:[%s17989_s1 + $0xb8] sm:$0xf] }
  0xc0   :  { %v9655_v32 = vcombine.low %v4852_v12, %v4855_v28  ;;  %v707_v33 = vor.u32 %v706_v43, %v703_v15  ;;  %v4858_v38 = vrot.slane %v11849_v37, 5  ;;  %v717_v40 = vor.u32 %v716_v30, %v712_v25  ;;  %v11853_v10 = vld [vmem:[%s17989_s1 + $0xbc] sm:$0xf]  ;;  %v104_v15 = vld [vmem:[%s17988_s0 + $0x210] sm:$0xf] }
  0xc1   :  { %10413 = vmatmul.mubr.msk.bf16.gmra.mrb[44].mxu1 %vm990_vm4, %v9283_v27  ;;  %v722_v41 = vrot.slane %v720_v31, 5  ;;  %v4861_v44 = vrot.slane %v11850_v42, 5  ;;  %v725_v23 = vshrl.u32 %v12948_v26, 16  ;;  %v728_v48 = vshll.u32 %v12948_v26, 16  ;;  %v13018_v35 = vld [vmem:[%s17988_s0 + $0x21c] sm:$0xf] }
  0xc2   :  { %10711 = vmatmul.mubr.msk.bf16.gmra.mrb[12].mxu0 %vm990_vm4, %v9655_v32  ;;  %v708_v1 = vrot.slane %v707_v33, 4  ;;  %v4859_v46 = vsel %vm12721_vm8, %v9623_v13, %v4858_v38  ;;  %v4860_v47 = vrot.slane %v4858_v38, 4  ;;  %v718_v49 = vrot.slane %v717_v40, 4  ;;  %v11854_v40 = vld [vmem:[%s17989_s1 + $0xc8] sm:$0xf] }
  0xc3   :  { %v727_v50 = vrot.slane %v725_v23, 4  ;;  %v734_v51 = vshll.u32 %v12961_v39, 16  ;;  %v738_v52 = vshrl.u32 %v12961_v39, 16  ;;  %v730_v55 = vrot.slane %v728_v48, 5  ;;  %v13030_v42 = vld [vmem:[%s17988_s0 + $0x220] sm:$0xf] }
  0xc4   :  { %v713_v53 = vsel %vm12240_vm5, %v708_v1, %v712_v25  ;;  %v4862_v54 = vsel %vm12721_vm8, %v4860_v47, %v4861_v44  ;;  %v744_v56 = vshll.u32 %v101_v45, 16  ;;  %v723_v58 = vsel %vm12240_vm5, %v718_v49, %v722_v41  ;;  %v11855_v47 = vld [vmem:[%s17989_s1 + $0xcc] sm:$0xf]  ;;  %v11856_v49 = vld [vmem:[%s17989_s1 + $0xd0] sm:$0xf] }
  0xc5   :  { %v9656_v62 = vcombine.low %v4859_v46, %v4862_v54  ;;  %v736_v18 = vrot.slane %v734_v51, 5  ;;  %v740_v59 = vrot.slane %v738_v52, 4  ;;  %v9284_v61 = vcombine.low %v713_v53, %v723_v58  ;;  %v107_v54 = vld [vmem:[%s17988_s0 + $0x224] sm:$0xf] }
  0xc6   :  { %v731_v63 = vor.u32 %v730_v55, %v727_v50  ;;  %v746_v0 = vrot.slane %v744_v56, 5  ;;  %v9624_v2 = vrot.slane %v11851_v5, 9  ;;  %v4865_v9 = vrot.slane %v11852_v6, 5 }
  0xc7   :  { %10714 = vmatprep.mubr.msk.bf16.mxu0 %vm990_vm4, %v9656_v62  ;;  %v741_v29 = vor.u32 %v740_v59, %v736_v18  ;;  %v4868_v11 = vrot.slane %v11853_v10, 5  ;;  %v749_v12 = vshrl.u32 %v12984_v57, 16  ;;  %10416 = vmatprep.mubr.msk.bf16.mxu1 %vm990_vm4, %v9284_v61  ;;  %v752_v20 = vshll.u32 %v12984_v57, 16 }
  0xc8   :  { %v732_v14 = vrot.slane %v731_v63, 4  ;;  %v758_v21 = vshll.u32 %v12991_v60, 16  ;;  %v762_v22 = vshrl.u32 %v12991_v60, 16  ;;  %v4866_v25 = vsel %vm12721_vm8, %v9624_v2, %v4865_v9  ;;  %v13056_v2 = vld [vmem:[%s17988_s0 + $0x230] sm:$0xf] }
  0xc9   :  { %v742_v43 = vrot.slane %v741_v29, 4  ;;  %v4867_v27 = vrot.slane %v4865_v9, 4  ;;  %v751_v28 = vrot.slane %v749_v12, 4  ;;  %v754_v31 = vrot.slane %v752_v20, 5  ;;  %v11858_v20 = vld [vmem:[%s17989_s1 + $0xe0] sm:$0xf] }
  0xca   :  { %v737_v30 = vsel %vm12240_vm5, %v732_v14, %v736_v18  ;;  %v760_v32 = vrot.slane %v758_v21, 5  ;;  %v764_v33 = vrot.slane %v762_v22, 4  ;;  %v768_v38 = vshll.u32 %v104_v15, 16  ;;  %v11857_v14 = vld [vmem:[%s17989_s1 + $0xdc] sm:$0xf] }
  0xcb   :  { %v747_v13 = vsel %vm12240_vm5, %v742_v43, %v746_v0  ;;  %v4869_v37 = vsel %vm12721_vm8, %v4867_v27, %v4868_v11  ;;  %v9625_v41 = vrot.slane %v11854_v40, 9  ;;  %v755_v23 = vor.u32 %v754_v31, %v751_v28  ;;  %v13069_v22 = vld [vmem:[%s17988_s0 + $0x234] sm:$0xf]  ;;  %v11859_v27 = vld [vmem:[%s17989_s1 + $0xe4] sm:$0xf] }
  0xcc   :  { %v9285_v44 = vcombine.low %v737_v30, %v747_v13  ;;  %v9657_v45 = vcombine.low %v4866_v25, %v4869_v37  ;;  %v765_v1 = vor.u32 %v764_v33, %v760_v32  ;;  %v770_v46 = vrot.slane %v768_v38, 5  ;;  %v110_v30 = vld [vmem:[%s17988_s0 + $0x238] sm:$0xf] }
  0xcd   :  { %v4872_v48 = vrot.slane %v11855_v47, 5  ;;  %v4875_v50 = vrot.slane %v11856_v49, 5  ;;  %v773_v51 = vshrl.u32 %v13018_v35, 16  ;;  %v756_v52 = vrot.slane %v755_v23, 4  ;;  %v13092_v47 = vld [vmem:[%s17988_s0 + $0x244] sm:$0xf] }
  0xce   :  { %10417 = vmatmul.mubr.msk.bf16.gmra.mrb[48].mxu1 %vm990_vm4, %v9285_v44  ;;  %10715 = vmatmul.mubr.msk.bf16.gmra.mrb[16].mxu0 %vm990_vm4, %v9657_v45  ;;  %v766_v53 = vrot.slane %v765_v1, 4  ;;  %v776_v55 = vshll.u32 %v13018_v35, 16  ;;  %v782_v56 = vshll.u32 %v13030_v42, 16  ;;  %v786_v59 = vshrl.u32 %v13030_v42, 16 }
  0xcf   :  { %v4873_v58 = vsel %vm12721_vm8, %v9625_v41, %v4872_v48  ;;  %v4874_v62 = vrot.slane %v4872_v48, 4  ;;  %v775_v18 = vrot.slane %v773_v51, 4  ;;  %v761_v61 = vsel %vm12240_vm5, %v756_v52, %v760_v32  ;;  %v13099_v52 = vld [vmem:[%s17988_s0 + $0x248] sm:$0xf] }
  0xd0   :  { %v771_v63 = vsel %vm12240_vm5, %v766_v53, %v770_v46  ;;  %v778_v0 = vrot.slane %v776_v55, 5  ;;  %v784_v5 = vrot.slane %v782_v56, 5  ;;  %v788_v9 = vrot.slane %v786_v59, 4  ;;  %v11860_v56 = vld [vmem:[%s17989_s1 + $0xf0] sm:$0xf] }
  0xd1   :  { %v9286_v29 = vcombine.low %v761_v61, %v771_v63  ;;  %v4876_v6 = vsel %vm12721_vm8, %v4874_v62, %v4875_v50  ;;  %v792_v10 = vshll.u32 %v107_v54, 16  ;;  %v9626_v15 = vrot.slane %v11857_v14, 9  ;;  %v11862_v61 = vld [vmem:[%s17989_s1 + $0xf8] sm:$0xf] }
  0xd2   :  { %v9658_v11 = vcombine.low %v4873_v58, %v4876_v6  ;;  %v779_v12 = vor.u32 %v778_v0, %v775_v18  ;;  %v4879_v21 = vrot.slane %v11858_v20, 5  ;;  %v789_v43 = vor.u32 %v788_v9, %v784_v5  ;;  %v11861_v18 = vld [vmem:[%s17989_s1 + $0xf4] sm:$0xf] }
  0xd3   :  { %10420 = vmatprep.mubr.msk.bf16.mxu1 %vm990_vm4, %v9286_v29  ;;  %v794_v25 = vrot.slane %v792_v10, 5  ;;  %v4882_v28 = vrot.slane %v11859_v27, 5  ;;  %v797_v31 = vshrl.u32 %v13056_v2, 16  ;;  %v800_v37 = vshll.u32 %v13056_v2, 16  ;;  %v113_v29 = vld [vmem:[%s17988_s0 + $0x24c] sm:$0xf] }
  0xd4   :  { %10718 = vmatprep.mubr.msk.bf16.mxu0 %vm990_vm4, %v9658_v11  ;;  %v780_v32 = vrot.slane %v779_v12, 4  ;;  %v4880_v33 = vsel %vm12721_vm8, %v9626_v15, %v4879_v21  ;;  %v4881_v13 = vrot.slane %v4879_v21, 4  ;;  %v790_v38 = vrot.slane %v789_v43, 4  ;;  %v13126_v27 = vld [vmem:[%s17988_s0 + $0x258] sm:$0xf] }
  0xd5   :  { %v799_v40 = vrot.slane %v797_v31, 4  ;;  %v806_v41 = vshll.u32 %v13069_v22, 16  ;;  %v810_v44 = vshrl.u32 %v13069_v22, 16  ;;  %v802_v1 = vrot.slane %v800_v37, 5 }
  0xd6   :  { %v785_v45 = vsel %vm12240_vm5, %v780_v32, %v784_v5  ;;  %v4883_v23 = vsel %vm12721_vm8, %v4881_v13, %v4882_v28  ;;  %v816_v46 = vshll.u32 %v110_v30, 16  ;;  %v795_v48 = vsel %vm12240_vm5, %v790_v38, %v794_v25  ;;  %v11863_v32 = vld [vmem:[%s17989_s1 + $0x104] sm:$0xf]  ;;  %v13138_v13 = vld [vmem:[%s17988_s0 + $0x25c] sm:$0xf] }
  0xd7   :  { %v9659_v49 = vcombine.low %v4880_v33, %v4883_v23  ;;  %v808_v50 = vrot.slane %v806_v41, 5  ;;  %v812_v51 = vrot.slane %v810_v44, 4  ;;  %v9287_v53 = vcombine.low %v785_v45, %v795_v48  ;;  %v11864_v45 = vld [vmem:[%s17989_s1 + $0x108] sm:$0xf] }
  0xd8   :  { %v803_v54 = vor.u32 %v802_v1, %v799_v40  ;;  %v818_v55 = vrot.slane %v816_v46, 5  ;;  %v9627_v58 = vrot.slane %v11860_v56, 9  ;;  %v4886_v59 = vrot.slane %v11861_v18, 5  ;;  %v11865_v1 = vld [vmem:[%s17989_s1 + $0x10c] sm:$0xf] }
  0xd9   :  { %10719 = vmatmul.mubr.msk.bf16.gmra.mrb[20].mxu0 %vm990_vm4, %v9659_v49  ;;  %v813_v62 = vor.u32 %v812_v51, %v808_v50  ;;  %v4889_v63 = vrot.slane %v11862_v61, 5  ;;  %v821_v0 = vshrl.u32 %v13092_v47, 16  ;;  %10421 = vmatmul.mubr.msk.bf16.gmra.mrb[52].mxu1 %vm990_vm4, %v9287_v53  ;;  %v824_v6 = vshll.u32 %v13092_v47, 16  ;;  %v116_v51 = vld [vmem:[%s17988_s0 + $0x260] sm:$0xf] }
  0xda   :  { %v804_v5 = vrot.slane %v803_v54, 4  ;;  %v830_v9 = vshll.u32 %v13099_v52, 16  ;;  %v834_v10 = vshrl.u32 %v13099_v52, 16  ;;  %v4887_v12 = vsel %vm12721_vm8, %v9627_v58, %v4886_v59 }
  0xdb   :  { %v814_v11 = vrot.slane %v813_v62, 4  ;;  %v4888_v14 = vrot.slane %v4886_v59, 4  ;;  %v823_v15 = vrot.slane %v821_v0, 4  ;;  %v826_v21 = vrot.slane %v824_v6, 5  ;;  %v13164_v0 = vld [vmem:[%s17988_s0 + $0x26c] sm:$0xf] }
  0xdc   :  { %v809_v20 = vsel %vm12240_vm5, %v804_v5, %v808_v50  ;;  %v832_v43 = vrot.slane %v830_v9, 5  ;;  %v836_v25 = vrot.slane %v834_v10, 4  ;;  %v840_v31 = vshll.u32 %v113_v29, 16 }
  0xdd   :  { %v819_v28 = vsel %vm12240_vm5, %v814_v11, %v818_v55  ;;  %v4890_v30 = vsel %vm12721_vm8, %v4888_v14, %v4889_v63  ;;  %v9628_v33 = vrot.slane %v11863_v32, 9  ;;  %v827_v40 = vor.u32 %v826_v21, %v823_v15  ;;  %v13173_v15 = vld [vmem:[%s17988_s0 + $0x270] sm:$0xf] }
  0xde   :  { %v9288_v37 = vcombine.low %v809_v20, %v819_v28  ;;  %v9660_v38 = vcombine.low %v4887_v12, %v4890_v30  ;;  %v837_v41 = vor.u32 %v836_v25, %v832_v43  ;;  %v842_v44 = vrot.slane %v840_v31, 5  ;;  %v119_v25 = vld [vmem:[%s17988_s0 + $0x274] sm:$0xf] }
  0xdf   :  { %v4893_v23 = vrot.slane %v11864_v45, 5  ;;  %v4896_v46 = vrot.slane %v11865_v1, 5  ;;  %v845_v48 = vshrl.u32 %v13126_v27, 16  ;;  %v828_v49 = vrot.slane %v827_v40, 4  ;;  %v2789_v45 = vld [vmem:[%s17989_s1 + $0x144] sm:$0xf] }
  0xe0   :  { %10424 = vmatprep.mubr.msk.bf16.mxu1 %vm990_vm4, %v9288_v37  ;;  %10722 = vmatprep.mubr.msk.bf16.mxu0 %vm990_vm4, %v9660_v38  ;;  %v838_v50 = vrot.slane %v837_v41, 4  ;;  %v848_v53 = vshll.u32 %v13126_v27, 16  ;;  %v854_v54 = vshll.u32 %v13138_v13, 16  ;;  %v858_v62 = vshrl.u32 %v13138_v13, 16 }
  0xe1   :  { %v4894_v55 = vsel %vm12721_vm8, %v9628_v33, %v4893_v23  ;;  %v4895_v56 = vrot.slane %v4893_v23, 4  ;;  %v847_v58 = vrot.slane %v845_v48, 4  ;;  %v833_v18 = vsel %vm12240_vm5, %v828_v49, %v832_v43  ;;  %v9420_v49 = vld [vmem:[%s17987_s3 + $0x4] sm:$0x3] }
  0xe2   :  { %v843_v59 = vsel %vm12240_vm5, %v838_v50, %v842_v44  ;;  %v850_v61 = vrot.slane %v848_v53, 5  ;;  %v856_v63 = vrot.slane %v854_v54, 5  ;;  %v860_v6 = vrot.slane %v858_v62, 4  ;;  %v2788_v50 = vld [vmem:[%s17989_s1 + $0x140] sm:$0xf] }
  0xe3   :  { %v9289_v5 = vcombine.low %v833_v18, %v843_v59  ;;  %v4897_v29 = vsel %vm12721_vm8, %v4895_v56, %v4896_v46  ;;  %v864_v9 = vshll.u32 %v116_v51, 16  ;;  %v9629_v12 = vrot.slane %v12635_v16, 9 }
  0xe4   :  { %v9661_v10 = vcombine.low %v4894_v55, %v4897_v29  ;;  %v851_v11 = vor.u32 %v850_v61, %v847_v58  ;;  %v4900_v14 = vrot.slane %v12642_v24, 5  ;;  %v861_v20 = vor.u32 %v860_v6, %v856_v63  ;;  %v2790_v55 = vld [vmem:[%s17989_s1 + $0x148] sm:$0xf] }
  0xe5   :  { %10425 = vmatmul.mubr.msk.bf16.gmra.mrb[56].mxu1 %vm990_vm4, %v9289_v5  ;;  %v866_v21 = vrot.slane %v864_v9, 5  ;;  %v4903_v43 = vrot.slane %v12653_v36, 5  ;;  %v869_v28 = vshrl.u32 %v13164_v0, 16  ;;  %v872_v31 = vshll.u32 %v13164_v0, 16 }
  0xe6   :  { %10723 = vmatmul.mubr.msk.bf16.gmra.mrb[24].mxu0 %vm990_vm4, %v9661_v10  ;;  %v852_v16 = vrot.slane %v851_v11, 4  ;;  %v4901_v24 = vsel %vm12721_vm8, %v9629_v12, %v4900_v14  ;;  %v4902_v30 = vrot.slane %v4900_v14, 4  ;;  %v862_v32 = vrot.slane %v861_v20, 4  ;;  %v13227_v14 = vld [vmem:[%s17988_s0] sm:$0xf] }
  0xe7   :  { %v871_v33 = vrot.slane %v869_v28, 4  ;;  %v878_v37 = vshll.u32 %v13173_v15, 16  ;;  %v882_v36 = vshrl.u32 %v13173_v15, 16  ;;  %v874_v41 = vrot.slane %v872_v31, 5  ;;  %v13232_v20 = vld [vmem:[%s17988_s0 + $0x4] sm:$0xf] }
  0xe8   :  { %v857_v38 = vsel %vm12240_vm5, %v852_v16, %v856_v63  ;;  %v4904_v40 = vsel %vm12721_vm8, %v4902_v30, %v4903_v43  ;;  %v888_v44 = vshll.u32 %v119_v25, 16  ;;  %v867_v23 = vsel %vm12240_vm5, %v862_v32, %v866_v21  ;;  %v2791_v43 = vld [vmem:[%s17989_s1 + $0x154] sm:$0xf]  ;;  %v2792_v25 = vld [vmem:[%s17989_s1 + $0x158] sm:$0xf] }
  0xe9   :  { %v9662_v1 = vcombine.low %v4901_v24, %v4904_v40  ;;  %v880_v46 = vrot.slane %v878_v37, 5  ;;  %v884_v48 = vrot.slane %v882_v36, 4  ;;  %v9290_v51 = vcombine.low %v857_v38, %v867_v23  ;;  %v2793_v30 = vld [vmem:[%s17989_s1 + $0x15c] sm:$0xf]  ;;  %v2794_v31 = vld [vmem:[%s17989_s1 + $0x168] sm:$0xf] }
  0xea   :  { %v875_v53 = vor.u32 %v874_v41, %v871_v33  ;;  %v9630_v54 = vrot.slane %v12674_v17, 9  ;;  %v890_v58 = vrot.slane %v888_v44, 5  ;;  %v4907_v62 = vrot.slane %v12681_v7, 5  ;;  %v2795_v33 = vld [vmem:[%s17989_s1 + $0x16c] sm:$0xf] }
  0xeb   :  { %10726 = vmatprep.mubr.msk.bf16.mxu0 %vm990_vm4, %v9662_v1  ;;  %v885_v56 = vor.u32 %v884_v48, %v880_v46  ;;  %v4910_v18 = vrot.slane %v12690_v19, 5  ;;  %10428 = vmatprep.mubr.msk.bf16.mxu1 %vm990_vm4, %v9290_v51  ;;  %v13211_v61 = vand.u32 %v9420_v49, %v12196_v4  ;;  %v9631_v63 = vrot.slane %v2788_v50, 9  ;;  %v2796_v38 = vld [vmem:[%s17989_s1 + $0x170] sm:$0xf]  ;;  %v2798_v40 = vld [vmem:[%s17989_s1 + $0x180] sm:$0xf] }
  0xec   :  { %v876_v59 = vrot.slane %v875_v53, 4  ;;  %v4914_v17 = vrot.slane %v2789_v45, 5  ;;  %v4908_v29 = vsel %vm12721_vm8, %v9630_v54, %v4907_v62  ;;  %v4909_v6 = vrot.slane %v4907_v62, 4  ;;  %v2797_v45 = vld [vmem:[%s17989_s1 + $0x17c] sm:$0xf] }
  0xed   :  { %v886_v5 = vrot.slane %v885_v56, 4  ;;  %v4917_v9 = vrot.slane %v2790_v55, 5  ;;  %10498 = vmatprep.subr.bf16.mxu1 %v13211_v61  ;;  %v9324_v21 = vcombine.low %v13227_v14, %v13232_v20  ;;  %v9632_v37 = vrot.slane %v2791_v43, 9  ;;  %v2799_v48 = vld [vmem:[%s17989_s1 + $0x184] sm:$0xf] }
  0xee   :  { %v881_v10 = vsel %vm12240_vm5, %v876_v59, %v880_v46  ;;  %v4915_v7 = vsel %vm12721_vm8, %v9631_v63, %v4914_v17  ;;  %v4916_v19 = vrot.slane %v4914_v17, 4  ;;  %v4911_v12 = vsel %vm12721_vm8, %v4909_v6, %v4910_v18  ;;  %v2801_v49 = vld [vmem:[%s17989_s1 + $0x194] sm:$0xf]  ;;  %v13282_v51 = vld [vmem:[%s17988_s0 + $0x18] sm:$0xf] }
  0xef   :  { %v891_v11 = vsel %vm12240_vm5, %v886_v5, %v890_v58  ;;  %v9663_v16 = vcombine.low %v4908_v29, %v4911_v12  ;;  %v4921_v36 = vrot.slane %v2792_v25, 5  ;;  %v4924_v41 = vrot.slane %v2793_v30, 5  ;;  %v13277_v50 = vld [vmem:[%s17988_s0 + $0x14] sm:$0xf]  ;;  %v2800_v56 = vld [vmem:[%s17989_s1 + $0x190] sm:$0xf] }
  0xf0   :  { %v9291_v28 = vcombine.low %v881_v10, %v891_v11  ;;  %v4918_v24 = vsel %vm12721_vm8, %v4916_v19, %v4917_v9  ;;  %v9633_v44 = vrot.slane %v2794_v31, 9  ;;  %v4928_v46 = vrot.slane %v2795_v33, 5  ;;  %v2802_v58 = vld [vmem:[%s17989_s1 + $0x198] sm:$0xf]  ;;  %v13297_v18 = vld [vmem:[%s17988_s0 + $0x28] sm:$0xf] }
  0xf1   :  { %v9664_v32 = vcombine.low %v4915_v7, %v4918_v24  ;;  %10727 = vmatmul.mubr.msk.bf16.gmra.mrb[28].mxu0 %vm990_vm4, %v9663_v16  ;;  %v4922_v23 = vsel %vm12721_vm8, %v9632_v37, %v4921_v36  ;;  %v4923_v1 = vrot.slane %v4921_v36, 4  ;;  %v9325_v53 = vcombine.low %v13277_v50, %v13282_v51  ;;  %v13302_v59 = vld [vmem:[%s17988_s0 + $0x2c] sm:$0xf]  ;;  %v2807_v25 = vld [vmem:[%s17989_s1 + $0x1bc] sm:$0xf] }
  0xf2   :  { %10429 = vmatmul.mubr.msk.bf16.gmra.mrb[60].mxu1 %vm990_vm4, %v9291_v28  ;;  %v4931_v54 = vrot.slane %v2796_v38, 5  ;;  %v4935_v55 = vrot.slane %v2798_v40, 5  ;;  %v9326_v63 = vcombine.low %v13297_v18, %v13302_v59  ;;  %v4929_v17 = vsel %vm12721_vm8, %v9633_v44, %v4928_v46  ;;  %v2805_v33 = vld [vmem:[%s17989_s1 + $0x1ac] sm:$0xf]  ;;  %v2806_v36 = vld [vmem:[%s17989_s1 + $0x1b8] sm:$0xf] }
  0xf3   :  { %10434 = vmatprep.mubr.msk.bf16.mxu1 %vm990_vm4, %v9324_v21  ;;  %10730 = vmatprep.mubr.msk.bf16.mxu0 %vm990_vm4, %v9664_v32  ;;  %v4925_v62 = vsel %vm12721_vm8, %v4923_v1, %v4924_v41  ;;  %v4930_v5 = vrot.slane %v4928_v46, 4  ;;  %v9634_v6 = vrot.slane %v2797_v45, 9  ;;  %v4938_v10 = vrot.slane %v2799_v48, 5  ;;  %v2804_v21 = vld [vmem:[%s17989_s1 + $0x1a8] sm:$0xf] }
  0xf4   :  { %v9665_v29 = vcombine.low %v4922_v23, %v4925_v62  ;;  %v4937_v9 = vrot.slane %v4935_v55, 4  ;;  %v9635_v19 = vrot.slane %v2800_v56, 9  ;;  %v4942_v11 = vrot.slane %v2801_v49, 5  ;;  %v2808_v38 = vld [vmem:[%s17989_s1 + $0x1c0] sm:$0xf] }
  0xf5   :  { %v4932_v7 = vsel %vm12721_vm8, %v4930_v5, %v4931_v54  ;;  %v4945_v12 = vrot.slane %v2802_v58, 5  ;;  %v4936_v16 = vsel %vm12721_vm8, %v9634_v6, %v4935_v55  ;;  %v4949_v30 = vrot.slane %v2804_v21, 5  ;;  %v13344_v40 = vld [vmem:[%s17988_s0 + $0x3c] sm:$0xf]  ;;  %v13349_v41 = vld [vmem:[%s17988_s0 + $0x40] sm:$0xf] }
  0xf6   :  { %v9666_v43 = vcombine.low %v4929_v17, %v4932_v7  ;;  %v4944_v28 = vrot.slane %v4942_v11, 4  ;;  %v4939_v24 = vsel %vm12721_vm8, %v4937_v9, %v4938_v10  ;;  %v4943_v31 = vsel %vm12721_vm8, %v9635_v19, %v4942_v11  ;;  %v13356_v23 = vld [vmem:[%s17988_s0 + $0x50] sm:$0xf]  ;;  %v13361_v1 = vld [vmem:[%s17988_s0 + $0x54] sm:$0xf] }
  0xf7   :  { %v4956_v37 = vrot.slane %v2807_v25, 5  ;;  %v9327_v44 = vcombine.low %v13344_v40, %v13349_v41  ;;  %v9667_v45 = vcombine.low %v4936_v16, %v4939_v24  ;;  %v9328_v46 = vcombine.low %v13356_v23, %v13361_v1  ;;  %v2810_v62 = vld [vmem:[%s17989_s1 + $0x1d0] sm:$0xf]  ;;  %v2809_v10 = vld [vmem:[%s17989_s1 + $0x1cc] sm:$0xf] }
  0xf8   :  { %v4946_v32 = vsel %vm12721_vm8, %v4944_v28, %v4945_v12  ;;  %v4952_v54 = vrot.slane %v2805_v33, 5  ;;  %v9637_v55 = vrot.slane %v2806_v36, 9  ;;  %v4959_v58 = vrot.slane %v2808_v38, 5  ;;  %v2811_v7 = vld [vmem:[%s17989_s1 + $0x1d4] sm:$0xf] }
  0xf9   :  { %10731 = vmatmul.mubr.msk.bf16.gmra.mrb[32].mxu0 %vm990_vm4, %v9665_v29  ;;  %v9668_v48 = vcombine.low %v4943_v31, %v4946_v32  ;;  %v4958_v56 = vrot.slane %v4956_v37, 4  ;;  %v4963_v29 = vrot.slane %v2810_v62, 5  ;;  %v2812_v11 = vld [vmem:[%s17989_s1 + $0x1e0] sm:$0xf]  ;;  %v2814_v12 = vld [vmem:[%s17989_s1 + $0x1e8] sm:$0xf] }
  0xfa   :  { %10435 = vmatmul.mubr.msk.bf16.vlgmr.msra.gmra.mrb[0].mxu1 %vm990_vm4, %v9325_v53  ;;  %10734 = vmatprep.mubr.msk.bf16.mxu0 %vm990_vm4, %v9666_v43  ;;  %v4951_v53 = vrot.slane %v4949_v30, 4  ;;  %v4957_v6 = vsel %vm12721_vm8, %v9637_v55, %v4956_v37  ;;  %v13398_v21 = vld [vmem:[%s17988_s0 + $0x64] sm:$0xf]  ;;  %v13403_v43 = vld [vmem:[%s17988_s0 + $0x68] sm:$0xf]  ;;  %v9638_v32 = vrot.slane %v2809_v10, 9 }
  0xfb   :  { %10499 = vmatpush3.bf16.msra.mxu1 %v13211_v61  ;;  %10438 = vmatprep.mubr.msk.bf16.mxu1 %vm990_vm4, %v9326_v63  ;;  %v2803_v61 = vld [vmem:[%s17989_s1 + $0x1a4] sm:$0xf]  ;;  %v4960_v9 = vsel %vm12721_vm8, %v4958_v56, %v4959_v58  ;;  %v9329_v25 = vcombine.low %v13398_v21, %v13403_v43  ;;  %v13410_v16 = vld [vmem:[%s17988_s0 + $0x78] sm:$0xf]  ;;  %v13415_v24 = vld [vmem:[%s17988_s0 + $0x7c] sm:$0xf] }
  0xfc   :  { %v9636_v49 = vrot.slane %v2803_v61, 9  ;;  %v2813_v63 = vld [vmem:[%s17989_s1 + $0x1e4] sm:$0xf]  ;;  %v4953_v5 = vsel %vm12721_vm8, %v4951_v53, %v4952_v54  ;;  %v9670_v31 = vcombine.low %v4957_v6, %v4960_v9  ;;  %v4965_v61 = vrot.slane %v4963_v29, 4  ;;  %v2815_v55 = vld [vmem:[%s17989_s1 + $0x1f4] sm:$0xf] }
  0xfd   :  { %v4970_v19 = vrot.slane %v2813_v63, 5  ;;  %v4966_v33 = vrot.slane %v2811_v7, 5  ;;  %v9639_v37 = vrot.slane %v2812_v11, 9  ;;  %v4973_v38 = vrot.slane %v2814_v12, 5  ;;  %v2817_v56 = vld [vmem:[%s17989_s1 + $0x1fc] sm:$0xf] }
  0xfe   :  { %v4950_v17 = vsel %vm12721_vm8, %v9636_v49, %v4949_v30  ;;  %v9330_v30 = vcombine.low %v13410_v16, %v13415_v24  ;;  %v2818_v62 = vld [vmem:[%s17989_s1 + $0x208] sm:$0xf]  ;;  %v2820_v63 = vld [vmem:[%s17989_s1 + $0x210] sm:$0xf]  ;;  %v13464_v9 = vld [vmem:[%s17988_s0 + $0xa0] sm:$0xf] }
  0xff   :  { %v9669_v28 = vcombine.low %v4950_v17, %v4953_v5  ;;  %v4972_v36 = vrot.slane %v4970_v19, 4  ;;  %v4971_v53 = vsel %vm12721_vm8, %v9639_v37, %v4970_v19  ;;  %v13452_v17 = vld [vmem:[%s17988_s0 + $0x8c] sm:$0xf]  ;;  %v13457_v5 = vld [vmem:[%s17988_s0 + $0x90] sm:$0xf]  ;;  %18130 = vst [vmem:[#allocation4_spill] sm:$0xff] %v13464_v9 }
 0x100   :  { %v13469_v10 = vld [vmem:[%s17988_s0 + $0xa4] sm:$0xf]  ;;  %v9777_v19 = vld [vmem:[%s17987_s3 + $0xe] sm:$0x3]  ;;  %v9640_v12 = vrot.slane %v2815_v55, 9  ;;  %vm9190_vm9 = vcmask 191488  }
 0x101   :  { %10735 = vmatmul.mubr.msk.bf16.gmra.mrb[36].mxu0 %vm990_vm4, %v9667_v45  ;;  %v2819_v45 = vld [vmem:[%s17989_s1 + $0x20c] sm:$0xf]  ;;  %v4974_v54 = vsel %vm12721_vm8, %v4972_v36, %v4973_v38  ;;  %v9332_v7 = vcombine.low %v13464_v9, %v13469_v10  ;;  %v13483_v37 = vand.u32 %v9777_v19, %v12196_v4  ;;  %v2826_v55 = vld [vmem:[%s17989_s1 + $0x238] sm:$0xf] }
 0x102   :  { %10439 = vmatmul.mubr.msk.bf16.gmra.mrb[4].mxu1 %vm990_vm4, %v9327_v44  ;;  %10738 = vmatprep.mubr.msk.bf16.mxu0 %vm990_vm4, %v9668_v48  ;;  %v2816_v44 = vld [vmem:[%s17989_s1 + $0x1f8] sm:$0xf]  ;;  %v4967_v48 = vsel %vm12721_vm8, %v4965_v61, %v4966_v33  ;;  %v4984_v58 = vrot.slane %v2819_v45, 5  ;;  %v9672_v11 = vcombine.low %v4971_v53, %v4974_v54  ;;  %v2822_v61 = vld [vmem:[%s17989_s1 + $0x220] sm:$0xf] }
 0x103   :  { %10442 = vmatprep.mubr.msk.bf16.mxu1 %vm990_vm4, %v9328_v46  ;;  %v4964_v46 = vsel %vm12721_vm8, %v9638_v32, %v4963_v29  ;;  %v4977_v49 = vrot.slane %v2816_v44, 5  ;;  %v9331_v29 = vcombine.low %v13452_v17, %v13457_v5  ;;  %v4987_v32 = vrot.slane %v2820_v63, 5  ;;  %v2825_v33 = vld [vmem:[%s17989_s1 + $0x234] sm:$0xf]  ;;  %v2823_v53 = vld [vmem:[%s17989_s1 + $0x224] sm:$0xf]  ;;  %10828 = vmatprep.subr.bf16.mxu0 %v13483_v37 }
 0x104   :  { %v9671_v6 = vcombine.low %v4964_v46, %v4967_v48  ;;  %v4991_v44 = vrot.slane %v2822_v61, 5  ;;  %v2821_v48 = vld [vmem:[%s17989_s1 + $0x21c] sm:$0xf]  ;;  %v4998_v54 = vrot.slane %v2825_v33, 5 }
 0x105   :  { %v4978_v36 = vsel %vm12721_vm8, %v9640_v12, %v4977_v49  ;;  %v2831_v61 = vld [vmem:[%s17989_s1 + $0x25c] sm:$0xf] }
 0x106   :  { %v4993_v12 = vrot.slane %v4991_v44, 4 }
 0x109   :  { %10739 = vmatmul.mubr.msk.bf16.gmra.mrb[40].mxu0 %vm990_vm4, %v9669_v28  ;;  %v4980_v28 = vrot.slane %v2817_v56, 5  ;;  %v13513_v56 = vld [vmem:[%s17988_s0 + $0xb4] sm:$0xf] }
 0x10a   :  { %10443 = vmatmul.mubr.msk.bf16.gmra.mrb[8].mxu1 %vm990_vm4, %v9329_v25  ;;  %10742 = vmatprep.mubr.msk.bf16.mxu0 %vm990_vm4, %v9670_v31  ;;  %v4979_v25 = vrot.slane %v4977_v49, 4  ;;  %v4986_v31 = vrot.slane %v4984_v58, 4  ;;  %v2824_v49 = vld [vmem:[%s17989_s1 + $0x230] sm:$0xf]  ;;  %18131 = vst [vmem:[#allocation5_spill] sm:$0xff] %v13513_v56 }
 0x10b   :  { %10446 = vmatprep.mubr.msk.bf16.mxu1 %vm990_vm4, %v9330_v30  ;;  %v9641_v30 = vrot.slane %v2818_v62, 9 }
 0x10c   :  { %v4981_v38 = vsel %vm12721_vm8, %v4979_v25, %v4980_v28  ;;  %v4988_v46 = vsel %vm12721_vm8, %v4986_v31, %v4987_v32  ;;  %v4994_v25 = vrot.slane %v2823_v53, 5  ;;  %v9643_v28 = vrot.slane %v2824_v49, 9  ;;  %v2828_v32 = vld [vmem:[%s17989_s1 + $0x248] sm:$0xf]  ;;  %v2829_v53 = vld [vmem:[%s17989_s1 + $0x24c] sm:$0xf] }
 0x10d   :  { %v4985_v45 = vsel %vm12721_vm8, %v9641_v30, %v4984_v58  ;;  %v13518_v58 = vld [vmem:[%s17988_s0 + $0xb8] sm:$0xf]  ;;  %v9673_v63 = vcombine.low %v4978_v36, %v4981_v38  ;;  %v5000_v30 = vrot.slane %v4998_v54, 4  ;;  %v5001_v31 = vrot.slane %v2826_v55, 5  ;;  %v13567_v55 = vld [vmem:[%s17988_s0 + $0xdc] sm:$0xf] }
 0x10e   :  { %18132 = vst [vmem:[#allocation6_spill] sm:$0xff] %v13518_v58  ;;  %v9333_v62 = vcombine.low %v13513_v56, %v13518_v58  ;;  %v9674_v19 = vcombine.low %v4985_v45, %v4988_v46  ;;  %v4995_v36 = vsel %vm12721_vm8, %v4993_v12, %v4994_v25  ;;  %v5005_v38 = vrot.slane %v2828_v32, 5  ;;  %18135 = vst [vmem:[#allocation9_spill] sm:$0xff] %v13567_v55  ;;  %v13887_v56 = vld [vmem:[%s17988_s0 + $0x1e4] sm:$0xf] }
 0x10f   :  { %v4999_v45 = vsel %vm12721_vm8, %v9643_v28, %v4998_v54  ;;  %v5002_v46 = vsel %vm12721_vm8, %v5000_v30, %v5001_v31  ;;  %v5012_v49 = vrot.slane %v2831_v61, 5  ;;  %v2832_v54 = vld [vmem:[%s17989_s1 + $0x260] sm:$0xf]  ;;  %v5008_v31 = vrot.slane %v2829_v53, 5  ;;  %18172 = vst [vmem:[#allocation46_spill] sm:$0xff] %v13887_v56 }
 0x110   :  { %v9676_v25 = vcombine.low %v4999_v45, %v5002_v46  ;;  %v5007_v30 = vrot.slane %v5005_v38, 4  ;;  %v13952_v58 = vld [vmem:[%s17990_s2 + $0xdc] sm:$0xf] }
 0x111   :  { %10743 = vmatmul.mubr.msk.bf16.gmra.mrb[44].mxu0 %vm990_vm4, %v9671_v6  ;;  %v13530_v6 = vld [vmem:[%s17988_s0 + $0xcc] sm:$0xf]  ;;  %v5014_v61 = vrot.slane %v5012_v49, 4  ;;  %18178 = vst [vmem:[#allocation52_spill] sm:$0xff] %v13952_v58 }
 0x112   :  { %10447 = vmatmul.mubr.msk.bf16.gmra.mrb[12].mxu1 %vm990_vm4, %v9331_v29  ;;  %10746 = vmatprep.mubr.msk.bf16.mxu0 %vm990_vm4, %v9672_v11  ;;  %v13525_v29 = vld [vmem:[%s17988_s0 + $0xc8] sm:$0xf]  ;;  %18134 = vst [vmem:[#allocation8_spill] sm:$0xff] %v13530_v6  ;;  %v9642_v11 = vrot.slane %v2821_v48, 9  ;;  %v2827_v48 = vld [vmem:[%s17989_s1 + $0x244] sm:$0xf]  ;;  %v5009_v46 = vsel %vm12721_vm8, %v5007_v30, %v5008_v31 }
 0x113   :  { %10450 = vmatprep.mubr.msk.bf16.mxu1 %vm990_vm4, %v9332_v7  ;;  %18133 = vst [vmem:[#allocation7_spill] sm:$0xff] %v13525_v29  ;;  %v9334_v7 = vcombine.low %v13525_v29, %v13530_v6  ;;  %v9644_v28 = vrot.slane %v2827_v48, 9  ;;  %v13882_v29 = vld [vmem:[%s17988_s0 + $0x1e0] sm:$0xf]  ;;  %v13935_v6 = vld [vmem:[%s17988_s0 + $0x8] sm:$0xf] }
 0x114   :  { %v4992_v33 = vsel %vm12721_vm8, %v9642_v11, %v4991_v44  ;;  %v2830_v44 = vld [vmem:[%s17989_s1 + $0x258] sm:$0xf]  ;;  %v13584_v11 = vld [vmem:[%s17988_s0 + $0xf4] sm:$0xf]  ;;  %18171 = vst [vmem:[#allocation45_spill] sm:$0xff] %v13882_v29 }
 0x115   :  { %18138 = vst [vmem:[#allocation12_spill] sm:$0xff] %v13584_v11  ;;  %v9645_v32 = vrot.slane %v2830_v44, 9  ;;  %v5006_v45 = vsel %vm12721_vm8, %v9644_v28, %v5005_v38  ;;  %v13613_v38 = vand.u32 %v9485_v34, %v12196_v4  ;;  %v13630_v28 = vld [vmem:[%s17988_s0 + $0x118] sm:$0xf]  ;;  %v13635_v34 = vld [vmem:[%s17988_s0 + $0x11c] sm:$0xf] }
 0x116   :  { %18141 = vst [vmem:[#allocation15_spill] sm:$0xff] %v13630_v28  ;;  %18142 = vst [vmem:[#allocation16_spill] sm:$0xff] %v13635_v34  ;;  %v9338_v30 = vcombine.low %v13630_v28, %v13635_v34  ;;  %v13783_v28 = vld [vmem:[%s17988_s0 + $0x194] sm:$0xf] }
 0x117   :  { %v5013_v53 = vsel %vm12721_vm8, %v9645_v32, %v5012_v49  ;;  %v13623_v49 = vld [vmem:[%s17988_s0 + $0x108] sm:$0xf]  ;;  %10564 = vmatprep.subr.bf16.mxu1 %v13613_v38  ;;  %18157 = vst [vmem:[#allocation31_spill] sm:$0xff] %v13783_v28 }
 0x118   :  { %18140 = vst [vmem:[#allocation14_spill] sm:$0xff] %v13623_v49 }
 0x119   :  { %10747 = vmatmul.mubr.msk.bf16.gmra.mrb[48].mxu0 %vm990_vm4, %v9673_v63 }
 0x11a   :  { %10451 = vmatmul.mubr.msk.bf16.gmra.mrb[16].mxu1 %vm990_vm4, %v9333_v62  ;;  %10750 = vmatprep.mubr.msk.bf16.mxu0 %vm990_vm4, %v9674_v19  ;;  %v13572_v62 = vld [vmem:[%s17988_s0 + $0xe0] sm:$0xf]  ;;  %v13579_v19 = vld [vmem:[%s17988_s0 + $0xf0] sm:$0xf] }
 0x11b   :  { %10454 = vmatprep.mubr.msk.bf16.mxu1 %vm990_vm4, %v9334_v7  ;;  %18136 = vst [vmem:[#allocation10_spill] sm:$0xff] %v13572_v62  ;;  %v9335_v63 = vcombine.low %v13567_v55, %v13572_v62  ;;  %v9675_v7 = vcombine.low %v4992_v33, %v4995_v36  ;;  %18137 = vst [vmem:[#allocation11_spill] sm:$0xff] %v13579_v19  ;;  %v9336_v12 = vcombine.low %v13579_v19, %v13584_v11  ;;  %v2834_v36 = vld [vmem:[%s17989_s1 + $0x270] sm:$0xf] }
 0x11c   :  { %v5015_v33 = vrot.slane %v2832_v54, 5  ;;  %v5019_v48 = vrot.slane %v2834_v36, 5  ;;  %v2833_v54 = vld [vmem:[%s17989_s1 + $0x26c] sm:$0xf]  ;;  %v9348_v11 = vcombine.low %v13882_v29, %v13887_v56  ;;  %v13908_v29 = vld [vmem:[%s17990_s2 + $0xb8] sm:$0xf] }
 0x11d   :  { %v9646_v32 = vrot.slane %v2833_v54, 9  ;;  %18174 = vst [vmem:[#allocation48_spill] sm:$0xff] %v13908_v29 }
 0x11e   :  { %v5016_v44 = vsel %vm12721_vm8, %v5014_v61, %v5015_v33  ;;  %v5021_v61 = vrot.slane %v5019_v48, 4 }
 0x11f   :  { %v9678_v31 = vcombine.low %v5013_v53, %v5016_v44  ;;  %v5020_v36 = vsel %vm12721_vm8, %v9646_v32, %v5019_v48  ;;  %v13656_v53 = vld [vmem:[%s17990_s2 + $0x4] sm:$0xf]  ;;  %v13661_v44 = vld [vmem:[%s17988_s0 + $0x12c] sm:$0xf]  ;;  %v13666_v48 = vld [vmem:[%s17988_s0 + $0x130] sm:$0xf] }
 0x120   :  { %18144 = vst [vmem:[#allocation18_spill] sm:$0xff] %v13661_v44  ;;  %18145 = vst [vmem:[#allocation19_spill] sm:$0xff] %v13666_v48  ;;  %v9339_v54 = vcombine.low %v13661_v44, %v13666_v48  ;;  %v13691_v32 = vld [vmem:[%s17990_s2 + $0x14] sm:$0xf] }
 0x121   :  { %10751 = vmatmul.mubr.msk.bf16.gmra.mrb[52].mxu0 %vm990_vm4, %v9675_v7  ;;  %v13618_v7 = vld [vmem:[%s17988_s0 + $0x104] sm:$0xf]  ;;  %18148 = vst [vmem:[#allocation22_spill] sm:$0xff] %v13691_v32 }
 0x122   :  { %10455 = vmatmul.mubr.msk.bf16.gmra.mrb[20].mxu1 %vm990_vm4, %v9335_v63  ;;  %10754 = vmatprep.mubr.msk.bf16.mxu0 %vm990_vm4, %v9676_v25  ;;  %v2835_v63 = vld [vmem:[%s17989_s1 + $0x274] sm:$0xf]  ;;  %18139 = vst [vmem:[#allocation13_spill] sm:$0xff] %v13618_v7  ;;  %v9677_v25 = vcombine.low %v5006_v45, %v5009_v46  ;;  %v13651_v46 = vld [vmem:[%s17990_s2] sm:$0xf] }
 0x123   :  { %10458 = vmatprep.mubr.msk.bf16.mxu1 %vm990_vm4, %v9336_v12  ;;  %v9337_v12 = vcombine.low %v13618_v7, %v13623_v49  ;;  %v5022_v33 = vrot.slane %v2835_v63, 5  ;;  %18143 = vst [vmem:[#allocation17_spill] sm:$0xff] %v13651_v46  ;;  %v13830_v7 = vld [vmem:[%s17988_s0 + $0x1b8] sm:$0xf]  ;;  %v13835_v49 = vld [vmem:[%s17988_s0 + $0x1bc] sm:$0xf] }
 0x124   :  { %18163 = vst [vmem:[#allocation37_spill] sm:$0xff] %v13830_v7  ;;  %18164 = vst [vmem:[#allocation38_spill] sm:$0xff] %v13835_v49  ;;  %v9346_v19 = vcombine.low %v13830_v7, %v13835_v49  ;;  %v13853_v7 = vld [vmem:[%s17990_s2 + $0x90] sm:$0xf] }
 0x125   :  { %v5023_v45 = vsel %vm12721_vm8, %v5021_v61, %v5022_v33  ;;  %v13696_v61 = vld [vmem:[%s17990_s2 + $0x18] sm:$0xf]  ;;  %v13701_v33 = vld [vmem:[%s17990_s2 + $0x28] sm:$0xf]  ;;  %18166 = vst [vmem:[#allocation40_spill] sm:$0xff] %v13853_v7 }
 0x126   :  { %v9679_v63 = vcombine.low %v5020_v36, %v5023_v45  ;;  %18149 = vst [vmem:[#allocation23_spill] sm:$0xff] %v13701_v33  ;;  %v13706_v36 = vld [vmem:[%s17990_s2 + $0x2c] sm:$0xf]  ;;  %v13711_v45 = vld [vmem:[%s17988_s0 + $0x154] sm:$0xf] }
 0x127   :  { %18150 = vst [vmem:[#allocation24_spill] sm:$0xff] %v13711_v45  ;;  %v9715_v44 = vcombine.low %v13701_v33, %v13706_v36  ;;  %v14053_v33 = vld [vmem:[%s17990_s2 + $0x130] sm:$0xf] }
 0x128   :  { %18187 = vst [vmem:[#allocation61_spill] sm:$0xff] %v14053_v33 }
 0x129   :  { %10755 = vmatmul.mubr.msk.bf16.gmra.mrb[56].mxu0 %vm990_vm4, %v9677_v25  ;;  %v13678_v25 = vld [vmem:[%s17988_s0 + $0x144] sm:$0xf] }
 0x12a   :  { %10459 = vmatmul.mubr.msk.bf16.gmra.mrb[24].mxu1 %vm990_vm4, %v9337_v12  ;;  %10758 = vmatprep.mubr.msk.bf16.mxu0 %vm990_vm4, %v9678_v31  ;;  %v13673_v12 = vld [vmem:[%s17988_s0 + $0x140] sm:$0xf]  ;;  %18147 = vst [vmem:[#allocation21_spill] sm:$0xff] %v13678_v25  ;;  %v9713_v31 = vcombine.low %v13651_v46, %v13656_v53 }
 0x12b   :  { %10462 = vmatprep.mubr.msk.bf16.mxu1 %vm990_vm4, %v9338_v30  ;;  %18146 = vst [vmem:[#allocation20_spill] sm:$0xff] %v13673_v12  ;;  %v9340_v30 = vcombine.low %v13673_v12, %v13678_v25  ;;  %v13730_v12 = vld [vmem:[%s17988_s0 + $0x16c] sm:$0xf] }
 0x12c   :  { %18153 = vst [vmem:[#allocation27_spill] sm:$0xff] %v13730_v12 }
 0x131   :  { %10759 = vmatmul.mubr.msk.bf16.gmra.mrb[60].mxu0 %vm990_vm4, %v9679_v63 }
 0x132   :  { %10463 = vmatmul.mubr.msk.bf16.gmra.mrb[28].mxu1 %vm990_vm4, %v9339_v54  ;;  %10764 = vmatprep.mubr.msk.bf16.mxu0 %vm990_vm4, %v9713_v31  ;;  %v13716_v54 = vld [vmem:[%s17988_s0 + $0x158] sm:$0xf]  ;;  %v13725_v31 = vld [vmem:[%s17988_s0 + $0x168] sm:$0xf] }
 0x133   :  { %10466 = vmatprep.mubr.msk.bf16.mxu1 %vm990_vm4, %v9340_v30  ;;  %18151 = vst [vmem:[#allocation25_spill] sm:$0xff] %v13716_v54  ;;  %v9341_v63 = vcombine.low %v13711_v45, %v13716_v54  ;;  %v9714_v30 = vcombine.low %v13691_v32, %v13696_v61  ;;  %18152 = vst [vmem:[#allocation26_spill] sm:$0xff] %v13725_v31  ;;  %v9342_v25 = vcombine.low %v13725_v31, %v13730_v12  ;;  %v13743_v45 = vld [vmem:[%s17990_s2 + $0x3c] sm:$0xf]  ;;  %v13748_v31 = vld [vmem:[%s17990_s2 + $0x40] sm:$0xf] }
 0x134   :  { %v9716_v12 = vcombine.low %v13743_v45, %v13748_v31  ;;  %v13778_v54 = vld [vmem:[%s17988_s0 + $0x190] sm:$0xf] }
 0x135   :  { %18156 = vst [vmem:[#allocation30_spill] sm:$0xff] %v13778_v54  ;;  %v9344_v48 = vcombine.low %v13778_v54, %v13783_v28  ;;  %v13801_v54 = vld [vmem:[%s17990_s2 + $0x68] sm:$0xf] }
 0x139   :  { %10765 = vmatmul.mubr.msk.bf16.vlgmr.msra.gmra.mrb[0].mxu0 %vm990_vm4, %v9714_v30  ;;  %v13769_v30 = vld [vmem:[%s17988_s0 + $0x180] sm:$0xf] }
 0x13a   :  { %10467 = vmatmul.mubr.msk.bf16.gmra.mrb[32].mxu1 %vm990_vm4, %v9341_v63  ;;  %10829 = vmatpush3.bf16.msra.mxu0 %v13483_v37  ;;  %v13754_v63 = vld [vmem:[%s17990_s2 + $0x50] sm:$0xf]  ;;  %v13759_v37 = vld [vmem:[%s17990_s2 + $0x54] sm:$0xf]  ;;  %18155 = vst [vmem:[#allocation29_spill] sm:$0xff] %v13769_v30 }
 0x13b   :  { %10470 = vmatprep.mubr.msk.bf16.mxu1 %vm990_vm4, %v9342_v25  ;;  %10768 = vmatprep.mubr.msk.bf16.mxu0 %vm990_vm4, %v9715_v44  ;;  %v13764_v25 = vld [vmem:[%s17988_s0 + $0x17c] sm:$0xf]  ;;  %v9717_v34 = vcombine.low %v13754_v63, %v13759_v37 }
 0x13c   :  { %18154 = vst [vmem:[#allocation28_spill] sm:$0xff] %v13764_v25  ;;  %v9343_v44 = vcombine.low %v13764_v25, %v13769_v30  ;;  %v13796_v30 = vld [vmem:[%s17990_s2 + $0x64] sm:$0xf] }
 0x13d   :  { %18158 = vst [vmem:[#allocation32_spill] sm:$0xff] %v13796_v30  ;;  %v9718_v25 = vcombine.low %v13796_v30, %v13801_v54  ;;  %v14017_v30 = vld [vmem:[%s17990_s2 + $0x108] sm:$0xf] }
 0x13e   :  { %18183 = vst [vmem:[#allocation57_spill] sm:$0xff] %v14017_v30 }
 0x141   :  { %10769 = vmatmul.mubr.msk.bf16.gmra.mrb[4].mxu0 %vm990_vm4, %v9716_v12  ;;  %v13821_v12 = vld [vmem:[%s17988_s0 + $0x1a8] sm:$0xf] }
 0x142   :  { %10471 = vmatmul.mubr.msk.bf16.gmra.mrb[36].mxu1 %vm990_vm4, %v9343_v44  ;;  %10772 = vmatprep.mubr.msk.bf16.mxu0 %vm990_vm4, %v9717_v34  ;;  %v13806_v44 = vld [vmem:[%s17990_s2 + $0x78] sm:$0xf]  ;;  %v13816_v34 = vld [vmem:[%s17988_s0 + $0x1a4] sm:$0xf]  ;;  %18162 = vst [vmem:[#allocation36_spill] sm:$0xff] %v13821_v12 }
 0x143   :  { %10474 = vmatprep.mubr.msk.bf16.mxu1 %vm990_vm4, %v9344_v48  ;;  %18159 = vst [vmem:[#allocation33_spill] sm:$0xff] %v13806_v44  ;;  %v13811_v48 = vld [vmem:[%s17990_s2 + $0x7c] sm:$0xf]  ;;  %18161 = vst [vmem:[#allocation35_spill] sm:$0xff] %v13816_v34  ;;  %v9345_v28 = vcombine.low %v13816_v34, %v13821_v12  ;;  %v13848_v34 = vld [vmem:[%s17990_s2 + $0x8c] sm:$0xf] }
 0x144   :  { %18160 = vst [vmem:[#allocation34_spill] sm:$0xff] %v13811_v48  ;;  %v9719_v55 = vcombine.low %v13806_v44, %v13811_v48  ;;  %18165 = vst [vmem:[#allocation39_spill] sm:$0xff] %v13848_v34  ;;  %v9720_v12 = vcombine.low %v13848_v34, %v13853_v7  ;;  %v18245_v48 = vld [vmem:[#allocation25_spill] sm:$0xff] }
 0x149   :  { %10773 = vmatmul.mubr.msk.bf16.gmra.mrb[8].mxu0 %vm990_vm4, %v9718_v25  ;;  %v13873_v25 = vld [vmem:[%s17988_s0 + $0x1d0] sm:$0xf] }
 0x14a   :  { %10475 = vmatmul.mubr.msk.bf16.gmra.mrb[40].mxu1 %vm990_vm4, %v9345_v28  ;;  %10776 = vmatprep.mubr.msk.bf16.mxu0 %vm990_vm4, %v9719_v55  ;;  %v13858_v28 = vld [vmem:[%s17990_s2 + $0xa0] sm:$0xf]  ;;  %v13868_v55 = vld [vmem:[%s17988_s0 + $0x1cc] sm:$0xf]  ;;  %18170 = vst [vmem:[#allocation44_spill] sm:$0xff] %v13873_v25 }
 0x14b   :  { %10478 = vmatprep.mubr.msk.bf16.mxu1 %vm990_vm4, %v9346_v19  ;;  %18167 = vst [vmem:[#allocation41_spill] sm:$0xff] %v13858_v28  ;;  %v13863_v19 = vld [vmem:[%s17990_s2 + $0xa4] sm:$0xf]  ;;  %18169 = vst [vmem:[#allocation43_spill] sm:$0xff] %v13868_v55  ;;  %v9347_v49 = vcombine.low %v13868_v55, %v13873_v25  ;;  %v9874_v55 = vld [vmem:[%s17987_s3 + $0x10] sm:$0x3] }
 0x14c   :  { %18168 = vst [vmem:[#allocation42_spill] sm:$0xff] %v13863_v19  ;;  %v9721_v62 = vcombine.low %v13858_v28, %v13863_v19  ;;  %v13903_v25 = vld [vmem:[%s17990_s2 + $0xb4] sm:$0xf]  ;;  %v13911_v56 = vand.u32 %v9874_v55, %v12196_v4  ;;  %v9350_v4 = vcombine.low %v12984_v57, %v12991_v60  ;;  %v9351_v57 = vcombine.low %v13018_v35, %v13030_v42  ;;  %v18237_v28 = vld [vmem:[#allocation22_spill] sm:$0xff] }
 0x14d   :  { %18173 = vst [vmem:[#allocation47_spill] sm:$0xff] %v13903_v25  ;;  %v9388_v42 = vrot.slane %v13227_v14, 9  ;;  %v9389_v60 = vrot.slane %v13277_v50, 9  ;;  %v9355_v14 = vcombine.low %v13164_v0, %v13173_v15  ;;  %v14088_v50 = vld [vmem:[%s17990_s2 + $0x154] sm:$0xf]  ;;  %v18238_v19 = vshrl.u32 %v18237_v28, 16 }
 0x14e   :  { %18175 = vst [vmem:[#allocation49_spill] sm:$0xff] %v13911_v56  ;;  %10894 = vmatprep.subr.bf16.mxu0 %v13911_v56  ;;  %v13957_v56 = vld [vmem:[%s17990_s2 + $0xe0] sm:$0xf]  ;;  %18191 = vst [vmem:[#allocation64_spill] sm:$0xff] %v14088_v50  ;;  %v18239_v7 = vshll.u32 %v18237_v28, 16 }
 0x14f   :  { %18179 = vst [vmem:[#allocation53_spill] sm:$0xff] %v13957_v56  ;;  %v6311_v34 = vrot.slane %v18238_v19, 4  ;;  %v11932_v28 = vld [vmem:[%s17988_s0 + $0x148] sm:$0xf] }
 0x150   :  { %v6314_v44 = vrot.slane %v18239_v7, 5  ;;  %v2083_v7 = vrot.slane %v11932_v28, 5  ;;  %v5576_v19 = vld [vmem:[%s17990_s2 + $0x8] sm:$0xf] }
 0x151   :  { %10777 = vmatmul.mubr.msk.bf16.gmra.mrb[12].mxu0 %vm990_vm4, %v9720_v12  ;;  %v9722_v12 = vcombine.low %v13903_v25, %v13908_v29  ;;  %v18236_v25 = vshrl.u32 %v13656_v53, 16 }
 0x152   :  { %10479 = vmatmul.mubr.msk.bf16.gmra.mrb[44].mxu1 %vm990_vm4, %v9347_v49  ;;  %10780 = vmatprep.mubr.msk.bf16.mxu0 %vm990_vm4, %v9721_v62  ;;  %v13916_v49 = vld [vmem:[%s17990_s2 + $0xc8] sm:$0xf]  ;;  %v13921_v62 = vld [vmem:[%s17990_s2 + $0xcc] sm:$0xf] }
 0x153   :  { %10482 = vmatprep.mubr.msk.bf16.mxu1 %vm990_vm4, %v9348_v11  ;;  %18176 = vst [vmem:[#allocation50_spill] sm:$0xff] %v13916_v49  ;;  %18177 = vst [vmem:[#allocation51_spill] sm:$0xff] %v13921_v62  ;;  %v9349_v11 = vcombine.low %v12948_v26, %v12961_v39  ;;  %v9723_v55 = vcombine.low %v13916_v49, %v13921_v62  ;;  %v13942_v26 = vld [vmem:[%s17988_s0 + $0x1c] sm:$0xf]  ;;  %v9724_v39 = vcombine.low %v13952_v58, %v13957_v56  ;;  %v14100_v56 = vld [vmem:[%s17990_s2 + $0x158] sm:$0xf] }
 0x154   :  { %18192 = vst [vmem:[#allocation65_spill] sm:$0xff] %v14100_v56  ;;  %v6300_v29 = vrot.slane %v18236_v25, 4 }
 0x159   :  { %10781 = vmatmul.mubr.msk.bf16.gmra.mrb[16].mxu0 %vm990_vm4, %v9722_v12  ;;  %v13968_v12 = vld [vmem:[%s17990_s2 + $0xf0] sm:$0xf] }
 0x15a   :  { %10483 = vmatmul.mubr.msk.bf16.gmra.mrb[48].mxu1 %vm990_vm4, %v9349_v11  ;;  %10784 = vmatprep.mubr.msk.bf16.mxu0 %vm990_vm4, %v9723_v55  ;;  %18180 = vst [vmem:[#allocation54_spill] sm:$0xff] %v13968_v12  ;;  %v13977_v11 = vld [vmem:[%s17990_s2 + $0xf4] sm:$0xf]  ;;  %v9352_v55 = vcombine.low %v13056_v2, %v13069_v22  ;;  %v14006_v2 = vld [vmem:[%s17990_s2 + $0x104] sm:$0xf] }
 0x15b   :  { %10486 = vmatprep.mubr.msk.bf16.mxu1 %vm990_vm4, %v9350_v4  ;;  %18181 = vst [vmem:[#allocation55_spill] sm:$0xff] %v13977_v11  ;;  %v9725_v32 = vcombine.low %v13968_v12, %v13977_v11  ;;  %18182 = vst [vmem:[#allocation56_spill] sm:$0xff] %v14006_v2  ;;  %v9726_v35 = vcombine.low %v14006_v2, %v14017_v30  ;;  %v14048_v4 = vld [vmem:[%s17990_s2 + $0x12c] sm:$0xf]  ;;  %v14071_v22 = vld [vmem:[%s17990_s2 + $0x144] sm:$0xf] }
 0x15c   :  { %18186 = vst [vmem:[#allocation60_spill] sm:$0xff] %v14048_v4  ;;  %18189 = vst [vmem:[#allocation63_spill] sm:$0xff] %v14071_v22  ;;  %v1982_v2 = vrot.slane %v13302_v59, 5  ;;  %v9728_v12 = vcombine.low %v14048_v4, %v14053_v33  ;;  %v18194_v59 = vrot.slane %v13282_v51, 5  ;;  %v9390_v11 = vrot.slane %v13297_v18, 9 }
 0x15d   :  { %v14134_v18 = vld [vmem:[%s17990_s2 + $0x16c] sm:$0xf]  ;;  %v14451_v4 = vld [vmem:[%s17990_s2 + $0x230] sm:$0xf] }
 0x15e   :  { %v14114_v15 = vsel %vm12721_vm8, %v9389_v60, %v18194_v59  ;;  %18197 = vst [vmem:[#allocation67_spill] sm:$0xff] %v14134_v18  ;;  %v1996_v59 = vrot.slane %v13361_v1, 5  ;;  %v14157_v1 = vld [vmem:[%s17990_s2 + $0x17c] sm:$0xf] }
 0x15f   :  { %18198 = vst [vmem:[#allocation68_spill] sm:$0xff] %v14157_v1 }
 0x161   :  { %10785 = vmatmul.mubr.msk.bf16.gmra.mrb[20].mxu0 %vm990_vm4, %v9724_v39  ;;  %v1968_v39 = vrot.slane %v13232_v20, 5  ;;  %v9353_v20 = vcombine.low %v13092_v47, %v13099_v52  ;;  %v9354_v47 = vcombine.low %v13126_v27, %v13138_v13  ;;  %v14063_v52 = vld [vmem:[%s17990_s2 + $0x140] sm:$0xf] }
 0x162   :  { %10487 = vmatmul.mubr.msk.bf16.gmra.mrb[52].mxu1 %vm990_vm4, %v9351_v57  ;;  %10788 = vmatprep.mubr.msk.bf16.mxu0 %vm990_vm4, %v9725_v32  ;;  %v14027_v57 = vld [vmem:[%s17990_s2 + $0x118] sm:$0xf]  ;;  %18188 = vst [vmem:[#allocation62_spill] sm:$0xff] %v14063_v52  ;;  %v18190_v32 = vrot.slane %v13282_v51, 5  ;;  %v9729_v0 = vcombine.low %v14063_v52, %v14071_v22  ;;  %v11918_v51 = vld [vmem:[%s17988_s0 + $0x30] sm:$0xf] }
 0x163   :  { %10490 = vmatprep.mubr.msk.bf16.mxu1 %vm990_vm4, %v9352_v55  ;;  %18184 = vst [vmem:[#allocation58_spill] sm:$0xff] %v14027_v57  ;;  %v14037_v55 = vld [vmem:[%s17990_s2 + $0x11c] sm:$0xf]  ;;  %v1970_v46 = vrot.slane %v1968_v39, 4  ;;  %v1985_v60 = vrot.slane %v11918_v51, 5  ;;  %v1998_v51 = vrot.slane %v1996_v59, 4 }
 0x164   :  { %18185 = vst [vmem:[#allocation59_spill] sm:$0xff] %v14037_v55  ;;  %v9727_v9 = vcombine.low %v14027_v57, %v14037_v55  ;;  %v1977_v30 = vrot.slane %v18190_v32, 4 }
 0x169   :  { %10789 = vmatmul.mubr.msk.bf16.gmra.mrb[24].mxu0 %vm990_vm4, %v9726_v35  ;;  %v1969_v35 = vsel %vm12721_vm8, %v9388_v42, %v1968_v39  ;;  %v18196_v42 = vrot.slane %v13942_v26, 5  ;;  %v1989_v39 = vrot.slane %v13349_v41, 5  ;;  %v14149_v41 = vsel %vm12721_vm8, %v9390_v11, %v1982_v2 }
 0x16a   :  { %10491 = vmatmul.mubr.msk.bf16.gmra.mrb[56].mxu1 %vm990_vm4, %v9353_v20  ;;  %10792 = vmatprep.mubr.msk.bf16.mxu0 %vm990_vm4, %v9727_v9  ;;  %v18193_v20 = vrot.slane %v13935_v6, 5  ;;  %v14120_v9 = vld [vmem:[%s17990_s2 + $0x168] sm:$0xf] }
 0x16b   :  { %10494 = vmatprep.mubr.msk.bf16.mxu1 %vm990_vm4, %v9354_v47  ;;  %18195 = vst [vmem:[#allocation66_spill] sm:$0xff] %v14120_v9  ;;  %v14126_v6 = vsel %vm12721_vm8, %v1977_v30, %v18196_v42  ;;  %v9730_v30 = vcombine.low %v14088_v50, %v14100_v56  ;;  %v9391_v47 = vrot.slane %v13344_v40, 9  ;;  %v1991_v11 = vrot.slane %v1989_v39, 4  ;;  %v14184_v42 = vld [vmem:[%s17990_s2 + $0x194] sm:$0xf] }
 0x16c   :  { %v1972_v32 = vsel %vm12721_vm8, %v1970_v46, %v18193_v20  ;;  %v1984_v46 = vrot.slane %v1982_v2, 4  ;;  %v9422_v27 = vcombine.low %v14114_v15, %v14126_v6  ;;  %v11919_v2 = vld [vmem:[%s17988_s0 + $0x44] sm:$0xf]  ;;  %v14175_v6 = vld [vmem:[%s17990_s2 + $0x190] sm:$0xf]  ;;  %18201 = vst [vmem:[#allocation71_spill] sm:$0xff] %v14184_v42 }
 0x16d   :  { %v9421_v20 = vcombine.low %v1969_v35, %v1972_v32  ;;  %v14162_v32 = vld [vmem:[%s17990_s2 + $0x180] sm:$0xf]  ;;  %v1992_v40 = vrot.slane %v11919_v2, 5  ;;  %v9392_v35 = vrot.slane %v13356_v23, 9  ;;  %18200 = vst [vmem:[#allocation70_spill] sm:$0xff] %v14175_v6  ;;  %v2003_v23 = vrot.slane %v13403_v43, 5 }
 0x16e   :  { %18199 = vst [vmem:[#allocation69_spill] sm:$0xff] %v14162_v32  ;;  %v14166_v15 = vsel %vm12721_vm8, %v1984_v46, %v1985_v60  ;;  %v11920_v46 = vld [vmem:[%s17988_s0 + $0x58] sm:$0xf]  ;;  %v18217_v50 = vcombine.low %v14157_v1, %v14162_v32 }
 0x16f   :  { %v1999_v60 = vrot.slane %v11920_v46, 5  ;;  %v2010_v46 = vrot.slane %v13415_v24, 5  ;;  %v9423_v43 = vcombine.low %v14149_v41, %v14166_v15  ;;  %v14206_v2 = vsel %vm12721_vm8, %v1991_v11, %v1992_v40  ;;  %v14231_v40 = vld [vmem:[%s17990_s2 + $0x1a8] sm:$0xf] }
 0x170   :  { %v9393_v41 = vrot.slane %v13398_v21, 9  ;;  %v2005_v15 = vrot.slane %v2003_v23, 4  ;;  %18203 = vst [vmem:[#allocation73_spill] sm:$0xff] %v14231_v40  ;;  %v2017_v21 = vrot.slane %v13457_v5, 5  ;;  %v9395_v5 = vrot.slane %v13452_v17, 9 }
 0x171   :  { %10793 = vmatmul.mubr.msk.bf16.gmra.mrb[28].mxu0 %vm990_vm4, %v9728_v12  ;;  %v2012_v24 = vrot.slane %v2010_v46, 4 }
 0x172   :  { %10495 = vmatmul.mubr.msk.bf16.gmra.mrb[60].mxu1 %vm990_vm4, %v9355_v14  ;;  %10796 = vmatprep.mubr.msk.bf16.mxu0 %vm990_vm4, %v9729_v0  ;;  %v14200_v14 = vsel %vm12721_vm8, %v9391_v47, %v1989_v39  ;;  %v14211_v0 = vsel %vm12721_vm8, %v9392_v35, %v1996_v59  ;;  %v14218_v39 = vld [vmem:[%s17990_s2 + $0x1a4] sm:$0xf]  ;;  %v14222_v47 = vsel %vm12721_vm8, %v1998_v51, %v1999_v60  ;;  %v11921_v59 = vld [vmem:[%s17988_s0 + $0x6c] sm:$0xf]  ;;  %v9394_v35 = vrot.slane %v13410_v16, 9 }
 0x173   :  { %10500 = vmatprep.mubr.msk.bf16.mxu1 %vm990_vm4, %v9421_v20  ;;  %18202 = vst [vmem:[#allocation72_spill] sm:$0xff] %v14218_v39  ;;  %v2006_v11 = vrot.slane %v11921_v59, 5  ;;  %v11922_v51 = vld [vmem:[%s17988_s0 + $0x80] sm:$0xf]  ;;  %v9424_v13 = vcombine.low %v14200_v14, %v14206_v2  ;;  %v14246_v16 = vld [vmem:[%s17990_s2 + $0x1b8] sm:$0xf]  ;;  %v9425_v20 = vcombine.low %v14211_v0, %v14222_v47  ;;  %v14262_v12 = vsel %vm12721_vm8, %v9393_v41, %v2003_v23 }
 0x174   :  { %v2013_v60 = vrot.slane %v11922_v51, 5  ;;  %18204 = vst [vmem:[#allocation74_spill] sm:$0xff] %v14246_v16  ;;  %v14256_v14 = vld [vmem:[%s17990_s2 + $0x1bc] sm:$0xf]  ;;  %v14272_v2 = vld [vmem:[%s17990_s2 + $0x1cc] sm:$0xf]  ;;  %v14286_v17 = vsel %vm12721_vm8, %v9394_v35, %v2010_v46  ;;  %v18227_v58 = vcombine.low %v14218_v39, %v14231_v40 }
 0x175   :  { %18205 = vst [vmem:[#allocation75_spill] sm:$0xff] %v14256_v14  ;;  %v14266_v59 = vsel %vm12721_vm8, %v2005_v15, %v2006_v11  ;;  %18206 = vst [vmem:[#allocation76_spill] sm:$0xff] %v14272_v2  ;;  %v14277_v51 = vld [vmem:[%s17990_s2 + $0x1d0] sm:$0xf]  ;;  %v2019_v0 = vrot.slane %v2017_v21, 4  ;;  %v18208_v15 = vcombine.low %v14120_v9, %v14134_v18  ;;  %v2024_v35 = vrot.slane %v13469_v10, 5 }
 0x176   :  { %18207 = vst [vmem:[#allocation77_spill] sm:$0xff] %v14277_v51  ;;  %v14290_v23 = vsel %vm12721_vm8, %v2012_v24, %v2013_v60  ;;  %v11923_v47 = vld [vmem:[%s17988_s0 + $0x94] sm:$0xf]  ;;  %v14315_v60 = vld [vmem:[%s17990_s2 + $0x1e0] sm:$0xf]  ;;  %v18226_v57 = vcombine.low %v14262_v12, %v14266_v59  ;;  %v6318_v39 = vshll.u32 %v13696_v61, 16  ;;  %v18244_v28 = vcombine.low %v14272_v2, %v14277_v51 }
 0x177   :  { %v2020_v41 = vrot.slane %v11923_v47, 5  ;;  %18209 = vst [vmem:[#allocation78_spill] sm:$0xff] %v14315_v60  ;;  %v14320_v47 = vld [vmem:[%s17990_s2 + $0x1e4] sm:$0xf]  ;;  %v18211_v24 = vld [vmem:[#allocation4_spill] sm:$0xff]  ;;  %v18229_v12 = vcombine.low %v14286_v17, %v14290_v23 }
 0x178   :  { %18210 = vst [vmem:[#allocation79_spill] sm:$0xff] %v14320_v47  ;;  %v9396_v46 = vrot.slane %v18211_v24, 9  ;;  %v18213_v11 = vld [vmem:[#allocation8_spill] sm:$0xff]  ;;  %v11925_v10 = vld [vmem:[%s17988_s0 + $0xbc] sm:$0xf]  ;;  %v18218_v24 = vld [vmem:[#allocation7_spill] sm:$0xff] }
 0x179   :  { %10797 = vmatmul.mubr.msk.bf16.gmra.mrb[32].mxu0 %vm990_vm4, %v9730_v30  ;;  %v14333_v30 = vsel %vm12721_vm8, %v2019_v0, %v2020_v41  ;;  %v14347_v0 = vld [vmem:[%s17990_s2 + $0x1f4] sm:$0xf]  ;;  %v18214_v41 = vld [vmem:[#allocation10_spill] sm:$0xff]  ;;  %v9398_v22 = vrot.slane %v18218_v24, 9  ;;  %v18220_v24 = vld [vmem:[#allocation9_spill] sm:$0xff] }
 0x17a   :  { %10501 = vmatmul.mubr.msk.bf16.vlgmr.msra.gmra.mrb[0].mxu1 %vm990_vm4, %v9422_v27  ;;  %10800 = vmatprep.mubr.msk.bf16.mxu0 %vm990_vm4, %v18208_v15  ;;  %v18212_v27 = vld [vmem:[#allocation6_spill] sm:$0xff]  ;;  %v11924_v15 = vld [vmem:[%s17988_s0 + $0xa8] sm:$0xf]  ;;  %v14362_v9 = vsel %vm12721_vm8, %v9396_v46, %v2024_v35  ;;  %v11926_v46 = vld [vmem:[%s17988_s0 + $0xd0] sm:$0xf] }
 0x17b   :  { %10565 = vmatpush3.bf16.msra.mxu1 %v13613_v38  ;;  %10504 = vmatprep.mubr.msk.bf16.mxu1 %vm990_vm4, %v9423_v43  ;;  %v14327_v43 = vsel %vm12721_vm8, %v9395_v5, %v2017_v21  ;;  %v2031_v26 = vrot.slane %v18212_v27, 5  ;;  %v2027_v21 = vrot.slane %v11924_v15, 5  ;;  %v2045_v38 = vrot.slane %v18214_v41, 5  ;;  %v14355_v15 = vld [vmem:[%s17990_s2 + $0x1f8] sm:$0xf]  ;;  %v18215_v5 = vld [vmem:[#allocation12_spill] sm:$0xff] }
 0x17c   :  { %10960 = vmatprep.subr.bf16.mxu1 %v12206_v8  ;;  %v2038_v8 = vrot.slane %v18213_v11, 5  ;;  %v2026_v27 = vrot.slane %v2024_v35, 4  ;;  %v2052_v18 = vrot.slane %v18215_v5, 5  ;;  %v18216_v41 = vld [vmem:[#allocation5_spill] sm:$0xff]  ;;  %v2034_v11 = vrot.slane %v11925_v10, 5 }
 0x17d   :  { %v9397_v56 = vrot.slane %v18216_v41, 9  ;;  %v2033_v5 = vrot.slane %v2031_v26, 4  ;;  %v2041_v35 = vrot.slane %v11926_v46, 5  ;;  %v18219_v10 = vcombine.low %v14175_v6, %v14184_v42  ;;  %v11931_v59 = vld [vmem:[%s17988_s0 + $0x134] sm:$0xf] }
 0x17e   :  { %v2040_v52 = vrot.slane %v2038_v8, 4  ;;  %v9399_v41 = vrot.slane %v18220_v24, 9  ;;  %v2047_v32 = vrot.slane %v2045_v38, 4  ;;  %v14395_v42 = vsel %vm12721_vm8, %v2026_v27, %v2027_v21  ;;  %v11928_v24 = vld [vmem:[%s17988_s0 + $0xf8] sm:$0xf] }
 0x17f   :  { %v2054_v1 = vrot.slane %v2052_v18, 4  ;;  %v2055_v33 = vrot.slane %v11928_v24, 5  ;;  %v14415_v55 = vsel %vm12721_vm8, %v2033_v5, %v2034_v11  ;;  %v18222_v11 = vld [vmem:[#allocation14_spill] sm:$0xff]  ;;  %v14475_v21 = vld [vmem:[%s17990_s2 + $0x248] sm:$0xf] }
 0x180   :  { %v14423_v24 = vsel %vm12721_vm8, %v2040_v52, %v2041_v35  ;;  %v2059_v5 = vrot.slane %v18222_v11, 5  ;;  %v14442_v52 = vsel %vm12721_vm8, %v9399_v41, %v2045_v38  ;;  %v14456_v11 = vld [vmem:[%s17990_s2 + $0x234] sm:$0xf] }
 0x181   :  { %10801 = vmatmul.mubr.msk.bf16.gmra.mrb[36].mxu0 %vm990_vm4, %v18217_v50  ;;  %v14387_v50 = vld [vmem:[%s17990_s2 + $0x208] sm:$0xf]  ;;  %v14464_v38 = vsel %vm12721_vm8, %v2054_v1, %v2055_v33  ;;  %v11929_v1 = vld [vmem:[%s17988_s0 + $0x10c] sm:$0xf] }
 0x182   :  { %10505 = vmatmul.mubr.msk.bf16.gmra.mrb[4].mxu1 %vm990_vm4, %v9424_v13  ;;  %10804 = vmatprep.mubr.msk.bf16.mxu0 %vm990_vm4, %v18219_v10  ;;  %v14400_v10 = vld [vmem:[%s17990_s2 + $0x20c] sm:$0xf]  ;;  %v2062_v33 = vrot.slane %v11929_v1, 5  ;;  %v2076_v1 = vrot.slane %v11931_v59, 5  ;;  %v14543_v59 = vld [vmem:[%s17990_s2 + $0x25c] sm:$0xf] }
 0x183   :  { %10508 = vmatprep.mubr.msk.bf16.mxu1 %vm990_vm4, %v9425_v20  ;;  %v11927_v20 = vld [vmem:[%s17988_s0 + $0xe4] sm:$0xf]  ;;  %v18221_v13 = vld [vmem:[#allocation11_spill] sm:$0xff] }
 0x184   :  { %v2048_v46 = vrot.slane %v11927_v20, 5  ;;  %v9400_v6 = vrot.slane %v18221_v13, 9  ;;  %v14408_v20 = vsel %vm12721_vm8, %v9397_v56, %v2031_v26  ;;  %v14419_v13 = vsel %vm12721_vm8, %v9398_v22, %v2038_v8  ;;  %v14428_v56 = vld [vmem:[%s17990_s2 + $0x21c] sm:$0xf]  ;;  %v14433_v26 = vld [vmem:[%s17990_s2 + $0x220] sm:$0xf] }
 0x185   :  { %v18224_v22 = vld [vmem:[#allocation16_spill] sm:$0xff] }
 0x186   :  { %v14446_v35 = vsel %vm12721_vm8, %v2047_v32, %v2048_v46  ;;  %v14460_v27 = vsel %vm12721_vm8, %v9400_v6, %v2052_v18  ;;  %v18223_v32 = vld [vmem:[#allocation13_spill] sm:$0xff]  ;;  %v14470_v46 = vld [vmem:[%s17990_s2 + $0x244] sm:$0xf]  ;;  %v2066_v8 = vrot.slane %v18224_v22, 5  ;;  %v18225_v6 = vld [vmem:[#allocation19_spill] sm:$0xff]  ;;  %v2061_v18 = vrot.slane %v2059_v5, 4 }
 0x187   :  { %v9401_v41 = vrot.slane %v18223_v32, 9  ;;  %v2073_v32 = vrot.slane %v18225_v6, 5  ;;  %v18228_v6 = vld [vmem:[#allocation15_spill] sm:$0xff]  ;;  %v18231_v22 = vld [vmem:[#allocation18_spill] sm:$0xff] }
 0x188   :  { %v9402_v62 = vrot.slane %v18228_v6, 9  ;;  %v6294_v6 = vshll.u32 %v13656_v53, 16  ;;  %v2068_v23 = vrot.slane %v2066_v8, 4  ;;  %v18241_v53 = vld [vmem:[#allocation20_spill] sm:$0xff] }
 0x189   :  { %10805 = vmatmul.mubr.msk.bf16.gmra.mrb[40].mxu0 %vm990_vm4, %v18227_v58  ;;  %v14516_v17 = vsel %vm12721_vm8, %v9401_v41, %v2059_v5  ;;  %v9403_v58 = vrot.slane %v18231_v22, 9  ;;  %v14529_v5 = vsel %vm12721_vm8, %v2061_v18, %v2062_v33  ;;  %v14538_v22 = vld [vmem:[%s17990_s2 + $0x258] sm:$0xf]  ;;  %v9404_v25 = vrot.slane %v18241_v53, 9 }
 0x18a   :  { %10509 = vmatmul.mubr.msk.bf16.gmra.mrb[8].mxu1 %vm990_vm4, %v18226_v57  ;;  %v18230_v57 = vcombine.low %v14246_v16, %v14256_v14  ;;  %v2075_v14 = vrot.slane %v2073_v32, 4  ;;  %v18232_v16 = vld [vmem:[#allocation21_spill] sm:$0xff]  ;;  %v14533_v41 = vsel %vm12721_vm8, %v9402_v62, %v2066_v8  ;;  %v14552_v62 = vld [vmem:[%s17990_s2 + $0x26c] sm:$0xf]  ;;  %v14554_v8 = vrot.slane %v6294_v6, 5 }
 0x18b   :  { %10512 = vmatprep.mubr.msk.bf16.mxu1 %vm990_vm4, %v18229_v12  ;;  %v11930_v12 = vld [vmem:[%s17988_s0 + $0x120] sm:$0xf]  ;;  %v2080_v40 = vrot.slane %v18232_v16, 5  ;;  %v18233_v16 = vld [vmem:[#allocation17_spill] sm:$0xff]  ;;  %v14573_v6 = vld [vmem:[%s17990_s2 + $0x270] sm:$0xf]  ;;  %v18243_v53 = vcombine.low %v14327_v43, %v14333_v30  ;;  %v18246_v43 = vcombine.low %v14362_v9, %v14395_v42 }
 0x18c   :  { %10808 = vmatprep.mubr.msk.bf16.mxu0 %vm990_vm4, %v18230_v57  ;;  %v2069_v57 = vrot.slane %v11930_v12, 5  ;;  %v18234_v12 = vshrl.u32 %v18233_v16, 16  ;;  %v18235_v18 = vshll.u32 %v18233_v16, 16  ;;  %18240 = vst [vmem:[#allocation4_spill] sm:$0xff] %v14573_v6  ;;  %v5579_v30 = vld [vmem:[%s17990_s2 + $0x1c] sm:$0xf] }
 0x18d   :  { %v14623_v42 = vsel %vm12721_vm8, %v9404_v25, %v2080_v40  ;;  %v11933_v9 = vld [vmem:[%s17988_s0 + $0x15c] sm:$0xf] }
 0x18e   :  { %v6287_v49 = vrot.slane %v18234_v12, 4  ;;  %v6290_v33 = vrot.slane %v18235_v18, 5  ;;  %v14564_v16 = vsel %vm12721_vm8, %v2068_v23, %v2069_v57  ;;  %v14568_v12 = vsel %vm12721_vm8, %v9403_v58, %v2073_v32 }
 0x18f   :  { %v14584_v32 = vsel %vm12721_vm8, %v2075_v14, %v2076_v1  ;;  %v2082_v58 = vrot.slane %v2080_v40, 4  ;;  %v14586_v23 = vrot.slane %v6318_v39, 5  ;;  %v18242_v57 = vshrl.u32 %v13696_v61, 16 }
 0x190   :  { %v6291_v1 = vor.u32 %v6290_v33, %v6287_v49  ;;  %v2087_v61 = vrot.slane %v18245_v48, 5  ;;  %v6301_v49 = vor.u32 %v6300_v29, %v14554_v8  ;;  %v6304_v48 = vshll.u32 %v5576_v19, 16 }
 0x191   :  { %v6324_v18 = vrot.slane %v18242_v57, 4  ;;  %10809 = vmatmul.mubr.msk.bf16.gmra.mrb[44].mxu0 %vm990_vm4, %v18244_v28  ;;  %v18247_v57 = vcombine.low %v14315_v60, %v14320_v47  ;;  %v6315_v33 = vor.u32 %v6314_v44, %v6311_v34  ;;  %v6328_v34 = vshll.u32 %v5579_v30, 16  ;;  %v18250_v60 = vld [vmem:[#allocation26_spill] sm:$0xff] }
 0x192   :  { %10513 = vmatmul.mubr.msk.bf16.gmra.mrb[12].mxu1 %vm990_vm4, %v18243_v53  ;;  %v18249_v53 = vld [vmem:[#allocation24_spill] sm:$0xff]  ;;  %v6292_v19 = vrot.slane %v6291_v1, 4  ;;  %v2089_v28 = vrot.slane %v2087_v61, 4  ;;  %v2090_v14 = vrot.slane %v11933_v9, 5  ;;  %v6342_v40 = vshll.u32 %v13706_v36, 16  ;;  %v18251_v1 = vld [vmem:[#allocation23_spill] sm:$0xff] }
 0x193   :  { %10516 = vmatprep.mubr.msk.bf16.mxu1 %vm990_vm4, %v18246_v43  ;;  %10812 = vmatprep.mubr.msk.bf16.mxu0 %vm990_vm4, %v18247_v57  ;;  %v18248_v43 = vld [vmem:[#allocation27_spill] sm:$0xff]  ;;  %v14628_v57 = vsel %vm12721_vm8, %v2082_v58, %v2083_v7  ;;  %v9405_v29 = vrot.slane %v18249_v53, 9  ;;  %v6325_v44 = vor.u32 %v6324_v18, %v14586_v23  ;;  %v6302_v25 = vrot.slane %v6301_v49, 4  ;;  %v11934_v18 = vld [vmem:[%s17988_s0 + $0x170] sm:$0xf] }
 0x194   :  { %v2094_v39 = vrot.slane %v18248_v43, 5  ;;  %v6306_v43 = vrot.slane %v6304_v48, 5  ;;  %v6316_v47 = vrot.slane %v6315_v33, 4  ;;  %v9406_v7 = vrot.slane %v18250_v60, 9 }
 0x195   :  { %v2097_v30 = vrot.slane %v11934_v18, 5  ;;  %v18252_v53 = vshrl.u32 %v18251_v1, 16  ;;  %v18253_v2 = vshll.u32 %v18251_v1, 16  ;;  %v14646_v9 = vsel %vm12721_vm8, %v9405_v29, %v2087_v61  ;;  %v5582_v29 = vld [vmem:[%s17990_s2 + $0x30] sm:$0xf] }
 0x196   :  { %v2096_v58 = vrot.slane %v2094_v39, 4  ;;  %v6326_v49 = vrot.slane %v6325_v44, 4  ;;  %v6330_v48 = vrot.slane %v6328_v34, 5  ;;  %v6366_v60 = vshll.u32 %v13748_v31, 16 }
 0x197   :  { %v6335_v51 = vrot.slane %v18252_v53, 4  ;;  %v6338_v6 = vrot.slane %v18253_v2, 5  ;;  %v18254_v33 = vcombine.low %v14408_v20, %v14415_v55  ;;  %v18255_v18 = vcombine.low %v14347_v0, %v14355_v15 }
 0x198   :  { %v6297_v1 = vsel %vm12240_vm5, %v6292_v19, %v14554_v8  ;;  %v14662_v61 = vsel %vm12721_vm8, %v2089_v28, %v2090_v14  ;;  %v14667_v55 = vrot.slane %v6342_v40, 5  ;;  %v18257_v20 = vshrl.u32 %v13706_v36, 16 }
 0x199   :  { %10813 = vmatmul.mubr.msk.bf16.gmra.mrb[48].mxu0 %vm990_vm4, %v18255_v18  ;;  %v18258_v34 = vcombine.low %v14419_v13, %v14423_v24  ;;  %v18259_v8 = vcombine.low %v14387_v50, %v14400_v10  ;;  %v6909_v14 = vshrl.u32 %v14387_v50, 16  ;;  %v6307_v28 = vsel %vm12240_vm5, %v6302_v25, %v6306_v43 }
 0x19a   :  { %10517 = vmatmul.mubr.msk.bf16.gmra.mrb[16].mxu1 %vm990_vm4, %v18254_v33  ;;  %v6348_v44 = vrot.slane %v18257_v20, 4  ;;  %v6321_v36 = vsel %vm12240_vm5, %v6316_v47, %v14586_v23  ;;  %v14687_v19 = vsel %vm12721_vm8, %v9406_v7, %v2094_v39  ;;  %v14691_v13 = vsel %vm12721_vm8, %v2096_v58, %v2097_v30  ;;  %v18264_v30 = vld [vmem:[#allocation29_spill] sm:$0xff] }
 0x19b   :  { %10520 = vmatprep.mubr.msk.bf16.mxu1 %vm990_vm4, %v18258_v34  ;;  %10816 = vmatprep.mubr.msk.bf16.mxu0 %vm990_vm4, %v18259_v8  ;;  %v6339_v24 = vor.u32 %v6338_v6, %v6335_v51  ;;  %v18260_v40 = vshrl.u32 %v13743_v45, 16  ;;  %v18261_v33 = vshll.u32 %v13743_v45, 16  ;;  %v6331_v25 = vsel %vm12240_vm5, %v6326_v49, %v6330_v48  ;;  %v18263_v6 = vld [vmem:[#allocation28_spill] sm:$0xff]  ;;  %v5585_v45 = vld [vmem:[%s17990_s2 + $0x44] sm:$0xf] }
 0x19c   :  { %v6352_v43 = vshll.u32 %v5582_v29, 16  ;;  %v14699_v47 = vrot.slane %v6366_v60, 5  ;;  %v18262_v23 = vshrl.u32 %v13748_v31, 16  ;;  %v9437_v7 = vcombine.low %v14623_v42, %v14628_v57  ;;  %v18265_v60 = vld [vmem:[#allocation31_spill] sm:$0xff]  ;;  %v5597_v42 = vld [vmem:[%s17990_s2 + $0x94] sm:$0xf] }
 0x19d   :  { %v6359_v53 = vrot.slane %v18260_v40, 4  ;;  %v6362_v18 = vrot.slane %v18261_v33, 5  ;;  %v6349_v51 = vor.u32 %v6348_v44, %v14667_v55  ;;  %v9407_v58 = vrot.slane %v18263_v6, 9 }
 0x19e   :  { %v6372_v39 = vrot.slane %v18262_v23, 4  ;;  %v2101_v20 = vrot.slane %v18264_v30, 5  ;;  %v14711_v49 = vcombine.low %v6297_v1, %v6307_v28  ;;  %v9438_v48 = vcombine.low %v14646_v9, %v14662_v61  ;;  %v11935_v1 = vld [vmem:[%s17988_s0 + $0x184] sm:$0xf] }
 0x19f   :  { %v9439_v31 = vcombine.low %v14687_v19, %v14691_v13  ;;  %v2108_v29 = vrot.slane %v18265_v60, 5  ;;  %v14718_v34 = vcombine.low %v6321_v36, %v6331_v25  ;;  %v6340_v44 = vrot.slane %v6339_v24, 4  ;;  %v18268_v25 = vld [vmem:[#allocation30_spill] sm:$0xff] }
 0x1a0   :  { %v6363_v8 = vor.u32 %v6362_v18, %v6359_v53  ;;  %v6390_v40 = vshll.u32 %v13759_v37, 16  ;;  %v6354_v33 = vrot.slane %v6352_v43, 5  ;;  %v2104_v28 = vrot.slane %v11935_v1, 5 }
 0x1a1   :  { %v6373_v23 = vor.u32 %v6372_v39, %v14699_v47  ;;  %v6376_v6 = vshll.u32 %v5585_v45, 16  ;;  %v18266_v30 = vcombine.low %v14442_v52, %v14446_v35  ;;  %v18267_v36 = vcombine.low %v14428_v56, %v14433_v26  ;;  %v11936_v35 = vld [vmem:[%s17988_s0 + $0x198] sm:$0xf] }
 0x1a2   :  { %v6350_v24 = vrot.slane %v6349_v51, 4  ;;  %v14735_v53 = vsel %vm12721_vm8, %v9407_v58, %v2101_v20  ;;  %v2103_v18 = vrot.slane %v2101_v20, 4  ;;  %v9408_v43 = vrot.slane %v18268_v25, 9  ;;  %v5588_v58 = vld [vmem:[%s17990_s2 + $0x58] sm:$0xf] }
 0x1a3   :  { %10521 = vmatmul.mubr.msk.bf16.gmra.mrb[20].mxu1 %vm990_vm4, %v18266_v30  ;;  %10817 = vmatmul.mubr.msk.bf16.gmra.mrb[52].mxu0 %vm990_vm4, %v18267_v36  ;;  %v18269_v39 = vcombine.low %v14460_v27, %v14464_v38  ;;  %v18270_v52 = vcombine.low %v14451_v4, %v14456_v11  ;;  %v2110_v26 = vrot.slane %v2108_v29, 4  ;;  %v2111_v51 = vrot.slane %v11936_v35, 5 }
 0x1a4   :  { %v18271_v20 = vshrl.u32 %v13754_v63, 16  ;;  %v18272_v38 = vshll.u32 %v13754_v63, 16  ;;  %v6364_v60 = vrot.slane %v6363_v8, 4  ;;  %v14756_v4 = vrot.slane %v6390_v40, 5 }
 0x1a5   :  { %10524 = vmatprep.mubr.msk.bf16.mxu1 %vm990_vm4, %v18269_v39  ;;  %10820 = vmatprep.mubr.msk.bf16.mxu0 %vm990_vm4, %v18270_v52  ;;  %v18273_v11 = vshrl.u32 %v13759_v37, 16  ;;  %v6414_v30 = vshll.u32 %v13801_v54, 16  ;;  %v6345_v36 = vsel %vm12240_vm5, %v6340_v44, %v14667_v55  ;;  %v6374_v25 = vrot.slane %v6373_v23, 4  ;;  %v18274_v52 = vld [vmem:[#allocation36_spill] sm:$0xff] }
 0x1a6   :  { %v6383_v27 = vrot.slane %v18271_v20, 4  ;;  %v6386_v45 = vrot.slane %v18272_v38, 5  ;;  %v6378_v39 = vrot.slane %v6376_v6, 5  ;;  %v2115_v35 = vrot.slane %v18274_v52, 5  ;;  %v18275_v44 = vld [vmem:[#allocation32_spill] sm:$0xff] }
 0x1a7   :  { %v6396_v1 = vrot.slane %v18273_v11, 4  ;;  %v6355_v63 = vsel %vm12240_vm5, %v6350_v24, %v6354_v33  ;;  %v14769_v8 = vsel %vm12721_vm8, %v2103_v18, %v2104_v28  ;;  %v14773_v37 = vsel %vm12721_vm8, %v9408_v43, %v2108_v29 }
 0x1a8   :  { %v6400_v40 = vshll.u32 %v5588_v58, 16  ;;  %v14777_v20 = vsel %vm12721_vm8, %v2110_v26, %v2111_v51  ;;  %v6387_v55 = vor.u32 %v6386_v45, %v6383_v27  ;;  %v18276_v23 = vshrl.u32 %v18275_v44, 16  ;;  %v18279_v51 = vld [vmem:[#allocation35_spill] sm:$0xff] }
 0x1a9   :  { %v18277_v38 = vshll.u32 %v18275_v44, 16  ;;  %v6369_v28 = vsel %vm12240_vm5, %v6364_v60, %v14699_v47  ;;  %v6397_v24 = vor.u32 %v6396_v1, %v14756_v4  ;;  %v14787_v29 = vrot.slane %v6414_v30, 5  ;;  %v11937_v45 = vld [vmem:[%s17988_s0 + $0x1ac] sm:$0xf] }
 0x1aa   :  { %v6407_v6 = vrot.slane %v18276_v23, 4  ;;  %v18278_v18 = vshrl.u32 %v13801_v54, 16  ;;  %v6379_v26 = vsel %vm12240_vm5, %v6374_v25, %v6378_v39  ;;  %v9409_v58 = vrot.slane %v18279_v51, 9  ;;  %v5591_v47 = vld [vmem:[%s17990_s2 + $0x6c] sm:$0xf]  ;;  %v18282_v39 = vld [vmem:[#allocation38_spill] sm:$0xff] }
 0x1ab   :  { %v6410_v33 = vrot.slane %v18277_v38, 5  ;;  %v2117_v27 = vrot.slane %v2115_v35, 4  ;;  %v2118_v11 = vrot.slane %v11937_v45, 5  ;;  %v18280_v60 = vcombine.low %v14516_v17, %v14529_v5 }
 0x1ac   :  { %v6420_v43 = vrot.slane %v18278_v18, 4  ;;  %v18281_v54 = vcombine.low %v14470_v46, %v14475_v21  ;;  %v14808_v1 = vcombine.low %v6345_v36, %v6355_v63  ;;  %v9440_v30 = vcombine.low %v14735_v53, %v14769_v8  ;;  %v18285_v63 = vld [vmem:[#allocation34_spill] sm:$0xff]  ;;  %v11946_v53 = vld [vmem:[%s17988_s0 + $0x208] sm:$0xf] }
 0x1ad   :  { %10525 = vmatmul.mubr.msk.bf16.gmra.mrb[24].mxu1 %vm990_vm4, %v18280_v60  ;;  %v9441_v25 = vcombine.low %v14773_v37, %v14777_v20  ;;  %v2122_v52 = vrot.slane %v18282_v39, 5  ;;  %v18283_v17 = vcombine.low %v14533_v41, %v14564_v16  ;;  %v18284_v21 = vcombine.low %v14538_v22, %v14543_v59  ;;  %v18286_v59 = vld [vmem:[#allocation33_spill] sm:$0xff]  ;;  %v11947_v37 = vld [vmem:[%s17990_s2 + $0xe0] sm:$0xf] }
 0x1ae   :  { %10821 = vmatmul.mubr.msk.bf16.gmra.mrb[56].mxu0 %vm990_vm4, %v18281_v54  ;;  %v6388_v46 = vrot.slane %v6387_v55, 4  ;;  %v6402_v5 = vrot.slane %v6400_v40, 5  ;;  %v6411_v36 = vor.u32 %v6410_v33, %v6407_v6  ;;  %v6438_v44 = vshll.u32 %v18285_v63, 16  ;;  %v18289_v33 = vld [vmem:[#allocation37_spill] sm:$0xff] }
 0x1af   :  { %10528 = vmatprep.mubr.msk.bf16.mxu1 %vm990_vm4, %v18283_v17  ;;  %10824 = vmatprep.mubr.msk.bf16.mxu0 %vm990_vm4, %v18284_v21  ;;  %v14824_v23 = vcombine.low %v6369_v28, %v6379_v26  ;;  %v6398_v38 = vrot.slane %v6397_v24, 4  ;;  %v6421_v18 = vor.u32 %v6420_v43, %v14787_v29  ;;  %v6424_v51 = vshll.u32 %v5591_v47, 16  ;;  %v11938_v43 = vld [vmem:[%s17988_s0 + $0x1c0] sm:$0xf] }
 0x1b0   :  { %v14829_v41 = vsel %vm12721_vm8, %v9409_v58, %v2115_v35  ;;  %v14833_v22 = vsel %vm12721_vm8, %v2117_v27, %v2118_v11  ;;  %v18287_v16 = vshrl.u32 %v18286_v59, 16  ;;  %v18288_v55 = vshll.u32 %v18286_v59, 16  ;;  %v5594_v35 = vld [vmem:[%s17990_s2 + $0x80] sm:$0xf]  ;;  %v18290_v58 = vld [vmem:[#allocation40_spill] sm:$0xff] }
 0x1b1   :  { %v9410_v28 = vrot.slane %v18289_v33, 9  ;;  %v2124_v24 = vrot.slane %v2122_v52, 4  ;;  %v2125_v26 = vrot.slane %v11938_v43, 5  ;;  %v6462_v27 = vshll.u32 %v18290_v58, 16  ;;  %v18301_v43 = vld [vmem:[#allocation46_spill] sm:$0xff] }
 0x1b2   :  { %v6431_v40 = vrot.slane %v18287_v16, 4  ;;  %v6434_v6 = vrot.slane %v18288_v55, 5  ;;  %v6393_v45 = vsel %vm12240_vm5, %v6388_v46, %v14756_v4  ;;  %v14850_v11 = vrot.slane %v6411_v36, 4  ;;  %v18292_v4 = vld [vmem:[#allocation39_spill] sm:$0xff] }
 0x1b3   :  { %v14852_v47 = vrot.slane %v6438_v44, 5  ;;  %v18291_v60 = vshrl.u32 %v18285_v63, 16  ;;  %v6403_v39 = vsel %vm12240_vm5, %v6398_v38, %v6402_v5  ;;  %v9442_v17 = vcombine.low %v14829_v41, %v14833_v22  ;;  %v18296_v5 = vld [vmem:[#allocation4_spill] sm:$0xff] }
 0x1b4   :  { %v14860_v21 = vrot.slane %v6421_v18, 4  ;;  %v14862_v59 = vrot.slane %v6424_v51, 5  ;;  %v6435_v16 = vor.u32 %v6434_v6, %v6431_v40  ;;  %v6448_v55 = vshll.u32 %v5594_v35, 16  ;;  %v18302_v35 = vld [vmem:[#allocation42_spill] sm:$0xff] }
 0x1b5   :  { %v6444_v54 = vrot.slane %v18291_v60, 4  ;;  %v18293_v46 = vshrl.u32 %v18292_v4, 16  ;;  %v18294_v44 = vshll.u32 %v18292_v4, 16  ;;  %v18295_v63 = vcombine.low %v14568_v12, %v14584_v32 }
 0x1b6   :  { %v18297_v38 = vcombine.low %v14552_v62, %v18296_v5  ;;  %v14878_v18 = vsel %vm12721_vm8, %v9410_v28, %v2122_v52  ;;  %v14882_v51 = vsel %vm12721_vm8, %v2124_v24, %v2125_v26  ;;  %v14884_v40 = vrot.slane %v6462_v27, 5  ;;  %v18299_v28 = vld [vmem:[#allocation44_spill] sm:$0xff] }
 0x1b7   :  { %v6455_v36 = vrot.slane %v18293_v46, 4  ;;  %v6458_v33 = vrot.slane %v18294_v44, 5  ;;  %10529 = vmatmul.mubr.msk.bf16.gmra.mrb[28].mxu1 %vm990_vm4, %v18295_v63  ;;  %v18298_v6 = vshrl.u32 %v18290_v58, 16  ;;  %v14894_v62 = vcombine.low %v6393_v45, %v6403_v39  ;;  %v18303_v39 = vld [vmem:[#allocation41_spill] sm:$0xff]  ;;  %v11939_v5 = vld [vmem:[%s17988_s0 + $0x1d4] sm:$0xf] }
 0x1b8   :  { %10825 = vmatmul.mubr.msk.bf16.gmra.mrb[60].mxu0 %vm990_vm4, %v18297_v38  ;;  %10532 = vmatprep.mubr.msk.bf16.mxu1 %vm990_vm4, %v9437_v7  ;;  %v6417_v32 = vsel %vm12240_vm5, %v14850_v11, %v14787_v29  ;;  %v6445_v52 = vor.u32 %v6444_v54, %v14852_v47  ;;  %v2129_v24 = vrot.slane %v18299_v28, 5  ;;  %v6427_v57 = vsel %vm12240_vm5, %v14860_v21, %v14862_v59  ;;  %v18300_v7 = vld [vmem:[#allocation43_spill] sm:$0xff] }
 0x1b9   :  { %v6468_v12 = vrot.slane %v18298_v6, 4  ;;  %10830 = vmatprep.mubr.msk.bf16.mxu0 %vm990_vm4, %v14711_v49  ;;  %v9411_v49 = vrot.slane %v18300_v7, 9  ;;  %v2136_v26 = vrot.slane %v18301_v43, 5  ;;  %v6486_v58 = vshll.u32 %v18302_v35, 16  ;;  %v18306_v6 = vld [vmem:[#allocation45_spill] sm:$0xff] }
 0x1ba   :  { %v9443_v29 = vcombine.low %v14878_v18, %v14882_v51  ;;  %v6436_v27 = vrot.slane %v6435_v16, 4  ;;  %v6450_v45 = vrot.slane %v6448_v55, 5  ;;  %v6459_v11 = vor.u32 %v6458_v33, %v6455_v36  ;;  %v11940_v36 = vld [vmem:[%s17988_s0 + $0x1e8] sm:$0xf] }
 0x1bb   :  { %v6469_v60 = vor.u32 %v6468_v12, %v14884_v40  ;;  %v6472_v54 = vshll.u32 %v5597_v42, 16  ;;  %v18304_v4 = vshrl.u32 %v18303_v39, 16  ;;  %v18305_v21 = vshll.u32 %v18303_v39, 16  ;;  %v5600_v12 = vld [vmem:[%s17990_s2 + $0xa8] sm:$0xf] }
 0x1bc   :  { %v6446_v44 = vrot.slane %v6445_v52, 4  ;;  %v2131_v63 = vrot.slane %v2129_v24, 4  ;;  %v2132_v38 = vrot.slane %v11939_v5, 5  ;;  %v9412_v16 = vrot.slane %v18306_v6, 9 }
 0x1bd   :  { %v6479_v46 = vrot.slane %v18304_v4, 4  ;;  %v6482_v59 = vrot.slane %v18305_v21, 5  ;;  %v2138_v55 = vrot.slane %v2136_v26, 4  ;;  %v2139_v33 = vrot.slane %v11940_v36, 5  ;;  %v18308_v4 = vld [vmem:[#allocation48_spill] sm:$0xff] }
 0x1be   :  { %v14929_v28 = vrot.slane %v6486_v58, 5  ;;  %v18307_v52 = vshrl.u32 %v18302_v35, 16  ;;  %v6441_v7 = vsel %vm12240_vm5, %v6436_v27, %v14852_v47  ;;  %v14938_v43 = vsel %vm12721_vm8, %v9411_v49, %v2129_v24  ;;  %v11941_v47 = vld [vmem:[%s17988_s0 + $0x1f8] sm:$0xf] }
 0x1bf   :  { %v6460_v39 = vrot.slane %v6459_v11, 4  ;;  %v6510_v21 = vshll.u32 %v18308_v4, 16  ;;  %10533 = vmatmul.mubr.msk.bf16.gmra.mrb[32].mxu1 %vm990_vm4, %v9438_v48  ;;  %v6470_v35 = vrot.slane %v6469_v60, 4  ;;  %v6474_v58 = vrot.slane %v6472_v54, 5  ;;  %v18309_v49 = vld [vmem:[#allocation49_spill] sm:$0xff] }
 0x1c0   :  { %v6492_v42 = vrot.slane %v18307_v52, 4  ;;  %10831 = vmatmul.mubr.msk.bf16.vlgmr.msra.gmra.mrb[0].mxu0 %vm990_vm4, %v14718_v34  ;;  %v6483_v5 = vor.u32 %v6482_v59, %v6479_v46  ;;  %v2143_v24 = vrot.slane %v11941_v47, 5  ;;  %10536 = vmatprep.mubr.msk.bf16.mxu1 %vm990_vm4, %v9439_v31  ;;  %v6451_v9 = vsel %vm12240_vm5, %v6446_v44, %v6450_v45  ;;  %v18310_v31 = vld [vmem:[#allocation47_spill] sm:$0xff] }
 0x1c1   :  { %10895 = vmatpush3.bf16.msra.mxu0 %v18309_v49  ;;  %v14959_v61 = vsel %vm12721_vm8, %v2131_v63, %v2132_v38  ;;  %v14963_v48 = vsel %vm12721_vm8, %v9412_v16, %v2136_v26  ;;  %v6496_v34 = vshll.u32 %v5600_v12, 16  ;;  %10834 = vmatprep.mubr.msk.bf16.mxu0 %vm990_vm4, %v14808_v1  ;;  %v14969_v19 = vsel %vm12721_vm8, %v2138_v55, %v2139_v33  ;;  %v11942_v1 = vld [vmem:[%s17988_s0 + $0x1f4] sm:$0xf]  ;;  %v11943_v16 = vld [vmem:[%s17988_s0 + $0x1fc] sm:$0xf] }
 0x1c2   :  { %v6493_v13 = vor.u32 %v6492_v42, %v14929_v28  ;;  %v18311_v27 = vshrl.u32 %v18310_v31, 16  ;;  %v18312_v11 = vshll.u32 %v18310_v31, 16  ;;  %v6465_v26 = vsel %vm12240_vm5, %v6460_v39, %v14884_v40  ;;  %v5603_v55 = vld [vmem:[%s17990_s2 + $0xbc] sm:$0xf] }
 0x1c3   :  { %v9413_v54 = vrot.slane %v11942_v1, 9  ;;  %v14982_v46 = vrot.slane %v6510_v21, 5  ;;  %v18313_v59 = vshrl.u32 %v18308_v4, 16  ;;  %v6475_v63 = vsel %vm12240_vm5, %v6470_v35, %v6474_v58  ;;  %v11944_v21 = vld [vmem:[%s17988_s0 + $0x20c] sm:$0xf] }
 0x1c4   :  { %v6503_v45 = vrot.slane %v18311_v27, 4  ;;  %v6506_v60 = vrot.slane %v18312_v11, 5  ;;  %v6484_v38 = vrot.slane %v6483_v5, 4  ;;  %v2145_v6 = vrot.slane %v2143_v24, 4  ;;  %v11948_v27 = vld [vmem:[%s17988_s0 + $0x210] sm:$0xf] }
 0x1c5   :  { %v6516_v44 = vrot.slane %v18313_v59, 4  ;;  %v2146_v40 = vrot.slane %v11943_v16, 5  ;;  %v9783_v36 = vcombine.low %v6417_v32, %v6427_v57  ;;  %v14994_v33 = vcombine.low %v6441_v7, %v6451_v9  ;;  %v11945_v7 = vld [vmem:[%s17990_s2 + $0xcc] sm:$0xf]  ;;  %v18319_v16 = vld [vmem:[#allocation52_spill] sm:$0xff] }
 0x1c6   :  { %v9444_v12 = vcombine.low %v14938_v43, %v14959_v61  ;;  %v9445_v52 = vcombine.low %v14963_v48, %v14969_v19  ;;  %v6494_v42 = vrot.slane %v6493_v13, 4  ;;  %v6498_v39 = vrot.slane %v6496_v34, 5  ;;  %v18317_v1 = vld [vmem:[#allocation51_spill] sm:$0xff]  ;;  %v15178_v43 = vld [vmem:[%s17990_s2 + $0x11c] sm:$0xf] }
 0x1c7   :  { %v6507_v4 = vor.u32 %v6506_v60, %v6503_v45  ;;  %v2150_v35 = vrot.slane %v11944_v21, 5  ;;  %v15003_v58 = vcombine.low %v6465_v26, %v6475_v63  ;;  %v6517_v32 = vor.u32 %v6516_v44, %v14982_v46  ;;  %10537 = vmatmul.mubr.msk.bf16.gmra.mrb[36].mxu1 %vm990_vm4, %v9440_v30  ;;  %v18314_v30 = vld [vmem:[#allocation50_spill] sm:$0xff]  ;;  %v5606_v63 = vld [vmem:[%s17990_s2 + $0xd0] sm:$0xf]  ;;  %v11960_v48 = vld [vmem:[%s17988_s0 + $0x24c] sm:$0xf] }
 0x1c8   :  { %v6520_v57 = vshll.u32 %v5603_v55, 16  ;;  %v6534_v5 = vshll.u32 %v11945_v7, 16  ;;  %v6912_v47 = vshll.u32 %v14387_v50, 16  ;;  %10835 = vmatmul.mubr.msk.bf16.gmra.mrb[4].mxu0 %vm990_vm4, %v14824_v23  ;;  %v6489_v49 = vsel %vm12240_vm5, %v6484_v38, %v14929_v28  ;;  %10540 = vmatprep.mubr.msk.bf16.mxu1 %vm990_vm4, %v9441_v25  ;;  %v11949_v38 = vld [vmem:[%s17988_s0 + $0x220] sm:$0xf] }
 0x1c9   :  { %v15021_v9 = vsel %vm12721_vm8, %v9413_v54, %v2143_v24  ;;  %v15025_v34 = vsel %vm12721_vm8, %v2145_v6, %v2146_v40  ;;  %10838 = vmatprep.mubr.msk.bf16.mxu0 %vm990_vm4, %v14894_v62  ;;  %v9414_v8 = vrot.slane %v11946_v53, 9  ;;  %v18315_v23 = vshrl.u32 %v18314_v30, 16 }
 0x1ca   :  { %v18316_v24 = vshll.u32 %v18314_v30, 16  ;;  %v6558_v20 = vshll.u32 %v11947_v37, 16  ;;  %v6499_v25 = vsel %vm12240_vm5, %v6494_v42, %v6498_v39  ;;  %v6508_v62 = vrot.slane %v6507_v4, 4 }
 0x1cb   :  { %v6527_v28 = vrot.slane %v18315_v23, 4  ;;  %v2152_v31 = vrot.slane %v2150_v35, 4  ;;  %v2153_v45 = vrot.slane %v11948_v27, 5  ;;  %v6518_v11 = vrot.slane %v6517_v32, 4  ;;  %v11953_v27 = vld [vmem:[%s17988_s0 + $0x234] sm:$0xf] }
 0x1cc   :  { %v6530_v13 = vrot.slane %v18316_v24, 5  ;;  %v6522_v60 = vrot.slane %v6520_v57, 5  ;;  %v15048_v26 = vrot.slane %v6534_v5, 5  ;;  %v18318_v54 = vshrl.u32 %v18317_v1, 16  ;;  %v18322_v57 = vld [vmem:[#allocation53_spill] sm:$0xff] }
 0x1cd   :  { %v9446_v44 = vcombine.low %v15021_v9, %v15025_v34  ;;  %v2157_v6 = vrot.slane %v11949_v38, 5  ;;  %v18320_v40 = vshrl.u32 %v18319_v16, 16  ;;  %v18321_v42 = vshll.u32 %v18319_v16, 16 }
 0x1ce   :  { %v6540_v59 = vrot.slane %v18318_v54, 4  ;;  %v15064_v4 = vcombine.low %v6489_v49, %v6499_v25  ;;  %v6531_v21 = vor.u32 %v6530_v13, %v6527_v28  ;;  %v15066_v32 = vrot.slane %v6558_v20, 5  ;;  %v5609_v49 = vld [vmem:[%s17990_s2 + $0xe4] sm:$0xf]  ;;  %v11950_v28 = vld [vmem:[%s17990_s2 + $0xf4] sm:$0xf] }
 0x1cf   :  { %v6551_v55 = vrot.slane %v18320_v40, 4  ;;  %v6554_v39 = vrot.slane %v18321_v42, 5  ;;  %v18323_v7 = vshrl.u32 %v18322_v57, 16  ;;  %v6513_v53 = vsel %vm12240_vm5, %v6508_v62, %v14982_v46  ;;  %10541 = vmatmul.mubr.msk.bf16.gmra.mrb[40].mxu1 %vm990_vm4, %v9442_v17  ;;  %v11952_v25 = vld [vmem:[%s17988_s0 + $0x224] sm:$0xf] }
 0x1d0   :  { %v15075_v30 = vsel %vm12721_vm8, %v9414_v8, %v2150_v35  ;;  %v15079_v23 = vsel %vm12721_vm8, %v2152_v31, %v2153_v45  ;;  %v6582_v24 = vshll.u32 %v11950_v28, 16  ;;  %v6523_v46 = vsel %vm12240_vm5, %v6518_v11, %v6522_v60  ;;  %v11951_v8 = vld [vmem:[%s17988_s0 + $0x21c] sm:$0xf]  ;;  %10839 = vmatmul.mubr.msk.bf16.gmra.mrb[8].mxu0 %vm990_vm4, %v9783_v36  ;;  %10544 = vmatprep.mubr.msk.bf16.mxu1 %vm990_vm4, %v9443_v29  ;;  %v5612_v11 = vld [vmem:[%s17990_s2 + $0xf8] sm:$0xf]  ;;  %v18324_v60 = vld [vmem:[#allocation54_spill] sm:$0xff] }
 0x1d1   :  { %v6564_v5 = vrot.slane %v18323_v7, 4  ;;  %v6541_v13 = vor.u32 %v6540_v59, %v15048_v26  ;;  %v6544_v35 = vshll.u32 %v5606_v63, 16  ;;  %v9415_v37 = vrot.slane %v11951_v8, 9  ;;  %10842 = vmatprep.mubr.msk.bf16.mxu0 %vm990_vm4, %v14994_v33  ;;  %v18327_v33 = vld [vmem:[#allocation55_spill] sm:$0xff]  ;;  %v11955_v7 = vld [vmem:[%s17988_s0 + $0x238] sm:$0xf] }
 0x1d2   :  { %v2159_v20 = vrot.slane %v2157_v6, 4  ;;  %v2160_v62 = vrot.slane %v11952_v25, 5  ;;  %v6555_v31 = vor.u32 %v6554_v39, %v6551_v55  ;;  %v2164_v45 = vrot.slane %v11953_v27, 5  ;;  %v11954_v55 = vld [vmem:[%s17988_s0 + $0x230] sm:$0xf] }
 0x1d3   :  { %v9447_v41 = vcombine.low %v15075_v30, %v15079_v23  ;;  %v6532_v22 = vrot.slane %v6531_v21, 4  ;;  %v6565_v17 = vor.u32 %v6564_v5, %v15066_v32  ;;  %v6568_v36 = vshll.u32 %v5609_v49, 16  ;;  %v18342_v30 = vld [vmem:[#allocation61_spill] sm:$0xff] }
 0x1d4   :  { %v18325_v1 = vshrl.u32 %v18324_v60, 16  ;;  %v18326_v18 = vshll.u32 %v18324_v60, 16  ;;  %v15120_v29 = vrot.slane %v6582_v24, 5  ;;  %v18328_v59 = vshrl.u32 %v18327_v33, 16 }
 0x1d5   :  { %v6542_v38 = vrot.slane %v6541_v13, 4  ;;  %v6546_v16 = vrot.slane %v6544_v35, 5  ;;  %v15126_v40 = vsel %vm12721_vm8, %v9415_v37, %v2157_v6  ;;  %v9416_v42 = vrot.slane %v11954_v55, 9  ;;  %v11956_v37 = vld [vmem:[%s17988_s0 + $0x248] sm:$0xf] }
 0x1d6   :  { %v6575_v54 = vrot.slane %v18325_v1, 4  ;;  %v6578_v51 = vrot.slane %v18326_v18, 5  ;;  %v6588_v63 = vrot.slane %v18328_v59, 4  ;;  %v15133_v39 = vsel %vm12721_vm8, %v2159_v20, %v2160_v62 }
 0x1d7   :  { %v6556_v21 = vrot.slane %v6555_v31, 4  ;;  %v2166_v57 = vrot.slane %v2164_v45, 4  ;;  %v2167_v5 = vrot.slane %v11955_v7, 5  ;;  %v9787_v49 = vcombine.low %v6513_v53, %v6523_v46  ;;  %10545 = vmatmul.mubr.msk.bf16.gmra.mrb[44].mxu1 %vm990_vm4, %v9444_v12 }
 0x1d8   :  { %v6566_v28 = vrot.slane %v6565_v17, 4  ;;  %v6570_v6 = vrot.slane %v6568_v36, 5  ;;  %v6592_v24 = vshll.u32 %v5612_v11, 16  ;;  %v6537_v13 = vsel %vm12240_vm5, %v6532_v22, %v15048_v26  ;;  %v15156_v26 = vld [vmem:[%s17990_s2 + $0x108] sm:$0xf]  ;;  %10843 = vmatmul.mubr.msk.bf16.gmra.mrb[12].mxu0 %vm990_vm4, %v15003_v58  ;;  %10548 = vmatprep.mubr.msk.bf16.mxu1 %vm990_vm4, %v9445_v52 }
 0x1d9   :  { %v6579_v35 = vor.u32 %v6578_v51, %v6575_v54  ;;  %v6589_v8 = vor.u32 %v6588_v63, %v15120_v29  ;;  %v2171_v20 = vrot.slane %v11956_v37, 5  ;;  %v6547_v25 = vsel %vm12240_vm5, %v6542_v38, %v6546_v16  ;;  %10846 = vmatprep.mubr.msk.bf16.mxu0 %vm990_vm4, %v15064_v4  ;;  %v15199_v52 = vld [vmem:[%s17990_s2 + $0x10c] sm:$0xf]  ;;  %v18332_v51 = vld [vmem:[#allocation57_spill] sm:$0xff]  ;;  %v18334_v63 = vld [vmem:[#allocation58_spill] sm:$0xff] }
 0x1da   :  { %v9448_v53 = vcombine.low %v15126_v40, %v15133_v39  ;;  %v15151_v46 = vsel %vm12721_vm8, %v9416_v42, %v2164_v45  ;;  %v6606_v62 = vshll.u32 %v15156_v26, 16  ;;  %v6561_v31 = vsel %vm12240_vm5, %v6556_v21, %v15066_v32  ;;  %v11958_v45 = vld [vmem:[%s17988_s0 + $0x244] sm:$0xf]  ;;  %v18329_v32 = vld [vmem:[#allocation56_spill] sm:$0xff]  ;;  %v11961_v37 = vld [vmem:[%s17988_s0 + $0x25c] sm:$0xf] }
 0x1db   :  { %v15170_v27 = vsel %vm12721_vm8, %v2166_v57, %v2167_v5  ;;  %v9417_v22 = vrot.slane %v11958_v45, 9  ;;  %v6630_v61 = vshll.u32 %v15178_v43, 16  ;;  %v6571_v12 = vsel %vm12240_vm5, %v6566_v28, %v6570_v6  ;;  %v18337_v5 = vld [vmem:[#allocation59_spill] sm:$0xff] }
 0x1dc   :  { %v6594_v58 = vrot.slane %v6592_v24, 5  ;;  %v18330_v17 = vshrl.u32 %v18329_v32, 16  ;;  %v18331_v11 = vshll.u32 %v18329_v32, 16  ;;  %v6580_v1 = vrot.slane %v6579_v35, 4 }
 0x1dd   :  { %v6590_v54 = vrot.slane %v6589_v8, 4  ;;  %v2173_v18 = vrot.slane %v2171_v20, 4  ;;  %v2174_v19 = vrot.slane %v11960_v48, 5  ;;  %v15201_v4 = vrot.slane %v6606_v62, 5 }
 0x1de   :  { %v6599_v36 = vrot.slane %v18330_v17, 4  ;;  %v6602_v60 = vrot.slane %v18331_v11, 5  ;;  %v18333_v33 = vshrl.u32 %v18332_v51, 16  ;;  %v18335_v38 = vshrl.u32 %v18334_v63, 16 }
 0x1df   :  { %v18336_v55 = vshll.u32 %v18334_v63, 16  ;;  %v9788_v21 = vcombine.low %v6537_v13, %v6547_v25  ;;  %v9449_v57 = vcombine.low %v15151_v46, %v15170_v27  ;;  %v15211_v7 = vrot.slane %v6630_v61, 5  ;;  %v15222_v13 = vld [vmem:[%s17990_s2 + $0x120] sm:$0xf]  ;;  %v15238_v61 = vld [vmem:[%s17990_s2 + $0x130] sm:$0xf]  ;;  %10549 = vmatmul.mubr.msk.bf16.gmra.mrb[48].mxu1 %vm990_vm4, %v9446_v44 }
 0x1e0   :  { %v6612_v59 = vrot.slane %v18333_v33, 4  ;;  %v6623_v16 = vrot.slane %v18335_v38, 4  ;;  %v18338_v28 = vshrl.u32 %v18337_v5, 16  ;;  %v9789_v24 = vcombine.low %v6561_v31, %v6571_v12  ;;  %10847 = vmatmul.mubr.msk.bf16.gmra.mrb[16].mxu0 %vm990_vm4, %v9787_v49  ;;  %10552 = vmatprep.mubr.msk.bf16.mxu1 %vm990_vm4, %v9447_v41  ;;  %v11964_v49 = vld [vmem:[%s17988_s0 + $0x260] sm:$0xf] }
 0x1e1   :  { %v6626_v42 = vrot.slane %v18336_v55, 5  ;;  %v6603_v35 = vor.u32 %v6602_v60, %v6599_v36  ;;  %v6616_v8 = vshll.u32 %v15199_v52, 16  ;;  %v2178_v62 = vrot.slane %v11961_v37, 5  ;;  %10850 = vmatprep.mubr.msk.bf16.mxu0 %vm990_vm4, %v9788_v21 }
 0x1e2   :  { %v6636_v6 = vrot.slane %v18338_v28, 4  ;;  %v6585_v25 = vsel %vm12240_vm5, %v6580_v1, %v15120_v29  ;;  %v15229_v31 = vsel %vm12721_vm8, %v9417_v22, %v2171_v20  ;;  %v15233_v45 = vsel %vm12721_vm8, %v2173_v18, %v2174_v19  ;;  %v11963_v20 = vld [vmem:[%s17988_s0 + $0x258] sm:$0xf]  ;;  %v15269_v19 = vld [vmem:[%s17990_s2 + $0x134] sm:$0xf] }
 0x1e3   :  { %v6654_v12 = vshll.u32 %v15238_v61, 16  ;;  %v6595_v32 = vsel %vm12240_vm5, %v6590_v54, %v6594_v58  ;;  %v6613_v29 = vor.u32 %v6612_v59, %v15201_v4  ;;  %v9418_v22 = vrot.slane %v11963_v20, 9  ;;  %v18339_v58 = vld [vmem:[#allocation60_spill] sm:$0xff]  ;;  %v15278_v59 = vld [vmem:[%s17990_s2 + $0x144] sm:$0xf] }
 0x1e4   :  { %v6627_v17 = vor.u32 %v6626_v42, %v6623_v16  ;;  %v6637_v36 = vor.u32 %v6636_v6, %v15211_v7  ;;  %v6640_v11 = vshll.u32 %v15222_v13, 16  ;;  %v18340_v60 = vshrl.u32 %v18339_v58, 16  ;;  %v11966_v42 = vld [vmem:[%s17988_s0 + $0x270] sm:$0xf] }
 0x1e5   :  { %v18341_v54 = vshll.u32 %v18339_v58, 16  ;;  %v6604_v9 = vrot.slane %v6603_v35, 4  ;;  %v6618_v34 = vrot.slane %v6616_v8, 5  ;;  %v2180_v44 = vrot.slane %v2178_v62, 4  ;;  %v15311_v58 = vld [vmem:[%s17990_s2 + $0x158] sm:$0xf] }
 0x1e6   :  { %v6647_v1 = vrot.slane %v18340_v60, 4  ;;  %v2181_v48 = vrot.slane %v11964_v49, 5  ;;  %v9790_v51 = vcombine.low %v6585_v25, %v6595_v32  ;;  %v15271_v33 = vrot.slane %v6654_v12, 5 }
 0x1e7   :  { %v6650_v18 = vrot.slane %v18341_v54, 5  ;;  %v18343_v23 = vshrl.u32 %v18342_v30, 16  ;;  %v6678_v63 = vshll.u32 %v15278_v59, 16  ;;  %v6614_v38 = vrot.slane %v6613_v29, 4  ;;  %v11968_v54 = vld [vmem:[%s17988_s0 + $0x26c] sm:$0xf]  ;;  %10553 = vmatmul.mubr.msk.bf16.gmra.mrb[52].mxu1 %vm990_vm4, %v9448_v53 }
 0x1e8   :  { %v15283_v16 = vsel %vm12721_vm8, %v9418_v22, %v2178_v62  ;;  %v6628_v55 = vrot.slane %v6627_v17, 4  ;;  %v2185_v21 = vrot.slane %v11966_v42, 5  ;;  %v6638_v5 = vrot.slane %v6637_v36, 4  ;;  %v18344_v62 = vld [vmem:[#allocation62_spill] sm:$0xff]  ;;  %v15302_v22 = vld [vmem:[%s17990_s2 + $0x148] sm:$0xf]  ;;  %10851 = vmatmul.mubr.msk.bf16.gmra.mrb[20].mxu0 %vm990_vm4, %v9789_v24  ;;  %10556 = vmatprep.mubr.msk.bf16.mxu1 %vm990_vm4, %v9449_v57 }
 0x1e9   :  { %v6660_v41 = vrot.slane %v18343_v23, 4  ;;  %v6642_v28 = vrot.slane %v6640_v11, 5  ;;  %v6651_v6 = vor.u32 %v6650_v18, %v6647_v1  ;;  %v6664_v35 = vshll.u32 %v15269_v19, 16  ;;  %v18347_v36 = vld [vmem:[#allocation63_spill] sm:$0xff]  ;;  %10854 = vmatprep.mubr.msk.bf16.mxu0 %vm990_vm4, %v9790_v51  ;;  %v18349_v53 = vld [vmem:[#allocation64_spill] sm:$0xff] }
 0x1ea   :  { %v6609_v8 = vsel %vm12240_vm5, %v6604_v9, %v15201_v4  ;;  %v2182_v37 = vsel %vm12721_vm8, %v2180_v44, %v2181_v48  ;;  %v18345_v25 = vshrl.u32 %v18344_v62, 16  ;;  %v18346_v32 = vshll.u32 %v18344_v62, 16  ;;  %v11969_v44 = vld [vmem:[%s17988_s0 + $0x274] sm:$0xf] }
 0x1eb   :  { %v6661_v20 = vor.u32 %v6660_v41, %v15271_v33  ;;  %v15304_v17 = vrot.slane %v6678_v63, 5  ;;  %v18348_v4 = vshrl.u32 %v18347_v36, 16  ;;  %v6702_v60 = vshll.u32 %v15311_v58, 16 }
 0x1ec   :  { %v6671_v12 = vrot.slane %v18345_v25, 4  ;;  %v6674_v29 = vrot.slane %v18346_v32, 5  ;;  %v6619_v1 = vsel %vm12240_vm5, %v6614_v38, %v6618_v34  ;;  %v9419_v18 = vrot.slane %v11968_v54, 9 }
 0x1ed   :  { %v6684_v11 = vrot.slane %v18348_v4, 4  ;;  %v2187_v9 = vrot.slane %v2185_v21, 4  ;;  %v2188_v49 = vrot.slane %v11969_v44, 5  ;;  %v6633_v34 = vsel %vm12240_vm5, %v6628_v55, %v15211_v7 }
 0x1ee   :  { %v6643_v48 = vsel %vm12240_vm5, %v6638_v5, %v6642_v28  ;;  %v6652_v30 = vrot.slane %v6651_v6, 4  ;;  %v6666_v23 = vrot.slane %v6664_v35, 5  ;;  %v6675_v40 = vor.u32 %v6674_v29, %v6671_v12  ;;  %v18352_v5 = vld [vmem:[#allocation65_spill] sm:$0xff]  ;;  %v15359_v35 = vld [vmem:[%s17990_s2 + $0x16c] sm:$0xf] }
 0x1ef   :  { %v6688_v39 = vshll.u32 %v15302_v22, 16  ;;  %v18350_v24 = vshrl.u32 %v18349_v53, 16  ;;  %v18351_v7 = vshll.u32 %v18349_v53, 16  ;;  %v6662_v38 = vrot.slane %v6661_v20, 4  ;;  %v15354_v6 = vld [vmem:[%s17990_s2 + $0x15c] sm:$0xf] }
 0x1f0   :  { %v6685_v55 = vor.u32 %v6684_v11, %v15304_v17  ;;  %v15343_v42 = vrot.slane %v6702_v60, 5  ;;  %v18353_v46 = vshrl.u32 %v18352_v5, 16  ;;  %v6922_v57 = vshrl.u32 %v14400_v10, 16  ;;  %v18355_v11 = vld [vmem:[#allocation66_spill] sm:$0xff] }
 0x1f1   :  { %v6695_v41 = vrot.slane %v18350_v24, 4  ;;  %v6698_v63 = vrot.slane %v18351_v7, 5  ;;  %v9450_v51 = vcombine.low %v15229_v31, %v15233_v45  ;;  %v9451_v28 = vcombine.low %v15283_v16, %v2182_v37 }
 0x1f2   :  { %v6708_v27 = vrot.slane %v18353_v46, 4  ;;  %v6726_v62 = vshll.u32 %v15359_v35, 16  ;;  %v9791_v25 = vcombine.low %v6609_v8, %v6619_v1  ;;  %v9792_v12 = vcombine.low %v6633_v34, %v6643_v48 }
 0x1f3   :  { %v2186_v32 = vsel %vm12721_vm8, %v9419_v18, %v2185_v21  ;;  %v2189_v31 = vsel %vm12721_vm8, %v2187_v9, %v2188_v49  ;;  %v6657_v45 = vsel %vm12240_vm5, %v6652_v30, %v15271_v33  ;;  %v6676_v16 = vrot.slane %v6675_v40, 4  ;;  %v15376_v21 = vld [vmem:[%s17990_s2 + $0x170] sm:$0xf]  ;;  %v18358_v9 = vld [vmem:[#allocation67_spill] sm:$0xff]  ;;  %10557 = vmatmul.mubr.msk.bf16.gmra.mrb[56].mxu1 %vm990_vm4, %v9450_v51 }
 0x1f4   :  { %v6690_v37 = vrot.slane %v6688_v39, 5  ;;  %v6699_v29 = vor.u32 %v6698_v63, %v6695_v41  ;;  %v6667_v20 = vsel %vm12240_vm5, %v6662_v38, %v6666_v23  ;;  %v6686_v36 = vrot.slane %v6685_v55, 4  ;;  %18354 = vst [vmem:[#allocation6_spill] sm:$0xff] %v15376_v21  ;;  %10855 = vmatmul.mubr.msk.bf16.gmra.mrb[24].mxu0 %vm990_vm4, %v9791_v25  ;;  %v11971_v23 = vld [vmem:[%s17990_s2 + $0x180] sm:$0xf]  ;;  %10560 = vmatprep.mubr.msk.bf16.mxu1 %vm990_vm4, %v9451_v28  ;;  %v18360_v51 = vld [vmem:[#allocation68_spill] sm:$0xff] }
 0x1f5   :  { %v6709_v8 = vor.u32 %v6708_v27, %v15343_v42  ;;  %v6712_v4 = vshll.u32 %v15354_v6, 16  ;;  %v18356_v60 = vshrl.u32 %v18355_v11, 16  ;;  %v18357_v33 = vshll.u32 %v18355_v11, 16  ;;  %10858 = vmatprep.mubr.msk.bf16.mxu0 %vm990_vm4, %v9792_v12  ;;  %v11972_v41 = vld [vmem:[%s17990_s2 + $0x194] sm:$0xf] }
 0x1f6   :  { %v15382_v18 = vrot.slane %v6726_v62, 5  ;;  %v18359_v44 = vshrl.u32 %v18358_v9, 16  ;;  %v6933_v34 = vshrl.u32 %v14428_v56, 16  ;;  %v6936_v48 = vshll.u32 %v14428_v56, 16  ;;  %v5633_v12 = vld [vmem:[%s17990_s2 + $0x184] sm:$0xf] }
 0x1f7   :  { %v6719_v1 = vrot.slane %v18356_v60, 4  ;;  %v6722_v54 = vrot.slane %v18357_v33, 5  ;;  %v9452_v30 = vcombine.low %v2186_v32, %v2189_v31  ;;  %v6750_v40 = vshll.u32 %v11971_v23, 16  ;;  %v18363_v31 = vld [vmem:[#allocation69_spill] sm:$0xff]  ;;  %v11974_v11 = vld [vmem:[%s17989_s1 + $0x4] sm:$0xf] }
 0x1f8   :  { %v6732_v49 = vrot.slane %v18359_v44, 4  ;;  %v9793_v39 = vcombine.low %v6657_v45, %v6667_v20  ;;  %v6681_v53 = vsel %vm12240_vm5, %v6676_v16, %v15304_v17  ;;  %v6700_v24 = vrot.slane %v6699_v29, 4  ;;  %v5636_v33 = vld [vmem:[%s17990_s2 + $0x198] sm:$0xf]  ;;  %v18368_v9 = vld [vmem:[#allocation71_spill] sm:$0xff] }
 0x1f9   :  { %v6774_v7 = vshll.u32 %v11972_v41, 16  ;;  %v6691_v63 = vsel %vm12240_vm5, %v6686_v36, %v6690_v37  ;;  %v6710_v38 = vrot.slane %v6709_v8, 4  ;;  %v6714_v55 = vrot.slane %v6712_v4, 5  ;;  %v18365_v37 = vld [vmem:[#allocation70_spill] sm:$0xff] }
 0x1fa   :  { %v6736_v5 = vshll.u32 %v15376_v21, 16  ;;  %v6723_v46 = vor.u32 %v6722_v54, %v6719_v1  ;;  %v6733_v27 = vor.u32 %v6732_v49, %v15382_v18  ;;  %v18361_v28 = vshrl.u32 %v18360_v51, 16  ;;  %v11973_v4 = vld [vmem:[%s17989_s1] sm:$0xf]  ;;  %v12082_v21 = vld [vmem:[%s17990_s2 + $0xf0] sm:$0xf] }
 0x1fb   :  { %v18362_v17 = vshll.u32 %v18360_v51, 16  ;;  %v15412_v32 = vrot.slane %v6750_v40, 5  ;;  %v18364_v45 = vshrl.u32 %v18363_v31, 16  ;;  %v18366_v29 = vshrl.u32 %v18365_v37, 16  ;;  %10561 = vmatmul.mubr.msk.bf16.gmra.mrb[60].mxu1 %vm990_vm4, %v9452_v30  ;;  %v11978_v30 = vld [vmem:[%s17989_s1 + $0x28] sm:$0xf] }
 0x1fc   :  { %v6743_v62 = vrot.slane %v18361_v28, 4  ;;  %v18367_v36 = vshll.u32 %v18365_v37, 16  ;;  %v9486_v60 = vcombine.low %v11973_v4, %v11974_v11  ;;  %v9794_v1 = vcombine.low %v6681_v53, %v6691_v63  ;;  %v11975_v53 = vld [vmem:[%s17990_s2 + $0x1a8] sm:$0xf]  ;;  %10859 = vmatmul.mubr.msk.bf16.gmra.mrb[28].mxu0 %vm990_vm4, %v9793_v39  ;;  %v11979_v39 = vld [vmem:[%s17989_s1 + $0x2c] sm:$0xf] }
 0x1fd   :  { %v6746_v25 = vrot.slane %v18362_v17, 5  ;;  %v6756_v16 = vrot.slane %v18364_v45, 4  ;;  %v6767_v20 = vrot.slane %v18366_v29, 4  ;;  %v15429_v54 = vrot.slane %v6774_v7, 5  ;;  %v11980_v11 = vld [vmem:[%s17990_s2 + $0x1bc] sm:$0xf] }
 0x1fe   :  { %v6770_v8 = vrot.slane %v18367_v36, 5  ;;  %v18369_v44 = vshrl.u32 %v18368_v9, 16  ;;  %v6705_v23 = vsel %vm12240_vm5, %v6700_v24, %v15343_v42  ;;  %v6715_v40 = vsel %vm12240_vm5, %v6710_v38, %v6714_v55  ;;  %v11976_v42 = vld [vmem:[%s17989_s1 + $0x14] sm:$0xf]  ;;  %v11977_v24 = vld [vmem:[%s17989_s1 + $0x18] sm:$0xf]  ;;  %10566 = vmatprep.mubr.msk.bf16.mxu1 %vm990_vm4, %v9486_v60  ;;  %10862 = vmatprep.mubr.msk.bf16.mxu0 %vm990_vm4, %v9794_v1 }
 0x1ff   :  { %v6738_v41 = vrot.slane %v6736_v5, 5  ;;  %v6798_v63 = vshll.u32 %v11975_v53, 16  ;;  %v6724_v51 = vrot.slane %v6723_v46, 4  ;;  %v6734_v28 = vrot.slane %v6733_v27, 4  ;;  %v18373_v36 = vld [vmem:[#allocation73_spill] sm:$0xff] }
 0x200   :  { %v6780_v49 = vrot.slane %v18369_v44, 4  ;;  %v6747_v7 = vor.u32 %v6746_v25, %v6743_v62  ;;  %v6760_v17 = vshll.u32 %v5633_v12, 16  ;;  %v9487_v38 = vcombine.low %v11976_v42, %v11977_v24  ;;  %v5639_v25 = vld [vmem:[%s17990_s2 + $0x1ac] sm:$0xf]  ;;  %v18370_v12 = vld [vmem:[#allocation72_spill] sm:$0xff]  ;;  %v18375_v24 = vld [vmem:[#allocation74_spill] sm:$0xff] }
 0x201   :  { %v6757_v55 = vor.u32 %v6756_v16, %v15412_v32  ;;  %v6771_v5 = vor.u32 %v6770_v8, %v6767_v20  ;;  %v6784_v46 = vshll.u32 %v5636_v33, 16  ;;  %v9488_v27 = vcombine.low %v11978_v30, %v11979_v39 }
 0x202   :  { %v6781_v62 = vor.u32 %v6780_v49, %v15429_v54  ;;  %v18371_v31 = vshrl.u32 %v18370_v12, 16  ;;  %v18372_v16 = vshll.u32 %v18370_v12, 16  ;;  %v9795_v29 = vcombine.low %v6705_v23, %v6715_v40 }
 0x203   :  { %v15466_v20 = vrot.slane %v6798_v63, 5  ;;  %v18374_v8 = vshrl.u32 %v18373_v36, 16  ;;  %v6822_v60 = vshll.u32 %v11980_v11, 16  ;;  %v6729_v1 = vsel %vm12240_vm5, %v6724_v51, %v15382_v18  ;;  %10567 = vmatmul.mubr.msk.bf16.vlgmr.msra.gmra.mrb[0].mxu1 %vm990_vm4, %v9487_v38 }
 0x204   :  { %v6791_v45 = vrot.slane %v18371_v31, 4  ;;  %v6794_v37 = vrot.slane %v18372_v16, 5  ;;  %v6739_v33 = vsel %vm12240_vm5, %v6734_v28, %v6738_v41  ;;  %v6748_v9 = vrot.slane %v6747_v7, 4  ;;  %v5642_v41 = vld [vmem:[%s17990_s2 + $0x1c0] sm:$0xf]  ;;  %v18378_v28 = vld [vmem:[#allocation75_spill] sm:$0xff]  ;;  %10863 = vmatmul.mubr.msk.bf16.gmra.mrb[32].mxu0 %vm990_vm4, %v9795_v29  ;;  %10570 = vmatprep.mubr.msk.bf16.mxu1 %vm990_vm4, %v9488_v27 }
 0x205   :  { %v6804_v4 = vrot.slane %v18374_v8, 4  ;;  %v6762_v44 = vrot.slane %v6760_v17, 5  ;;  %v6758_v49 = vrot.slane %v6757_v55, 4  ;;  %v6772_v23 = vrot.slane %v6771_v5, 4  ;;  %v15493_v55 = vld [vmem:[%s17990_s2 + $0x220] sm:$0xf] }
 0x206   :  { %v6786_v40 = vrot.slane %v6784_v46, 5  ;;  %v6808_v53 = vshll.u32 %v5639_v25, 16  ;;  %v6782_v63 = vrot.slane %v6781_v62, 4  ;;  %v6795_v42 = vor.u32 %v6794_v37, %v6791_v45  ;;  %v11982_v46 = vld [vmem:[%s17989_s1 + $0x3c] sm:$0xf] }
 0x207   :  { %v18376_v30 = vshrl.u32 %v18375_v24, 16  ;;  %v18377_v12 = vshll.u32 %v18375_v24, 16  ;;  %v9796_v16 = vcombine.low %v6729_v1, %v6739_v33  ;;  %v6805_v18 = vor.u32 %v6804_v4, %v15466_v20  ;;  %v11983_v62 = vld [vmem:[%s17989_s1 + $0x40] sm:$0xf]  ;;  %v11984_v37 = vld [vmem:[%s17990_s2 + $0x1d0] sm:$0xf] }
 0x208   :  { %v15486_v51 = vrot.slane %v6822_v60, 5  ;;  %v18379_v7 = vshrl.u32 %v18378_v28, 16  ;;  %v6946_v5 = vshrl.u32 %v15493_v55, 16  ;;  %v9489_v25 = vcombine.low %v11982_v46, %v11983_v62  ;;  %v18380_v1 = vld [vmem:[#allocation2_spill] sm:$0xff]  ;;  %v11986_v27 = vld [vmem:[%s17989_s1 + $0x50] sm:$0xf] }
 0x209   :  { %v6815_v39 = vrot.slane %v18376_v30, 4  ;;  %v6818_v31 = vrot.slane %v18377_v12, 5  ;;  %v6753_v45 = vsel %vm12240_vm5, %v6748_v9, %v15412_v32  ;;  %v6846_v36 = vshll.u32 %v11984_v37, 16  ;;  %v11985_v32 = vld [vmem:[%s17990_s2 + $0x1e4] sm:$0xf]  ;;  %10961 = vmatpush3.bf16.msra.mxu1 %v18380_v1  ;;  %10866 = vmatprep.mubr.msk.bf16.mxu0 %vm990_vm4, %v9796_v16  ;;  %v18389_v37 = vld [vmem:[#allocation79_spill] sm:$0xff] }
 0x20a   :  { %v6828_v17 = vrot.slane %v18379_v7, 4  ;;  %v6763_v8 = vsel %vm12240_vm5, %v6758_v49, %v6762_v44  ;;  %v6777_v4 = vsel %vm12240_vm5, %v6772_v23, %v15429_v54  ;;  %v6810_v11 = vrot.slane %v6808_v53, 5  ;;  %v18381_v49 = vld [vmem:[#allocation76_spill] sm:$0xff]  ;;  %v18386_v28 = vld [vmem:[#allocation78_spill] sm:$0xff] }
 0x20b   :  { %v6870_v60 = vshll.u32 %v11985_v32, 16  ;;  %v6787_v38 = vsel %vm12240_vm5, %v6782_v63, %v6786_v40  ;;  %v6796_v29 = vrot.slane %v6795_v42, 4  ;;  %v6819_v33 = vor.u32 %v6818_v31, %v6815_v39  ;;  %v11987_v40 = vld [vmem:[%s17989_s1 + $0x54] sm:$0xf]  ;;  %v18384_v31 = vld [vmem:[#allocation77_spill] sm:$0xff]  ;;  %10571 = vmatmul.mubr.msk.bf16.gmra.mrb[4].mxu1 %vm990_vm4, %v9489_v25 }
 0x20c   :  { %v6832_v9 = vshll.u32 %v5642_v41, 16  ;;  %v6806_v44 = vrot.slane %v6805_v18, 4  ;;  %v6829_v54 = vor.u32 %v6828_v17, %v15486_v51  ;;  %v18382_v23 = vshrl.u32 %v18381_v49, 16  ;;  %v5645_v42 = vld [vmem:[%s17990_s2 + $0x1d4] sm:$0xf] }
 0x20d   :  { %v18383_v24 = vshll.u32 %v18381_v49, 16  ;;  %v9797_v12 = vcombine.low %v6753_v45, %v6763_v8  ;;  %v9490_v63 = vcombine.low %v11986_v27, %v11987_v40  ;;  %v15537_v39 = vrot.slane %v6846_v36, 5  ;;  %v5648_v41 = vld [vmem:[%s17990_s2 + $0x1e8] sm:$0xf]  ;;  %v11992_v25 = vld [vmem:[%s17989_s1 + $0x64] sm:$0xf] }
 0x20e   :  { %v6839_v53 = vrot.slane %v18382_v23, 4  ;;  %v18385_v16 = vshrl.u32 %v18384_v31, 16  ;;  %v18387_v7 = vshrl.u32 %v18386_v28, 16  ;;  %v18388_v46 = vshll.u32 %v18386_v28, 16 }
 0x20f   :  { %v6842_v30 = vrot.slane %v18383_v24, 5  ;;  %v15548_v45 = vrot.slane %v6870_v60, 5  ;;  %v18390_v8 = vshrl.u32 %v18389_v37, 16  ;;  %v9798_v36 = vcombine.low %v6777_v4, %v6787_v38  ;;  %v15560_v60 = vld [vmem:[%s17990_s2 + $0x230] sm:$0xf]  ;;  %10867 = vmatmul.mubr.msk.bf16.gmra.mrb[36].mxu0 %vm990_vm4, %v9797_v12  ;;  %10574 = vmatprep.mubr.msk.bf16.mxu1 %vm990_vm4, %v9490_v63 }
 0x210   :  { %v6852_v18 = vrot.slane %v18385_v16, 4  ;;  %v6863_v17 = vrot.slane %v18387_v7, 4  ;;  %v6866_v62 = vrot.slane %v18388_v46, 5  ;;  %v6801_v1 = vsel %vm12240_vm5, %v6796_v29, %v15466_v20  ;;  %v15568_v29 = vld [vmem:[%s17990_s2 + $0x234] sm:$0xf] }
 0x211   :  { %v6876_v32 = vrot.slane %v18390_v8, 4  ;;  %v6820_v49 = vrot.slane %v6819_v33, 4  ;;  %v6834_v23 = vrot.slane %v6832_v9, 5  ;;  %v6811_v24 = vsel %vm12240_vm5, %v6806_v44, %v6810_v11  ;;  %v11990_v44 = vld [vmem:[%s17990_s2 + $0x1f8] sm:$0xf]  ;;  %10870 = vmatprep.mubr.msk.bf16.mxu0 %vm990_vm4, %v9798_v36 }
 0x212   :  { %v6830_v27 = vrot.slane %v6829_v54, 4  ;;  %v6843_v40 = vor.u32 %v6842_v30, %v6839_v53  ;;  %v6856_v31 = vshll.u32 %v5645_v42, 16  ;;  %v6957_v16 = vshrl.u32 %v15560_v60, 16  ;;  %v15580_v53 = vld [vmem:[%s17990_s2 + $0x244] sm:$0xf] }
 0x213   :  { %v6960_v4 = vshll.u32 %v15560_v60, 16  ;;  %v6853_v38 = vor.u32 %v6852_v18, %v15537_v39  ;;  %v6880_v20 = vshll.u32 %v5648_v41, 16  ;;  %v6970_v11 = vshrl.u32 %v15568_v29, 16  ;;  %v11993_v12 = vld [vmem:[%s17989_s1 + $0x68] sm:$0xf] }
 0x214   :  { %v6867_v33 = vor.u32 %v6866_v62, %v6863_v17  ;;  %v6877_v9 = vor.u32 %v6876_v32, %v15548_v45  ;;  %v6894_v54 = vshll.u32 %v11990_v44, 16  ;;  %v6981_v30 = vshrl.u32 %v15580_v53, 16  ;;  %v11994_v17 = vld [vmem:[%s17990_s2 + $0x20c] sm:$0xf] }
 0x215   :  { %v9491_v42 = vcombine.low %v11992_v25, %v11993_v12  ;;  %v9799_v18 = vcombine.low %v6801_v1, %v6811_v24  ;;  %v6825_v41 = vsel %vm12240_vm5, %v6820_v49, %v15486_v51  ;;  %v6835_v28 = vsel %vm12240_vm5, %v6830_v27, %v6834_v23  ;;  %v5651_v49 = vld [vmem:[%s17990_s2 + $0x1fc] sm:$0xf] }
 0x216   :  { %v6844_v63 = vrot.slane %v6843_v40, 4  ;;  %v6858_v7 = vrot.slane %v6856_v31, 5  ;;  %v6918_v46 = vshll.u32 %v11994_v17, 16  ;;  %v6854_v62 = vrot.slane %v6853_v38, 4  ;;  %v15614_v38 = vld [vmem:[%s17990_s2 + $0x248] sm:$0xf] }
 0x217   :  { %v6882_v37 = vrot.slane %v6880_v20, 5  ;;  %v18391_v8 = vshrl.u32 %v14347_v0, 16  ;;  %v18392_v36 = vshll.u32 %v14347_v0, 16  ;;  %v6868_v24 = vrot.slane %v6867_v33, 4  ;;  %v11996_v20 = vld [vmem:[%s17989_s1 + $0x78] sm:$0xf]  ;;  %10575 = vmatmul.mubr.msk.bf16.gmra.mrb[8].mxu1 %vm990_vm4, %v9491_v42  ;;  %10871 = vmatmul.mubr.msk.bf16.gmra.mrb[40].mxu0 %vm990_vm4, %v9799_v18 }
 0x218   :  { %v6878_v51 = vrot.slane %v6877_v9, 4  ;;  %v15606_v23 = vrot.slane %v6894_v54, 5  ;;  %v18393_v27 = vshrl.u32 %v14355_v15, 16  ;;  %v6984_v31 = vshll.u32 %v15580_v53, 16  ;;  %v11997_v33 = vld [vmem:[%s17989_s1 + $0x7c] sm:$0xf] }
 0x219   :  { %v6887_v32 = vrot.slane %v18391_v8, 4  ;;  %v6890_v1 = vrot.slane %v18392_v36, 5  ;;  %v6994_v0 = vshrl.u32 %v15614_v38, 16  ;;  %v9492_v9 = vcombine.low %v11996_v20, %v11997_v33  ;;  %v12000_v18 = vld [vmem:[%s17989_s1 + $0x90] sm:$0xf] }
 0x21a   :  { %v6900_v40 = vrot.slane %v18393_v27, 4  ;;  %v9800_v15 = vcombine.low %v6825_v41, %v6835_v28  ;;  %v6911_v44 = vrot.slane %v6909_v14, 4  ;;  %v6914_v54 = vrot.slane %v6912_v47, 5  ;;  %v5654_v14 = vld [vmem:[%s17990_s2 + $0x210] sm:$0xf] }
 0x21b   :  { %v15627_v25 = vrot.slane %v6918_v46, 5  ;;  %v6924_v12 = vrot.slane %v6922_v57, 4  ;;  %v6849_v17 = vsel %vm12240_vm5, %v6844_v63, %v15537_v39  ;;  %v6859_v8 = vsel %vm12240_vm5, %v6854_v62, %v6858_v7  ;;  %v15651_v39 = vld [vmem:[%s17990_s2 + $0x258] sm:$0xf]  ;;  %10578 = vmatprep.mubr.msk.bf16.mxu1 %vm990_vm4, %v9492_v9  ;;  %v12001_v63 = vld [vmem:[%s17989_s1 + $0xa0] sm:$0xf] }
 0x21c   :  { %v6891_v36 = vor.u32 %v6890_v1, %v6887_v32  ;;  %v6904_v41 = vshll.u32 %v5651_v49, 16  ;;  %v6873_v50 = vsel %vm12240_vm5, %v6868_v24, %v15548_v45  ;;  %v6883_v10 = vsel %vm12240_vm5, %v6878_v51, %v6882_v37  ;;  %10874 = vmatprep.mubr.msk.bf16.mxu0 %vm990_vm4, %v9800_v15  ;;  %v11999_v45 = vld [vmem:[%s17989_s1 + $0x8c] sm:$0xf]  ;;  %v12002_v7 = vld [vmem:[%s17989_s1 + $0xa4] sm:$0xf] }
 0x21d   :  { %v6901_v47 = vor.u32 %v6900_v40, %v15606_v23  ;;  %v6942_v57 = vshll.u32 %v15493_v55, 16  ;;  %v7005_v42 = vshrl.u32 %v15651_v39, 16  ;;  %v9493_v28 = vcombine.low %v11999_v45, %v12000_v18  ;;  %v5657_v33 = vld [vmem:[%s17990_s2 + $0x224] sm:$0xf]  ;;  %v5660_v55 = vld [vmem:[%s17990_s2 + $0x238] sm:$0xf] }
 0x21e   :  { %v9494_v46 = vcombine.low %v12001_v63, %v12002_v7  ;;  %v6966_v62 = vshll.u32 %v15568_v29, 16  ;;  %v9801_v37 = vcombine.low %v6849_v17, %v6859_v8  ;;  %v6915_v32 = vor.u32 %v6914_v54, %v6911_v44  ;;  %v12007_v63 = vld [vmem:[%s17989_s1 + $0xc8] sm:$0xf]  ;;  %v12008_v7 = vld [vmem:[%s17989_s1 + $0xcc] sm:$0xf] }
 0x21f   :  { %v6925_v1 = vor.u32 %v6924_v12, %v15627_v25  ;;  %v6928_v24 = vshll.u32 %v5654_v14, 16  ;;  %v9802_v51 = vcombine.low %v6873_v50, %v6883_v10  ;;  %v6892_v49 = vrot.slane %v6891_v36, 4  ;;  %10579 = vmatmul.mubr.msk.bf16.gmra.mrb[12].mxu1 %vm990_vm4, %v9493_v28 }
 0x220   :  { %v6906_v27 = vrot.slane %v6904_v41, 5  ;;  %v6935_v40 = vrot.slane %v6933_v34, 4  ;;  %v6902_v20 = vrot.slane %v6901_v47, 4  ;;  %v6938_v9 = vrot.slane %v6936_v48, 5  ;;  %10875 = vmatmul.mubr.msk.bf16.gmra.mrb[44].mxu0 %vm990_vm4, %v9801_v37  ;;  %10582 = vmatprep.mubr.msk.bf16.mxu1 %vm990_vm4, %v9494_v46  ;;  %v12006_v47 = vld [vmem:[%s17989_s1 + $0xb8] sm:$0xf] }
 0x221   :  { %v15677_v15 = vrot.slane %v6942_v57, 5  ;;  %v6948_v44 = vrot.slane %v6946_v5, 4  ;;  %v6959_v54 = vrot.slane %v6957_v16, 4  ;;  %v6962_v12 = vrot.slane %v6960_v4, 5  ;;  %v12003_v5 = vld [vmem:[%s17990_s2 + $0x25c] sm:$0xf]  ;;  %10878 = vmatprep.mubr.msk.bf16.mxu0 %vm990_vm4, %v9802_v51 }
 0x222   :  { %v15685_v34 = vrot.slane %v6966_v62, 5  ;;  %v6972_v17 = vrot.slane %v6970_v11, 4  ;;  %v7008_v8 = vshll.u32 %v15651_v39, 16  ;;  %v6916_v56 = vrot.slane %v6915_v32, 4  ;;  %v15699_v16 = vld [vmem:[%s17990_s2 + $0x26c] sm:$0xf] }
 0x223   :  { %v6926_v48 = vrot.slane %v6925_v1, 4  ;;  %v6930_v36 = vrot.slane %v6928_v24, 5  ;;  %v7018_v60 = vshrl.u32 %v12003_v5, 16  ;;  %v7029_v4 = vshrl.u32 %v15699_v16, 16 }
 0x224   :  { %v6897_v29 = vsel %vm12240_vm5, %v6892_v49, %v15606_v23  ;;  %v6952_v11 = vshll.u32 %v5657_v33, 16  ;;  %v6907_v41 = vsel %vm12240_vm5, %v6902_v20, %v6906_v27  ;;  %v6939_v14 = vor.u32 %v6938_v9, %v6935_v40  ;;  %v12005_v23 = vld [vmem:[%s17989_s1 + $0xb4] sm:$0xf]  ;;  %v5663_v20 = vld [vmem:[%s17990_s2 + $0x24c] sm:$0xf] }
 0x225   :  { %v6949_v50 = vor.u32 %v6948_v44, %v15677_v15  ;;  %v6990_v10 = vshll.u32 %v15614_v38, 16  ;;  %v9495_v57 = vcombine.low %v12005_v23, %v12006_v47  ;;  %v6963_v45 = vor.u32 %v6962_v12, %v6959_v54 }
 0x226   :  { %v6973_v18 = vor.u32 %v6972_v17, %v15685_v34  ;;  %v6976_v28 = vshll.u32 %v5660_v55, 16  ;;  %v9496_v46 = vcombine.low %v12007_v63, %v12008_v7  ;;  %v6921_v62 = vsel %vm12240_vm5, %v6916_v56, %v15627_v25  ;;  %v5666_v55 = vld [vmem:[%s17990_s2 + $0x260] sm:$0xf] }
 0x227   :  { %v6931_v37 = vsel %vm12240_vm5, %v6926_v48, %v6930_v36  ;;  %v7014_v32 = vshll.u32 %v12003_v5, 16  ;;  %v9803_v1 = vcombine.low %v6897_v29, %v6907_v41  ;;  %v6954_v24 = vrot.slane %v6952_v11, 5  ;;  %v12009_v48 = vld [vmem:[%s17990_s2 + $0x270] sm:$0xf]  ;;  %10583 = vmatmul.mubr.msk.bf16.gmra.mrb[16].mxu1 %vm990_vm4, %v9495_v57  ;;  %v12011_v29 = vld [vmem:[%s17989_s1 + $0xe0] sm:$0xf] }
 0x228   :  { %v6983_v51 = vrot.slane %v6981_v30, 4  ;;  %v6986_v49 = vrot.slane %v6984_v31, 5  ;;  %v6940_v27 = vrot.slane %v6939_v14, 4  ;;  %v6950_v40 = vrot.slane %v6949_v50, 4  ;;  %10586 = vmatprep.mubr.msk.bf16.mxu1 %vm990_vm4, %v9496_v46  ;;  %v12013_v46 = vld [vmem:[%s17989_s1 + $0xf4] sm:$0xf] }
 0x229   :  { %v15738_v33 = vrot.slane %v6990_v10, 5  ;;  %v6996_v25 = vrot.slane %v6994_v0, 4  ;;  %v9804_v9 = vcombine.low %v6921_v62, %v6931_v37  ;;  %v6964_v44 = vrot.slane %v6963_v45, 4  ;;  %10879 = vmatmul.mubr.msk.bf16.gmra.mrb[48].mxu0 %vm990_vm4, %v9803_v1 }
 0x22a   :  { %v6974_v54 = vrot.slane %v6973_v18, 4  ;;  %v6978_v12 = vrot.slane %v6976_v28, 5  ;;  %v7007_v30 = vrot.slane %v7005_v42, 4  ;;  %v7010_v53 = vrot.slane %v7008_v8, 5 }
 0x22b   :  { %v15744_v31 = vrot.slane %v7014_v32, 5  ;;  %v7020_v17 = vrot.slane %v7018_v60, 4  ;;  %v7032_v56 = vshll.u32 %v15699_v16, 16  ;;  %v7042_v36 = vshrl.u32 %v12009_v48, 16  ;;  %10882 = vmatprep.mubr.msk.bf16.mxu0 %vm990_vm4, %v9804_v9  ;;  %v12010_v60 = vld [vmem:[%s17989_s1 + $0xdc] sm:$0xf] }
 0x22c   :  { %v6987_v38 = vor.u32 %v6986_v49, %v6983_v51  ;;  %v7000_v0 = vshll.u32 %v5663_v20, 16  ;;  %v6945_v39 = vsel %vm12240_vm5, %v6940_v27, %v15677_v15  ;;  %v6955_v42 = vsel %vm12240_vm5, %v6950_v40, %v6954_v24  ;;  %v5669_v16 = vld [vmem:[%s17990_s2 + $0x274] sm:$0xf]  ;;  %v12014_v51 = vld [vmem:[%s17990_s2 + $0x4] sm:$0xf] }
 0x22d   :  { %v6997_v8 = vor.u32 %v6996_v25, %v15738_v33  ;;  %v7038_v5 = vshll.u32 %v12009_v48, 16  ;;  %v9497_v11 = vcombine.low %v12010_v60, %v12011_v29  ;;  %v6969_v15 = vsel %vm12240_vm5, %v6964_v44, %v15685_v34  ;;  %v12012_v34 = vld [vmem:[%s17989_s1 + $0xf0] sm:$0xf]  ;;  %v12021_v60 = vld [vmem:[%s17990_s2 + $0x2c] sm:$0xf] }
 0x22e   :  { %v6979_v41 = vsel %vm12240_vm5, %v6974_v54, %v6978_v12  ;;  %v7011_v14 = vor.u32 %v7010_v53, %v7007_v30  ;;  %v7021_v50 = vor.u32 %v7020_v17, %v15744_v31  ;;  %v7024_v10 = vshll.u32 %v5666_v55, 16  ;;  %v12016_v54 = vld [vmem:[%s17989_s1 + $0x104] sm:$0xf]  ;;  %v12017_v12 = vld [vmem:[%s17989_s1 + $0x108] sm:$0xf] }
 0x22f   :  { %v9805_v23 = vcombine.low %v6945_v39, %v6955_v42  ;;  %v6988_v47 = vrot.slane %v6987_v38, 4  ;;  %v7002_v57 = vrot.slane %v7000_v0, 5  ;;  %v7031_v45 = vrot.slane %v7029_v4, 4  ;;  %10587 = vmatmul.mubr.msk.bf16.gmra.mrb[20].mxu1 %vm990_vm4, %v9497_v11  ;;  %v12019_v0 = vld [vmem:[%s17990_s2 + $0x8] sm:$0xf] }
 0x230   :  { %v6998_v18 = vrot.slane %v6997_v8, 4  ;;  %v7034_v28 = vrot.slane %v7032_v56, 5  ;;  %v15777_v63 = vrot.slane %v7038_v5, 5  ;;  %v7044_v7 = vrot.slane %v7042_v36, 4  ;;  %v12018_v56 = vld [vmem:[%s17990_s2] sm:$0xf] }
 0x231   :  { %v9498_v62 = vcombine.low %v12012_v34, %v12013_v46  ;;  %v9806_v37 = vcombine.low %v6969_v15, %v6979_v41  ;;  %v7012_v4 = vrot.slane %v7011_v14, 4  ;;  %v7022_v32 = vrot.slane %v7021_v50, 4  ;;  %10883 = vmatmul.mubr.msk.bf16.gmra.mrb[52].mxu0 %vm990_vm4, %v9805_v23  ;;  %v12020_v39 = vld [vmem:[%s17990_s2 + $0x18] sm:$0xf]  ;;  %v12024_v14 = vld [vmem:[%s17989_s1 + $0x11c] sm:$0xf] }
 0x232   :  { %v7026_v1 = vrot.slane %v7024_v10, 5  ;;  %v6993_v24 = vsel %vm12240_vm5, %v6988_v47, %v15738_v33  ;;  %v7636_v49 = vrot.slane %v12014_v51, 5  ;;  %v7003_v27 = vsel %vm12240_vm5, %v6998_v18, %v7002_v57  ;;  %v15802_v33 = vld [vmem:[%s17989_s1 + $0x154] sm:$0xf]  ;;  %v15834_v11 = vld [vmem:[%s17989_s1 + $0x158] sm:$0xf] }
 0x233   :  { %v7035_v40 = vor.u32 %v7034_v28, %v7031_v45  ;;  %v7045_v20 = vor.u32 %v7044_v7, %v15777_v63  ;;  %v7048_v25 = vshll.u32 %v5669_v16, 16  ;;  %v3859_v9 = vshrl.u32 %v15802_v33, 16  ;;  %10590 = vmatprep.mubr.msk.bf16.mxu1 %vm990_vm4, %v9498_v62  ;;  %10886 = vmatprep.mubr.msk.bf16.mxu0 %vm990_vm4, %v9806_v37  ;;  %v12023_v41 = vld [vmem:[%s17989_s1 + $0x118] sm:$0xf]  ;;  %v12025_v45 = vld [vmem:[%s17990_s2 + $0x14] sm:$0xf] }
 0x234   :  { %v3862_v44 = vshll.u32 %v15802_v33, 16  ;;  %v9499_v30 = vcombine.low %v12016_v54, %v12017_v12  ;;  %v7017_v53 = vsel %vm12240_vm5, %v7012_v4, %v15744_v31  ;;  %v7027_v17 = vsel %vm12240_vm5, %v7022_v32, %v7026_v1  ;;  %v12026_v34 = vld [vmem:[%s17990_s2 + $0x1c] sm:$0xf]  ;;  %v12027_v62 = vld [vmem:[%s17990_s2 + $0x28] sm:$0xf] }
 0x235   :  { %v9842_v48 = vrot.slane %v12018_v56, 9  ;;  %v9807_v36 = vcombine.low %v6993_v24, %v7003_v27  ;;  %v7638_v38 = vrot.slane %v7636_v49, 4  ;;  %v7639_v55 = vrot.slane %v12019_v0, 5  ;;  %v12028_v1 = vld [vmem:[%s17990_s2 + $0x30] sm:$0xf] }
 0x236   :  { %v7643_v31 = vrot.slane %v12020_v39, 5  ;;  %v7036_v42 = vrot.slane %v7035_v40, 4  ;;  %v7046_v8 = vrot.slane %v7045_v20, 4  ;;  %v7050_v5 = vrot.slane %v7048_v25, 5  ;;  %v12030_v40 = vld [vmem:[%s17990_s2 + $0x54] sm:$0xf] }
 0x237   :  { %v7650_v29 = vrot.slane %v12021_v60, 5  ;;  %v3868_v15 = vshll.u32 %v15834_v11, 16  ;;  %v9500_v50 = vcombine.low %v12023_v41, %v12024_v14  ;;  %v9808_v10 = vcombine.low %v7017_v53, %v7027_v17  ;;  %10591 = vmatmul.mubr.msk.bf16.gmra.mrb[24].mxu1 %vm990_vm4, %v9499_v30  ;;  %v15888_v25 = vld [vmem:[%s17989_s1 + $0x15c] sm:$0xf]  ;;  %v12033_v54 = vld [vmem:[%s17989_s1 + $0x130] sm:$0xf] }
 0x238   :  { %v15843_v23 = vrot.slane %v3859_v9, 4  ;;  %v15845_v47 = vrot.slane %v3862_v44, 5  ;;  %v15849_v57 = vsel %vm12721_vm8, %v9842_v48, %v7636_v49  ;;  %v9843_v18 = vrot.slane %v12025_v45, 9  ;;  %v12032_v44 = vld [vmem:[%s17989_s1 + $0x12c] sm:$0xf] }
 0x239   :  { %v15856_v28 = vsel %vm12721_vm8, %v7638_v38, %v7639_v55  ;;  %v7645_v7 = vrot.slane %v7643_v31, 4  ;;  %v7646_v46 = vrot.slane %v12026_v34, 5  ;;  %v9844_v37 = vrot.slane %v12027_v62, 9  ;;  %10887 = vmatmul.mubr.msk.bf16.gmra.mrb[56].mxu0 %vm990_vm4, %v9807_v36  ;;  %10594 = vmatprep.mubr.msk.bf16.mxu1 %vm990_vm4, %v9500_v50  ;;  %v15900_v30 = vld [vmem:[%s17989_s1 + $0x144] sm:$0xf] }
 0x23a   :  { %v7041_v16 = vsel %vm12240_vm5, %v7036_v42, %v15777_v63  ;;  %v7051_v4 = vsel %vm12240_vm5, %v7046_v8, %v7050_v5  ;;  %v7652_v32 = vrot.slane %v7650_v29, 4  ;;  %v7653_v24 = vrot.slane %v12028_v1, 5  ;;  %10890 = vmatprep.mubr.msk.bf16.mxu0 %vm990_vm4, %v9808_v10  ;;  %v12029_v63 = vld [vmem:[%s17990_s2 + $0x40] sm:$0xf]  ;;  %v12036_v39 = vld [vmem:[%s17990_s2 + $0x3c] sm:$0xf] }
 0x23b   :  { %v15874_v51 = vrot.slane %v3868_v15, 5  ;;  %v3872_v49 = vshrl.u32 %v15834_v11, 16  ;;  %v7657_v27 = vrot.slane %v12029_v63, 5  ;;  %v7664_v20 = vrot.slane %v12030_v40, 5  ;;  %v15905_v53 = vld [vmem:[%s17989_s1 + $0x140] sm:$0xf] }
 0x23c   :  { %v3878_v9 = vshll.u32 %v15888_v25, 16  ;;  %v9501_v12 = vcombine.low %v12032_v44, %v12033_v54  ;;  %v9502_v17 = vcombine.low %v15905_v53, %v15900_v30  ;;  %v9875_v56 = vcombine.low %v15849_v57, %v15856_v28  ;;  %v12038_v5 = vld [vmem:[%s17990_s2 + $0x68] sm:$0xf]  ;;  %v12039_v15 = vld [vmem:[%s17990_s2 + $0x50] sm:$0xf] }
 0x23d   :  { %v9809_v48 = vcombine.low %v7041_v16, %v7051_v4  ;;  %v15913_v36 = vsel %vm12721_vm8, %v9843_v18, %v7643_v31  ;;  %v15917_v38 = vsel %vm12721_vm8, %v7645_v7, %v7646_v46  ;;  %v15921_v0 = vsel %vm12721_vm8, %v9844_v37, %v7650_v29  ;;  %v12037_v31 = vld [vmem:[%s17990_s2 + $0x44] sm:$0xf]  ;;  %v12040_v50 = vld [vmem:[%s17990_s2 + $0x58] sm:$0xf]  ;;  %v15947_v45 = vld [vmem:[%s17989_s1 + $0x168] sm:$0xf] }
 0x23e   :  { %v15925_v55 = vsel %vm12721_vm8, %v7652_v32, %v7653_v24  ;;  %v9845_v42 = vrot.slane %v12036_v39, 9  ;;  %v7660_v8 = vrot.slane %v12037_v31, 5  ;;  %v7671_v60 = vrot.slane %v12038_v5, 5  ;;  %v15952_v18 = vld [vmem:[%s17989_s1 + $0x16c] sm:$0xf] }
 0x23f   :  { %v7659_v29 = vrot.slane %v7657_v27, 4  ;;  %v9846_v41 = vrot.slane %v12039_v15, 9  ;;  %v7666_v14 = vrot.slane %v7664_v20, 4  ;;  %v7667_v10 = vrot.slane %v12040_v50, 5  ;;  %v15959_v7 = vld [vmem:[%s17989_s1 + $0x180] sm:$0xf]  ;;  %10595 = vmatmul.mubr.msk.bf16.gmra.mrb[28].mxu1 %vm990_vm4, %v9501_v12 }
 0x240   :  { %v9503_v57 = vcombine.low %v15802_v33, %v15834_v11  ;;  %v15964_v34 = vld [vmem:[%s17989_s1 + $0x17c] sm:$0xf]  ;;  %v9876_v16 = vcombine.low %v15913_v36, %v15917_v38  ;;  %v15978_v32 = vld [vmem:[%s17989_s1 + $0x194] sm:$0xf]  ;;  %v15983_v1 = vld [vmem:[%s17989_s1 + $0x190] sm:$0xf]  ;;  %v15994_v44 = vsel %vm12721_vm8, %v9845_v42, %v7657_v27  ;;  %10598 = vmatprep.mubr.msk.bf16.mxu1 %vm990_vm4, %v9502_v17 }
 0x241   :  { %v12045_v62 = vld [vmem:[%s17990_s2 + $0x7c] sm:$0xf]  ;;  %v12048_v63 = vld [vmem:[%s17990_s2 + $0x90] sm:$0xf]  ;;  %10891 = vmatmul.mubr.msk.bf16.gmra.mrb[60].mxu0 %vm990_vm4, %v9809_v48  ;;  %v12049_v54 = vld [vmem:[%s17990_s2 + $0x64] sm:$0xf]  ;;  %v16008_v27 = vsel %vm12721_vm8, %v7659_v29, %v7660_v8  ;;  %v16012_v12 = vsel %vm12721_vm8, %v9846_v41, %v7664_v20  ;;  %v16016_v48 = vsel %vm12721_vm8, %v7666_v14, %v7667_v10 }
 0x242   :  { %v7678_v37 = vrot.slane %v12045_v62, 5  ;;  %v7685_v40 = vrot.slane %v12048_v63, 5  ;;  %v9847_v36 = vrot.slane %v12049_v54, 9  ;;  %v7673_v38 = vrot.slane %v7671_v60, 4  ;;  %v12050_v39 = vld [vmem:[%s17990_s2 + $0x6c] sm:$0xf]  ;;  %10896 = vmatprep.mubr.msk.bf16.mxu0 %vm990_vm4, %v9875_v56 }
 0x243   :  { %v7674_v31 = vrot.slane %v12050_v39, 5  ;;  %v16002_v5 = vrot.slane %v3872_v49, 4  ;;  %v12051_v49 = vld [vmem:[%s17990_s2 + $0x78] sm:$0xf]  ;;  %v12052_v56 = vld [vmem:[%s17990_s2 + $0x80] sm:$0xf] }
 0x244   :  { %v9848_v42 = vrot.slane %v12051_v49, 9  ;;  %v7680_v17 = vrot.slane %v7678_v37, 4  ;;  %v7681_v8 = vrot.slane %v12052_v56, 5  ;;  %v12053_v20 = vld [vmem:[%s17990_s2 + $0xa4] sm:$0xf]  ;;  %v7687_v62 = vrot.slane %v7685_v40, 4 }
 0x245   :  { %v7692_v29 = vrot.slane %v12053_v20, 5  ;;  %v16030_v15 = vld [vmem:[%s17989_s1 + $0x1a8] sm:$0xf]  ;;  %v16035_v41 = vld [vmem:[%s17989_s1 + $0x1a4] sm:$0xf]  ;;  %v16049_v49 = vsel %vm12721_vm8, %v9847_v36, %v7671_v60  ;;  %v16053_v56 = vsel %vm12721_vm8, %v7673_v38, %v7674_v31  ;;  %v16127_v11 = vrot.slane %v3878_v9, 5 }
 0x246   :  { %v12056_v50 = vld [vmem:[%s17990_s2 + $0x8c] sm:$0xf]  ;;  %v12057_v63 = vld [vmem:[%s17990_s2 + $0x94] sm:$0xf]  ;;  %v12058_v20 = vld [vmem:[%s17990_s2 + $0xb8] sm:$0xf]  ;;  %v16089_v36 = vsel %vm12721_vm8, %v9848_v42, %v7678_v37  ;;  %v16093_v39 = vsel %vm12721_vm8, %v7680_v17, %v7681_v8 }
 0x247   :  { %v9849_v10 = vrot.slane %v12056_v50, 9  ;;  %v7688_v54 = vrot.slane %v12057_v63, 5  ;;  %v7699_v50 = vrot.slane %v12058_v20, 5  ;;  %v16063_v63 = vld [vmem:[%s17989_s1 + $0x1bc] sm:$0xf]  ;;  %v7694_v46 = vrot.slane %v7692_v29, 4  ;;  %10599 = vmatmul.mubr.msk.bf16.gmra.mrb[32].mxu1 %vm990_vm4, %v9503_v57 }
 0x248   :  { %v16068_v60 = vld [vmem:[%s17989_s1 + $0x1b8] sm:$0xf]  ;;  %v16075_v38 = vld [vmem:[%s17989_s1 + $0x1d0] sm:$0xf]  ;;  %v16080_v31 = vld [vmem:[%s17989_s1 + $0x1cc] sm:$0xf]  ;;  %v18395_v57 = vcombine.low %v15947_v45, %v15952_v18 }
 0x249   :  { %v12063_v14 = vld [vmem:[%s17990_s2 + $0xa0] sm:$0xf]  ;;  %v12064_v4 = vld [vmem:[%s17990_s2 + $0xa8] sm:$0xf]  ;;  %v16106_v37 = vsel %vm12721_vm8, %v7687_v62, %v7688_v54  ;;  %v12065_v42 = vld [vmem:[%s17990_s2 + $0xb4] sm:$0xf]  ;;  %10897 = vmatmul.mubr.msk.bf16.vlgmr.msra.gmra.mrb[0].mxu0 %vm990_vm4, %v9876_v16  ;;  %v18396_v16 = vcombine.low %v15921_v0, %v15925_v55 }
 0x24a   :  { %v9850_v24 = vrot.slane %v12063_v14, 9  ;;  %v7695_v28 = vrot.slane %v12064_v4, 5  ;;  %v16102_v14 = vsel %vm12721_vm8, %v9849_v10, %v7685_v40  ;;  %v9851_v17 = vrot.slane %v12065_v42, 9  ;;  %v12066_v40 = vld [vmem:[%s17990_s2 + $0xbc] sm:$0xf]  ;;  %18394 = vst [vmem:[#allocation8_spill] sm:$0xff] %v16127_v11  ;;  %10602 = vmatprep.mubr.msk.bf16.mxu1 %vm990_vm4, %v18395_v57 }
 0x24b   :  { %v7701_v4 = vrot.slane %v7699_v50, 4  ;;  %v7702_v8 = vrot.slane %v12066_v40, 5  ;;  %v12067_v10 = vld [vmem:[%s17990_s2 + $0xcc] sm:$0xf]  ;;  %v12068_v54 = vld [vmem:[%s17990_s2 + $0xe0] sm:$0xf]  ;;  %10900 = vmatprep.mubr.msk.bf16.mxu0 %vm990_vm4, %v18396_v16 }
 0x24c   :  { %v7706_v62 = vrot.slane %v12067_v10, 5  ;;  %v7713_v33 = vrot.slane %v12068_v54, 5  ;;  %v16142_v40 = vld [vmem:[%s17989_s1 + $0x1e4] sm:$0xf]  ;;  %v16147_v25 = vld [vmem:[%s17989_s1 + $0x1e0] sm:$0xf]  ;;  %v16153_v0 = vsel %vm12721_vm8, %v9850_v24, %v7692_v29  ;;  %v16159_v10 = vsel %vm12721_vm8, %v7694_v46, %v7695_v28 }
 0x24d   :  { %18397 = vst [vmem:[#allocation10_spill] sm:$0xff] %v16142_v40  ;;  %18398 = vst [vmem:[#allocation12_spill] sm:$0xff] %v16153_v0  ;;  %v16164_v54 = vld [vmem:[%s17989_s1 + $0x1f8] sm:$0xf]  ;;  %v16169_v57 = vld [vmem:[%s17989_s1 + $0x1f4] sm:$0xf]  ;;  %v16178_v28 = vsel %vm12721_vm8, %v9851_v17, %v7699_v50 }
 0x24e   :  { %18399 = vst [vmem:[#allocation5_spill] sm:$0xff] %v16159_v10  ;;  %18400 = vst [vmem:[#allocation7_spill] sm:$0xff] %v16164_v54  ;;  %v12073_v29 = vld [vmem:[%s17990_s2 + $0xf4] sm:$0xf]  ;;  %v12074_v46 = vld [vmem:[%s17990_s2 + $0xc8] sm:$0xf] }
 0x24f   :  { %18401 = vst [vmem:[#allocation9_spill] sm:$0xff] %v16169_v57  ;;  %v7720_v16 = vrot.slane %v12073_v29, 5  ;;  %v9852_v9 = vrot.slane %v12074_v46, 9  ;;  %v12075_v55 = vld [vmem:[%s17990_s2 + $0xd0] sm:$0xf]  ;;  %v16191_v29 = vsel %vm12721_vm8, %v7701_v4, %v7702_v8  ;;  %v7708_v50 = vrot.slane %v7706_v62, 4 }
 0x250   :  { %v7709_v42 = vrot.slane %v12075_v55, 5  ;;  %v12076_v24 = vld [vmem:[%s17990_s2 + $0xdc] sm:$0xf]  ;;  %v7715_v17 = vrot.slane %v7713_v33, 4  ;;  %v12077_v46 = vld [vmem:[%s17990_s2 + $0xe4] sm:$0xf] }
 0x251   :  { %v9853_v20 = vrot.slane %v12076_v24, 9  ;;  %v7716_v54 = vrot.slane %v12077_v46, 5  ;;  %v16201_v55 = vld [vmem:[%s17989_s1 + $0x20c] sm:$0xf]  ;;  %v16206_v4 = vld [vmem:[%s17989_s1 + $0x208] sm:$0xf]  ;;  %v16234_v57 = vsel %vm12721_vm8, %v9852_v9, %v7706_v62  ;;  %v18405_v62 = vcombine.low %v15964_v34, %v15959_v7 }
 0x252   :  { %18402 = vst [vmem:[#allocation11_spill] sm:$0xff] %v16201_v55  ;;  %18403 = vst [vmem:[#allocation14_spill] sm:$0xff] %v16206_v4  ;;  %v16213_v24 = vld [vmem:[%s17989_s1 + $0x220] sm:$0xf]  ;;  %v16218_v46 = vld [vmem:[%s17989_s1 + $0x21c] sm:$0xf] }
 0x253   :  { %18404 = vst [vmem:[#allocation13_spill] sm:$0xff] %v16213_v24  ;;  %v9854_v11 = vrot.slane %v12082_v21, 9  ;;  %v7722_v10 = vrot.slane %v7720_v16, 4  ;;  %v12083_v8 = vld [vmem:[%s17990_s2 + $0xf8] sm:$0xf]  ;;  %v7727_v4 = vrot.slane %v15156_v26, 5  ;;  %v16238_v21 = vsel %vm12721_vm8, %v9853_v20, %v7713_v33  ;;  %10603 = vmatmul.mubr.msk.bf16.gmra.mrb[36].mxu1 %vm990_vm4, %v18405_v62 }
 0x254   :  { %v7723_v55 = vrot.slane %v12083_v8, 5  ;;  %v7734_v0 = vrot.slane %v15178_v43, 5  ;;  %v16243_v24 = vld [vmem:[%s17989_s1 + $0x234] sm:$0xf]  ;;  %v16248_v26 = vld [vmem:[%s17989_s1 + $0x230] sm:$0xf]  ;;  %v18406_v20 = vcombine.low %v15994_v44, %v16008_v27  ;;  %v16262_v33 = vsel %vm12721_vm8, %v7708_v50, %v7709_v42 }
 0x255   :  { %v16266_v9 = vsel %vm12721_vm8, %v7715_v17, %v7716_v54  ;;  %v3835_v8 = vshrl.u32 %v15905_v53, 16  ;;  %v3838_v43 = vshll.u32 %v15905_v53, 16  ;;  %v18407_v62 = vcombine.low %v15983_v1, %v15978_v32  ;;  %v12086_v42 = vld [vmem:[%s17990_s2 + $0x104] sm:$0xf]  ;;  %v12087_v50 = vld [vmem:[%s17990_s2 + $0x118] sm:$0xf] }
 0x256   :  { %10901 = vmatmul.mubr.msk.bf16.gmra.mrb[4].mxu0 %vm990_vm4, %v18406_v20  ;;  %v18408_v44 = vcombine.low %v16012_v12, %v16016_v48  ;;  %v16280_v27 = vsel %vm12721_vm8, %v9854_v11, %v7720_v16  ;;  %v9855_v54 = vrot.slane %v12086_v42, 9  ;;  %v7730_v53 = vrot.slane %v15199_v52, 5  ;;  %v16322_v16 = vld [vmem:[%s17989_s1 + $0x25c] sm:$0xf]  ;;  %v16327_v40 = vld [vmem:[%s17989_s1 + $0x258] sm:$0xf] }
 0x257   :  { %10606 = vmatprep.mubr.msk.bf16.mxu1 %vm990_vm4, %v18407_v62  ;;  %v9856_v17 = vrot.slane %v12087_v50, 9  ;;  %v16291_v12 = vsel %vm12721_vm8, %v7722_v10, %v7723_v55  ;;  %v7729_v48 = vrot.slane %v7727_v4, 4  ;;  %v7736_v20 = vrot.slane %v7734_v0, 4  ;;  %v16304_v10 = vld [vmem:[%s17989_s1 + $0x248] sm:$0xf]  ;;  %18410 = vst [vmem:[#allocation19_spill] sm:$0xff] %v16322_v16 }
 0x258   :  { %10904 = vmatprep.mubr.msk.bf16.mxu0 %vm990_vm4, %v18408_v44  ;;  %v7737_v11 = vrot.slane %v15222_v13, 5  ;;  %v7741_v62 = vrot.slane %v15238_v61, 5  ;;  %v3844_v52 = vshll.u32 %v15900_v30, 16  ;;  %v3848_v44 = vshrl.u32 %v15900_v30, 16  ;;  %18409 = vst [vmem:[#allocation16_spill] sm:$0xff] %v16304_v10 }
 0x259   :  { %v16309_v13 = vld [vmem:[%s17989_s1 + $0x244] sm:$0xf]  ;;  %v3837_v55 = vrot.slane %v3835_v8, 4  ;;  %v3840_v50 = vrot.slane %v3838_v43, 5  ;;  %v16317_v42 = vsel %vm12721_vm8, %v9855_v54, %v7727_v4  ;;  %v16333_v8 = vsel %vm12721_vm8, %v9856_v17, %v7734_v0  ;;  %v12092_v61 = vld [vmem:[%s17990_s2 + $0x12c] sm:$0xf] }
 0x25a   :  { %v16337_v4 = vsel %vm12721_vm8, %v7729_v48, %v7730_v53  ;;  %v16341_v54 = vsel %vm12721_vm8, %v7736_v20, %v7737_v11  ;;  %v9857_v30 = vrot.slane %v12092_v61, 9  ;;  %v7748_v10 = vrot.slane %v15278_v59, 5  ;;  %v16361_v59 = vld [vmem:[%s17989_s1 + $0x270] sm:$0xf] }
 0x25b   :  { %v7743_v43 = vrot.slane %v7741_v62, 4  ;;  %v7744_v16 = vrot.slane %v15269_v19, 5  ;;  %v16348_v0 = vrot.slane %v3844_v52, 5  ;;  %v3850_v17 = vrot.slane %v3848_v44, 4  ;;  %18413 = vst [vmem:[#allocation15_spill] sm:$0xff] %v16361_v59 }
 0x25c   :  { %v18411_v53 = vcombine.low %v16035_v41, %v16030_v15  ;;  %v18412_v48 = vcombine.low %v16049_v49, %v16053_v56  ;;  %v16366_v19 = vld [vmem:[%s17989_s1 + $0x26c] sm:$0xf]  ;;  %v3841_v11 = vor.u32 %v3840_v50, %v3837_v55  ;;  %v12095_v49 = vld [vmem:[%s17989_s1 + $0x148] sm:$0xf]  ;;  %v12096_v52 = vld [vmem:[%s17990_s2 + $0x140] sm:$0xf]  ;;  %v18415_v61 = vcombine.low %v16068_v60, %v16063_v63 }
 0x25d   :  { %18414 = vst [vmem:[#allocation18_spill] sm:$0xff] %v16366_v19  ;;  %v3854_v56 = vshll.u32 %v12095_v49, 16  ;;  %v9858_v44 = vrot.slane %v12096_v52, 9  ;;  %v3886_v49 = vshll.u32 %v15947_v45, 16  ;;  %v16392_v52 = vsel %vm12721_vm8, %v9857_v30, %v7741_v62 }
 0x25e   :  { %10607 = vmatmul.mubr.msk.bf16.gmra.mrb[40].mxu1 %vm990_vm4, %v18411_v53  ;;  %10905 = vmatmul.mubr.msk.bf16.gmra.mrb[8].mxu0 %vm990_vm4, %v18412_v48  ;;  %v18416_v53 = vcombine.low %v16089_v36, %v16093_v39  ;;  %v3883_v48 = vshrl.u32 %v15947_v45, 16  ;;  %v7751_v20 = vrot.slane %v15302_v22, 5  ;;  %v3865_v39 = vor.u32 %v15845_v47, %v15843_v23  ;;  %v12097_v23 = vld [vmem:[%s17990_s2 + $0x154] sm:$0xf] }
 0x25f   :  { %10610 = vmatprep.mubr.msk.bf16.mxu1 %vm990_vm4, %v18415_v61  ;;  %v7750_v61 = vrot.slane %v7748_v10, 4  ;;  %v16399_v36 = vsel %vm12721_vm8, %v7743_v43, %v7744_v16  ;;  %v3875_v50 = vor.u32 %v16002_v5, %v15874_v51  ;;  %v7755_v45 = vrot.slane %v15311_v58, 5 }
 0x260   :  { %10908 = vmatprep.mubr.msk.bf16.mxu0 %vm990_vm4, %v18416_v53  ;;  %v3851_v53 = vor.u32 %v3850_v17, %v16348_v0  ;;  %v3842_v55 = vrot.slane %v3841_v11, 4  ;;  %v3856_v62 = vrot.slane %v3854_v56, 5  ;;  %v16407_v30 = vsel %vm12721_vm8, %v9858_v44, %v7748_v10 }
 0x261   :  { %v3892_v22 = vshll.u32 %v15952_v18, 16  ;;  %v9859_v47 = vrot.slane %v12097_v23, 9  ;;  %v3885_v16 = vrot.slane %v3883_v48, 4  ;;  %v3888_v43 = vrot.slane %v3886_v49, 5  ;;  %v18419_v49 = vld [vmem:[#allocation10_spill] sm:$0xff] }
 0x262   :  { %v3896_v17 = vshrl.u32 %v15952_v18, 16  ;;  %v16416_v58 = vsel %vm12721_vm8, %v7750_v61, %v7751_v20  ;;  %v3866_v5 = vrot.slane %v3865_v39, 4  ;;  %v3907_v11 = vshrl.u32 %v15964_v34, 16  ;;  %v18421_v39 = vld [vmem:[#allocation12_spill] sm:$0xff] }
 0x263   :  { %v3910_v10 = vshll.u32 %v15964_v34, 16  ;;  %v3852_v56 = vrot.slane %v3851_v53, 4  ;;  %v3876_v44 = vrot.slane %v3875_v50, 4  ;;  %v7757_v59 = vrot.slane %v7755_v45, 4 }
 0x264   :  { %v7758_v19 = vrot.slane %v15354_v6, 5  ;;  %v18417_v48 = vcombine.low %v16080_v31, %v16075_v38  ;;  %v18418_v18 = vcombine.low %v16102_v14, %v16106_v37  ;;  %v3847_v34 = vsel %vm12240_vm5, %v3842_v55, %v16348_v0  ;;  %v18422_v14 = vld [vmem:[#allocation5_spill] sm:$0xff] }
 0x265   :  { %v16434_v50 = vrot.slane %v3892_v22, 5  ;;  %v7762_v6 = vrot.slane %v15359_v35, 5  ;;  %v18420_v61 = vcombine.low %v16147_v25, %v18419_v49  ;;  %v18423_v37 = vcombine.low %v18421_v39, %v18422_v14  ;;  %v18424_v39 = vld [vmem:[#allocation8_spill] sm:$0xff] }
 0x266   :  { %10611 = vmatmul.mubr.msk.bf16.gmra.mrb[44].mxu1 %vm990_vm4, %v18417_v48  ;;  %10909 = vmatmul.mubr.msk.bf16.gmra.mrb[12].mxu0 %vm990_vm4, %v18418_v18  ;;  %v3889_v53 = vor.u32 %v3888_v43, %v3885_v16  ;;  %v3898_v23 = vrot.slane %v3896_v17, 4  ;;  %v3916_v48 = vshll.u32 %v15959_v7, 16  ;;  %v3920_v0 = vshrl.u32 %v15959_v7, 16 }
 0x267   :  { %10614 = vmatprep.mubr.msk.bf16.mxu1 %vm990_vm4, %v18420_v61  ;;  %10912 = vmatprep.mubr.msk.bf16.mxu0 %vm990_vm4, %v18423_v37  ;;  %v3871_v35 = vsel %vm12240_vm5, %v3866_v5, %v15874_v51  ;;  %v3909_v22 = vrot.slane %v3907_v11, 4  ;;  %v3912_v18 = vrot.slane %v3910_v10, 5  ;;  %v3857_v61 = vsel %vm12240_vm5, %v3852_v56, %v3856_v62  ;;  %v12098_v51 = vld [vmem:[%s17989_s1 + $0x170] sm:$0xf]  ;;  %v12099_v62 = vld [vmem:[%s17990_s2 + $0x168] sm:$0xf] }
 0x268   :  { %v3881_v16 = vsel %vm12240_vm5, %v3876_v44, %v18424_v39  ;;  %v16459_v43 = vsel %vm12721_vm8, %v9859_v47, %v7755_v45  ;;  %v16463_v7 = vsel %vm12721_vm8, %v7757_v59, %v7758_v19  ;;  %v3902_v17 = vshll.u32 %v12098_v51, 16  ;;  %v18425_v10 = vld [vmem:[#allocation6_spill] sm:$0xff] }
 0x269   :  { %v9860_v5 = vrot.slane %v12099_v62, 9  ;;  %v7764_v11 = vrot.slane %v7762_v6, 4  ;;  %v7765_v56 = vrot.slane %v18425_v10, 5  ;;  %v16472_v44 = vrot.slane %v3889_v53, 4  ;;  %v12100_v37 = vld [vmem:[%s17989_s1 + $0x184] sm:$0xf] }
 0x26a   :  { %v3899_v45 = vor.u32 %v3898_v23, %v16434_v50  ;;  %v16475_v47 = vrot.slane %v3916_v48, 5  ;;  %v3922_v59 = vrot.slane %v3920_v0, 4  ;;  %v16477_v19 = vcombine.low %v3847_v34, %v3857_v61  ;;  %v18426_v48 = vld [vmem:[#allocation9_spill] sm:$0xff]  ;;  %v18427_v0 = vld [vmem:[#allocation7_spill] sm:$0xff]  ;;  %v18430_v61 = vld [vmem:[#allocation14_spill] sm:$0xff] }
 0x26b   :  { %v3913_v14 = vor.u32 %v3912_v18, %v3909_v22  ;;  %v3926_v39 = vshll.u32 %v12100_v37, 16  ;;  %v3931_v51 = vshrl.u32 %v15983_v1, 16  ;;  %v16483_v62 = vcombine.low %v3871_v35, %v3881_v16  ;;  %v18431_v16 = vld [vmem:[#allocation11_spill] sm:$0xff] }
 0x26c   :  { %v3934_v53 = vshll.u32 %v15983_v1, 16  ;;  %v3940_v10 = vshll.u32 %v15978_v32, 16  ;;  %v3944_v23 = vshrl.u32 %v15978_v32, 16  ;;  %v18428_v34 = vcombine.low %v18426_v48, %v18427_v0 }
 0x26d   :  { %v18429_v22 = vcombine.low %v16178_v28, %v16191_v29  ;;  %v16498_v18 = vrot.slane %v3902_v17, 5  ;;  %v16502_v1 = vsel %vm12721_vm8, %v9860_v5, %v7762_v6  ;;  %v16506_v32 = vsel %vm12721_vm8, %v7764_v11, %v7765_v56  ;;  %v12101_v5 = vld [vmem:[%s17990_s2 + $0x180] sm:$0xf] }
 0x26e   :  { %10615 = vmatmul.mubr.msk.bf16.gmra.mrb[48].mxu1 %vm990_vm4, %v18428_v34  ;;  %v18432_v37 = vcombine.low %v18430_v61, %v18431_v16  ;;  %v18433_v28 = vcombine.low %v16234_v57, %v16262_v33  ;;  %v3895_v29 = vsel %vm12240_vm5, %v16472_v44, %v16434_v50  ;;  %v3900_v6 = vrot.slane %v3899_v45, 4  ;;  %v12102_v57 = vld [vmem:[%s17990_s2 + $0x17c] sm:$0xf]  ;;  %v12103_v44 = vld [vmem:[%s17990_s2 + $0x194] sm:$0xf] }
 0x26f   :  { %10913 = vmatmul.mubr.msk.bf16.gmra.mrb[16].mxu0 %vm990_vm4, %v18429_v22  ;;  %v3923_v17 = vor.u32 %v3922_v59, %v16475_v47  ;;  %v7769_v11 = vrot.slane %v12101_v5, 5  ;;  %v3914_v56 = vrot.slane %v3913_v14, 4  ;;  %v3928_v34 = vrot.slane %v3926_v39, 5 }
 0x270   :  { %10618 = vmatprep.mubr.msk.bf16.mxu1 %vm990_vm4, %v18432_v37  ;;  %10916 = vmatprep.mubr.msk.bf16.mxu0 %vm990_vm4, %v18433_v28  ;;  %v9861_v33 = vrot.slane %v12102_v57, 9  ;;  %v3933_v22 = vrot.slane %v3931_v51, 4  ;;  %v3936_v37 = vrot.slane %v3934_v53, 5  ;;  %v16527_v28 = vrot.slane %v3940_v10, 5  ;;  %v12104_v51 = vld [vmem:[%s17990_s2 + $0x184] sm:$0xf] }
 0x271   :  { %v3946_v50 = vrot.slane %v3944_v23, 4  ;;  %v7776_v45 = vrot.slane %v12103_v44, 5  ;;  %v3955_v59 = vshrl.u32 %v16035_v41, 16  ;;  %v3958_v14 = vshll.u32 %v16035_v41, 16  ;;  %v12105_v10 = vld [vmem:[%s17989_s1 + $0x198] sm:$0xf] }
 0x272   :  { %v3964_v39 = vshll.u32 %v16030_v15, 16  ;;  %v3968_v5 = vshrl.u32 %v16030_v15, 16  ;;  %v3924_v35 = vrot.slane %v3923_v17, 4  ;;  %v7771_v57 = vrot.slane %v7769_v11, 4  ;;  %v12106_v17 = vld [vmem:[%s17990_s2 + $0x190] sm:$0xf] }
 0x273   :  { %v7772_v53 = vrot.slane %v12104_v51, 5  ;;  %v3950_v23 = vshll.u32 %v12105_v10, 16  ;;  %v3905_v41 = vsel %vm12240_vm5, %v3900_v6, %v16498_v18  ;;  %v16549_v15 = vsel %vm12721_vm8, %v9861_v33, %v7769_v11  ;;  %v12107_v18 = vld [vmem:[%s17990_s2 + $0x198] sm:$0xf] }
 0x274   :  { %v9862_v51 = vrot.slane %v12106_v17, 9  ;;  %v3937_v55 = vor.u32 %v3936_v37, %v3933_v22  ;;  %v3947_v20 = vor.u32 %v3946_v50, %v16527_v28  ;;  %v7778_v10 = vrot.slane %v7776_v45, 4  ;;  %v18434_v44 = vld [vmem:[#allocation13_spill] sm:$0xff] }
 0x275   :  { %v7779_v6 = vrot.slane %v12107_v18, 5  ;;  %v18435_v16 = vcombine.low %v16218_v46, %v18434_v44  ;;  %v18436_v11 = vcombine.low %v16238_v21, %v16266_v9  ;;  %v3957_v33 = vrot.slane %v3955_v59, 4 }
 0x276   :  { %v3960_v22 = vrot.slane %v3958_v14, 5  ;;  %v16566_v37 = vrot.slane %v3964_v39, 5  ;;  %v3970_v50 = vrot.slane %v3968_v5, 4  ;;  %v18437_v17 = vcombine.low %v16248_v26, %v16243_v24 }
 0x277   :  { %10619 = vmatmul.mubr.msk.bf16.gmra.mrb[52].mxu1 %vm990_vm4, %v18435_v16  ;;  %10917 = vmatmul.mubr.msk.bf16.gmra.mrb[20].mxu0 %vm990_vm4, %v18436_v11  ;;  %v18438_v18 = vcombine.low %v16280_v27, %v16291_v12  ;;  %v3919_v21 = vsel %vm12240_vm5, %v3914_v56, %v16475_v47  ;;  %v3929_v9 = vsel %vm12240_vm5, %v3924_v35, %v3928_v34  ;;  %v16585_v59 = vrot.slane %v3950_v23, 5  ;;  %v12108_v56 = vld [vmem:[%s17989_s1 + $0x1ac] sm:$0xf] }
 0x278   :  { %10622 = vmatprep.mubr.msk.bf16.mxu1 %vm990_vm4, %v18437_v17  ;;  %v16583_v16 = vsel %vm12721_vm8, %v7771_v57, %v7772_v53  ;;  %v3979_v14 = vshrl.u32 %v16068_v60, 16  ;;  %v3982_v39 = vshll.u32 %v16068_v60, 16  ;;  %v3988_v27 = vshll.u32 %v16063_v63, 16 }
 0x279   :  { %10920 = vmatprep.mubr.msk.bf16.mxu0 %vm990_vm4, %v18438_v18  ;;  %v3992_v12 = vshrl.u32 %v16063_v63, 16  ;;  %v16591_v5 = vrot.slane %v3937_v55, 4  ;;  %v16593_v47 = vrot.slane %v3947_v20, 4  ;;  %v16597_v35 = vsel %vm12721_vm8, %v9862_v51, %v7776_v45  ;;  %v12109_v20 = vld [vmem:[%s17990_s2 + $0x1a8] sm:$0xf]  ;;  %v18439_v18 = vld [vmem:[#allocation16_spill] sm:$0xff] }
 0x27a   :  { %v3974_v34 = vshll.u32 %v12108_v56, 16  ;;  %v16604_v60 = vsel %vm12721_vm8, %v7778_v10, %v7779_v6  ;;  %v3961_v57 = vor.u32 %v3960_v22, %v3957_v33  ;;  %v3971_v63 = vor.u32 %v3970_v50, %v16566_v37  ;;  %v12110_v51 = vld [vmem:[%s17990_s2 + $0x1a4] sm:$0xf] }
 0x27b   :  { %v7783_v55 = vrot.slane %v12109_v20, 5  ;;  %v16610_v53 = vcombine.low %v3895_v29, %v3905_v41  ;;  %v16612_v45 = vcombine.low %v3919_v21, %v3929_v9  ;;  %v9894_v23 = vcombine.low %v16549_v15, %v16583_v16  ;;  %v18445_v50 = vld [vmem:[#allocation18_spill] sm:$0xff] }
 0x27c   :  { %v9863_v10 = vrot.slane %v12110_v51, 9  ;;  %v3981_v6 = vrot.slane %v3979_v14, 4  ;;  %v3984_v11 = vrot.slane %v3982_v39, 5  ;;  %v16619_v33 = vrot.slane %v3988_v27, 5 }
 0x27d   :  { %v3994_v22 = vrot.slane %v3992_v12, 4  ;;  %v3943_v29 = vsel %vm12240_vm5, %v16591_v5, %v16527_v28  ;;  %v3953_v41 = vsel %vm12240_vm5, %v16593_v47, %v16585_v59  ;;  %v3976_v17 = vrot.slane %v3974_v34, 5  ;;  %v12111_v59 = vld [vmem:[%s17990_s2 + $0x1ac] sm:$0xf] }
 0x27e   :  { %v18440_v21 = vcombine.low %v16309_v13, %v18439_v18  ;;  %v18441_v9 = vcombine.low %v16317_v42, %v16337_v4  ;;  %v3962_v28 = vrot.slane %v3961_v57, 4  ;;  %v3972_v14 = vrot.slane %v3971_v63, 4  ;;  %v18442_v12 = vld [vmem:[#allocation19_spill] sm:$0xff] }
 0x27f   :  { %v7785_v39 = vrot.slane %v7783_v55, 4  ;;  %v7786_v27 = vrot.slane %v12111_v59, 5  ;;  %v18443_v5 = vcombine.low %v16327_v40, %v18442_v12  ;;  %v18444_v47 = vcombine.low %v16333_v8, %v16341_v54  ;;  %v12112_v8 = vld [vmem:[%s17989_s1 + $0x1c0] sm:$0xf] }
 0x280   :  { %10623 = vmatmul.mubr.msk.bf16.gmra.mrb[56].mxu1 %vm990_vm4, %v18440_v21  ;;  %10921 = vmatmul.mubr.msk.bf16.gmra.mrb[24].mxu0 %vm990_vm4, %v18441_v9  ;;  %v4003_v42 = vshrl.u32 %v16080_v31, 16  ;;  %v4006_v4 = vshll.u32 %v16080_v31, 16  ;;  %v4012_v56 = vshll.u32 %v16075_v38, 16  ;;  %v4016_v34 = vshrl.u32 %v16075_v38, 16 }
 0x281   :  { %10626 = vmatprep.mubr.msk.bf16.mxu1 %vm990_vm4, %v18443_v5  ;;  %10924 = vmatprep.mubr.msk.bf16.mxu0 %vm990_vm4, %v18444_v47  ;;  %v16656_v57 = vsel %vm12721_vm8, %v9863_v10, %v7783_v55  ;;  %v3985_v63 = vor.u32 %v3984_v11, %v3981_v6  ;;  %v3995_v20 = vor.u32 %v3994_v22, %v16619_v33  ;;  %v3998_v54 = vshll.u32 %v12112_v8, 16  ;;  %v12113_v11 = vld [vmem:[%s17990_s2 + $0x1b8] sm:$0xf] }
 0x282   :  { %v4027_v51 = vshrl.u32 %v16147_v25, 16  ;;  %v4030_v31 = vshll.u32 %v16147_v25, 16  ;;  %v4036_v21 = vshll.u32 %v18419_v49, 16  ;;  %v4040_v38 = vshrl.u32 %v18419_v49, 16 }
 0x283   :  { %v3967_v55 = vsel %vm12240_vm5, %v3962_v28, %v16566_v37  ;;  %v3977_v10 = vsel %vm12240_vm5, %v3972_v14, %v3976_v17  ;;  %v16673_v6 = vsel %vm12721_vm8, %v7785_v39, %v7786_v27  ;;  %v9864_v25 = vrot.slane %v12113_v11, 9  ;;  %v12114_v17 = vld [vmem:[%s17990_s2 + $0x1bc] sm:$0xf]  ;;  %v18446_v11 = vld [vmem:[#allocation15_spill] sm:$0xff] }
 0x284   :  { %v4005_v22 = vrot.slane %v4003_v42, 4  ;;  %v4008_v9 = vrot.slane %v4006_v4, 5  ;;  %v16678_v59 = vrot.slane %v4012_v56, 5  ;;  %v4018_v49 = vrot.slane %v4016_v34, 4 }
 0x285   :  { %v3986_v5 = vrot.slane %v3985_v63, 4  ;;  %v3996_v47 = vrot.slane %v3995_v20, 4  ;;  %v4000_v37 = vrot.slane %v3998_v54, 5  ;;  %v7790_v28 = vrot.slane %v12114_v17, 5  ;;  %v12116_v54 = vld [vmem:[%s17989_s1 + $0x1d4] sm:$0xf] }
 0x286   :  { %v4029_v14 = vrot.slane %v4027_v51, 4  ;;  %v4032_v39 = vrot.slane %v4030_v31, 5  ;;  %v16683_v27 = vrot.slane %v4036_v21, 5  ;;  %v4042_v8 = vrot.slane %v4040_v38, 4  ;;  %v12117_v31 = vld [vmem:[%s17990_s2 + $0x1d0] sm:$0xf] }
 0x287   :  { %v18447_v42 = vcombine.low %v18445_v50, %v18446_v11  ;;  %v18448_v4 = vcombine.low %v16392_v52, %v16399_v36  ;;  %v16693_v56 = vcombine.low %v3943_v29, %v3953_v41  ;;  %v16695_v34 = vcombine.low %v3967_v55, %v3977_v10  ;;  %v12115_v52 = vld [vmem:[%s17990_s2 + $0x1c0] sm:$0xf] }
 0x288   :  { %v9896_v63 = vcombine.low %v16656_v57, %v16673_v6  ;;  %v18449_v20 = vcombine.low %v16407_v30, %v16416_v58  ;;  %v7793_v36 = vrot.slane %v12115_v52, 5  ;;  %v4009_v29 = vor.u32 %v4008_v9, %v4005_v22 }
 0x289   :  { %10627 = vmatmul.mubr.msk.bf16.gmra.mrb[60].mxu1 %vm990_vm4, %v18447_v42  ;;  %10925 = vmatmul.mubr.msk.bf16.gmra.mrb[28].mxu0 %vm990_vm4, %v18448_v4  ;;  %v4019_v41 = vor.u32 %v4018_v49, %v16678_v59  ;;  %v4022_v51 = vshll.u32 %v12116_v54, 16  ;;  %v16717_v30 = vsel %vm12721_vm8, %v9864_v25, %v7790_v28  ;;  %v7792_v58 = vrot.slane %v7790_v28, 4 }
 0x28a   :  { %10664 = vmatprep.mubr.msk.bf16.mxu1 %vm990_vm4, %v16477_v19  ;;  %10928 = vmatprep.mubr.msk.bf16.mxu0 %vm990_vm4, %v18449_v20  ;;  %v3991_v19 = vsel %vm12240_vm5, %v3986_v5, %v16619_v33  ;;  %v7797_v21 = vrot.slane %v12117_v31, 5  ;;  %v4001_v38 = vsel %vm12240_vm5, %v3996_v47, %v4000_v37  ;;  %v4033_v55 = vor.u32 %v4032_v39, %v4029_v14  ;;  %v12118_v33 = vld [vmem:[%s17989_s1 + $0x1e8] sm:$0xf]  ;;  %v12119_v47 = vld [vmem:[%s17990_s2 + $0x1cc] sm:$0xf] }
 0x28b   :  { %v4043_v10 = vor.u32 %v4042_v8, %v16683_v27  ;;  %v4046_v22 = vshll.u32 %v12118_v33, 16  ;;  %v4051_v25 = vshrl.u32 %v18426_v48, 16  ;;  %v4054_v9 = vshll.u32 %v18426_v48, 16  ;;  %v12120_v48 = vld [vmem:[%s17990_s2 + $0x1d4] sm:$0xf] }
 0x28c   :  { %v4060_v49 = vshll.u32 %v18427_v0, 16  ;;  %v4064_v5 = vshrl.u32 %v18427_v0, 16  ;;  %v4010_v17 = vrot.slane %v4009_v29, 4  ;;  %v4020_v28 = vrot.slane %v4019_v41, 4  ;;  %v12121_v29 = vld [vmem:[%s17990_s2 + $0x1e4] sm:$0xf] }
 0x28d   :  { %v4024_v42 = vrot.slane %v4022_v51, 5  ;;  %v9865_v37 = vrot.slane %v12119_v47, 9  ;;  %v16735_v14 = vcombine.low %v3991_v19, %v4001_v38  ;;  %v16739_v39 = vsel %vm12721_vm8, %v7792_v58, %v7793_v36 }
 0x28e   :  { %v7799_v8 = vrot.slane %v7797_v21, 4  ;;  %v7800_v0 = vrot.slane %v12120_v48, 5  ;;  %v4034_v4 = vrot.slane %v4033_v55, 4  ;;  %v4044_v20 = vrot.slane %v4043_v10, 4 }
 0x28f   :  { %v4048_v52 = vrot.slane %v4046_v22, 5  ;;  %v7804_v41 = vrot.slane %v12121_v29, 5  ;;  %v18450_v36 = vcombine.low %v16459_v43, %v16463_v7  ;;  %v4053_v54 = vrot.slane %v4051_v25, 4  ;;  %v12124_v25 = vld [vmem:[%s17989_s1 + $0x1fc] sm:$0xf] }
 0x290   :  { %v4056_v51 = vrot.slane %v4054_v9, 5  ;;  %v16753_v19 = vrot.slane %v4060_v49, 5  ;;  %v4066_v58 = vrot.slane %v4064_v5, 4  ;;  %v18451_v31 = vcombine.low %v16502_v1, %v16506_v32  ;;  %v12123_v32 = vld [vmem:[%s17990_s2 + $0x1e8] sm:$0xf] }
 0x291   :  { %10665 = vmatmul.mubr.msk.bf16.vlgmr.msra.gmra.mrb[32].mxu1 %vm990_vm4, %v16483_v62  ;;  %10929 = vmatmul.mubr.msk.bf16.gmra.mrb[32].mxu0 %vm990_vm4, %v18450_v36  ;;  %v4015_v62 = vsel %vm12240_vm5, %v4010_v17, %v16678_v59  ;;  %v4025_v43 = vsel %vm12240_vm5, %v4020_v28, %v4024_v42  ;;  %v16768_v7 = vsel %vm12721_vm8, %v9865_v37, %v7797_v21  ;;  %v7807_v59 = vrot.slane %v12123_v32, 5  ;;  %v18452_v17 = vld [vmem:[#allocation11_spill] sm:$0xff] }
 0x292   :  { %10668 = vmatprep.mubr.msk.bf16.mxu1 %vm990_vm4, %v16610_v53  ;;  %10932 = vmatprep.mubr.msk.bf16.mxu0 %vm990_vm4, %v18451_v31  ;;  %v12122_v53 = vld [vmem:[%s17990_s2 + $0x1e0] sm:$0xf]  ;;  %v16775_v1 = vsel %vm12721_vm8, %v7799_v8, %v7800_v0  ;;  %v4075_v55 = vshrl.u32 %v18430_v61, 16  ;;  %v4078_v10 = vshll.u32 %v18430_v61, 16  ;;  %v4039_v21 = vsel %vm12240_vm5, %v4034_v4, %v16683_v27  ;;  %v12125_v8 = vld [vmem:[%s17990_s2 + $0x1f4] sm:$0xf] }
 0x293   :  { %v9866_v38 = vrot.slane %v12122_v53, 9  ;;  %v4049_v33 = vsel %vm12240_vm5, %v4044_v20, %v4048_v52  ;;  %v7806_v22 = vrot.slane %v7804_v41, 4  ;;  %v4070_v9 = vshll.u32 %v12124_v25, 16  ;;  %v12126_v0 = vld [vmem:[%s17990_s2 + $0x1f8] sm:$0xf] }
 0x294   :  { %v4057_v49 = vor.u32 %v4056_v51, %v4053_v54  ;;  %v4067_v5 = vor.u32 %v4066_v58, %v16753_v19  ;;  %v4084_v28 = vshll.u32 %v18452_v17, 16  ;;  %v4088_v61 = vshrl.u32 %v18452_v17, 16  ;;  %v12127_v54 = vld [vmem:[%s17990_s2 + $0x1fc] sm:$0xf] }
 0x295   :  { %v9897_v42 = vcombine.low %v16717_v30, %v16739_v39  ;;  %v16795_v27 = vcombine.low %v4015_v62, %v4025_v43  ;;  %v9898_v47 = vcombine.low %v16768_v7, %v16775_v1  ;;  %v16801_v37 = vsel %vm12721_vm8, %v9866_v38, %v7804_v41  ;;  %v12134_v30 = vld [vmem:[%s17990_s2 + $0x220] sm:$0xf]  ;;  %v12138_v7 = vld [vmem:[%s17990_s2 + $0x230] sm:$0xf] }
 0x296   :  { %v9867_v48 = vrot.slane %v12125_v8, 9  ;;  %v7811_v4 = vrot.slane %v12126_v0, 5  ;;  %v4077_v20 = vrot.slane %v4075_v55, 4  ;;  %v4080_v52 = vrot.slane %v4078_v10, 5 }
 0x297   :  { %v16809_v29 = vcombine.low %v4039_v21, %v4049_v33  ;;  %v16813_v36 = vsel %vm12721_vm8, %v7806_v22, %v7807_v59  ;;  %v4072_v41 = vrot.slane %v4070_v9, 5  ;;  %v7814_v51 = vrot.slane %v12127_v54, 5  ;;  %v12129_v22 = vld [vmem:[%s17990_s2 + $0x20c] sm:$0xf] }
 0x298   :  { %v4058_v58 = vrot.slane %v4057_v49, 4  ;;  %v4068_v31 = vrot.slane %v4067_v5, 4  ;;  %v16824_v62 = vrot.slane %v4084_v28, 5  ;;  %v4090_v43 = vrot.slane %v4088_v61, 4  ;;  %v12130_v28 = vld [vmem:[%s17990_s2 + $0x208] sm:$0xf] }
 0x299   :  { %10669 = vmatmul.mubr.msk.bf16.gmra.mrb[36].mxu1 %vm990_vm4, %v16612_v45  ;;  %10933 = vmatmul.mubr.msk.bf16.gmra.mrb[36].mxu0 %vm990_vm4, %v9894_v23  ;;  %v18453_v53 = vcombine.low %v16597_v35, %v16604_v60  ;;  %v4099_v45 = vshrl.u32 %v16218_v46, 16  ;;  %v4102_v38 = vshll.u32 %v16218_v46, 16  ;;  %v4108_v15 = vshll.u32 %v18434_v44, 16  ;;  %v12128_v35 = vld [vmem:[%s17989_s1 + $0x210] sm:$0xf] }
 0x29a   :  { %10672 = vmatprep.mubr.msk.bf16.mxu1 %vm990_vm4, %v16693_v56  ;;  %v4112_v16 = vshrl.u32 %v18434_v44, 16  ;;  %v16838_v23 = vsel %vm12721_vm8, %v9867_v48, %v7811_v4  ;;  %v7813_v32 = vrot.slane %v7811_v4, 4  ;;  %v4081_v59 = vor.u32 %v4080_v52, %v4077_v20 }
 0x29b   :  { %10936 = vmatprep.mubr.msk.bf16.mxu0 %vm990_vm4, %v18453_v53  ;;  %v4094_v60 = vshll.u32 %v12128_v35, 16  ;;  %v4123_v56 = vshrl.u32 %v16248_v26, 16  ;;  %v4126_v55 = vshll.u32 %v16248_v26, 16  ;;  %v4132_v46 = vshll.u32 %v16243_v24, 16 }
 0x29c   :  { %v4136_v10 = vshrl.u32 %v16243_v24, 16  ;;  %v4063_v44 = vsel %vm12240_vm5, %v4058_v58, %v16753_v19  ;;  %v4073_v21 = vsel %vm12240_vm5, %v4068_v31, %v4072_v41  ;;  %v4091_v33 = vor.u32 %v4090_v43, %v16824_v62  ;;  %v12131_v41 = vld [vmem:[%s17990_s2 + $0x210] sm:$0xf] }
 0x29d   :  { %v7818_v25 = vrot.slane %v12129_v22, 5  ;;  %v4101_v9 = vrot.slane %v4099_v45, 4  ;;  %v4104_v26 = vrot.slane %v4102_v38, 5  ;;  %v16856_v49 = vrot.slane %v4108_v15, 5 }
 0x29e   :  { %v4114_v5 = vrot.slane %v4112_v16, 4  ;;  %v16860_v24 = vsel %vm12721_vm8, %v7813_v32, %v7814_v51  ;;  %v16862_v19 = vrot.slane %v4081_v59, 4  ;;  %v16864_v17 = vrot.slane %v4094_v60, 5  ;;  %v12132_v51 = vld [vmem:[%s17989_s1 + $0x224] sm:$0xf] }
 0x29f   :  { %v9868_v61 = vrot.slane %v12130_v28, 9  ;;  %v4125_v8 = vrot.slane %v4123_v56, 4  ;;  %v4128_v48 = vrot.slane %v4126_v55, 5  ;;  %v16869_v0 = vrot.slane %v4132_v46, 5  ;;  %v12137_v55 = vld [vmem:[%s17990_s2 + $0x234] sm:$0xf] }
 0x2a0   :  { %v4138_v4 = vrot.slane %v4136_v10, 4  ;;  %v16877_v20 = vrot.slane %v4091_v33, 4  ;;  %v7820_v52 = vrot.slane %v7818_v25, 4  ;;  %v7821_v54 = vrot.slane %v12131_v41, 5 }
 0x2a1   :  { %10673 = vmatmul.mubr.msk.bf16.gmra.mrb[40].mxu1 %vm990_vm4, %v16695_v34  ;;  %10937 = vmatmul.mubr.msk.bf16.gmra.mrb[40].mxu0 %vm990_vm4, %v9896_v63  ;;  %v4118_v58 = vshll.u32 %v12132_v51, 16  ;;  %v9899_v57 = vcombine.low %v16801_v37, %v16813_v36  ;;  %v4105_v6 = vor.u32 %v4104_v26, %v4101_v9  ;;  %v4115_v34 = vor.u32 %v4114_v5, %v16856_v49  ;;  %v12133_v63 = vld [vmem:[%s17990_s2 + $0x21c] sm:$0xf] }
 0x2a2   :  { %10676 = vmatprep.mubr.msk.bf16.mxu1 %vm990_vm4, %v16735_v14  ;;  %10940 = vmatprep.mubr.msk.bf16.mxu0 %vm990_vm4, %v9897_v42  ;;  %v9869_v31 = vrot.slane %v12133_v63, 9  ;;  %v16897_v43 = vcombine.low %v4063_v44, %v4073_v21  ;;  %v9900_v14 = vcombine.low %v16838_v23, %v16860_v24  ;;  %v7825_v39 = vrot.slane %v12134_v30, 5  ;;  %v12135_v42 = vld [vmem:[%s17989_s1 + $0x238] sm:$0xf] }
 0x2a3   :  { %v4142_v37 = vshll.u32 %v12135_v42, 16  ;;  %v4087_v36 = vsel %vm12240_vm5, %v16862_v19, %v16824_v62  ;;  %v16913_v53 = vsel %vm12721_vm8, %v9868_v61, %v7818_v25  ;;  %v4129_v45 = vor.u32 %v4128_v48, %v4125_v8  ;;  %v12136_v62 = vld [vmem:[%s17990_s2 + $0x224] sm:$0xf] }
 0x2a4   :  { %v4139_v38 = vor.u32 %v4138_v4, %v16869_v0  ;;  %v4097_v15 = vsel %vm12240_vm5, %v16877_v20, %v16864_v17  ;;  %v16922_v16 = vsel %vm12721_vm8, %v7820_v52, %v7821_v54  ;;  %v4120_v32 = vrot.slane %v4118_v58, 5 }
 0x2a5   :  { %v7828_v59 = vrot.slane %v12136_v62, 5  ;;  %v4106_v35 = vrot.slane %v4105_v6, 4  ;;  %v4116_v60 = vrot.slane %v4115_v34, 4  ;;  %v16929_v56 = vsel %vm12721_vm8, %v9869_v31, %v7825_v39  ;;  %v12140_v31 = vld [vmem:[%s17989_s1 + $0x24c] sm:$0xf] }
 0x2a6   :  { %v7832_v46 = vrot.slane %v12137_v55, 5  ;;  %v7827_v10 = vrot.slane %v7825_v39, 4  ;;  %v4144_v44 = vrot.slane %v4142_v37, 5  ;;  %v4147_v21 = vshrl.u32 %v16309_v13, 16  ;;  %v12141_v37 = vld [vmem:[%s17990_s2 + $0x248] sm:$0xf] }
 0x2a7   :  { %v4150_v33 = vshll.u32 %v16309_v13, 16  ;;  %v4130_v22 = vrot.slane %v4129_v45, 4  ;;  %v4140_v25 = vrot.slane %v4139_v38, 4  ;;  %v4156_v9 = vshll.u32 %v18439_v18, 16  ;;  %v12145_v55 = vld [vmem:[%s17990_s2 + $0x24c] sm:$0xf] }
 0x2a8   :  { %v4160_v26 = vshrl.u32 %v18439_v18, 16  ;;  %v4171_v5 = vshrl.u32 %v16327_v40, 16  ;;  %v4174_v19 = vshll.u32 %v16327_v40, 16  ;;  %v4180_v13 = vshll.u32 %v18442_v12, 16  ;;  %v12139_v40 = vld [vmem:[%s17990_s2 + $0x238] sm:$0xf] }
 0x2a9   :  { %10677 = vmatmul.mubr.msk.bf16.gmra.mrb[44].mxu1 %vm990_vm4, %v16795_v27  ;;  %10941 = vmatmul.mubr.msk.bf16.gmra.mrb[44].mxu0 %vm990_vm4, %v9898_v47  ;;  %v4184_v17 = vshrl.u32 %v18442_v12, 16  ;;  %v4111_v18 = vsel %vm12240_vm5, %v4106_v35, %v16856_v49  ;;  %v9870_v1 = vrot.slane %v12138_v7, 9  ;;  %v7834_v27 = vrot.slane %v7832_v46, 4 }
 0x2aa   :  { %10680 = vmatprep.mubr.msk.bf16.mxu1 %vm990_vm4, %v16809_v29  ;;  %10944 = vmatprep.mubr.msk.bf16.mxu0 %vm990_vm4, %v9899_v57  ;;  %v7835_v12 = vrot.slane %v12139_v40, 5  ;;  %v4121_v47 = vsel %vm12240_vm5, %v4116_v60, %v4120_v32  ;;  %v16964_v29 = vsel %vm12721_vm8, %v7827_v10, %v7828_v59  ;;  %v4149_v28 = vrot.slane %v4147_v21, 4  ;;  %v12143_v32 = vld [vmem:[%s17990_s2 + $0x25c] sm:$0xf]  ;;  %v12144_v60 = vld [vmem:[%s17990_s2 + $0x244] sm:$0xf] }
 0x2ab   :  { %v4152_v49 = vrot.slane %v4150_v33, 5  ;;  %v4135_v61 = vsel %vm12240_vm5, %v4130_v22, %v16869_v0  ;;  %v4145_v8 = vsel %vm12240_vm5, %v4140_v25, %v4144_v44  ;;  %v16971_v48 = vrot.slane %v4156_v9, 5  ;;  %v12147_v9 = vld [vmem:[%s17990_s2 + $0x260] sm:$0xf] }
 0x2ac   :  { %v4162_v4 = vrot.slane %v4160_v26, 4  ;;  %v4173_v20 = vrot.slane %v4171_v5, 4  ;;  %v4176_v52 = vrot.slane %v4174_v19, 5  ;;  %v16973_v41 = vrot.slane %v4180_v13, 5 }
 0x2ad   :  { %v4186_v54 = vrot.slane %v4184_v17, 4  ;;  %v9577_v51 = vcombine.low %v4087_v36, %v4097_v15  ;;  %v9901_v58 = vcombine.low %v16913_v53, %v16922_v16  ;;  %v7833_v57 = vsel %vm12721_vm8, %v9870_v1, %v7832_v46  ;;  %v12142_v53 = vld [vmem:[%s17989_s1 + $0x260] sm:$0xf] }
 0x2ae   :  { %v7836_v0 = vsel %vm12721_vm8, %v7834_v27, %v7835_v12  ;;  %v9578_v6 = vcombine.low %v4111_v18, %v4121_v47  ;;  %v9902_v34 = vcombine.low %v16929_v56, %v16964_v29  ;;  %v4153_v63 = vor.u32 %v4152_v49, %v4149_v28  ;;  %v12148_v29 = vld [vmem:[%s17989_s1 + $0x274] sm:$0xf] }
 0x2af   :  { %v4166_v30 = vshll.u32 %v12140_v31, 16  ;;  %v9579_v39 = vcombine.low %v4135_v61, %v4145_v8  ;;  %v4163_v42 = vor.u32 %v4162_v4, %v16971_v48  ;;  %v7839_v36 = vrot.slane %v12141_v37, 5 }
 0x2b0   :  { %v4190_v45 = vshll.u32 %v12142_v53, 16  ;;  %v9903_v38 = vcombine.low %v7833_v57, %v7836_v0  ;;  %v4177_v15 = vor.u32 %v4176_v52, %v4173_v20  ;;  %v4187_v16 = vor.u32 %v4186_v54, %v16973_v41 }
 0x2b1   :  { %10681 = vmatmul.mubr.msk.bf16.gmra.mrb[48].mxu1 %vm990_vm4, %v16897_v43  ;;  %10945 = vmatmul.mubr.msk.bf16.gmra.mrb[48].mxu0 %vm990_vm4, %v9900_v14  ;;  %v7846_v62 = vrot.slane %v12143_v32, 5  ;;  %v4195_v43 = vshrl.u32 %v18445_v50, 16  ;;  %v4198_v59 = vshll.u32 %v18445_v50, 16  ;;  %v4204_v23 = vshll.u32 %v18446_v11, 16  ;;  %v12146_v50 = vld [vmem:[%s17990_s2 + $0x258] sm:$0xf] }
 0x2b2   :  { %10684 = vmatprep.mubr.msk.bf16.mxu1 %vm990_vm4, %v9577_v51  ;;  %10948 = vmatprep.mubr.msk.bf16.mxu0 %vm990_vm4, %v9901_v58  ;;  %v4208_v24 = vshrl.u32 %v18446_v11, 16  ;;  %v4154_v14 = vrot.slane %v4153_v63, 4  ;;  %v4168_v35 = vrot.slane %v4166_v30, 5  ;;  %v9871_v56 = vrot.slane %v12144_v60, 9  ;;  %v12150_v58 = vld [vmem:[%s17990_s2 + $0x26c] sm:$0xf] }
 0x2b3   :  { %v7842_v46 = vrot.slane %v12145_v55, 5  ;;  %v4164_v10 = vrot.slane %v4163_v42, 4  ;;  %v7841_v44 = vrot.slane %v7839_v36, 4  ;;  %v4192_v21 = vrot.slane %v4190_v45, 5  ;;  %v12151_v63 = vld [vmem:[%s17990_s2 + $0x274] sm:$0xf] }
 0x2b4   :  { %v9872_v11 = vrot.slane %v12146_v50, 9  ;;  %v4178_v33 = vrot.slane %v4177_v15, 4  ;;  %v4188_v22 = vrot.slane %v4187_v16, 4  ;;  %v7848_v25 = vrot.slane %v7846_v62, 4 }
 0x2b5   :  { %v7849_v26 = vrot.slane %v12147_v9, 5  ;;  %v4197_v5 = vrot.slane %v4195_v43, 4  ;;  %v4200_v19 = vrot.slane %v4198_v59, 5  ;;  %v4206_v13 = vrot.slane %v4204_v23, 5 }
 0x2b6   :  { %v4210_v17 = vrot.slane %v4208_v24, 4  ;;  %v4159_v18 = vsel %vm12240_vm5, %v4154_v14, %v16971_v48  ;;  %v4169_v7 = vsel %vm12240_vm5, %v4164_v10, %v4168_v35  ;;  %v7840_v1 = vsel %vm12721_vm8, %v9871_v56, %v7839_v36  ;;  %v12149_v48 = vld [vmem:[%s17990_s2 + $0x270] sm:$0xf] }
 0x2b7   :  { %v7843_v27 = vsel %vm12721_vm8, %v7841_v44, %v7842_v46  ;;  %v4183_v40 = vsel %vm12240_vm5, %v4178_v33, %v16973_v41  ;;  %v4193_v12 = vsel %vm12240_vm5, %v4188_v22, %v4192_v21  ;;  %v7847_v47 = vsel %vm12721_vm8, %v9872_v11, %v7846_v62 }
 0x2b8   :  { %v4214_v28 = vshll.u32 %v12148_v29, 16  ;;  %v7850_v49 = vsel %vm12721_vm8, %v7848_v25, %v7849_v26  ;;  %v4201_v61 = vor.u32 %v4200_v19, %v4197_v5  ;;  %v4211_v8 = vor.u32 %v4210_v17, %v4206_v13 }
 0x2b9   :  { %10685 = vmatmul.mubr.msk.bf16.gmra.mrb[52].mxu1 %vm990_vm4, %v9578_v6  ;;  %10949 = vmatmul.mubr.msk.bf16.gmra.mrb[52].mxu0 %vm990_vm4, %v9902_v34  ;;  %v7853_v4 = vrot.slane %v12149_v48, 5  ;;  %v9580_v20 = vcombine.low %v4159_v18, %v4169_v7  ;;  %v9904_v52 = vcombine.low %v7840_v1, %v7843_v27  ;;  %v9581_v41 = vcombine.low %v4183_v40, %v4193_v12  ;;  %v17122_v7 = vld [vmem:[%s17991_s4] ss:$0 sm:$0xff] }
 0x2ba   :  { %10688 = vmatprep.mubr.msk.bf16.mxu1 %vm990_vm4, %v9579_v39  ;;  %10952 = vmatprep.mubr.msk.bf16.mxu0 %vm990_vm4, %v9903_v38  ;;  %v9905_v54 = vcombine.low %v7847_v47, %v7850_v49  ;;  %v4216_v51 = vrot.slane %v4214_v28, 5  ;;  %v9873_v57 = vrot.slane %v12150_v58, 9  ;;  %v4202_v0 = vrot.slane %v4201_v61, 4  ;;  %v17127_v40 = vld [vmem:[%s17992_s5] ss:$0 sm:$0xff] }
 0x2bb   :  { %v4212_v6 = vrot.slane %v4211_v8, 4  ;;  %v7855_v34 = vrot.slane %v7853_v4, 4  ;;  %v7856_v31 = vrot.slane %v12151_v63, 5 }
 0x2bc   :  { %v7854_v30 = vsel %vm12721_vm8, %v9873_v57, %v7853_v4  ;;  %v4207_v39 = vsel %vm12240_vm5, %v4202_v0, %v4206_v13 }
 0x2bd   :  { %v4217_v42 = vsel %vm12240_vm5, %v4212_v6, %v4216_v51  ;;  %v7857_v37 = vsel %vm12721_vm8, %v7855_v34, %v7856_v31 }
 0x2be   :  { %v9582_v36 = vcombine.low %v4207_v39, %v4217_v42  ;;  %v9906_v53 = vcombine.low %v7854_v30, %v7857_v37 }
 0x2c1   :  { %10689 = vmatmul.mubr.msk.bf16.gmra.mrb[56].mxu1 %vm990_vm4, %v9580_v20  ;;  %10953 = vmatmul.mubr.msk.bf16.gmra.mrb[56].mxu0 %vm990_vm4, %v9904_v52 }
 0x2c2   :  { %10692 = vmatprep.mubr.msk.bf16.mxu1 %vm990_vm4, %v9581_v41  ;;  %10956 = vmatprep.mubr.msk.bf16.mxu0 %vm990_vm4, %v9905_v54 }
 0x2c9   :  { %10693 = vmatmul.mubr.msk.bf16.gmra.mrb[60].mxu1 %vm990_vm4, %v9582_v36  ;;  %10957 = vmatmul.mubr.msk.bf16.gmra.mrb[60].mxu0 %vm990_vm4, %v9906_v53 }
 0x2d6   :  { %v10568_v45 = vpop.f32.mrb[0].mxu1 }
 0x2d7   :  { %v3131_v38 = vpop.f32.mrb[1].mxu1 }
 0x2d8   :  { %v10569_v15 = vpop.f32.mrb[2].mxu1 }
 0x2d9   :  { %v3134_v16 = vpop.f32.mrb[3].mxu1 }
 0x2de   :  { %v10572_v32 = vpop.f32.mrb[4].mxu1 }
 0x2df   :  { %v3147_v62 = vpop.f32.mrb[5].mxu1 }
 0x2e0   :  { %v10573_v43 = vpop.f32.mrb[6].mxu1 }
 0x2e1   :  { %v17069_v59 = vpop.f32.mrb[7].mxu1 }
 0x2ea   :  { %v17071_v2 = vpop.f32.mrb[8].mxu1 }
 0x2eb   :  { %v17073_v23 = vpop.f32.mrb[9].mxu1 }
 0x2ec   :  { %v17075_v3 = vpop.f32.mrb[10].mxu1 }
 0x2ed   :  { %v17077_v24 = vpop.f32.mrb[11].mxu1 }
 0x2f2   :  { %v17079_v14 = vpop.f32.mrb[12].mxu1 }
 0x2f3   :  { %v17081_v35 = vpop.f32.mrb[13].mxu1 }
 0x2f4   :  { %v17083_v60 = vpop.f32.mrb[14].mxu1 }
 0x2f5   :  { %v17085_v56 = vpop.f32.mrb[15].mxu1 }
 0x2fa   :  { %v17087_v55 = vpop.f32.mrb[16].mxu1 }
 0x2fb   :  { %v17089_v46 = vpop.f32.mrb[17].mxu1 }
 0x2fc   :  { %v17091_v10 = vpop.f32.mrb[18].mxu1 }
 0x2fd   :  { %v17093_v44 = vpop.f32.mrb[19].mxu1 }
 0x302   :  { %v17095_v21 = vpop.f32.mrb[20].mxu1 }
 0x303   :  { %v17097_v50 = vpop.f32.mrb[21].mxu1 }
 0x304   :  { %v17099_v11 = vpop.f32.mrb[22].mxu1 }
 0x305   :  { %v17101_v33 = vpop.f32.mrb[23].mxu1 }
 0x30a   :  { %v17103_v22 = vpop.f32.mrb[24].mxu1 }
 0x30b   :  { %v17105_v25 = vpop.f32.mrb[25].mxu1 }
 0x30c   :  { %v17107_v9 = vpop.f32.mrb[26].mxu1 }
 0x30d   :  { %v17109_v26 = vpop.f32.mrb[27].mxu1 }
 0x312   :  { %v17111_v5 = vpop.f32.mrb[28].mxu1 }
 0x313   :  { %v17113_v19 = vpop.f32.mrb[29].mxu1 }
 0x314   :  { %v17115_v13 = vpop.f32.mrb[30].mxu1 }
 0x315   :  { %v17117_v17 = vpop.f32.mrb[31].mxu1 }
 0x31c   :  { %v10898_v18 = vpop.f32.mrb[0].mxu0 }
 0x31d   :  { %v10962_v1 = vadd.f32 %v10898_v18, %v10568_v45  ;;  %v8089_v27 = vpop.f32.mrb[1].mxu0 }
 0x31e   :  { %v10963_v12 = vadd.f32 %v8089_v27, %v3131_v38  ;;  %v10899_v47 = vpop.f32.mrb[2].mxu0 }
 0x31f   :  { %v8417_v29 = vmul.f32 %v10962_v1, %v17122_v7  ;;  %v10964_v28 = vadd.f32 %v10899_v47, %v10569_v15  ;;  %v8092_v49 = vpop.f32.mrb[3].mxu0 }
 0x320   :  { %v8415_v61 = vmul.f32 %v10963_v12, %v17122_v7  ;;  %v10965_v8 = vadd.f32 %v8092_v49, %v3134_v16 }
 0x321   :  { %v17132_v48 = vadd.f32 %v17127_v40, %v8417_v29  ;;  %v8418_v4 = vmul.f32 %v10964_v28, %v17122_v7 }
 0x322   :  { %v17136_v20 = vadd.f32 %v17127_v40, %v8415_v61  ;;  %v8416_v52 = vmul.f32 %v10965_v8, %v17122_v7 }
 0x323   :  { %v8552_v41 = vsub.f32 0.0, %v17132_v48  ;;  %v17141_v54 = vadd.f32 %v17127_v40, %v8418_v4 }
 0x324   :  { %v8550_v51 = vsub.f32 0.0, %v17136_v20  ;;  %v17145_v58 = vadd.f32 %v17127_v40, %v8416_v52 }
 0x325   :  { %v8618_v0 = vmul.f32 1.442695, %v8552_v41  ;;  %v8553_v6 = vsub.f32 0.0, %v17141_v54 }
 0x326   :  { %v8614_v31 = vmul.f32 1.442695, %v8550_v51  ;;  %v8551_v30 = vsub.f32 0.0, %v17145_v58 }
 0x327   :  { %11571 = vpow2.f32 %v8618_v0  ;;  %v8620_v37 = vmul.f32 1.442695, %v8553_v6 }
 0x328   :  { %11573 = vpow2.f32 %v8614_v31  ;;  %v8616_v38 = vmul.f32 1.442695, %v8551_v30 }
 0x329   :  { %v10902_v57 = vpop.f32.mrb[4].mxu0  ;;  %11575 = vpow2.f32 %v8620_v37 }
 0x32a   :  { %v10966_v34 = vadd.f32 %v10902_v57, %v10572_v32  ;;  %v8105_v63 = vpop.f32.mrb[5].mxu0  ;;  %11577 = vpow2.f32 %v8616_v38 }
 0x32b   :  { %v10967_v39 = vadd.f32 %v8105_v63, %v3147_v62  ;;  %v10903_v42 = vpop.f32.mrb[6].mxu0 }
 0x32c   :  { %v8421_v36 = vmul.f32 %v10966_v34, %v17122_v7  ;;  %v10968_v53 = vadd.f32 %v10903_v42, %v10573_v43  ;;  %v8108_v45 = vpop.f32.mrb[7].mxu0 }
 0x32d   :  { %v8419_v15 = vmul.f32 %v10967_v39, %v17122_v7  ;;  %v10969_v16 = vadd.f32 %v8108_v45, %v17069_v59 }
 0x32e   :  { %v17153_v32 = vadd.f32 %v17127_v40, %v8421_v36  ;;  %v8422_v18 = vmul.f32 %v10968_v53, %v17122_v7 }
 0x32f   :  { %v17157_v62 = vadd.f32 %v17127_v40, %v8419_v15  ;;  %v8420_v1 = vmul.f32 %v10969_v16, %v17122_v7 }
 0x330   :  { %v8556_v43 = vsub.f32 0.0, %v17153_v32  ;;  %v17162_v27 = vadd.f32 %v17127_v40, %v8422_v18 }
 0x331   :  { %v8554_v12 = vsub.f32 0.0, %v17157_v62  ;;  %v17166_v59 = vadd.f32 %v17127_v40, %v8420_v1  ;;  %v10906_v47 = vpop.f32.mrb[8].mxu0  ;;  %v11572_v31 = vpop.eup %11571 }
 0x332   :  { %v8626_v29 = vmul.f32 1.442695, %v8556_v43  ;;  %v8557_v28 = vsub.f32 0.0, %v17162_v27  ;;  %v10970_v49 = vadd.f32 %v10906_v47, %v17071_v2  ;;  %v8121_v61 = vpop.f32.mrb[9].mxu0  ;;  %v11574_v39 = vpop.eup %11573  ;;  %v8744_v42 = vadd.f32 1.0, %v11572_v31 }
 0x333   :  { %v8622_v8 = vmul.f32 1.442695, %v8554_v12  ;;  %v8555_v4 = vsub.f32 0.0, %v17166_v59  ;;  %v10971_v52 = vadd.f32 %v8121_v61, %v17073_v23  ;;  %v10907_v41 = vpop.f32.mrb[10].mxu0  ;;  %v11576_v36 = vpop.eup %11575  ;;  %v8742_v53 = vadd.f32 1.0, %v11574_v39 }
 0x334   :  { %11579 = vpow2.f32 %v8626_v29  ;;  %v8628_v51 = vmul.f32 1.442695, %v8557_v28  ;;  %v8425_v57 = vmul.f32 %v10970_v49, %v17122_v7  ;;  %v10972_v0 = vadd.f32 %v10907_v41, %v17075_v3  ;;  %v8124_v6 = vpop.f32.mrb[11].mxu0  ;;  %v11578_v38 = vpop.eup %11577 }
 0x335   :  { %11581 = vpow2.f32 %v8622_v8  ;;  %v8624_v34 = vmul.f32 1.442695, %v8555_v4  ;;  %v8423_v63 = vmul.f32 %v10971_v52, %v17122_v7  ;;  %v10973_v2 = vadd.f32 %v8124_v6, %v17077_v24 }
 0x336   :  { %11583 = vpow2.f32 %v8628_v51  ;;  %v17177_v30 = vadd.f32 %v17127_v40, %v8425_v57  ;;  %v8426_v23 = vmul.f32 %v10972_v0, %v17122_v7  ;;  %v8745_v15 = vadd.f32 1.0, %v11576_v36 }
 0x337   :  { %11585 = vpow2.f32 %v8624_v34  ;;  %v17181_v37 = vadd.f32 %v17127_v40, %v8423_v63  ;;  %v8424_v3 = vmul.f32 %v10973_v2, %v17122_v7  ;;  %v8743_v43 = vadd.f32 1.0, %v11578_v38 }
 0x338   :  { %v8560_v45 = vsub.f32 0.0, %v17177_v30  ;;  %v17186_v24 = vadd.f32 %v17127_v40, %v8426_v23  ;;  %11587 = vrcp.f32 %v8744_v42 }
 0x339   :  { %v8558_v16 = vsub.f32 0.0, %v17181_v37  ;;  %v17190_v18 = vadd.f32 %v17127_v40, %v8424_v3  ;;  %v10910_v1 = vpop.f32.mrb[12].mxu0  ;;  %11589 = vrcp.f32 %v8742_v53 }
 0x33a   :  { %v8634_v12 = vmul.f32 1.442695, %v8560_v45  ;;  %v8561_v47 = vsub.f32 0.0, %v17186_v24  ;;  %v8137_v29 = vpop.f32.mrb[13].mxu0  ;;  %11591 = vrcp.f32 %v8745_v15  ;;  %v10974_v61 = vadd.f32 %v10910_v1, %v17079_v14 }
 0x33b   :  { %v8630_v28 = vmul.f32 1.442695, %v8558_v16  ;;  %v8559_v49 = vsub.f32 0.0, %v17190_v18  ;;  %v10911_v8 = vpop.f32.mrb[14].mxu0  ;;  %11593 = vrcp.f32 %v8743_v43  ;;  %v10975_v52 = vadd.f32 %v8137_v29, %v17081_v35 }
 0x33c   :  { %v8636_v4 = vmul.f32 1.442695, %v8561_v47  ;;  %v10976_v41 = vadd.f32 %v10911_v8, %v17083_v60  ;;  %v8140_v51 = vpop.f32.mrb[15].mxu0  ;;  %11595 = vpow2.f32 %v8634_v12  ;;  %v8429_v0 = vmul.f32 %v10974_v61, %v17122_v7 }
 0x33d   :  { %v8632_v57 = vmul.f32 1.442695, %v8559_v49  ;;  %v10977_v6 = vadd.f32 %v8140_v51, %v17085_v56  ;;  %11597 = vpow2.f32 %v8630_v28  ;;  %v8427_v63 = vmul.f32 %v10975_v52, %v17122_v7 }
 0x33e   :  { %v11580_v34 = vpop.eup %11579  ;;  %v8430_v14 = vmul.f32 %v10976_v41, %v17122_v7  ;;  %11599 = vpow2.f32 %v8636_v4  ;;  %v17202_v35 = vadd.f32 %v17127_v40, %v8429_v0 }
 0x33f   :  { %v11582_v2 = vpop.eup %11581  ;;  %v8748_v31 = vadd.f32 1.0, %v11580_v34  ;;  %v8428_v60 = vmul.f32 %v10977_v6, %v17122_v7  ;;  %11601 = vpow2.f32 %v8632_v57  ;;  %v17206_v56 = vadd.f32 %v17127_v40, %v8427_v63 }
 0x340   :  { %v11584_v23 = vpop.eup %11583  ;;  %v8746_v39 = vadd.f32 1.0, %v11582_v2  ;;  %v17209_v42 = vadd.f32 %v17127_v40, %v8430_v14  ;;  %v8564_v53 = vsub.f32 0.0, %v17202_v35 }
 0x341   :  { %v11586_v3 = vpop.eup %11585  ;;  %11603 = vrcp.f32 %v8748_v31  ;;  %v8749_v36 = vadd.f32 1.0, %v11584_v23  ;;  %v17213_v45 = vadd.f32 %v17127_v40, %v8428_v60  ;;  %v8562_v16 = vsub.f32 0.0, %v17206_v56 }
 0x342   :  { %v10914_v38 = vpop.f32.mrb[16].mxu0  ;;  %11605 = vrcp.f32 %v8746_v39  ;;  %v8747_v15 = vadd.f32 1.0, %v11586_v3  ;;  %v8565_v1 = vsub.f32 0.0, %v17209_v42  ;;  %v11588_v12 = vpop.eup %11587  ;;  %v8642_v47 = vmul.f32 1.442695, %v8564_v53 }
 0x343   :  { %v8153_v43 = vpop.f32.mrb[17].mxu0  ;;  %11607 = vrcp.f32 %v8749_v36  ;;  %v8563_v29 = vsub.f32 0.0, %v17213_v45  ;;  %v10978_v28 = vadd.f32 %v10914_v38, %v17087_v55  ;;  %v11590_v61 = vpop.eup %11589  ;;  %v8872_v8 = vmul.f32 %v11588_v12, %v17132_v48 }
 0x344   :  { %v10915_v49 = vpop.f32.mrb[18].mxu0  ;;  %11609 = vrcp.f32 %v8747_v15  ;;  %v8638_v4 = vmul.f32 1.442695, %v8562_v16  ;;  %v8644_v52 = vmul.f32 1.442695, %v8565_v1  ;;  %v11592_v51 = vpop.eup %11591  ;;  %v8870_v57 = vmul.f32 %v11590_v61, %v17136_v20 }
 0x345   :  { %v8156_v41 = vpop.f32.mrb[19].mxu0  ;;  %11611 = vpow2.f32 %v8642_v47  ;;  %v8640_v0 = vmul.f32 1.442695, %v8563_v29  ;;  %v8433_v6 = vmul.f32 %v10978_v28, %v17122_v7  ;;  %v11594_v34 = vpop.eup %11593  ;;  %v10007_v63 = vpack.c.bf16 %v8872_v8, %v8872_v8 }
 0x346   :  { %v8873_v14 = vmul.f32 %v11592_v51, %v17141_v54  ;;  %11613 = vpow2.f32 %v8638_v4  ;;  %v10979_v55 = vadd.f32 %v8153_v43, %v17089_v46  ;;  %v11596_v2 = vpop.eup %11595  ;;  %v10005_v48 = vpack.c.bf16 %v8870_v57, %v8870_v57 }
 0x347   :  { %v8871_v31 = vmul.f32 %v11594_v34, %v17145_v58  ;;  %11615 = vpow2.f32 %v8644_v52  ;;  %v17226_v60 = vadd.f32 %v17127_v40, %v8433_v6  ;;  %v11598_v20 = vpop.eup %11597  ;;  %9193 = vst.msk [vmem:[%s17993_s6 + $0x8] sm:$0xf] %vm9190_vm9, %v10007_v63  ;;  %v8752_v39 = vadd.f32 1.0, %v11596_v2 }
 0x348   :  { %v10008_v23 = vpack.c.bf16 %v8873_v14, %v8873_v14  ;;  %11617 = vpow2.f32 %v8640_v0  ;;  %v8431_v54 = vmul.f32 %v10979_v55, %v17122_v7  ;;  %v11600_v46 = vpop.eup %11599  ;;  %9191 = vst.msk [vmem:[%s17993_s6] sm:$0xf] %vm9190_vm9, %v10005_v48  ;;  %v8750_v3 = vadd.f32 1.0, %v11598_v20 }
 0x349   :  { %v10006_v58 = vpack.c.bf16 %v8871_v31, %v8871_v31  ;;  %v8568_v36 = vsub.f32 0.0, %v17226_v60  ;;  %v10980_v53 = vadd.f32 %v10915_v49, %v17091_v10  ;;  %v11602_v15 = vpop.eup %11601  ;;  %11619 = vrcp.f32 %v8752_v39 }
 0x34a   :  { %v10918_v38 = vpop.f32.mrb[20].mxu0  ;;  %9194 = vst.msk [vmem:[%s17993_s6 + $0xc] sm:$0xf] %vm9190_vm9, %v10008_v23  ;;  %v8753_v16 = vadd.f32 1.0, %v11600_v46  ;;  %v17244_v1 = vadd.f32 %v17127_v40, %v8431_v54  ;;  %v10981_v43 = vadd.f32 %v8156_v41, %v17093_v44  ;;  %11621 = vrcp.f32 %v8750_v3 }
 0x34b   :  { %v8169_v12 = vpop.f32.mrb[21].mxu0  ;;  %v11604_v47 = vpop.eup %11603  ;;  %9192 = vst.msk [vmem:[%s17993_s6 + $0x4] sm:$0xf] %vm9190_vm9, %v10006_v58  ;;  %v8751_v10 = vadd.f32 1.0, %v11602_v15  ;;  %v8650_v29 = vmul.f32 1.442695, %v8568_v36  ;;  %v8434_v28 = vmul.f32 %v10980_v53, %v17122_v7  ;;  %v10982_v0 = vadd.f32 %v10918_v38, %v17095_v21 }
 0x34c   :  { %v10919_v49 = vpop.f32.mrb[22].mxu0  ;;  %v11606_v61 = vpop.eup %11605  ;;  %v8876_v8 = vmul.f32 %v11604_v47, %v17153_v32  ;;  %11623 = vrcp.f32 %v8753_v16  ;;  %v8566_v4 = vsub.f32 0.0, %v17244_v1  ;;  %v8432_v44 = vmul.f32 %v10981_v43, %v17122_v7 }
 0x34d   :  { %v8172_v52 = vpop.f32.mrb[23].mxu0  ;;  %v11608_v41 = vpop.eup %11607  ;;  %v8874_v51 = vmul.f32 %v11606_v61, %v17157_v62  ;;  %11625 = vrcp.f32 %v8751_v10  ;;  %v17257_v57 = vadd.f32 %v17127_v40, %v8434_v28  ;;  %v10983_v38 = vadd.f32 %v8169_v12, %v17097_v50 }
 0x34e   :  { %v11610_v6 = vpop.eup %11609  ;;  %v10011_v34 = vpack.c.bf16 %v8876_v8, %v8876_v8  ;;  %v8877_v63 = vmul.f32 %v11608_v41, %v17162_v27  ;;  %11627 = vpow2.f32 %v8650_v29  ;;  %v8646_v32 = vmul.f32 1.442695, %v8566_v4 }
 0x34f   :  { %v11612_v14 = vpop.eup %11611  ;;  %v10009_v55 = vpack.c.bf16 %v8874_v51, %v8874_v51  ;;  %v8875_v2 = vmul.f32 %v11610_v6, %v17166_v59  ;;  %v8569_v48 = vsub.f32 0.0, %v17257_v57  ;;  %v17264_v62 = vadd.f32 %v17127_v40, %v8432_v44 }
 0x350   :  { %v11614_v31 = vpop.eup %11613  ;;  %9197 = vst.msk [vmem:[%s17993_s6 + $0x18] sm:$0xf] %vm9190_vm9, %v10011_v34  ;;  %v10012_v21 = vpack.c.bf16 %v8877_v63, %v8877_v63  ;;  %v8756_v20 = vadd.f32 1.0, %v11612_v14  ;;  %11629 = vpow2.f32 %v8646_v32  ;;  %v8437_v27 = vmul.f32 %v10982_v0, %v17122_v7 }
 0x351   :  { %v11616_v23 = vpop.eup %11615  ;;  %9195 = vst.msk [vmem:[%s17993_s6 + $0x10] sm:$0xf] %vm9190_vm9, %v10009_v55  ;;  %v10010_v59 = vpack.c.bf16 %v8875_v2, %v8875_v2  ;;  %v8754_v39 = vadd.f32 1.0, %v11614_v31  ;;  %v8652_v54 = vmul.f32 1.442695, %v8569_v48  ;;  %v8567_v46 = vsub.f32 0.0, %v17264_v62 }
 0x352   :  { %v11618_v3 = vpop.eup %11617  ;;  %9198 = vst.msk [vmem:[%s17993_s6 + $0x1c] sm:$0xf] %vm9190_vm9, %v10012_v21  ;;  %11631 = vrcp.f32 %v8756_v20  ;;  %v8757_v36 = vadd.f32 1.0, %v11616_v23  ;;  %v17281_v53 = vadd.f32 %v17127_v40, %v8437_v27  ;;  %v10984_v47 = vadd.f32 %v10919_v49, %v17099_v11 }
 0x353   :  { %v10922_v58 = vpop.f32.mrb[24].mxu0  ;;  %9196 = vst.msk [vmem:[%s17993_s6 + $0x14] sm:$0xf] %vm9190_vm9, %v10010_v59  ;;  %11633 = vrcp.f32 %v8754_v39  ;;  %v8755_v16 = vadd.f32 1.0, %v11618_v3  ;;  %v8648_v43 = vmul.f32 1.442695, %v8567_v46  ;;  %v11620_v29 = vpop.eup %11619  ;;  %v8435_v61 = vmul.f32 %v10983_v38, %v17122_v7 }
 0x354   :  { %v8185_v15 = vpop.f32.mrb[25].mxu0  ;;  %11635 = vrcp.f32 %v8757_v36  ;;  %v8572_v28 = vsub.f32 0.0, %v17281_v53  ;;  %v10985_v50 = vadd.f32 %v8172_v52, %v17101_v33  ;;  %v11622_v8 = vpop.eup %11621  ;;  %v8880_v4 = vmul.f32 %v11620_v29, %v17177_v30 }
 0x355   :  { %v10923_v10 = vpop.f32.mrb[26].mxu0  ;;  %11637 = vrcp.f32 %v8755_v16  ;;  %v8438_v44 = vmul.f32 %v10984_v47, %v17122_v7  ;;  %v10986_v41 = vadd.f32 %v10922_v58, %v17103_v22  ;;  %v8878_v11 = vmul.f32 %v11622_v8, %v17181_v37 }
 0x356   :  { %v8188_v12 = vpop.f32.mrb[27].mxu0  ;;  %v11624_v51 = vpop.eup %11623  ;;  %11639 = vpow2.f32 %v8652_v54  ;;  %v8658_v49 = vmul.f32 1.442695, %v8572_v28  ;;  %v17297_v0 = vadd.f32 %v17127_v40, %v8435_v61  ;;  %v10015_v34 = vpack.c.bf16 %v8880_v4, %v8880_v4 }
 0x357   :  { %v11626_v6 = vpop.eup %11625  ;;  %v8881_v33 = vmul.f32 %v11624_v51, %v17186_v24  ;;  %11641 = vpow2.f32 %v8648_v43  ;;  %v17301_v30 = vadd.f32 %v17127_v40, %v8438_v44  ;;  %v10013_v63 = vpack.c.bf16 %v8878_v11, %v8878_v11 }
 0x358   :  { %v11628_v52 = vpop.eup %11627  ;;  %v8879_v22 = vmul.f32 %v11626_v6, %v17190_v18  ;;  %11643 = vpow2.f32 %v8658_v49  ;;  %v8570_v37 = vsub.f32 0.0, %v17297_v0  ;;  %9201 = vst.msk [vmem:[%s17993_s6 + $0x28] sm:$0xf] %vm9190_vm9, %v10015_v34  ;;  %v8436_v55 = vmul.f32 %v10985_v50, %v17122_v7 }
 0x359   :  { %v10016_v32 = vpack.c.bf16 %v8881_v33, %v8881_v33  ;;  %v8760_v14 = vadd.f32 1.0, %v11628_v52  ;;  %v8573_v24 = vsub.f32 0.0, %v17301_v30  ;;  %9199 = vst.msk [vmem:[%s17993_s6 + $0x20] sm:$0xf] %vm9190_vm9, %v10013_v63  ;;  %v8441_v21 = vmul.f32 %v10986_v41, %v17122_v7 }
 0x35a   :  { %v11630_v48 = vpop.eup %11629  ;;  %v10014_v18 = vpack.c.bf16 %v8879_v22, %v8879_v22  ;;  %v8654_v31 = vmul.f32 1.442695, %v8570_v37  ;;  %v10987_v20 = vadd.f32 %v8185_v15, %v17105_v25  ;;  %v17324_v39 = vadd.f32 %v17127_v40, %v8436_v55 }
 0x35b   :  { %9202 = vst.msk [vmem:[%s17993_s6 + $0x2c] sm:$0xf] %vm9190_vm9, %v10016_v32  ;;  %11645 = vrcp.f32 %v8760_v14  ;;  %v8758_v23 = vadd.f32 1.0, %v11630_v48  ;;  %v8660_v59 = vmul.f32 1.442695, %v8573_v24  ;;  %v17331_v25 = vadd.f32 %v17127_v40, %v8441_v21 }
 0x35c   :  { %v17311_v2 = vpop.f32.mrb[28].mxu0  ;;  %v11632_v46 = vpop.eup %11631  ;;  %9200 = vst.msk [vmem:[%s17993_s6 + $0x24] sm:$0xf] %vm9190_vm9, %v10014_v18  ;;  %11647 = vpow2.f32 %v8654_v31  ;;  %v8439_v58 = vmul.f32 %v10987_v20, %v17122_v7  ;;  %v10988_v3 = vadd.f32 %v10923_v10, %v17107_v9  ;;  %v8571_v16 = vsub.f32 0.0, %v17324_v39 }
 0x35d   :  { %v8201_v27 = vpop.f32.mrb[29].mxu0  ;;  %v11634_v38 = vpop.eup %11633  ;;  %v8884_v15 = vmul.f32 %v11632_v46, %v17202_v35  ;;  %11649 = vrcp.f32 %v8758_v23  ;;  %v10989_v43 = vadd.f32 %v8188_v12, %v17109_v26  ;;  %v8576_v28 = vsub.f32 0.0, %v17331_v25 }
 0x35e   :  { %v10927_v54 = vpop.f32.mrb[30].mxu0  ;;  %v11636_v47 = vpop.eup %11635  ;;  %v8882_v29 = vmul.f32 %v11634_v38, %v17206_v56  ;;  %11651 = vpow2.f32 %v8660_v59  ;;  %v17341_v61 = vadd.f32 %v17127_v40, %v8439_v58  ;;  %v8656_v8 = vmul.f32 1.442695, %v8571_v16 }
 0x35f   :  { %v8204_v36 = vpop.f32.mrb[31].mxu0  ;;  %v11638_v50 = vpop.eup %11637  ;;  %v10019_v9 = vpack.c.bf16 %v8884_v15, %v8884_v15  ;;  %v8885_v10 = vmul.f32 %v11636_v47, %v17209_v42  ;;  %v8442_v35 = vmul.f32 %v10988_v3, %v17122_v7  ;;  %v8666_v12 = vmul.f32 1.442695, %v8576_v28 }
 0x360   :  { %v11640_v4 = vpop.eup %11639  ;;  %v10017_v44 = vpack.c.bf16 %v8882_v29, %v8882_v29  ;;  %v8883_v26 = vmul.f32 %v11638_v50, %v17213_v45  ;;  %v8574_v56 = vsub.f32 0.0, %v17341_v61  ;;  %11653 = vpow2.f32 %v8656_v8 }
 0x361   :  { %v11642_v41 = vpop.eup %11641  ;;  %9205 = vst.msk [vmem:[%s17993_s6 + $0x38] sm:$0xf] %vm9190_vm9, %v10019_v9  ;;  %v10020_v51 = vpack.c.bf16 %v8885_v10, %v8885_v10  ;;  %v8761_v11 = vadd.f32 1.0, %v11640_v4  ;;  %v17352_v42 = vadd.f32 %v17127_v40, %v8442_v35  ;;  %11655 = vpow2.f32 %v8666_v12 }
 0x362   :  { %v11644_v34 = vpop.eup %11643  ;;  %9203 = vst.msk [vmem:[%s17993_s6 + $0x30] sm:$0xf] %vm9190_vm9, %v10017_v44  ;;  %v10018_v45 = vpack.c.bf16 %v8883_v26, %v8883_v26  ;;  %v8759_v33 = vadd.f32 1.0, %v11642_v41  ;;  %v8662_v52 = vmul.f32 1.442695, %v8574_v56  ;;  %v8440_v14 = vmul.f32 %v10989_v43, %v17122_v7 }
 0x363   :  { %9206 = vst.msk [vmem:[%s17993_s6 + $0x3c] sm:$0xf] %vm9190_vm9, %v10020_v51  ;;  %11657 = vrcp.f32 %v8761_v11  ;;  %v8764_v37 = vadd.f32 1.0, %v11644_v34  ;;  %v8577_v32 = vsub.f32 0.0, %v17352_v42  ;;  %v10990_v48 = vadd.f32 %v17311_v2, %v17111_v5 }
 0x364   :  { %v10666_v49 = vpop.f32.mrb[32].mxu1  ;;  %v10930_v6 = vpop.f32.mrb[32].mxu0  ;;  %9204 = vst.msk [vmem:[%s17993_s6 + $0x34] sm:$0xf] %vm9190_vm9, %v10018_v45  ;;  %11659 = vrcp.f32 %v8759_v33  ;;  %v10991_v18 = vadd.f32 %v8201_v27, %v17113_v19  ;;  %v10992_v31 = vadd.f32 %v10927_v54, %v17115_v13  ;;  %v17381_v46 = vadd.f32 %v17127_v40, %v8440_v14 }
 0x365   :  { %v4577_v63 = vpop.f32.mrb[33].mxu1  ;;  %v8217_v22 = vpop.f32.mrb[33].mxu0  ;;  %11661 = vrcp.f32 %v8764_v37  ;;  %v8668_v59 = vmul.f32 1.442695, %v8577_v32  ;;  %v10993_v58 = vadd.f32 %v8204_v36, %v17117_v17  ;;  %v8445_v5 = vmul.f32 %v10990_v48, %v17122_v7 }
 0x366   :  { %v17364_v24 = vpop.f32.mrb[34].mxu1  ;;  %v17366_v55 = vpop.f32.mrb[34].mxu0  ;;  %11663 = vpow2.f32 %v8662_v52  ;;  %v8443_v19 = vmul.f32 %v10991_v18, %v17122_v7  ;;  %v8575_v27 = vsub.f32 0.0, %v17381_v46  ;;  %v8446_v54 = vmul.f32 %v10992_v31, %v17122_v7 }
 0x367   :  { %v17376_v21 = vpop.f32.mrb[35].mxu1  ;;  %v17378_v20 = vpop.f32.mrb[35].mxu0  ;;  %11665 = vpow2.f32 %v8668_v59  ;;  %v17391_v17 = vadd.f32 %v17127_v40, %v8445_v5  ;;  %v8444_v8 = vmul.f32 %v10993_v58, %v17122_v7  ;;  %v10994_v12 = vadd.f32 %v10930_v6, %v10666_v49 }
 0x368   :  { %v11646_v23 = vpop.eup %11645  ;;  %v8664_v47 = vmul.f32 1.442695, %v8575_v27  ;;  %v17397_v29 = vadd.f32 %v17127_v40, %v8446_v54  ;;  %v10995_v56 = vadd.f32 %v8217_v22, %v4577_v63  ;;  %v10996_v31 = vadd.f32 %v17366_v55, %v17364_v24 }
 0x369   :  { %v11648_v3 = vpop.eup %11647  ;;  %v8888_v38 = vmul.f32 %v11646_v23, %v17226_v60  ;;  %v17394_v60 = vadd.f32 %v17127_v40, %v8443_v19  ;;  %v8580_v9 = vsub.f32 0.0, %v17391_v17  ;;  %v17426_v6 = vadd.f32 %v17127_v40, %v8444_v8 }
 0x36a   :  { %v11650_v13 = vpop.eup %11649  ;;  %v8762_v2 = vadd.f32 1.0, %v11648_v3  ;;  %v8581_v26 = vsub.f32 0.0, %v17397_v29  ;;  %v8449_v63 = vmul.f32 %v10994_v12, %v17122_v7  ;;  %v8447_v18 = vmul.f32 %v10995_v56, %v17122_v7 }
 0x36b   :  { %v11652_v15 = vpop.eup %11651  ;;  %v10023_v16 = vpack.c.bf16 %v8888_v38, %v8888_v38  ;;  %v8886_v43 = vmul.f32 %v11650_v13, %v17244_v1  ;;  %v8578_v10 = vsub.f32 0.0, %v17394_v60  ;;  %v8674_v45 = vmul.f32 1.442695, %v8580_v9 }
 0x36c   :  { %11667 = vrcp.f32 %v8762_v2  ;;  %v8765_v36 = vadd.f32 1.0, %v11652_v15  ;;  %v17399_v28 = vpop.f32.mrb[36].mxu1  ;;  %v17401_v50 = vpop.f32.mrb[36].mxu0  ;;  %v8676_v49 = vmul.f32 1.442695, %v8581_v26  ;;  %v8579_v58 = vsub.f32 0.0, %v17426_v6 }
 0x36d   :  { %9209 = vst.msk [vmem:[%s17993_s6 + $0x48] sm:$0xf] %vm9190_vm9, %v10023_v16  ;;  %v10021_v1 = vpack.c.bf16 %v8886_v43, %v8886_v43  ;;  %v17410_v35 = vpop.f32.mrb[37].mxu1  ;;  %v17412_v4 = vpop.f32.mrb[37].mxu0  ;;  %v8670_v33 = vmul.f32 1.442695, %v8578_v10  ;;  %v17438_v3 = vadd.f32 %v17127_v40, %v8449_v63  ;;  %v10997_v9 = vadd.f32 %v17378_v20, %v17376_v21 }
 0x36e   :  { %v11654_v44 = vpop.eup %11653  ;;  %11669 = vrcp.f32 %v8765_v36  ;;  %v17415_v41 = vpop.f32.mrb[38].mxu1  ;;  %v8672_v55 = vmul.f32 1.442695, %v8579_v58  ;;  %v10998_v12 = vadd.f32 %v17401_v50, %v17399_v28 }
 0x36f   :  { %v17417_v51 = vpop.f32.mrb[38].mxu0  ;;  %v11656_v11 = vpop.eup %11655  ;;  %9207 = vst.msk [vmem:[%s17993_s6 + $0x40] sm:$0xf] %vm9190_vm9, %v10021_v1  ;;  %v8763_v34 = vadd.f32 1.0, %v11654_v44  ;;  %11671 = vpow2.f32 %v8664_v47  ;;  %v8584_v15 = vsub.f32 0.0, %v17438_v3  ;;  %v8450_v1 = vmul.f32 %v10996_v31, %v17122_v7 }
 0x370   :  { %v17423_v52 = vpop.f32.mrb[39].mxu1  ;;  %v11658_v37 = vpop.eup %11657  ;;  %v8768_v32 = vadd.f32 1.0, %v11656_v11 }
 0x371   :  { %v17429_v22 = vpop.f32.mrb[39].mxu0  ;;  %v11660_v14 = vpop.eup %11659  ;;  %v8889_v48 = vmul.f32 %v11658_v37, %v17257_v57  ;;  %11673 = vrcp.f32 %v8763_v34  ;;  %v17442_v57 = vadd.f32 %v17127_v40, %v8447_v18  ;;  %v8682_v26 = vmul.f32 1.442695, %v8584_v15 }
 0x372   :  { %v11662_v23 = vpop.eup %11661  ;;  %v8887_v59 = vmul.f32 %v11660_v14, %v17264_v62  ;;  %11675 = vrcp.f32 %v8768_v32  ;;  %v17481_v34 = vadd.f32 %v17127_v40, %v8450_v1  ;;  %v8453_v32 = vmul.f32 %v10998_v12, %v17122_v7 }
 0x373   :  { %v11664_v38 = vpop.eup %11663  ;;  %v10024_v5 = vpack.c.bf16 %v8889_v48, %v8889_v48  ;;  %v8892_v19 = vmul.f32 %v11662_v23, %v17281_v53  ;;  %11677 = vpow2.f32 %v8674_v45  ;;  %v8582_v47 = vsub.f32 0.0, %v17442_v57 }
 0x374   :  { %v11666_v13 = vpop.eup %11665  ;;  %v10022_v2 = vpack.c.bf16 %v8887_v59, %v8887_v59  ;;  %v8766_v24 = vadd.f32 1.0, %v11664_v38  ;;  %11679 = vpow2.f32 %v8670_v33  ;;  %v17444_v62 = vpop.f32.mrb[40].mxu1  ;;  %v8448_v45 = vmul.f32 %v10997_v9, %v17122_v7 }
 0x375   :  { %v17446_v27 = vpop.f32.mrb[40].mxu0  ;;  %9210 = vst.msk [vmem:[%s17993_s6 + $0x4c] sm:$0xf] %vm9190_vm9, %v10024_v5  ;;  %v10027_v54 = vpack.c.bf16 %v8892_v19, %v8892_v19  ;;  %v8769_v53 = vadd.f32 1.0, %v11666_v13  ;;  %11681 = vpow2.f32 %v8676_v49  ;;  %v17453_v16 = vpop.f32.mrb[41].mxu1  ;;  %v8585_v50 = vsub.f32 0.0, %v17481_v34 }
 0x376   :  { %v17455_v43 = vpop.f32.mrb[41].mxu0  ;;  %v11668_v36 = vpop.eup %11667  ;;  %9208 = vst.msk [vmem:[%s17993_s6 + $0x44] sm:$0xf] %vm9190_vm9, %v10022_v2  ;;  %11683 = vrcp.f32 %v8766_v24  ;;  %v8678_v20 = vmul.f32 1.442695, %v8582_v47  ;;  %v17488_v49 = vadd.f32 %v17127_v40, %v8448_v45  ;;  %v17495_v48 = vadd.f32 %v17127_v40, %v8453_v32 }
 0x377   :  { %v17465_v10 = vpop.f32.mrb[42].mxu1  ;;  %v17467_v8 = vpop.f32.mrb[42].mxu0  ;;  %9213 = vst.msk [vmem:[%s17993_s6 + $0x58] sm:$0xf] %vm9190_vm9, %v10027_v54  ;;  %v8890_v44 = vmul.f32 %v11668_v36, %v17297_v0  ;;  %11685 = vrcp.f32 %v8769_v53  ;;  %v11000_v18 = vadd.f32 %v17417_v51, %v17415_v41  ;;  %v8684_v59 = vmul.f32 1.442695, %v8585_v50 }
 0x378   :  { %v17476_v56 = vpop.f32.mrb[43].mxu1  ;;  %v17478_v11 = vpop.f32.mrb[43].mxu0  ;;  %11687 = vpow2.f32 %v8672_v55  ;;  %v8583_v58 = vsub.f32 0.0, %v17488_v49  ;;  %v11001_v45 = vadd.f32 %v17429_v22, %v17423_v52  ;;  %v11002_v32 = vadd.f32 %v17446_v27, %v17444_v62  ;;  %v17564_v27 = vld [vmem:[%s17991_s4] ss:$0 sm:$0xff] }
 0x379   :  { %v11670_v21 = vpop.eup %11669  ;;  %v10025_v37 = vpack.c.bf16 %v8890_v44, %v8890_v44  ;;  %11689 = vpow2.f32 %v8682_v26  ;;  %v8454_v41 = vmul.f32 %v11000_v18, %v17122_v7 }
 0x37a   :  { %v11672_v33 = vpop.eup %11671  ;;  %v8893_v0 = vmul.f32 %v11670_v21, %v17301_v30  ;;  %11691 = vpow2.f32 %v8678_v20  ;;  %v10999_v30 = vadd.f32 %v17412_v4, %v17410_v35  ;;  %v8588_v4 = vsub.f32 0.0, %v17495_v48 }
 0x37b   :  { %v8767_v28 = vadd.f32 1.0, %v11672_v33  ;;  %v11674_v63 = vpop.eup %11673  ;;  %9211 = vst.msk [vmem:[%s17993_s6 + $0x50] sm:$0xf] %vm9190_vm9, %v10025_v37  ;;  %v8680_v54 = vmul.f32 1.442695, %v8583_v58  ;;  %v17535_v20 = vadd.f32 %v17127_v40, %v8454_v41  ;;  %v8452_v22 = vmul.f32 %v11001_v45, %v17122_v7 }
 0x37c   :  { %v10028_v14 = vpack.c.bf16 %v8893_v0, %v8893_v0  ;;  %v11676_v31 = vpop.eup %11675  ;;  %v8891_v23 = vmul.f32 %v11674_v63, %v17324_v39  ;;  %v17503_v38 = vpop.f32.mrb[44].mxu1  ;;  %v8451_v39 = vmul.f32 %v10999_v30, %v17122_v7  ;;  %v8690_v1 = vmul.f32 1.442695, %v8588_v4 }
 0x37d   :  { %11693 = vrcp.f32 %v8767_v28  ;;  %v17505_v5 = vpop.f32.mrb[44].mxu0  ;;  %v11678_v19 = vpop.eup %11677  ;;  %v8896_v35 = vmul.f32 %v11676_v31, %v17331_v25  ;;  %v8589_v52 = vsub.f32 0.0, %v17535_v20  ;;  %v11004_v41 = vadd.f32 %v17467_v8, %v17465_v10 }
 0x37e   :  { %9214 = vst.msk [vmem:[%s17993_s6 + $0x5c] sm:$0xf] %vm9190_vm9, %v10028_v14  ;;  %v17515_v51 = vpop.f32.mrb[45].mxu1  ;;  %v17517_v13 = vpop.f32.mrb[45].mxu0  ;;  %v10026_v24 = vpack.c.bf16 %v8891_v23, %v8891_v23  ;;  %v8772_v55 = vadd.f32 1.0, %v11678_v19  ;;  %11695 = vpow2.f32 %v8684_v59  ;;  %v17524_v9 = vadd.f32 %v17127_v40, %v8451_v39 }
 0x37f   :  { %v11680_v2 = vpop.eup %11679  ;;  %v17519_v53 = vpop.f32.mrb[46].mxu1  ;;  %v10031_v36 = vpack.c.bf16 %v8896_v35, %v8896_v35  ;;  %v8692_v59 = vmul.f32 1.442695, %v8589_v52  ;;  %v8457_v19 = vmul.f32 %v17564_v27, %v11002_v32  ;;  %v11007_v52 = vadd.f32 %v17517_v13, %v17515_v51 }
 0x380   :  { %v17521_v15 = vpop.f32.mrb[46].mxu0  ;;  %v11682_v25 = vpop.eup %11681  ;;  %v8770_v47 = vadd.f32 1.0, %v11680_v2  ;;  %9212 = vst.msk [vmem:[%s17993_s6 + $0x54] sm:$0xf] %vm9190_vm9, %v10026_v24  ;;  %11697 = vrcp.f32 %v8772_v55  ;;  %v8586_v0 = vsub.f32 0.0, %v17524_v9  ;;  %v11005_v2 = vadd.f32 %v17478_v11, %v17476_v56 }
 0x381   :  { %v17526_v44 = vpop.f32.mrb[47].mxu1  ;;  %v17528_v26 = vpop.f32.mrb[47].mxu0  ;;  %v8773_v21 = vadd.f32 1.0, %v11682_v25  ;;  %9217 = vst.msk [vmem:[%s17993_s6 + $0x68] sm:$0xf] %vm9190_vm9, %v10031_v36 }
 0x382   :  { %v11684_v12 = vpop.eup %11683  ;;  %11699 = vrcp.f32 %v8770_v47  ;;  %v8686_v18 = vmul.f32 1.442695, %v8586_v0  ;;  %v17590_v36 = vld [vmem:[%s17992_s5] ss:$0 sm:$0xff]  ;;  %v8456_v11 = vmul.f32 %v17564_v27, %v11005_v2 }
 0x383   :  { %v11686_v33 = vpop.eup %11685  ;;  %v8894_v37 = vmul.f32 %v11684_v12, %v17341_v61  ;;  %11701 = vrcp.f32 %v8773_v21 }
 0x384   :  { %v11688_v28 = vpop.eup %11687  ;;  %v8897_v50 = vmul.f32 %v11686_v33, %v17352_v42  ;;  %11703 = vpow2.f32 %v8680_v54  ;;  %v17550_v58 = vpop.f32.mrb[48].mxu1  ;;  %v17559_v42 = vadd.f32 %v17127_v40, %v8452_v22  ;;  %v11003_v40 = vadd.f32 %v17455_v43, %v17453_v16 }
 0x385   :  { %v11690_v63 = vpop.eup %11689  ;;  %v10029_v14 = vpack.c.bf16 %v8894_v37, %v8894_v37  ;;  %v8771_v30 = vadd.f32 1.0, %v11688_v28  ;;  %11705 = vpow2.f32 %v8690_v1  ;;  %v17552_v62 = vpop.f32.mrb[48].mxu0  ;;  %v17593_v16 = vadd.f32 %v17590_v36, %v8457_v19 }
 0x386   :  { %v11692_v61 = vpop.eup %11691  ;;  %v10032_v31 = vpack.c.bf16 %v8897_v50, %v8897_v50  ;;  %v8776_v23 = vadd.f32 1.0, %v11690_v63  ;;  %v17567_v35 = vpop.f32.mrb[49].mxu1  ;;  %v8587_v25 = vsub.f32 0.0, %v17559_v42  ;;  %v8455_v56 = vmul.f32 %v17564_v27, %v11003_v40 }
 0x387   :  { %9215 = vst.msk [vmem:[%s17993_s6 + $0x60] sm:$0xf] %vm9190_vm9, %v10029_v14  ;;  %11707 = vrcp.f32 %v8771_v30  ;;  %v8774_v7 = vadd.f32 1.0, %v11692_v61  ;;  %v17569_v4 = vpop.f32.mrb[49].mxu0  ;;  %v11694_v39 = vpop.eup %11693  ;;  %v8592_v45 = vsub.f32 0.0, %v17593_v16  ;;  %v17610_v0 = vadd.f32 %v17590_v36, %v8456_v11 }
 0x388   :  { %9218 = vst.msk [vmem:[%s17993_s6 + $0x6c] sm:$0xf] %vm9190_vm9, %v10032_v31  ;;  %11709 = vrcp.f32 %v8776_v23  ;;  %v17581_v24 = vpop.f32.mrb[50].mxu1  ;;  %v17583_v55 = vpop.f32.mrb[50].mxu0  ;;  %v8895_v54 = vmul.f32 %v11694_v39, %v17381_v46  ;;  %v8458_v46 = vmul.f32 %v17564_v27, %v11004_v41  ;;  %v8688_v12 = vmul.f32 1.442695, %v8587_v25 }
 0x389   :  { %11711 = vrcp.f32 %v8774_v7  ;;  %v17595_v43 = vpop.f32.mrb[51].mxu1  ;;  %v17597_v10 = vpop.f32.mrb[51].mxu0  ;;  %v17604_v33 = vadd.f32 %v17590_v36, %v8455_v56  ;;  %v11006_v50 = vadd.f32 %v17505_v5, %v17503_v38  ;;  %v8698_v14 = vmul.f32 1.442695, %v8592_v45 }
 0x38a   :  { %v11696_v8 = vpop.eup %11695  ;;  %11713 = vpow2.f32 %v8686_v18  ;;  %v10030_v47 = vpack.c.bf16 %v8895_v54, %v8895_v54  ;;  %v17607_v37 = vadd.f32 %v17590_v36, %v8458_v46  ;;  %v8591_v5 = vsub.f32 0.0, %v17610_v0 }
 0x38b   :  { %v8777_v1 = vadd.f32 1.0, %v11696_v8  ;;  %11715 = vpow2.f32 %v8692_v59  ;;  %v11698_v21 = vpop.eup %11697  ;;  %v8590_v30 = vsub.f32 0.0, %v17604_v33  ;;  %v8461_v11 = vmul.f32 %v17564_v27, %v11006_v50 }
 0x38c   :  { %v11700_v32 = vpop.eup %11699  ;;  %9216 = vst.msk [vmem:[%s17993_s6 + $0x64] sm:$0xf] %vm9190_vm9, %v10030_v47  ;;  %v8900_v28 = vmul.f32 %v11698_v21, %v17391_v17  ;;  %v17623_v18 = vpop.f32.mrb[52].mxu1  ;;  %v8593_v38 = vsub.f32 0.0, %v17607_v37  ;;  %v8696_v25 = vmul.f32 1.442695, %v8591_v5  ;;  %v8459_v47 = vmul.f32 %v17564_v27, %v11007_v52 }
 0x38d   :  { %11717 = vrcp.f32 %v8777_v1  ;;  %v11702_v22 = vpop.eup %11701  ;;  %v8898_v63 = vmul.f32 %v11700_v32, %v17394_v60  ;;  %v17625_v61 = vpop.f32.mrb[52].mxu0  ;;  %v8694_v19 = vmul.f32 1.442695, %v8590_v30  ;;  %v11008_v45 = vadd.f32 %v17521_v15, %v17519_v53 }
 0x38e   :  { %11719 = vpow2.f32 %v8688_v12  ;;  %v11704_v31 = vpop.eup %11703  ;;  %v10035_v17 = vpack.c.bf16 %v8900_v28, %v8900_v28  ;;  %v8901_v23 = vmul.f32 %v11702_v22, %v17397_v29  ;;  %v17630_v51 = vpop.f32.mrb[53].mxu1  ;;  %v8700_v54 = vmul.f32 1.442695, %v8593_v38 }
 0x38f   :  { %v17632_v13 = vpop.f32.mrb[53].mxu0  ;;  %v11706_v60 = vpop.eup %11705  ;;  %v10033_v59 = vpack.c.bf16 %v8898_v63, %v8898_v63  ;;  %v8775_v7 = vadd.f32 1.0, %v11704_v31  ;;  %11721 = vpow2.f32 %v8698_v14  ;;  %v17664_v52 = vadd.f32 %v17590_v36, %v8461_v11 }
 0x390   :  { %v17634_v39 = vpop.f32.mrb[54].mxu1  ;;  %v17636_v40 = vpop.f32.mrb[54].mxu0  ;;  %9221 = vst.msk [vmem:[%s17993_s6 + $0x78] sm:$0xf] %vm9190_vm9, %v10035_v17  ;;  %v10036_v29 = vpack.c.bf16 %v8901_v23, %v8901_v23  ;;  %v8780_v2 = vadd.f32 1.0, %v11706_v60  ;;  %v8462_v17 = vmul.f32 %v17564_v27, %v11008_v45 }
 0x391   :  { %v11708_v41 = vpop.eup %11707  ;;  %v17642_v8 = vpop.f32.mrb[55].mxu1  ;;  %9219 = vst.msk [vmem:[%s17993_s6 + $0x70] sm:$0xf] %vm9190_vm9, %v10033_v59  ;;  %11723 = vrcp.f32 %v8775_v7 }
 0x392   :  { %v11710_v56 = vpop.eup %11709  ;;  %v8899_v46 = vmul.f32 %v11708_v41, %v17426_v6  ;;  %v17651_v1 = vpop.f32.mrb[55].mxu0  ;;  %9222 = vst.msk [vmem:[%s17993_s6 + $0x7c] sm:$0xf] %vm9190_vm9, %v10036_v29  ;;  %11725 = vrcp.f32 %v8780_v2  ;;  %v11009_v6 = vadd.f32 %v17528_v26, %v17526_v44 }
 0x393   :  { %v11712_v12 = vpop.eup %11711  ;;  %v8904_v21 = vmul.f32 %v11710_v56, %v17438_v3  ;;  %11727 = vpow2.f32 %v8694_v19  ;;  %v17667_v3 = vadd.f32 %v17590_v36, %v8459_v47  ;;  %v11010_v19 = vadd.f32 %v17552_v62, %v17550_v58 }
 0x394   :  { %v11714_v32 = vpop.eup %11713  ;;  %v10034_v28 = vpack.c.bf16 %v8899_v46, %v8899_v46  ;;  %v8902_v50 = vmul.f32 %v11712_v12, %v17442_v57  ;;  %11729 = vpow2.f32 %v8700_v54  ;;  %v8596_v57 = vsub.f32 0.0, %v17664_v52  ;;  %v17674_v44 = vpop.f32.mrb[56].mxu1 }
 0x395   :  { %v11716_v22 = vpop.eup %11715  ;;  %v10039_v63 = vpack.c.bf16 %v8904_v21, %v8904_v21  ;;  %v8778_v14 = vadd.f32 1.0, %v11714_v32  ;;  %11731 = vpow2.f32 %v8696_v25  ;;  %v17676_v26 = vpop.f32.mrb[56].mxu0  ;;  %v8594_v31 = vsub.f32 0.0, %v17667_v3 }
 0x396   :  { %9220 = vst.msk [vmem:[%s17993_s6 + $0x74] sm:$0xf] %vm9190_vm9, %v10034_v28  ;;  %v10037_v53 = vpack.c.bf16 %v8902_v50, %v8902_v50  ;;  %v8781_v15 = vadd.f32 1.0, %v11716_v22  ;;  %v8460_v23 = vmul.f32 %v17564_v27, %v11009_v6  ;;  %v17685_v38 = vpop.f32.mrb[57].mxu1  ;;  %v17687_v5 = vpop.f32.mrb[57].mxu0  ;;  %v17701_v25 = vadd.f32 %v17590_v36, %v8462_v17 }
 0x397   :  { %v11718_v30 = vpop.eup %11717  ;;  %9225 = vst.msk [vmem:[%s17993_s6 + $0x88] sm:$0xf] %vm9190_vm9, %v10039_v63  ;;  %11733 = vrcp.f32 %v8778_v14  ;;  %v8706_v7 = vmul.f32 1.442695, %v8596_v57  ;;  %v17696_v41 = vpop.f32.mrb[58].mxu1  ;;  %v8465_v58 = vmul.f32 %v17564_v27, %v11010_v19  ;;  %v11011_v62 = vadd.f32 %v17569_v4, %v17567_v35 }
 0x398   :  { %v11720_v60 = vpop.eup %11719  ;;  %9223 = vst.msk [vmem:[%s17993_s6 + $0x80] sm:$0xf] %vm9190_vm9, %v10037_v53  ;;  %v8905_v59 = vmul.f32 %v11718_v30, %v17481_v34  ;;  %11735 = vrcp.f32 %v8781_v15  ;;  %v17698_v29 = vpop.f32.mrb[58].mxu0  ;;  %v8702_v54 = vmul.f32 1.442695, %v8594_v31  ;;  %v17704_v56 = vadd.f32 %v17590_v36, %v8460_v23 }
 0x399   :  { %v8779_v2 = vadd.f32 1.0, %v11720_v60  ;;  %v17706_v46 = vpop.f32.mrb[59].mxu1  ;;  %v17708_v34 = vpop.f32.mrb[59].mxu0  ;;  %11737 = vpow2.f32 %v8706_v7  ;;  %v8597_v21 = vsub.f32 0.0, %v17701_v25  ;;  %v17720_v32 = vadd.f32 %v17590_v36, %v8465_v58 }
 0x39a   :  { %v11722_v11 = vpop.eup %11721  ;;  %v10040_v47 = vpack.c.bf16 %v8905_v59, %v8905_v59  ;;  %v8595_v45 = vsub.f32 0.0, %v17704_v56  ;;  %v8463_v28 = vmul.f32 %v17564_v27, %v11011_v62  ;;  %v11012_v35 = vadd.f32 %v17583_v55, %v17581_v24 }
 0x39b   :  { %11739 = vrcp.f32 %v8779_v2  ;;  %v8784_v12 = vadd.f32 1.0, %v11722_v11  ;;  %v11724_v6 = vpop.eup %11723  ;;  %v8708_v22 = vmul.f32 1.442695, %v8597_v21  ;;  %v8600_v15 = vsub.f32 0.0, %v17720_v32 }
 0x39c   :  { %9226 = vst.msk [vmem:[%s17993_s6 + $0x8c] sm:$0xf] %vm9190_vm9, %v10040_v47  ;;  %11741 = vpow2.f32 %v8702_v54  ;;  %v11726_v4 = vpop.eup %11725  ;;  %v8903_v50 = vmul.f32 %v11724_v6, %v17488_v49  ;;  %v8704_v63 = vmul.f32 1.442695, %v8595_v45  ;;  %v17729_v57 = vadd.f32 %v17590_v36, %v8463_v28  ;;  %v17732_v31 = vpop.f32.mrb[60].mxu1 }
 0x39d   :  { %11743 = vrcp.f32 %v8784_v12  ;;  %v11728_v14 = vpop.eup %11727  ;;  %v8908_v53 = vmul.f32 %v11726_v4, %v17495_v48  ;;  %v8466_v30 = vmul.f32 %v17564_v27, %v11012_v35  ;;  %v17734_v17 = vpop.f32.mrb[60].mxu0  ;;  %v11013_v23 = vadd.f32 %v17597_v10, %v17595_v43 }
 0x39e   :  { %v11730_v24 = vpop.eup %11729  ;;  %v10038_v55 = vpack.c.bf16 %v8903_v50, %v8903_v50  ;;  %v8782_v49 = vadd.f32 1.0, %v11728_v14  ;;  %11745 = vpow2.f32 %v8708_v22  ;;  %v17738_v60 = vpop.f32.mrb[61].mxu1  ;;  %v8714_v2 = vmul.f32 1.442695, %v8600_v15 }
 0x39f   :  { %v17740_v48 = vpop.f32.mrb[61].mxu0  ;;  %v11732_v59 = vpop.eup %11731  ;;  %v10043_v7 = vpack.c.bf16 %v8908_v53, %v8908_v53  ;;  %v8785_v19 = vadd.f32 1.0, %v11730_v24  ;;  %11747 = vpow2.f32 %v8704_v63  ;;  %v8598_v10 = vsub.f32 0.0, %v17729_v57 }
 0x3a0   :  { %v17742_v54 = vpop.f32.mrb[62].mxu1  ;;  %v17744_v11 = vpop.f32.mrb[62].mxu0  ;;  %9224 = vst.msk [vmem:[%s17993_s6 + $0x84] sm:$0xf] %vm9190_vm9, %v10038_v55  ;;  %11749 = vrcp.f32 %v8782_v49  ;;  %v8783_v43 = vadd.f32 1.0, %v11732_v59  ;;  %v17752_v58 = vadd.f32 %v17590_v36, %v8466_v30  ;;  %v8464_v6 = vmul.f32 %v17564_v27, %v11013_v23 }
 0x3a1   :  { %v11734_v47 = vpop.eup %11733  ;;  %v17754_v62 = vpop.f32.mrb[63].mxu1  ;;  %9229 = vst.msk [vmem:[%s17993_s6 + $0x98] sm:$0xf] %vm9190_vm9, %v10043_v7  ;;  %11751 = vrcp.f32 %v8785_v19  ;;  %v11014_v28 = vadd.f32 %v17625_v61, %v17623_v18  ;;  %v8710_v4 = vmul.f32 1.442695, %v8598_v10  ;;  %v11015_v49 = vadd.f32 %v17632_v13, %v17630_v51 }
 0x3a2   :  { %v17756_v12 = vpop.f32.mrb[63].mxu0  ;;  %v11736_v21 = vpop.eup %11735  ;;  %v8906_v45 = vmul.f32 %v11734_v47, %v17524_v9  ;;  %11753 = vrcp.f32 %v8783_v43  ;;  %v8601_v50 = vsub.f32 0.0, %v17752_v58  ;;  %v17769_v14 = vadd.f32 %v17590_v36, %v8464_v6 }
 0x3a3   :  { %v8909_v35 = vmul.f32 %v11736_v21, %v17535_v20  ;;  %v11738_v22 = vpop.eup %11737  ;;  %11755 = vpow2.f32 %v8714_v2  ;;  %v8469_v9 = vmul.f32 %v17564_v27, %v11014_v28  ;;  %v11016_v7 = vadd.f32 %v17636_v40, %v17634_v39 }
 0x3a4   :  { %v10041_v63 = vpack.c.bf16 %v8906_v45, %v8906_v45  ;;  %v8788_v30 = vadd.f32 1.0, %v11738_v22  ;;  %11757 = vpow2.f32 %v8710_v4  ;;  %v8716_v24 = vmul.f32 1.442695, %v8601_v50 }
 0x3a5   :  { %v11740_v53 = vpop.eup %11739  ;;  %v10044_v15 = vpack.c.bf16 %v8909_v35, %v8909_v35  ;;  %v8599_v61 = vsub.f32 0.0, %v17769_v14  ;;  %v17779_v55 = vadd.f32 %v17590_v36, %v8469_v9  ;;  %v8467_v43 = vmul.f32 %v17564_v27, %v11015_v49 }
 0x3a6   :  { %v11742_v18 = vpop.eup %11741  ;;  %9227 = vst.msk [vmem:[%s17993_s6 + $0x90] sm:$0xf] %vm9190_vm9, %v10041_v63  ;;  %v8907_v20 = vmul.f32 %v11740_v53, %v17559_v42  ;;  %11759 = vrcp.f32 %v8788_v30  ;;  %v11017_v42 = vadd.f32 %v17651_v1, %v17642_v8  ;;  %v8470_v10 = vmul.f32 %v17564_v27, %v11016_v7 }
 0x3a7   :  { %v11744_v23 = vpop.eup %11743  ;;  %9230 = vst.msk [vmem:[%s17993_s6 + $0x9c] sm:$0xf] %vm9190_vm9, %v10044_v15  ;;  %v8786_v59 = vadd.f32 1.0, %v11742_v18  ;;  %11761 = vpow2.f32 %v8716_v24  ;;  %v8712_v47 = vmul.f32 1.442695, %v8599_v61  ;;  %v8604_v13 = vsub.f32 0.0, %v17779_v55 }
 0x3a8   :  { %v10042_v19 = vpack.c.bf16 %v8907_v20, %v8907_v20  ;;  %v8912_v2 = vmul.f32 %v11744_v23, %v17593_v16  ;;  %v11746_v51 = vpop.eup %11745  ;;  %v8468_v16 = vmul.f32 %v17564_v27, %v11017_v42  ;;  %v17801_v6 = vadd.f32 %v17590_v36, %v8467_v43 }
 0x3a9   :  { %11763 = vrcp.f32 %v8786_v59  ;;  %v11748_v21 = vpop.eup %11747  ;;  %v8789_v40 = vadd.f32 1.0, %v11746_v51  ;;  %v8722_v45 = vmul.f32 1.442695, %v8604_v13  ;;  %v17804_v28 = vadd.f32 %v17590_v36, %v8470_v10 }
 0x3aa   :  { %9228 = vst.msk [vmem:[%s17993_s6 + $0x94] sm:$0xf] %vm9190_vm9, %v10042_v19  ;;  %v10047_v39 = vpack.c.bf16 %v8912_v2, %v8912_v2  ;;  %11765 = vpow2.f32 %v8712_v47  ;;  %v11750_v8 = vpop.eup %11749  ;;  %v8787_v1 = vadd.f32 1.0, %v11748_v21  ;;  %v17812_v50 = vadd.f32 %v17590_v36, %v8468_v16 }
 0x3ab   :  { %v11752_v35 = vpop.eup %11751  ;;  %v8910_v4 = vmul.f32 %v11750_v8, %v17604_v33  ;;  %11767 = vrcp.f32 %v8789_v40  ;;  %v11018_v22 = vadd.f32 %v17676_v26, %v17674_v44  ;;  %v8602_v53 = vsub.f32 0.0, %v17801_v6 }
 0x3ac   :  { %9233 = vst.msk [vmem:[%s17993_s6 + $0xa8] sm:$0xf] %vm9190_vm9, %v10047_v39  ;;  %v11754_v63 = vpop.eup %11753  ;;  %v8913_v9 = vmul.f32 %v11752_v35, %v17607_v37  ;;  %11769 = vrcp.f32 %v8787_v1  ;;  %v8605_v15 = vsub.f32 0.0, %v17804_v28  ;;  %v8603_v33 = vsub.f32 0.0, %v17812_v50 }
 0x3ad   :  { %v11756_v30 = vpop.eup %11755  ;;  %v10045_v24 = vpack.c.bf16 %v8910_v4, %v8910_v4  ;;  %v8911_v18 = vmul.f32 %v11754_v63, %v17610_v0  ;;  %11771 = vpow2.f32 %v8722_v45  ;;  %v8718_v23 = vmul.f32 1.442695, %v8602_v53 }
 0x3ae   :  { %v11758_v20 = vpop.eup %11757  ;;  %v10048_v61 = vpack.c.bf16 %v8913_v9, %v8913_v9  ;;  %v8792_v49 = vadd.f32 1.0, %v11756_v30  ;;  %v8724_v44 = vmul.f32 1.442695, %v8605_v15  ;;  %v8720_v59 = vmul.f32 1.442695, %v8603_v33 }
 0x3af   :  { %9231 = vst.msk [vmem:[%s17993_s6 + $0xa0] sm:$0xf] %vm9190_vm9, %v10045_v24  ;;  %v10046_v37 = vpack.c.bf16 %v8911_v18, %v8911_v18  ;;  %v8790_v26 = vadd.f32 1.0, %v11758_v20  ;;  %v8473_v7 = vmul.f32 %v17564_v27, %v11018_v22  ;;  %v11019_v0 = vadd.f32 %v17687_v5, %v17685_v38 }
 0x3b0   :  { %v11760_v42 = vpop.eup %11759  ;;  %9234 = vst.msk [vmem:[%s17993_s6 + $0xac] sm:$0xf] %vm9190_vm9, %v10048_v61  ;;  %11773 = vrcp.f32 %v8792_v49  ;;  %v11020_v19 = vadd.f32 %v17698_v29, %v17696_v41  ;;  %v11021_v2 = vadd.f32 %v17708_v34, %v17706_v46  ;;  %v11022_v38 = vadd.f32 %v17734_v17, %v17732_v31 }
 0x3b1   :  { %v11762_v47 = vpop.eup %11761  ;;  %9232 = vst.msk [vmem:[%s17993_s6 + $0xa4] sm:$0xf] %vm9190_vm9, %v10046_v37  ;;  %v8916_v51 = vmul.f32 %v11760_v42, %v17664_v52  ;;  %11775 = vrcp.f32 %v8790_v26  ;;  %v17842_v13 = vadd.f32 %v17590_v36, %v8473_v7  ;;  %v8471_v29 = vmul.f32 %v17564_v27, %v11019_v0 }
 0x3b2   :  { %v8793_v41 = vadd.f32 1.0, %v11762_v47  ;;  %11777 = vpow2.f32 %v8718_v23  ;;  %v8474_v46 = vmul.f32 %v17564_v27, %v11020_v19  ;;  %v8472_v16 = vmul.f32 %v17564_v27, %v11021_v2 }
 0x3b3   :  { %v11764_v5 = vpop.eup %11763  ;;  %v10051_v43 = vpack.c.bf16 %v8916_v51, %v8916_v51  ;;  %11779 = vpow2.f32 %v8724_v44  ;;  %v8608_v52 = vsub.f32 0.0, %v17842_v13  ;;  %v17851_v39 = vadd.f32 %v17590_v36, %v8471_v29 }
 0x3b4   :  { %v11766_v34 = vpop.eup %11765  ;;  %v8914_v10 = vmul.f32 %v11764_v5, %v17667_v3  ;;  %11781 = vrcp.f32 %v8793_v41  ;;  %v17854_v31 = vadd.f32 %v17590_v36, %v8474_v46  ;;  %v17870_v63 = vadd.f32 %v17590_v36, %v8472_v16 }
 0x3b5   :  { %v8791_v21 = vadd.f32 1.0, %v11766_v34  ;;  %v11768_v17 = vpop.eup %11767  ;;  %9237 = vst.msk [vmem:[%s17993_s6 + $0xb8] sm:$0xf] %vm9190_vm9, %v10051_v43  ;;  %11783 = vpow2.f32 %v8720_v59  ;;  %v8730_v3 = vmul.f32 1.442695, %v8608_v52  ;;  %v8606_v45 = vsub.f32 0.0, %v17851_v39 }
 0x3b6   :  { %v10049_v40 = vpack.c.bf16 %v8914_v10, %v8914_v10  ;;  %v11770_v8 = vpop.eup %11769  ;;  %v8917_v1 = vmul.f32 %v11768_v17, %v17701_v25  ;;  %v8609_v35 = vsub.f32 0.0, %v17854_v31  ;;  %v8477_v9 = vmul.f32 %v17564_v27, %v11022_v38 }
 0x3b7   :  { %11785 = vrcp.f32 %v8791_v21  ;;  %v11772_v4 = vpop.eup %11771  ;;  %v8915_v22 = vmul.f32 %v11770_v8, %v17704_v56  ;;  %v8726_v15 = vmul.f32 1.442695, %v8606_v45  ;;  %v8607_v18 = vsub.f32 0.0, %v17870_v63 }
 0x3b8   :  { %9235 = vst.msk [vmem:[%s17993_s6 + $0xb0] sm:$0xf] %vm9190_vm9, %v10049_v40  ;;  %11787 = vpow2.f32 %v8730_v3  ;;  %v10052_v25 = vpack.c.bf16 %v8917_v1, %v8917_v1  ;;  %v8796_v53 = vadd.f32 1.0, %v11772_v4  ;;  %v8732_v30 = vmul.f32 1.442695, %v8609_v35 }
 0x3b9   :  { %v10050_v24 = vpack.c.bf16 %v8915_v22, %v8915_v22  ;;  %v17875_v33 = vadd.f32 %v17590_v36, %v8477_v9  ;;  %v11023_v20 = vadd.f32 %v17740_v48, %v17738_v60  ;;  %v11024_v61 = vadd.f32 %v17744_v11, %v17742_v54 }
 0x3ba   :  { %v11774_v56 = vpop.eup %11773  ;;  %9238 = vst.msk [vmem:[%s17993_s6 + $0xbc] sm:$0xf] %vm9190_vm9, %v10052_v25  ;;  %11789 = vrcp.f32 %v8796_v53  ;;  %v11025_v49 = vadd.f32 %v17756_v12, %v17754_v62  ;;  %v8728_v48 = vmul.f32 1.442695, %v8607_v18 }
 0x3bb   :  { %v11776_v23 = vpop.eup %11775  ;;  %9236 = vst.msk [vmem:[%s17993_s6 + $0xb4] sm:$0xf] %vm9190_vm9, %v10050_v24  ;;  %v8920_v60 = vmul.f32 %v11774_v56, %v17720_v32  ;;  %11791 = vpow2.f32 %v8726_v15  ;;  %v8612_v44 = vsub.f32 0.0, %v17875_v33  ;;  %v8475_v54 = vmul.f32 %v17564_v27, %v11023_v20 }
 0x3bc   :  { %v11778_v37 = vpop.eup %11777  ;;  %v8918_v26 = vmul.f32 %v11776_v23, %v17729_v57  ;;  %11793 = vpow2.f32 %v8732_v30  ;;  %v8478_v11 = vmul.f32 %v17564_v27, %v11024_v61  ;;  %v8476_v51 = vmul.f32 %v17564_v27, %v11025_v49 }
 0x3bd   :  { %v11780_v62 = vpop.eup %11779  ;;  %v10055_v12 = vpack.c.bf16 %v8920_v60, %v8920_v60  ;;  %v8794_v59 = vadd.f32 1.0, %v11778_v37  ;;  %11795 = vpow2.f32 %v8728_v48  ;;  %v8738_v7 = vmul.f32 1.442695, %v8612_v44 }
 0x3be   :  { %v11782_v42 = vpop.eup %11781  ;;  %v10053_v0 = vpack.c.bf16 %v8918_v26, %v8918_v26  ;;  %v8797_v32 = vadd.f32 1.0, %v11780_v62  ;;  %v17897_v19 = vadd.f32 %v17590_v36, %v8475_v54  ;;  %v17900_v2 = vadd.f32 %v17590_v36, %v8478_v11 }
 0x3bf   :  { %v11784_v57 = vpop.eup %11783  ;;  %9241 = vst.msk [vmem:[%s17993_s6 + $0xc8] sm:$0xf] %vm9190_vm9, %v10055_v12  ;;  %v8921_v47 = vmul.f32 %v11782_v42, %v17752_v58  ;;  %11797 = vrcp.f32 %v8794_v59  ;;  %v17916_v58 = vadd.f32 %v17590_v36, %v8476_v51 }
 0x3c0   :  { %9239 = vst.msk [vmem:[%s17993_s6 + $0xc0] sm:$0xf] %vm9190_vm9, %v10053_v0  ;;  %11799 = vrcp.f32 %v8797_v32  ;;  %v8795_v5 = vadd.f32 1.0, %v11784_v57  ;;  %v8610_v41 = vsub.f32 0.0, %v17897_v19  ;;  %v8613_v29 = vsub.f32 0.0, %v17900_v2 }
 0x3c1   :  { %v11786_v38 = vpop.eup %11785  ;;  %v10056_v34 = vpack.c.bf16 %v8921_v47, %v8921_v47  ;;  %11801 = vpow2.f32 %v8738_v7  ;;  %v8611_v17 = vsub.f32 0.0, %v17916_v58 }
 0x3c2   :  { %v11788_v46 = vpop.eup %11787  ;;  %v8919_v43 = vmul.f32 %v11786_v38, %v17769_v14  ;;  %11803 = vrcp.f32 %v8795_v5  ;;  %v8734_v10 = vmul.f32 1.442695, %v8610_v41  ;;  %v8740_v52 = vmul.f32 1.442695, %v8613_v29 }
 0x3c3   :  { %v8800_v27 = vadd.f32 1.0, %v11788_v46  ;;  %9242 = vst.msk [vmem:[%s17993_s6 + $0xcc] sm:$0xf] %vm9190_vm9, %v10056_v34  ;;  %v8736_v14 = vmul.f32 1.442695, %v8611_v17 }
 0x3c4   :  { %v10054_v21 = vpack.c.bf16 %v8919_v43, %v8919_v43  ;;  %v11790_v40 = vpop.eup %11789 }
 0x3c5   :  { %11805 = vrcp.f32 %v8800_v27  ;;  %v11792_v3 = vpop.eup %11791  ;;  %v8924_v36 = vmul.f32 %v11790_v40, %v17779_v55 }
 0x3c6   :  { %9240 = vst.msk [vmem:[%s17993_s6 + $0xc4] sm:$0xf] %vm9190_vm9, %v10054_v21  ;;  %11807 = vpow2.f32 %v8734_v10  ;;  %v11794_v16 = vpop.eup %11793  ;;  %v8798_v8 = vadd.f32 1.0, %v11792_v3 }
 0x3c7   :  { %11809 = vpow2.f32 %v8740_v52  ;;  %v11796_v1 = vpop.eup %11795  ;;  %v10059_v45 = vpack.c.bf16 %v8924_v36, %v8924_v36  ;;  %v8801_v35 = vadd.f32 1.0, %v11794_v16 }
 0x3c8   :  { %11811 = vpow2.f32 %v8736_v14  ;;  %v8799_v4 = vadd.f32 1.0, %v11796_v1 }
 0x3c9   :  { %11813 = vrcp.f32 %v8798_v8  ;;  %v11798_v22 = vpop.eup %11797  ;;  %9245 = vst.msk [vmem:[%s17993_s6 + $0xd8] sm:$0xf] %vm9190_vm9, %v10059_v45 }
 0x3ca   :  { %11815 = vrcp.f32 %v8801_v35  ;;  %v11800_v9 = vpop.eup %11799  ;;  %v8922_v55 = vmul.f32 %v11798_v22, %v17801_v6 }
 0x3cb   :  { %11817 = vrcp.f32 %v8799_v4  ;;  %v11802_v25 = vpop.eup %11801  ;;  %v8925_v53 = vmul.f32 %v11800_v9, %v17804_v28 }
 0x3cc   :  { %v11804_v15 = vpop.eup %11803  ;;  %v10057_v30 = vpack.c.bf16 %v8922_v55, %v8922_v55  ;;  %v8804_v24 = vadd.f32 1.0, %v11802_v25 }
 0x3cd   :  { %v10060_v18 = vpack.c.bf16 %v8925_v53, %v8925_v53  ;;  %v8923_v20 = vmul.f32 %v11804_v15, %v17812_v50 }
 0x3ce   :  { %9243 = vst.msk [vmem:[%s17993_s6 + $0xd0] sm:$0xf] %vm9190_vm9, %v10057_v30  ;;  %11819 = vrcp.f32 %v8804_v24 }
 0x3cf   :  { %v11806_v56 = vpop.eup %11805  ;;  %9246 = vst.msk [vmem:[%s17993_s6 + $0xdc] sm:$0xf] %vm9190_vm9, %v10060_v18  ;;  %v10058_v6 = vpack.c.bf16 %v8923_v20, %v8923_v20 }
 0x3d0   :  { %v11808_v61 = vpop.eup %11807  ;;  %v8928_v28 = vmul.f32 %v11806_v56, %v17842_v13 }
 0x3d1   :  { %v11810_v49 = vpop.eup %11809  ;;  %v8802_v23 = vadd.f32 1.0, %v11808_v61  ;;  %9244 = vst.msk [vmem:[%s17993_s6 + $0xd4] sm:$0xf] %vm9190_vm9, %v10058_v6 }
 0x3d2   :  { %v11812_v60 = vpop.eup %11811  ;;  %v10063_v50 = vpack.c.bf16 %v8928_v28, %v8928_v28  ;;  %v8805_v48 = vadd.f32 1.0, %v11810_v49 }
 0x3d3   :  { %v11814_v44 = vpop.eup %11813  ;;  %11821 = vrcp.f32 %v8802_v23  ;;  %v8803_v37 = vadd.f32 1.0, %v11812_v60 }
 0x3d4   :  { %v11816_v26 = vpop.eup %11815  ;;  %9249 = vst.msk [vmem:[%s17993_s6 + $0xe8] sm:$0xf] %vm9190_vm9, %v10063_v50  ;;  %v8926_v13 = vmul.f32 %v11814_v44, %v17851_v39  ;;  %11823 = vrcp.f32 %v8805_v48 }
 0x3d5   :  { %v11818_v54 = vpop.eup %11817  ;;  %v8929_v11 = vmul.f32 %v11816_v26, %v17854_v31  ;;  %11825 = vrcp.f32 %v8803_v37 }
 0x3d6   :  { %v10061_v62 = vpack.c.bf16 %v8926_v13, %v8926_v13  ;;  %v8927_v12 = vmul.f32 %v11818_v54, %v17870_v63 }
 0x3d7   :  { %v10064_v59 = vpack.c.bf16 %v8929_v11, %v8929_v11 }
 0x3d8   :  { %9247 = vst.msk [vmem:[%s17993_s6 + $0xe0] sm:$0xf] %vm9190_vm9, %v10061_v62  ;;  %v10062_v7 = vpack.c.bf16 %v8927_v12, %v8927_v12  ;;  %v11820_v42 = vpop.eup %11819 }
 0x3d9   :  { %9250 = vst.msk [vmem:[%s17993_s6 + $0xec] sm:$0xf] %vm9190_vm9, %v10064_v59  ;;  %v8932_v39 = vmul.f32 %v11820_v42, %v17875_v33 }
 0x3da   :  { %9248 = vst.msk [vmem:[%s17993_s6 + $0xe4] sm:$0xf] %vm9190_vm9, %v10062_v7 }
 0x3db   :  { %v10067_v31 = vpack.c.bf16 %v8932_v39, %v8932_v39 }
 0x3dd   :  { %v11822_v63 = vpop.eup %11821  ;;  %9253 = vst.msk [vmem:[%s17993_s6 + $0xf8] sm:$0xf] %vm9190_vm9, %v10067_v31 }
 0x3de   :  { %v11824_v0 = vpop.eup %11823  ;;  %v8930_v32 = vmul.f32 %v11822_v63, %v17897_v19 }
 0x3df   :  { %v11826_v57 = vpop.eup %11825  ;;  %v8933_v47 = vmul.f32 %v11824_v0, %v17900_v2 }
 0x3e0   :  { %v10065_v51 = vpack.c.bf16 %v8930_v32, %v8930_v32  ;;  %v8931_v38 = vmul.f32 %v11826_v57, %v17916_v58 }
 0x3e1   :  { %v10068_v5 = vpack.c.bf16 %v8933_v47, %v8933_v47 }
 0x3e2   :  { %9251 = vst.msk [vmem:[%s17993_s6 + $0xf0] sm:$0xf] %vm9190_vm9, %v10065_v51  ;;  %v10066_v33 = vpack.c.bf16 %v8931_v38, %v8931_v38 }
 0x3e3   :  { %9254 = vst.msk [vmem:[%s17993_s6 + $0xfc] sm:$0xf] %vm9190_vm9, %v10068_v5 }
 0x3e4   :  { %9252 = vst.msk [vmem:[%s17993_s6 + $0xf4] sm:$0xf] %vm9190_vm9, %v10066_v33 }

</bundles_post_ra>
